<compile_context>
chip_gen: v7x
topology: tpu7x:2x2x1
jax: 0.10.0
libtpu: 0.0.40
codegen_flags: <defaults>
</compile_context>

<pallas_src>
import jax
import jax.numpy as jnp
from jax.experimental import pallas as pl
from jax.experimental.pallas import tpu as pltpu

EPS = 1e-5  # nn.BatchNorm2d default eps


def _ru8(x):
    return ((x + 7) // 8) * 8


# ----------------------------- kernel helpers ------------------------------

def _bn_relu(y, gamma, beta, m_true):
    """Training-mode BatchNorm2d (affine) + ReLU folded to scale/shift (f32).

    Stats are single-pass sum / sum-of-squares (biased variance, eps=1e-5),
    divided by the TRUE number of elements `m_true` (padded rows upstream are
    exactly zero and contribute nothing to the sums).
    """
    inv_m = 1.0 / float(m_true)
    s = jnp.sum(y, axis=0, keepdims=True)
    ss = jnp.sum(y * y, axis=0, keepdims=True)
    mu = s * inv_m
    var = jnp.maximum(ss * inv_m - mu * mu, 0.0)      # biased variance
    scale = gamma * jax.lax.rsqrt(var + EPS)          # rsqrt -> EUP slot
    shift = beta - mu * scale
    return jnp.maximum(y * scale + shift, 0.0)        # ReLU


def _make_kernel(*, N, C, W1, S1, H2, W2, S2, H3, W3, S3,
                 M1, M2, M3, P2r, P3r):
    """Builds the single fused forward kernel (all sizes are static Python ints)."""
    f32 = jnp.float32

    def kernel(p1_ref, w1_ref, w234_ref, bnp_ref, fcp_ref, out_ref,
               act1, y2f, act2, y3f, act3):
        # Make pad rows deterministic (they only ever feed discarded full-conv
        # rows, but keep them finite/zero).
        act2[...] = jnp.zeros_like(act2)
        act3[...] = jnp.zeros_like(act3)

        def gamma(l):
            return bnp_ref[pl.ds(2 * l, 1), :]

        def beta(l):
            return bnp_ref[pl.ds(2 * l + 1, 1), :]

        def w_tap(l, t):   # l in {1,2} -> conv2/conv3 tap weight (C, C)
            return w234_ref[pl.ds(((l - 1) * 9 + t) * C, C), :]

        # ---------------- layer 1: im2col matmul + BN + ReLU ----------------
        # p1 pad rows are zero and there is no conv bias, so they contribute
        # exactly zero to the BN sums; divide by the true M1.
        y1 = jnp.dot(p1_ref[...], w1_ref[...], preferred_element_type=f32)
        act1[...] = _bn_relu(y1, gamma(0), beta(0), M1)

        # ------- layers 2 & 3: stride-2 conv via shift-trick in VMEM --------
        # Full stride-1 conv = sum of 9 shifted contiguous slabs of the
        # previous activation (one accumulating dot per tap); then the
        # stride-2-valid rows are gathered with strided sublane reads.
        def shift_conv(src, dst, layer, w_in, prows):
            acc = None
            for kh in range(3):
                for kw in range(3):
                    t = kh * 3 + kw
                    lhs = src[pl.ds(kh * w_in + kw, prows), :]
                    d = jnp.dot(lhs, w_tap(layer, t),
                                preferred_element_type=f32)
                    acc = d if acc is None else acc + d
            dst[...] = acc

        def gather_valid(src, s_in, w_in, h_out, w_out):
            pieces = []
            for n in range(N):
                for i in range(h_out):
                    base = n * s_in + 2 * i * w_in
                    pieces.append(src[pl.ds(base, w_out, stride=2), :])
            return jnp.concatenate(pieces, axis=0)       # rows (n, i, j)

        # layer 2
        shift_conv(act1, y2f, 1, W1, P2r)
        a2 = _bn_relu(gather_valid(y2f, S1, W1, H2, W2), gamma(1), beta(1), M2)
        act2[pl.ds(0, M2), :] = a2

        # layer 3
        shift_conv(act2, y3f, 2, W2, P3r)
        a3 = _bn_relu(gather_valid(y3f, S2, W2, H3, W3), gamma(2), beta(2), M3)
        act3[pl.ds(0, M3), :] = a3

        # -------- layer 4 (1x1 output): single K = 9*C dot + BN + ReLU ------
        taps = []
        for kh in range(3):
            for kw in range(3):
                # row n*S3 + kh*W3 + kw for every sample n -> stride-S3 read
                taps.append(act3[pl.ds(kh * W3 + kw, N, stride=S3), :])
        x4 = jnp.concatenate(taps, axis=-1)               # (N, 9*C)
        w4 = w234_ref[pl.ds(18 * C, 9 * C), :]             # (9*C, C)
        y4 = jnp.dot(x4, w4, preferred_element_type=f32)
        a4 = _bn_relu(y4, gamma(3), beta(3), N)

        # ------ x.mean(dim=[2,3]) over a 1x1 map is the identity; FC_out ----
        fcw = fcp_ref[pl.ds(0, C), :]
        fcb = fcp_ref[pl.ds(C, 1), :]
        out_ref[...] = jnp.dot(a4, fcw, preferred_element_type=f32) + fcb

    return kernel


# ------------------------------- JAX glue -----------------------------------

def im2col_s2k3(x_nhwc):
    """im2col for kernel=3, stride=2, pad=0.  Rows (n, i, j); cols (kh, kw, c)."""
    n, h, w, c = x_nhwc.shape
    ho = (h - 3) // 2 + 1
    wo = (w - 3) // 2 + 1
    cols = []
    for kh in range(3):
        for kw in range(3):
            cols.append(x_nhwc[:, kh:kh + 2 * ho - 1:2, kw:kw + 2 * wo - 1:2, :])
    patches = jnp.concatenate(cols, axis=-1).reshape(n * ho * wo, 9 * c)
    return patches, (ho, wo)


@jax.jit
def om_convnet_forward(params, x_nchw):
    """Forward pass of OmConvNet (input NCHW, PyTorch convention)."""
    N, C0, H0, W0 = x_nchw.shape
    C = params['w234'].shape[1]          # filt_size
    D = params['fc'].shape[1]            # output_dim

    def conv_out(h, w):
        return (h - 3) // 2 + 1, (w - 3) // 2 + 1

    H1, W1 = conv_out(H0, W0)
    H2, W2 = conv_out(H1, W1)
    H3, W3 = conv_out(H2, W2)
    H4, W4 = conv_out(H3, W3)
    assert (H4, W4) == (1, 1), "fused kernel assumes a 1x1 final map (mean == identity)"

    S1, S2, S3 = H1 * W1, H2 * W2, H3 * W3
    M1, M2, M3 = N * S1, N * S2, N * S3

    # full (stride-1) conv row counts for the shift trick, and scratch sizes
    P2r = _ru8((N - 1) * S1 + 2 * (H2 - 1) * W1 + 2 * (W2 - 1) + 1)
    P3r = _ru8((N - 1) * S2 + 2 * (H3 - 1) * W2 + 2 * (W3 - 1) + 1)
    A1 = _ru8(max(M1, P2r + 2 * W1 + 2))     # rows of act1 scratch / p1 input
    A2 = _ru8(max(M2, P3r + 2 * W2 + 2))     # rows of act2 scratch
    A3 = _ru8(M3)                            # rows of act3 scratch

    # Layer-1 im2col stays in XLA glue (input is read from HBM exactly once);
    # everything downstream runs inside ONE pallas_call with VMEM-resident
    # activations.  Pad rows are zero -> zero conv output (no bias).
    x = jnp.transpose(x_nchw, (0, 2, 3, 1)).astype(jnp.float32)   # NHWC
    p1, _ = im2col_s2k3(x)                                        # (M1, 9*C0)
    p1 = jnp.pad(p1, ((0, A1 - M1), (0, 0)))

    kernel = _make_kernel(N=N, C=C, W1=W1, S1=S1, H2=H2, W2=W2, S2=S2,
                          H3=H3, W3=W3, S3=S3, M1=M1, M2=M2, M3=M3,
                          P2r=P2r, P3r=P3r)

    return pl.pallas_call(
        kernel,
        out_shape=jax.ShapeDtypeStruct((N, D), jnp.float32),
        grid=(1,),
        in_specs=[
            pl.BlockSpec((A1, 9 * C0), lambda i: (0, 0)),   # layer-1 patches
            pl.BlockSpec((9 * C0, C), lambda i: (0, 0)),    # conv1 weight
            pl.BlockSpec((27 * C, C), lambda i: (0, 0)),    # conv2/3/4 tap weights
            pl.BlockSpec((8, C), lambda i: (0, 0)),         # packed BN gamma/beta
            pl.BlockSpec((C + 1, D), lambda i: (0, 0)),     # packed FC weight+bias
        ],
        out_specs=pl.BlockSpec((N, D), lambda i: (0, 0)),
        scratch_shapes=[
            pltpu.VMEM((A1, C), jnp.float32),    # act1 (post BN+ReLU)
            pltpu.VMEM((P2r, C), jnp.float32),   # layer-2 full stride-1 conv
            pltpu.VMEM((A2, C), jnp.float32),    # act2
            pltpu.VMEM((P3r, C), jnp.float32),   # layer-3 full stride-1 conv
            pltpu.VMEM((A3, C), jnp.float32),    # act3
        ],
        compiler_params=pltpu.CompilerParams(
            dimension_semantics=("arbitrary",)),  # N=2: single TC is optimal
    )(p1, params['w1'], params['w234'], params['bnp'], params['fc'])


def make_params(in_ch, filt_size, output_dim, seed=0):
    """Deterministic parameter init matching the module's layer shapes."""
    key = jax.random.PRNGKey(seed)
    C = filt_size
    cins = [in_ch, C, C, C]
    w_mats = []
    for l in range(4):
        key, k = jax.random.split(key)
        cin = cins[l]
        fan_in = cin * 9
        # PyTorch conv layout (Cout, Cin, kh, kw) -> (kh, kw, Cin, Cout) matmul rows
        w = jax.random.normal(k, (C, cin, 3, 3), jnp.float32) * (2.0 / fan_in) ** 0.5
        w_mats.append(jnp.transpose(w, (2, 3, 1, 0)).reshape(9 * cin, C))
        # conv bias intentionally omitted: training-mode BN cancels it exactly.

    ones = jnp.ones((1, C), jnp.float32)
    zeros = jnp.zeros((1, C), jnp.float32)
    key, kw_, kb_ = jax.random.split(key, 3)
    fc_w = jax.random.normal(kw_, (C, output_dim), jnp.float32) * (1.0 / C) ** 0.5
    fc_b = jax.random.normal(kb_, (1, output_dim), jnp.float32) * 0.01

    return {
        'w1': w_mats[0],                                   # (9*in_ch, C)
        'w234': jnp.concatenate(w_mats[1:], axis=0),       # (27*C, C): conv2|conv3|conv4 taps
        'bnp': jnp.concatenate([ones, zeros] * 4, axis=0),  # (8, C): g1,b1,...,g4,b4
        'fc': jnp.concatenate([fc_w, fc_b], axis=0),        # (C+1, D): weight rows + bias row
    }


# --------------------------------- main -------------------------------------

if __name__ == "__main__":
    # Shapes consistent with the module: input_shape=(3, 31, 31), filt_size=32,
    # output_dim=5, batch=2.  Spatial: 31 -> 15 -> 7 -> 3 -> 1.
    N, C0, H0, W0 = 2, 3, 31, 31
    FILT, OUT_DIM = 32, 5

    key = jax.random.PRNGKey(0)
    x = jax.random.normal(key, (N, C0, H0, W0), jnp.float32)

    params = make_params(in_ch=C0, filt_size=FILT, output_dim=OUT_DIM, seed=0)

    out = jax.block_until_ready(om_convnet_forward(params, x))
    assert out.shape == (N, OUT_DIM), out.shape
    assert bool(jnp.all(jnp.isfinite(out)))
    print("KERNEL_OK")
</pallas_src>

<mosaic_0001>
module attributes {stable_mosaic.version = 11 : i64} {
  func.func @kernel(%arg0: i32, %arg1: memref<456x27xf32, #tpu.memory_space<vmem>>, %arg2: memref<27x32xf32, #tpu.memory_space<vmem>>, %arg3: memref<864x32xf32, #tpu.memory_space<vmem>>, %arg4: memref<8x32xf32, #tpu.memory_space<vmem>>, %arg5: memref<33x5xf32, #tpu.memory_space<vmem>>, %arg6: memref<2x5xf32, #tpu.memory_space<vmem>>, %arg7: memref<456x32xf32, #tpu.memory_space<vmem>>, %arg8: memref<424x32xf32, #tpu.memory_space<vmem>>, %arg9: memref<104x32xf32, #tpu.memory_space<vmem>>, %arg10: memref<88x32xf32, #tpu.memory_space<vmem>>, %arg11: memref<24x32xf32, #tpu.memory_space<vmem>>) attributes {dimension_semantics = [#tpu.dimension_semantics<arbitrary>], iteration_bounds = array<i64: 1>, scalar_prefetch = 0 : i64, scratch_operands = 5 : i64, tpu.core_type = #tpu.core_type<tc>, window_params = [{pipeline_mode = #tpu.pipeline_mode<synchronous>, transform_indices = @transform_0, window_bounds = array<i64: 456, 27>}, {pipeline_mode = #tpu.pipeline_mode<synchronous>, transform_indices = @transform_1, window_bounds = array<i64: 27, 32>}, {pipeline_mode = #tpu.pipeline_mode<synchronous>, transform_indices = @transform_2, window_bounds = array<i64: 864, 32>}, {pipeline_mode = #tpu.pipeline_mode<synchronous>, transform_indices = @transform_3, window_bounds = array<i64: 8, 32>}, {pipeline_mode = #tpu.pipeline_mode<synchronous>, transform_indices = @transform_4, window_bounds = array<i64: 33, 5>}, {pipeline_mode = #tpu.pipeline_mode<synchronous>, transform_indices = @transform_5, window_bounds = array<i64: 2, 5>}]} {
    %cst = arith.constant 0.000000e+00 : f32
    %0 = vector.broadcast %cst : f32 to vector<104x32xf32>
    %c0 = arith.constant 0 : index
    %c0_0 = arith.constant 0 : index
    %1 = vector.load %arg9[%c0, %c0_0] : memref<104x32xf32, #tpu.memory_space<vmem>>, vector<104x32xf32>
    tpu.vector_store %arg9[%c0, %c0_0], %0 {strides = array<i32>} : memref<104x32xf32, #tpu.memory_space<vmem>>, vector<104x32xf32>,
    %cst_1 = arith.constant 0.000000e+00 : f32
    %2 = vector.broadcast %cst_1 : f32 to vector<24x32xf32>
    %c0_2 = arith.constant 0 : index
    %c0_3 = arith.constant 0 : index
    %3 = vector.load %arg11[%c0_2, %c0_3] : memref<24x32xf32, #tpu.memory_space<vmem>>, vector<24x32xf32>
    tpu.vector_store %arg11[%c0_2, %c0_3], %2 {strides = array<i32>} : memref<24x32xf32, #tpu.memory_space<vmem>>, vector<24x32xf32>,
    %c0_4 = arith.constant 0 : index
    %c0_5 = arith.constant 0 : index
    %4 = vector.load %arg1[%c0_4, %c0_5] : memref<456x27xf32, #tpu.memory_space<vmem>>, vector<456x27xf32>
    %c0_6 = arith.constant 0 : index
    %c0_7 = arith.constant 0 : index
    %5 = vector.load %arg2[%c0_6, %c0_7] : memref<27x32xf32, #tpu.memory_space<vmem>>, vector<27x32xf32>
    %cst_8 = arith.constant dense<0.000000e+00> : vector<456x32xf32>
    %6 = tpu.matmul %4, %5, %cst_8 {dimension_numbers = #tpu.dot_dimension_numbers<[1], [0], [0], [1], [0, 0, 1, 1], [], []>} : vector<456x27xf32>, vector<27x32xf32>, vector<456x32xf32> -> vector<456x32xf32>
    %c0_9 = arith.constant 0 : index
    %c0_10 = arith.constant 0 : index
    %7 = vector.load %arg4[%c0_9, %c0_10] : memref<8x32xf32, #tpu.memory_space<vmem>>, vector<1x32xf32>
    %c1 = arith.constant 1 : index
    %c0_11 = arith.constant 0 : index
    %8 = vector.load %arg4[%c1, %c0_11] : memref<8x32xf32, #tpu.memory_space<vmem>>, vector<1x32xf32>
    %cst_12 = arith.constant dense<0.000000e+00> : vector<32xf32>
    %9 = vector.multi_reduction <add>, %6, %cst_12 [0] : vector<456x32xf32> to vector<32xf32>
    %10 = vector.shape_cast %9 : vector<32xf32> to vector<1x32xf32>
    %11 = arith.mulf %6, %6 : vector<456x32xf32>
    %cst_13 = arith.constant dense<0.000000e+00> : vector<32xf32>
    %12 = vector.multi_reduction <add>, %11, %cst_13 [0] : vector<456x32xf32> to vector<32xf32>
    %13 = vector.shape_cast %12 : vector<32xf32> to vector<1x32xf32>
    %cst_14 = arith.constant 0.00222222228 : f32
    %14 = vector.broadcast %cst_14 : f32 to vector<1x32xf32>
    %15 = arith.mulf %10, %14 : vector<1x32xf32>
    %cst_15 = arith.constant 0.00222222228 : f32
    %16 = vector.broadcast %cst_15 : f32 to vector<1x32xf32>
    %17 = arith.mulf %13, %16 : vector<1x32xf32>
    %18 = arith.mulf %15, %15 : vector<1x32xf32>
    %19 = arith.subf %17, %18 : vector<1x32xf32>
    %cst_16 = arith.constant 0.000000e+00 : f32
    %20 = vector.broadcast %cst_16 : f32 to vector<1x32xf32>
    %21 = arith.maximumf %19, %20 : vector<1x32xf32>
    %cst_17 = arith.constant 9.99999974E-6 : f32
    %22 = vector.broadcast %cst_17 : f32 to vector<1x32xf32>
    %23 = arith.addf %21, %22 : vector<1x32xf32>
    %24 = math.rsqrt %23 : vector<1x32xf32>
    %25 = arith.mulf %7, %24 : vector<1x32xf32>
    %26 = arith.mulf %15, %25 : vector<1x32xf32>
    %27 = arith.subf %8, %26 : vector<1x32xf32>
    %28 = vector.broadcast %25 : vector<1x32xf32> to vector<456x32xf32>
    %29 = arith.mulf %6, %28 : vector<456x32xf32>
    %30 = vector.broadcast %27 : vector<1x32xf32> to vector<456x32xf32>
    %31 = arith.addf %29, %30 : vector<456x32xf32>
    %cst_18 = arith.constant 0.000000e+00 : f32
    %32 = vector.broadcast %cst_18 : f32 to vector<456x32xf32>
    %33 = arith.maximumf %31, %32 : vector<456x32xf32>
    %c0_19 = arith.constant 0 : index
    %c0_20 = arith.constant 0 : index
    %34 = vector.load %arg7[%c0_19, %c0_20] : memref<456x32xf32, #tpu.memory_space<vmem>>, vector<456x32xf32>
    tpu.vector_store %arg7[%c0_19, %c0_20], %33 {strides = array<i32>} : memref<456x32xf32, #tpu.memory_space<vmem>>, vector<456x32xf32>,
    %c0_21 = arith.constant 0 : index
    %c0_22 = arith.constant 0 : index
    %35 = vector.load %arg7[%c0_21, %c0_22] : memref<456x32xf32, #tpu.memory_space<vmem>>, vector<424x32xf32>
    %c0_23 = arith.constant 0 : index
    %c0_24 = arith.constant 0 : index
    %36 = vector.load %arg3[%c0_23, %c0_24] : memref<864x32xf32, #tpu.memory_space<vmem>>, vector<32x32xf32>
    %cst_25 = arith.constant dense<0.000000e+00> : vector<424x32xf32>
    %37 = tpu.matmul %35, %36, %cst_25 {dimension_numbers = #tpu.dot_dimension_numbers<[1], [0], [0], [1], [0, 0, 1, 1], [], []>} : vector<424x32xf32>, vector<32x32xf32>, vector<424x32xf32> -> vector<424x32xf32>
    %c1_26 = arith.constant 1 : index
    %c0_27 = arith.constant 0 : index
    %38 = vector.load %arg7[%c1_26, %c0_27] : memref<456x32xf32, #tpu.memory_space<vmem>>, vector<424x32xf32>
    %c32 = arith.constant 32 : index
    %c0_28 = arith.constant 0 : index
    %39 = vector.load %arg3[%c32, %c0_28] : memref<864x32xf32, #tpu.memory_space<vmem>>, vector<32x32xf32>
    %cst_29 = arith.constant dense<0.000000e+00> : vector<424x32xf32>
    %40 = tpu.matmul %38, %39, %cst_29 {dimension_numbers = #tpu.dot_dimension_numbers<[1], [0], [0], [1], [0, 0, 1, 1], [], []>} : vector<424x32xf32>, vector<32x32xf32>, vector<424x32xf32> -> vector<424x32xf32>
    %41 = arith.addf %37, %40 : vector<424x32xf32>
    %c2 = arith.constant 2 : index
    %c0_30 = arith.constant 0 : index
    %42 = vector.load %arg7[%c2, %c0_30] : memref<456x32xf32, #tpu.memory_space<vmem>>, vector<424x32xf32>
    %c64 = arith.constant 64 : index
    %c0_31 = arith.constant 0 : index
    %43 = vector.load %arg3[%c64, %c0_31] : memref<864x32xf32, #tpu.memory_space<vmem>>, vector<32x32xf32>
    %cst_32 = arith.constant dense<0.000000e+00> : vector<424x32xf32>
    %44 = tpu.matmul %42, %43, %cst_32 {dimension_numbers = #tpu.dot_dimension_numbers<[1], [0], [0], [1], [0, 0, 1, 1], [], []>} : vector<424x32xf32>, vector<32x32xf32>, vector<424x32xf32> -> vector<424x32xf32>
    %45 = arith.addf %41, %44 : vector<424x32xf32>
    %c15 = arith.constant 15 : index
    %c0_33 = arith.constant 0 : index
    %46 = vector.load %arg7[%c15, %c0_33] : memref<456x32xf32, #tpu.memory_space<vmem>>, vector<424x32xf32>
    %c96 = arith.constant 96 : index
    %c0_34 = arith.constant 0 : index
    %47 = vector.load %arg3[%c96, %c0_34] : memref<864x32xf32, #tpu.memory_space<vmem>>, vector<32x32xf32>
    %cst_35 = arith.constant dense<0.000000e+00> : vector<424x32xf32>
    %48 = tpu.matmul %46, %47, %cst_35 {dimension_numbers = #tpu.dot_dimension_numbers<[1], [0], [0], [1], [0, 0, 1, 1], [], []>} : vector<424x32xf32>, vector<32x32xf32>, vector<424x32xf32> -> vector<424x32xf32>
    %49 = arith.addf %45, %48 : vector<424x32xf32>
    %c16 = arith.constant 16 : index
    %c0_36 = arith.constant 0 : index
    %50 = vector.load %arg7[%c16, %c0_36] : memref<456x32xf32, #tpu.memory_space<vmem>>, vector<424x32xf32>
    %c128 = arith.constant 128 : index
    %c0_37 = arith.constant 0 : index
    %51 = vector.load %arg3[%c128, %c0_37] : memref<864x32xf32, #tpu.memory_space<vmem>>, vector<32x32xf32>
    %cst_38 = arith.constant dense<0.000000e+00> : vector<424x32xf32>
    %52 = tpu.matmul %50, %51, %cst_38 {dimension_numbers = #tpu.dot_dimension_numbers<[1], [0], [0], [1], [0, 0, 1, 1], [], []>} : vector<424x32xf32>, vector<32x32xf32>, vector<424x32xf32> -> vector<424x32xf32>
    %53 = arith.addf %49, %52 : vector<424x32xf32>
    %c17 = arith.constant 17 : index
    %c0_39 = arith.constant 0 : index
    %54 = vector.load %arg7[%c17, %c0_39] : memref<456x32xf32, #tpu.memory_space<vmem>>, vector<424x32xf32>
    %c160 = arith.constant 160 : index
    %c0_40 = arith.constant 0 : index
    %55 = vector.load %arg3[%c160, %c0_40] : memref<864x32xf32, #tpu.memory_space<vmem>>, vector<32x32xf32>
    %cst_41 = arith.constant dense<0.000000e+00> : vector<424x32xf32>
    %56 = tpu.matmul %54, %55, %cst_41 {dimension_numbers = #tpu.dot_dimension_numbers<[1], [0], [0], [1], [0, 0, 1, 1], [], []>} : vector<424x32xf32>, vector<32x32xf32>, vector<424x32xf32> -> vector<424x32xf32>
    %57 = arith.addf %53, %56 : vector<424x32xf32>
    %c30 = arith.constant 30 : index
    %c0_42 = arith.constant 0 : index
    %58 = vector.load %arg7[%c30, %c0_42] : memref<456x32xf32, #tpu.memory_space<vmem>>, vector<424x32xf32>
    %c192 = arith.constant 192 : index
    %c0_43 = arith.constant 0 : index
    %59 = vector.load %arg3[%c192, %c0_43] : memref<864x32xf32, #tpu.memory_space<vmem>>, vector<32x32xf32>
    %cst_44 = arith.constant dense<0.000000e+00> : vector<424x32xf32>
    %60 = tpu.matmul %58, %59, %cst_44 {dimension_numbers = #tpu.dot_dimension_numbers<[1], [0], [0], [1], [0, 0, 1, 1], [], []>} : vector<424x32xf32>, vector<32x32xf32>, vector<424x32xf32> -> vector<424x32xf32>
    %61 = arith.addf %57, %60 : vector<424x32xf32>
    %c31 = arith.constant 31 : index
    %c0_45 = arith.constant 0 : index
    %62 = vector.load %arg7[%c31, %c0_45] : memref<456x32xf32, #tpu.memory_space<vmem>>, vector<424x32xf32>
    %c224 = arith.constant 224 : index
    %c0_46 = arith.constant 0 : index
    %63 = vector.load %arg3[%c224, %c0_46] : memref<864x32xf32, #tpu.memory_space<vmem>>, vector<32x32xf32>
    %cst_47 = arith.constant dense<0.000000e+00> : vector<424x32xf32>
    %64 = tpu.matmul %62, %63, %cst_47 {dimension_numbers = #tpu.dot_dimension_numbers<[1], [0], [0], [1], [0, 0, 1, 1], [], []>} : vector<424x32xf32>, vector<32x32xf32>, vector<424x32xf32> -> vector<424x32xf32>
    %65 = arith.addf %61, %64 : vector<424x32xf32>
    %c32_48 = arith.constant 32 : index
    %c0_49 = arith.constant 0 : index
    %66 = vector.load %arg7[%c32_48, %c0_49] : memref<456x32xf32, #tpu.memory_space<vmem>>, vector<424x32xf32>
    %c256 = arith.constant 256 : index
    %c0_50 = arith.constant 0 : index
    %67 = vector.load %arg3[%c256, %c0_50] : memref<864x32xf32, #tpu.memory_space<vmem>>, vector<32x32xf32>
    %cst_51 = arith.constant dense<0.000000e+00> : vector<424x32xf32>
    %68 = tpu.matmul %66, %67, %cst_51 {dimension_numbers = #tpu.dot_dimension_numbers<[1], [0], [0], [1], [0, 0, 1, 1], [], []>} : vector<424x32xf32>, vector<32x32xf32>, vector<424x32xf32> -> vector<424x32xf32>
    %69 = arith.addf %65, %68 : vector<424x32xf32>
    %c0_52 = arith.constant 0 : index
    %c0_53 = arith.constant 0 : index
    %70 = vector.load %arg8[%c0_52, %c0_53] : memref<424x32xf32, #tpu.memory_space<vmem>>, vector<424x32xf32>
    tpu.vector_store %arg8[%c0_52, %c0_53], %69 {strides = array<i32>} : memref<424x32xf32, #tpu.memory_space<vmem>>, vector<424x32xf32>,
    %c0_54 = arith.constant 0 : index
    %c0_55 = arith.constant 0 : index
    %71 = tpu.strided_load %arg8[%c0_54, %c0_55] {strides = array<i32: 2, 1>} : memref<424x32xf32, #tpu.memory_space<vmem>>, vector<7x32xf32>
    %c30_56 = arith.constant 30 : index
    %c0_57 = arith.constant 0 : index
    %72 = tpu.strided_load %arg8[%c30_56, %c0_57] {strides = array<i32: 2, 1>} : memref<424x32xf32, #tpu.memory_space<vmem>>, vector<7x32xf32>
    %c60 = arith.constant 60 : index
    %c0_58 = arith.constant 0 : index
    %73 = tpu.strided_load %arg8[%c60, %c0_58] {strides = array<i32: 2, 1>} : memref<424x32xf32, #tpu.memory_space<vmem>>, vector<7x32xf32>
    %c90 = arith.constant 90 : index
    %c0_59 = arith.constant 0 : index
    %74 = tpu.strided_load %arg8[%c90, %c0_59] {strides = array<i32: 2, 1>} : memref<424x32xf32, #tpu.memory_space<vmem>>, vector<7x32xf32>
    %c120 = arith.constant 120 : index
    %c0_60 = arith.constant 0 : index
    %75 = tpu.strided_load %arg8[%c120, %c0_60] {strides = array<i32: 2, 1>} : memref<424x32xf32, #tpu.memory_space<vmem>>, vector<7x32xf32>
    %c150 = arith.constant 150 : index
    %c0_61 = arith.constant 0 : index
    %76 = tpu.strided_load %arg8[%c150, %c0_61] {strides = array<i32: 2, 1>} : memref<424x32xf32, #tpu.memory_space<vmem>>, vector<7x32xf32>
    %c180 = arith.constant 180 : index
    %c0_62 = arith.constant 0 : index
    %77 = tpu.strided_load %arg8[%c180, %c0_62] {strides = array<i32: 2, 1>} : memref<424x32xf32, #tpu.memory_space<vmem>>, vector<7x32xf32>
    %c225 = arith.constant 225 : index
    %c0_63 = arith.constant 0 : index
    %78 = tpu.strided_load %arg8[%c225, %c0_63] {strides = array<i32: 2, 1>} : memref<424x32xf32, #tpu.memory_space<vmem>>, vector<7x32xf32>
    %c255 = arith.constant 255 : index
    %c0_64 = arith.constant 0 : index
    %79 = tpu.strided_load %arg8[%c255, %c0_64] {strides = array<i32: 2, 1>} : memref<424x32xf32, #tpu.memory_space<vmem>>, vector<7x32xf32>
    %c285 = arith.constant 285 : index
    %c0_65 = arith.constant 0 : index
    %80 = tpu.strided_load %arg8[%c285, %c0_65] {strides = array<i32: 2, 1>} : memref<424x32xf32, #tpu.memory_space<vmem>>, vector<7x32xf32>
    %c315 = arith.constant 315 : index
    %c0_66 = arith.constant 0 : index
    %81 = tpu.strided_load %arg8[%c315, %c0_66] {strides = array<i32: 2, 1>} : memref<424x32xf32, #tpu.memory_space<vmem>>, vector<7x32xf32>
    %c345 = arith.constant 345 : index
    %c0_67 = arith.constant 0 : index
    %82 = tpu.strided_load %arg8[%c345, %c0_67] {strides = array<i32: 2, 1>} : memref<424x32xf32, #tpu.memory_space<vmem>>, vector<7x32xf32>
    %c375 = arith.constant 375 : index
    %c0_68 = arith.constant 0 : index
    %83 = tpu.strided_load %arg8[%c375, %c0_68] {strides = array<i32: 2, 1>} : memref<424x32xf32, #tpu.memory_space<vmem>>, vector<7x32xf32>
    %c405 = arith.constant 405 : index
    %c0_69 = arith.constant 0 : index
    %84 = tpu.strided_load %arg8[%c405, %c0_69] {strides = array<i32: 2, 1>} : memref<424x32xf32, #tpu.memory_space<vmem>>, vector<7x32xf32>
    %85 = tpu.concatenate %71, %72, %73, %74, %75, %76, %77, %78, %79, %80, %81, %82, %83, %84 in 0 : vector<7x32xf32>, vector<7x32xf32>, vector<7x32xf32>, vector<7x32xf32>, vector<7x32xf32>, vector<7x32xf32>, vector<7x32xf32>, vector<7x32xf32>, vector<7x32xf32>, vector<7x32xf32>, vector<7x32xf32>, vector<7x32xf32>, vector<7x32xf32>, vector<7x32xf32> -> vector<98x32xf32>
    %c2_70 = arith.constant 2 : index
    %c0_71 = arith.constant 0 : index
    %86 = vector.load %arg4[%c2_70, %c0_71] : memref<8x32xf32, #tpu.memory_space<vmem>>, vector<1x32xf32>
    %c3 = arith.constant 3 : index
    %c0_72 = arith.constant 0 : index
    %87 = vector.load %arg4[%c3, %c0_72] : memref<8x32xf32, #tpu.memory_space<vmem>>, vector<1x32xf32>
    %cst_73 = arith.constant dense<0.000000e+00> : vector<32xf32>
    %88 = vector.multi_reduction <add>, %85, %cst_73 [0] : vector<98x32xf32> to vector<32xf32>
    %89 = vector.shape_cast %88 : vector<32xf32> to vector<1x32xf32>
    %90 = arith.mulf %85, %85 : vector<98x32xf32>
    %cst_74 = arith.constant dense<0.000000e+00> : vector<32xf32>
    %91 = vector.multi_reduction <add>, %90, %cst_74 [0] : vector<98x32xf32> to vector<32xf32>
    %92 = vector.shape_cast %91 : vector<32xf32> to vector<1x32xf32>
    %cst_75 = arith.constant 0.0102040814 : f32
    %93 = vector.broadcast %cst_75 : f32 to vector<1x32xf32>
    %94 = arith.mulf %89, %93 : vector<1x32xf32>
    %cst_76 = arith.constant 0.0102040814 : f32
    %95 = vector.broadcast %cst_76 : f32 to vector<1x32xf32>
    %96 = arith.mulf %92, %95 : vector<1x32xf32>
    %97 = arith.mulf %94, %94 : vector<1x32xf32>
    %98 = arith.subf %96, %97 : vector<1x32xf32>
    %cst_77 = arith.constant 0.000000e+00 : f32
    %99 = vector.broadcast %cst_77 : f32 to vector<1x32xf32>
    %100 = arith.maximumf %98, %99 : vector<1x32xf32>
    %cst_78 = arith.constant 9.99999974E-6 : f32
    %101 = vector.broadcast %cst_78 : f32 to vector<1x32xf32>
    %102 = arith.addf %100, %101 : vector<1x32xf32>
    %103 = math.rsqrt %102 : vector<1x32xf32>
    %104 = arith.mulf %86, %103 : vector<1x32xf32>
    %105 = arith.mulf %94, %104 : vector<1x32xf32>
    %106 = arith.subf %87, %105 : vector<1x32xf32>
    %107 = vector.broadcast %104 : vector<1x32xf32> to vector<98x32xf32>
    %108 = arith.mulf %85, %107 : vector<98x32xf32>
    %109 = vector.broadcast %106 : vector<1x32xf32> to vector<98x32xf32>
    %110 = arith.addf %108, %109 : vector<98x32xf32>
    %cst_79 = arith.constant 0.000000e+00 : f32
    %111 = vector.broadcast %cst_79 : f32 to vector<98x32xf32>
    %112 = arith.maximumf %110, %111 : vector<98x32xf32>
    %c0_80 = arith.constant 0 : index
    %c0_81 = arith.constant 0 : index
    %113 = vector.load %arg9[%c0_80, %c0_81] : memref<104x32xf32, #tpu.memory_space<vmem>>, vector<98x32xf32>
    tpu.vector_store %arg9[%c0_80, %c0_81], %112 {strides = array<i32>} : memref<104x32xf32, #tpu.memory_space<vmem>>, vector<98x32xf32>,
    %c0_82 = arith.constant 0 : index
    %c0_83 = arith.constant 0 : index
    %114 = vector.load %arg9[%c0_82, %c0_83] : memref<104x32xf32, #tpu.memory_space<vmem>>, vector<88x32xf32>
    %c288 = arith.constant 288 : index
    %c0_84 = arith.constant 0 : index
    %115 = vector.load %arg3[%c288, %c0_84] : memref<864x32xf32, #tpu.memory_space<vmem>>, vector<32x32xf32>
    %cst_85 = arith.constant dense<0.000000e+00> : vector<88x32xf32>
    %116 = tpu.matmul %114, %115, %cst_85 {dimension_numbers = #tpu.dot_dimension_numbers<[1], [0], [0], [1], [0, 0, 1, 1], [], []>} : vector<88x32xf32>, vector<32x32xf32>, vector<88x32xf32> -> vector<88x32xf32>
    %c1_86 = arith.constant 1 : index
    %c0_87 = arith.constant 0 : index
    %117 = vector.load %arg9[%c1_86, %c0_87] : memref<104x32xf32, #tpu.memory_space<vmem>>, vector<88x32xf32>
    %c320 = arith.constant 320 : index
    %c0_88 = arith.constant 0 : index
    %118 = vector.load %arg3[%c320, %c0_88] : memref<864x32xf32, #tpu.memory_space<vmem>>, vector<32x32xf32>
    %cst_89 = arith.constant dense<0.000000e+00> : vector<88x32xf32>
    %119 = tpu.matmul %117, %118, %cst_89 {dimension_numbers = #tpu.dot_dimension_numbers<[1], [0], [0], [1], [0, 0, 1, 1], [], []>} : vector<88x32xf32>, vector<32x32xf32>, vector<88x32xf32> -> vector<88x32xf32>
    %120 = arith.addf %116, %119 : vector<88x32xf32>
    %c2_90 = arith.constant 2 : index
    %c0_91 = arith.constant 0 : index
    %121 = vector.load %arg9[%c2_90, %c0_91] : memref<104x32xf32, #tpu.memory_space<vmem>>, vector<88x32xf32>
    %c352 = arith.constant 352 : index
    %c0_92 = arith.constant 0 : index
    %122 = vector.load %arg3[%c352, %c0_92] : memref<864x32xf32, #tpu.memory_space<vmem>>, vector<32x32xf32>
    %cst_93 = arith.constant dense<0.000000e+00> : vector<88x32xf32>
    %123 = tpu.matmul %121, %122, %cst_93 {dimension_numbers = #tpu.dot_dimension_numbers<[1], [0], [0], [1], [0, 0, 1, 1], [], []>} : vector<88x32xf32>, vector<32x32xf32>, vector<88x32xf32> -> vector<88x32xf32>
    %124 = arith.addf %120, %123 : vector<88x32xf32>
    %c7 = arith.constant 7 : index
    %c0_94 = arith.constant 0 : index
    %125 = vector.load %arg9[%c7, %c0_94] : memref<104x32xf32, #tpu.memory_space<vmem>>, vector<88x32xf32>
    %c384 = arith.constant 384 : index
    %c0_95 = arith.constant 0 : index
    %126 = vector.load %arg3[%c384, %c0_95] : memref<864x32xf32, #tpu.memory_space<vmem>>, vector<32x32xf32>
    %cst_96 = arith.constant dense<0.000000e+00> : vector<88x32xf32>
    %127 = tpu.matmul %125, %126, %cst_96 {dimension_numbers = #tpu.dot_dimension_numbers<[1], [0], [0], [1], [0, 0, 1, 1], [], []>} : vector<88x32xf32>, vector<32x32xf32>, vector<88x32xf32> -> vector<88x32xf32>
    %128 = arith.addf %124, %127 : vector<88x32xf32>
    %c8 = arith.constant 8 : index
    %c0_97 = arith.constant 0 : index
    %129 = vector.load %arg9[%c8, %c0_97] : memref<104x32xf32, #tpu.memory_space<vmem>>, vector<88x32xf32>
    %c416 = arith.constant 416 : index
    %c0_98 = arith.constant 0 : index
    %130 = vector.load %arg3[%c416, %c0_98] : memref<864x32xf32, #tpu.memory_space<vmem>>, vector<32x32xf32>
    %cst_99 = arith.constant dense<0.000000e+00> : vector<88x32xf32>
    %131 = tpu.matmul %129, %130, %cst_99 {dimension_numbers = #tpu.dot_dimension_numbers<[1], [0], [0], [1], [0, 0, 1, 1], [], []>} : vector<88x32xf32>, vector<32x32xf32>, vector<88x32xf32> -> vector<88x32xf32>
    %132 = arith.addf %128, %131 : vector<88x32xf32>
    %c9 = arith.constant 9 : index
    %c0_100 = arith.constant 0 : index
    %133 = vector.load %arg9[%c9, %c0_100] : memref<104x32xf32, #tpu.memory_space<vmem>>, vector<88x32xf32>
    %c448 = arith.constant 448 : index
    %c0_101 = arith.constant 0 : index
    %134 = vector.load %arg3[%c448, %c0_101] : memref<864x32xf32, #tpu.memory_space<vmem>>, vector<32x32xf32>
    %cst_102 = arith.constant dense<0.000000e+00> : vector<88x32xf32>
    %135 = tpu.matmul %133, %134, %cst_102 {dimension_numbers = #tpu.dot_dimension_numbers<[1], [0], [0], [1], [0, 0, 1, 1], [], []>} : vector<88x32xf32>, vector<32x32xf32>, vector<88x32xf32> -> vector<88x32xf32>
    %136 = arith.addf %132, %135 : vector<88x32xf32>
    %c14 = arith.constant 14 : index
    %c0_103 = arith.constant 0 : index
    %137 = vector.load %arg9[%c14, %c0_103] : memref<104x32xf32, #tpu.memory_space<vmem>>, vector<88x32xf32>
    %c480 = arith.constant 480 : index
    %c0_104 = arith.constant 0 : index
    %138 = vector.load %arg3[%c480, %c0_104] : memref<864x32xf32, #tpu.memory_space<vmem>>, vector<32x32xf32>
    %cst_105 = arith.constant dense<0.000000e+00> : vector<88x32xf32>
    %139 = tpu.matmul %137, %138, %cst_105 {dimension_numbers = #tpu.dot_dimension_numbers<[1], [0], [0], [1], [0, 0, 1, 1], [], []>} : vector<88x32xf32>, vector<32x32xf32>, vector<88x32xf32> -> vector<88x32xf32>
    %140 = arith.addf %136, %139 : vector<88x32xf32>
    %c15_106 = arith.constant 15 : index
    %c0_107 = arith.constant 0 : index
    %141 = vector.load %arg9[%c15_106, %c0_107] : memref<104x32xf32, #tpu.memory_space<vmem>>, vector<88x32xf32>
    %c512 = arith.constant 512 : index
    %c0_108 = arith.constant 0 : index
    %142 = vector.load %arg3[%c512, %c0_108] : memref<864x32xf32, #tpu.memory_space<vmem>>, vector<32x32xf32>
    %cst_109 = arith.constant dense<0.000000e+00> : vector<88x32xf32>
    %143 = tpu.matmul %141, %142, %cst_109 {dimension_numbers = #tpu.dot_dimension_numbers<[1], [0], [0], [1], [0, 0, 1, 1], [], []>} : vector<88x32xf32>, vector<32x32xf32>, vector<88x32xf32> -> vector<88x32xf32>
    %144 = arith.addf %140, %143 : vector<88x32xf32>
    %c16_110 = arith.constant 16 : index
    %c0_111 = arith.constant 0 : index
    %145 = vector.load %arg9[%c16_110, %c0_111] : memref<104x32xf32, #tpu.memory_space<vmem>>, vector<88x32xf32>
    %c544 = arith.constant 544 : index
    %c0_112 = arith.constant 0 : index
    %146 = vector.load %arg3[%c544, %c0_112] : memref<864x32xf32, #tpu.memory_space<vmem>>, vector<32x32xf32>
    %cst_113 = arith.constant dense<0.000000e+00> : vector<88x32xf32>
    %147 = tpu.matmul %145, %146, %cst_113 {dimension_numbers = #tpu.dot_dimension_numbers<[1], [0], [0], [1], [0, 0, 1, 1], [], []>} : vector<88x32xf32>, vector<32x32xf32>, vector<88x32xf32> -> vector<88x32xf32>
    %148 = arith.addf %144, %147 : vector<88x32xf32>
    %c0_114 = arith.constant 0 : index
    %c0_115 = arith.constant 0 : index
    %149 = vector.load %arg10[%c0_114, %c0_115] : memref<88x32xf32, #tpu.memory_space<vmem>>, vector<88x32xf32>
    tpu.vector_store %arg10[%c0_114, %c0_115], %148 {strides = array<i32>} : memref<88x32xf32, #tpu.memory_space<vmem>>, vector<88x32xf32>,
    %c0_116 = arith.constant 0 : index
    %c0_117 = arith.constant 0 : index
    %150 = tpu.strided_load %arg10[%c0_116, %c0_117] {strides = array<i32: 2, 1>} : memref<88x32xf32, #tpu.memory_space<vmem>>, vector<3x32xf32>
    %c14_118 = arith.constant 14 : index
    %c0_119 = arith.constant 0 : index
    %151 = tpu.strided_load %arg10[%c14_118, %c0_119] {strides = array<i32: 2, 1>} : memref<88x32xf32, #tpu.memory_space<vmem>>, vector<3x32xf32>
    %c28 = arith.constant 28 : index
    %c0_120 = arith.constant 0 : index
    %152 = tpu.strided_load %arg10[%c28, %c0_120] {strides = array<i32: 2, 1>} : memref<88x32xf32, #tpu.memory_space<vmem>>, vector<3x32xf32>
    %c49 = arith.constant 49 : index
    %c0_121 = arith.constant 0 : index
    %153 = tpu.strided_load %arg10[%c49, %c0_121] {strides = array<i32: 2, 1>} : memref<88x32xf32, #tpu.memory_space<vmem>>, vector<3x32xf32>
    %c63 = arith.constant 63 : index
    %c0_122 = arith.constant 0 : index
    %154 = tpu.strided_load %arg10[%c63, %c0_122] {strides = array<i32: 2, 1>} : memref<88x32xf32, #tpu.memory_space<vmem>>, vector<3x32xf32>
    %c77 = arith.constant 77 : index
    %c0_123 = arith.constant 0 : index
    %155 = tpu.strided_load %arg10[%c77, %c0_123] {strides = array<i32: 2, 1>} : memref<88x32xf32, #tpu.memory_space<vmem>>, vector<3x32xf32>
    %156 = tpu.concatenate %150, %151, %152, %153, %154, %155 in 0 : vector<3x32xf32>, vector<3x32xf32>, vector<3x32xf32>, vector<3x32xf32>, vector<3x32xf32>, vector<3x32xf32> -> vector<18x32xf32>
    %c4 = arith.constant 4 : index
    %c0_124 = arith.constant 0 : index
    %157 = vector.load %arg4[%c4, %c0_124] : memref<8x32xf32, #tpu.memory_space<vmem>>, vector<1x32xf32>
    %c5 = arith.constant 5 : index
    %c0_125 = arith.constant 0 : index
    %158 = vector.load %arg4[%c5, %c0_125] : memref<8x32xf32, #tpu.memory_space<vmem>>, vector<1x32xf32>
    %cst_126 = arith.constant dense<0.000000e+00> : vector<32xf32>
    %159 = vector.multi_reduction <add>, %156, %cst_126 [0] : vector<18x32xf32> to vector<32xf32>
    %160 = vector.shape_cast %159 : vector<32xf32> to vector<1x32xf32>
    %161 = arith.mulf %156, %156 : vector<18x32xf32>
    %cst_127 = arith.constant dense<0.000000e+00> : vector<32xf32>
    %162 = vector.multi_reduction <add>, %161, %cst_127 [0] : vector<18x32xf32> to vector<32xf32>
    %163 = vector.shape_cast %162 : vector<32xf32> to vector<1x32xf32>
    %cst_128 = arith.constant 0.055555556 : f32
    %164 = vector.broadcast %cst_128 : f32 to vector<1x32xf32>
    %165 = arith.mulf %160, %164 : vector<1x32xf32>
    %cst_129 = arith.constant 0.055555556 : f32
    %166 = vector.broadcast %cst_129 : f32 to vector<1x32xf32>
    %167 = arith.mulf %163, %166 : vector<1x32xf32>
    %168 = arith.mulf %165, %165 : vector<1x32xf32>
    %169 = arith.subf %167, %168 : vector<1x32xf32>
    %cst_130 = arith.constant 0.000000e+00 : f32
    %170 = vector.broadcast %cst_130 : f32 to vector<1x32xf32>
    %171 = arith.maximumf %169, %170 : vector<1x32xf32>
    %cst_131 = arith.constant 9.99999974E-6 : f32
    %172 = vector.broadcast %cst_131 : f32 to vector<1x32xf32>
    %173 = arith.addf %171, %172 : vector<1x32xf32>
    %174 = math.rsqrt %173 : vector<1x32xf32>
    %175 = arith.mulf %157, %174 : vector<1x32xf32>
    %176 = arith.mulf %165, %175 : vector<1x32xf32>
    %177 = arith.subf %158, %176 : vector<1x32xf32>
    %178 = vector.broadcast %175 : vector<1x32xf32> to vector<18x32xf32>
    %179 = arith.mulf %156, %178 : vector<18x32xf32>
    %180 = vector.broadcast %177 : vector<1x32xf32> to vector<18x32xf32>
    %181 = arith.addf %179, %180 : vector<18x32xf32>
    %cst_132 = arith.constant 0.000000e+00 : f32
    %182 = vector.broadcast %cst_132 : f32 to vector<18x32xf32>
    %183 = arith.maximumf %181, %182 : vector<18x32xf32>
    %c0_133 = arith.constant 0 : index
    %c0_134 = arith.constant 0 : index
    %184 = vector.load %arg11[%c0_133, %c0_134] : memref<24x32xf32, #tpu.memory_space<vmem>>, vector<18x32xf32>
    tpu.vector_store %arg11[%c0_133, %c0_134], %183 {strides = array<i32>} : memref<24x32xf32, #tpu.memory_space<vmem>>, vector<18x32xf32>,
    %c0_135 = arith.constant 0 : index
    %c0_136 = arith.constant 0 : index
    %185 = tpu.strided_load %arg11[%c0_135, %c0_136] {strides = array<i32: 9, 1>} : memref<24x32xf32, #tpu.memory_space<vmem>>, vector<2x32xf32>
    %c1_137 = arith.constant 1 : index
    %c0_138 = arith.constant 0 : index
    %186 = tpu.strided_load %arg11[%c1_137, %c0_138] {strides = array<i32: 9, 1>} : memref<24x32xf32, #tpu.memory_space<vmem>>, vector<2x32xf32>
    %c2_139 = arith.constant 2 : index
    %c0_140 = arith.constant 0 : index
    %187 = tpu.strided_load %arg11[%c2_139, %c0_140] {strides = array<i32: 9, 1>} : memref<24x32xf32, #tpu.memory_space<vmem>>, vector<2x32xf32>
    %c3_141 = arith.constant 3 : index
    %c0_142 = arith.constant 0 : index
    %188 = tpu.strided_load %arg11[%c3_141, %c0_142] {strides = array<i32: 9, 1>} : memref<24x32xf32, #tpu.memory_space<vmem>>, vector<2x32xf32>
    %c4_143 = arith.constant 4 : index
    %c0_144 = arith.constant 0 : index
    %189 = tpu.strided_load %arg11[%c4_143, %c0_144] {strides = array<i32: 9, 1>} : memref<24x32xf32, #tpu.memory_space<vmem>>, vector<2x32xf32>
    %c5_145 = arith.constant 5 : index
    %c0_146 = arith.constant 0 : index
    %190 = tpu.strided_load %arg11[%c5_145, %c0_146] {strides = array<i32: 9, 1>} : memref<24x32xf32, #tpu.memory_space<vmem>>, vector<2x32xf32>
    %c6 = arith.constant 6 : index
    %c0_147 = arith.constant 0 : index
    %191 = tpu.strided_load %arg11[%c6, %c0_147] {strides = array<i32: 9, 1>} : memref<24x32xf32, #tpu.memory_space<vmem>>, vector<2x32xf32>
    %c7_148 = arith.constant 7 : index
    %c0_149 = arith.constant 0 : index
    %192 = tpu.strided_load %arg11[%c7_148, %c0_149] {strides = array<i32: 9, 1>} : memref<24x32xf32, #tpu.memory_space<vmem>>, vector<2x32xf32>
    %c8_150 = arith.constant 8 : index
    %c0_151 = arith.constant 0 : index
    %193 = tpu.strided_load %arg11[%c8_150, %c0_151] {strides = array<i32: 9, 1>} : memref<24x32xf32, #tpu.memory_space<vmem>>, vector<2x32xf32>
    %194 = tpu.concatenate %185, %186, %187, %188, %189, %190, %191, %192, %193 in 1 : vector<2x32xf32>, vector<2x32xf32>, vector<2x32xf32>, vector<2x32xf32>, vector<2x32xf32>, vector<2x32xf32>, vector<2x32xf32>, vector<2x32xf32>, vector<2x32xf32> -> vector<2x288xf32>
    %c576 = arith.constant 576 : index
    %c0_152 = arith.constant 0 : index
    %195 = vector.load %arg3[%c576, %c0_152] : memref<864x32xf32, #tpu.memory_space<vmem>>, vector<288x32xf32>
    %cst_153 = arith.constant dense<0.000000e+00> : vector<2x32xf32>
    %196 = tpu.matmul %194, %195, %cst_153 {dimension_numbers = #tpu.dot_dimension_numbers<[1], [0], [0], [1], [0, 0, 1, 1], [], []>} : vector<2x288xf32>, vector<288x32xf32>, vector<2x32xf32> -> vector<2x32xf32>
    %c6_154 = arith.constant 6 : index
    %c0_155 = arith.constant 0 : index
    %197 = vector.load %arg4[%c6_154, %c0_155] : memref<8x32xf32, #tpu.memory_space<vmem>>, vector<1x32xf32>
    %c7_156 = arith.constant 7 : index
    %c0_157 = arith.constant 0 : index
    %198 = vector.load %arg4[%c7_156, %c0_157] : memref<8x32xf32, #tpu.memory_space<vmem>>, vector<1x32xf32>
    %cst_158 = arith.constant dense<0.000000e+00> : vector<32xf32>
    %199 = vector.multi_reduction <add>, %196, %cst_158 [0] : vector<2x32xf32> to vector<32xf32>
    %200 = vector.shape_cast %199 : vector<32xf32> to vector<1x32xf32>
    %201 = arith.mulf %196, %196 : vector<2x32xf32>
    %cst_159 = arith.constant dense<0.000000e+00> : vector<32xf32>
    %202 = vector.multi_reduction <add>, %201, %cst_159 [0] : vector<2x32xf32> to vector<32xf32>
    %203 = vector.shape_cast %202 : vector<32xf32> to vector<1x32xf32>
    %cst_160 = arith.constant 5.000000e-01 : f32
    %204 = vector.broadcast %cst_160 : f32 to vector<1x32xf32>
    %205 = arith.mulf %200, %204 : vector<1x32xf32>
    %cst_161 = arith.constant 5.000000e-01 : f32
    %206 = vector.broadcast %cst_161 : f32 to vector<1x32xf32>
    %207 = arith.mulf %203, %206 : vector<1x32xf32>
    %208 = arith.mulf %205, %205 : vector<1x32xf32>
    %209 = arith.subf %207, %208 : vector<1x32xf32>
    %cst_162 = arith.constant 0.000000e+00 : f32
    %210 = vector.broadcast %cst_162 : f32 to vector<1x32xf32>
    %211 = arith.maximumf %209, %210 : vector<1x32xf32>
    %cst_163 = arith.constant 9.99999974E-6 : f32
    %212 = vector.broadcast %cst_163 : f32 to vector<1x32xf32>
    %213 = arith.addf %211, %212 : vector<1x32xf32>
    %214 = math.rsqrt %213 : vector<1x32xf32>
    %215 = arith.mulf %197, %214 : vector<1x32xf32>
    %216 = arith.mulf %205, %215 : vector<1x32xf32>
    %217 = arith.subf %198, %216 : vector<1x32xf32>
    %218 = vector.broadcast %215 : vector<1x32xf32> to vector<2x32xf32>
    %219 = arith.mulf %196, %218 : vector<2x32xf32>
    %220 = vector.broadcast %217 : vector<1x32xf32> to vector<2x32xf32>
    %221 = arith.addf %219, %220 : vector<2x32xf32>
    %cst_164 = arith.constant 0.000000e+00 : f32
    %222 = vector.broadcast %cst_164 : f32 to vector<2x32xf32>
    %223 = arith.maximumf %221, %222 : vector<2x32xf32>
    %c0_165 = arith.constant 0 : index
    %c0_166 = arith.constant 0 : index
    %224 = vector.load %arg5[%c0_165, %c0_166] : memref<33x5xf32, #tpu.memory_space<vmem>>, vector<32x5xf32>
    %c32_167 = arith.constant 32 : index
    %c0_168 = arith.constant 0 : index
    %225 = vector.load %arg5[%c32_167, %c0_168] : memref<33x5xf32, #tpu.memory_space<vmem>>, vector<1x5xf32>
    %cst_169 = arith.constant dense<0.000000e+00> : vector<2x5xf32>
    %226 = tpu.matmul %223, %224, %cst_169 {dimension_numbers = #tpu.dot_dimension_numbers<[1], [0], [0], [1], [0, 0, 1, 1], [], []>} : vector<2x32xf32>, vector<32x5xf32>, vector<2x5xf32> -> vector<2x5xf32>
    %227 = vector.broadcast %225 : vector<1x5xf32> to vector<2x5xf32>
    %228 = arith.addf %226, %227 : vector<2x5xf32>
    %c0_170 = arith.constant 0 : index
    %c0_171 = arith.constant 0 : index
    %229 = vector.load %arg6[%c0_170, %c0_171] : memref<2x5xf32, #tpu.memory_space<vmem>>, vector<2x5xf32>
    tpu.vector_store %arg6[%c0_170, %c0_171], %228 {strides = array<i32>} : memref<2x5xf32, #tpu.memory_space<vmem>>, vector<2x5xf32>,
    return
  }
  func.func @transform_0(%arg0: i32) -> (i32, i32) {
    %c0_i32 = arith.constant 0 : i32
    %c0_i32_0 = arith.constant 0 : i32
    %c0_i32_1 = arith.constant 0 : i32
    return %c0_i32, %c0_i32_0 : i32, i32
  }
  func.func @transform_1(%arg0: i32) -> (i32, i32) {
    %c0_i32 = arith.constant 0 : i32
    %c0_i32_0 = arith.constant 0 : i32
    %c0_i32_1 = arith.constant 0 : i32
    return %c0_i32, %c0_i32_0 : i32, i32
  }
  func.func @transform_2(%arg0: i32) -> (i32, i32) {
    %c0_i32 = arith.constant 0 : i32
    %c0_i32_0 = arith.constant 0 : i32
    %c0_i32_1 = arith.constant 0 : i32
    return %c0_i32, %c0_i32_0 : i32, i32
  }
  func.func @transform_3(%arg0: i32) -> (i32, i32) {
    %c0_i32 = arith.constant 0 : i32
    %c0_i32_0 = arith.constant 0 : i32
    %c0_i32_1 = arith.constant 0 : i32
    return %c0_i32, %c0_i32_0 : i32, i32
  }
  func.func @transform_4(%arg0: i32) -> (i32, i32) {
    %c0_i32 = arith.constant 0 : i32
    %c0_i32_0 = arith.constant 0 : i32
    %c0_i32_1 = arith.constant 0 : i32
    return %c0_i32, %c0_i32_0 : i32, i32
  }
  func.func @transform_5(%arg0: i32) -> (i32, i32) {
    %c0_i32 = arith.constant 0 : i32
    %c0_i32_0 = arith.constant 0 : i32
    %c0_i32_1 = arith.constant 0 : i32
    return %c0_i32, %c0_i32_0 : i32, i32
  }
}

</mosaic_0001>

<bundles_post_ra>
// kernel: om_convnet_forward.1
= control target key start
LH: loop header
LB: loop body
LE: loop exit
PB: predicated region body
PF: predicated region fallthrough
CT: control target
= control target key end

     0   :  { %vm271_vm0 = vcmask 1042432   ;;  %v17523_v3 = vmov 0.0|0.0   ;;  %vm13389_vm1 = vmmov 0   ;;  %v17525_v6 = vmov 0.0   ;;  %s17517_s0 = inlined_call_operand.vmem [shape: f32[456,27], index: 0, kind: input, shape index: {}]   ;;  %s17518_s1 = inlined_call_operand.vmem [shape: f32[27,32], index: 1, kind: input, shape index: {}]   ;;  %s17519_s2 = inlined_call_operand.vmem [shape: f32[864,32], index: 2, kind: input, shape index: {}]   ;;  %s17520_s3 = inlined_call_operand.vmem [shape: f32[8,32], index: 3, kind: input, shape index: {}]   ;;  %s17521_s4 = inlined_call_operand.vmem [shape: f32[33,5], index: 4, kind: input, shape index: {}]   ;;  %s17522_s5 = inlined_call_operand.hbm [shape: f32[2,5], index: 5, kind: output, shape index: {}]  }
   0x1   :  { %v95_v0 = vld [vmem:[%s17518_s1] sm:$0xff]  ;;  %v96_v1 = vld [vmem:[%s17518_s1 + $0x8] sm:$0xff]  ;;  %v97_v2 = vld [vmem:[%s17518_s1 + $0x10] sm:$0xff]  ;;  %12251 = vmatprep.subr.bf16.mxu0 %v17523_v3  ;;  %12270 = vmatprep.subr.bf16.mxu1 %v17523_v3  ;;  %vm13391_vm2 = vmmov 1   ;;  %vm99_vm4 = vcmask 220160  }
   0x2   :  { %v12252_v4 = vpack.c.bf16 %v96_v1, %v95_v0  ;;  %v98_v5 = vld [vmem:[%s17518_s1 + $0x18] sm:$0x7]  ;;  %10186 = vmatprep.mubr.msk.f32.mxu0 %vm13389_vm1, %v17525_v6  ;;  %10699 = vmatprep.mubr.msk.f32.mxu1 %vm13389_vm1, %v17525_v6  ;;  %vm12256_vm3 = vmpackc.low %vm271_vm0, %vm13391_vm2  ;;  %v38_v8 = vld [vmem:[%s17517_s0] sm:$0xff] }
   0x3   :  { %v12255_v7 = vpack.c.bf16 %v98_v5, %v97_v2  ;;  %v39_v9 = vld [vmem:[%s17517_s0 + $0x8] sm:$0xff] }
   0x4   :  { %12253 = vmatpush3.bf16.msra.mxu0 %v12252_v4 }
   0x5   :  { %12254 = vmatprep.subr.bf16.mxu0 %v17523_v3 }
   0x8   :  { %12257 = vmatpush3.bf16.msk.msra.mxu0 %vm12256_vm3, %v12255_v7 }
   0x9   :  { %12258 = vmatprep.subr.bf16.mxu0 %v17523_v3 }
   0xb   :  { %10187 = vmatmul.mubr.msk.f32.vlgmr.msra.gmra.mrb[0].mxu0 %vm99_vm4, %v38_v8 }
   0xc   :  { %10189 = vmatprep.mubr.msk.f32.mxu0 %vm13389_vm1, %v17525_v6 }
   0xd   :  { %10 = vsyncpa [#allocation8], 0  ;;  %v40_v10 = vld [vmem:[%s17517_s0 + $0x10] sm:$0xff]  ;;  %v41_v11 = vld [vmem:[%s17517_s0 + $0x18] sm:$0xff]  ;;  %vm21_vm5 = vcmask 261120   ;;  %vm6571_vm6 = vcmask 1045504  }
   0xe   :  { %v42_v12 = vld [vmem:[%s17517_s0 + $0x20] sm:$0xff]  ;;  %v43_v13 = vld [vmem:[%s17517_s0 + $0x28] sm:$0xff]  ;;  %v44_v14 = vld [vmem:[%s17517_s0 + $0x30] sm:$0xff]  ;;  %22 = vst.msk [vmem:[#allocation4] sm:$0xff] %vm21_vm5, %v17525_v6  ;;  %vm6569_vm7 = vcmask 1046528   ;;  %vm6573_vm8 = vcmask 1044480  }
   0xf   :  { %10190 = vmatmul.mubr.msk.f32.gmra.mrb[2].mxu0 %vm99_vm4, %v39_v9  ;;  %v45_v15 = vld [vmem:[%s17517_s0 + $0x38] sm:$0xff]  ;;  %v46_v16 = vld [vmem:[%s17517_s0 + $0x40] sm:$0xff]  ;;  %v47_v17 = vld [vmem:[%s17517_s0 + $0x48] sm:$0xff]  ;;  %23 = vst.msk [vmem:[#allocation4 + $0x8] sm:$0xff] %vm21_vm5, %v17525_v6  ;;  %vm6575_vm9 = vcmask 1043456   ;;  %vm6578_vm10 = vcmask 1041408  }
  0x10   :  { %10192 = vmatprep.mubr.msk.f32.mxu0 %vm13389_vm1, %v17525_v6  ;;  %v48_v18 = vld [vmem:[%s17517_s0 + $0x50] sm:$0xff]  ;;  %v49_v19 = vld [vmem:[%s17517_s0 + $0x58] sm:$0xff]  ;;  %v50_v20 = vld [vmem:[%s17517_s0 + $0x60] sm:$0xff]  ;;  %24 = vst.msk [vmem:[#allocation4 + $0x10] sm:$0xff] %vm21_vm5, %v17525_v6  ;;  %vm6580_vm11 = vcmask 1040384   ;;  %vm6612_vm12 = vcmask 254976  }
  0x11   :  { %v51_v21 = vld [vmem:[%s17517_s0 + $0x68] sm:$0xff]  ;;  %v52_v22 = vld [vmem:[%s17517_s0 + $0x70] sm:$0xff]  ;;  %v53_v23 = vld [vmem:[%s17517_s0 + $0x78] sm:$0xff]  ;;  %25 = vst.msk [vmem:[#allocation4 + $0x18] sm:$0xff] %vm21_vm5, %v17525_v6  ;;  %s13392_s13 = smov 96   ;;  %s13393_s14 = smov 32  }
  0x12   :  { %v54_v24 = vld [vmem:[%s17517_s0 + $0x80] sm:$0xff]  ;;  %v55_v25 = vld [vmem:[%s17517_s0 + $0x88] sm:$0xff]  ;;  %v56_v26 = vld [vmem:[%s17517_s0 + $0x90] sm:$0xff]  ;;  %26 = vst.msk [vmem:[#allocation4 + $0x20] sm:$0xff] %vm21_vm5, %v17525_v6  ;;  %s13394_s15 = smov 64   ;;  %vm8465_vm13 = vcmask 523264  }
  0x13   :  { %10193 = vmatmul.mubr.msk.f32.gmra.mrb[4].mxu0 %vm99_vm4, %v40_v10  ;;  %v57_v27 = vld [vmem:[%s17517_s0 + $0x98] sm:$0xff]  ;;  %v58_v28 = vld [vmem:[%s17517_s0 + $0xa0] sm:$0xff]  ;;  %v59_v29 = vld [vmem:[%s17517_s0 + $0xa8] sm:$0xff]  ;;  %27 = vst.msk [vmem:[#allocation4 + $0x28] sm:$0xff] %vm21_vm5, %v17525_v6  ;;  %vm8467_vm14 = vcmask 785408   ;;  %s13395_s10 = smov [#allocation7]  }
  0x14   :  { %10195 = vmatprep.mubr.msk.f32.mxu0 %vm13389_vm1, %v17525_v6  ;;  %28 = vst.msk [vmem:[#allocation4 + $0x30] sm:$0xff] %vm21_vm5, %v17525_v6  ;;  %29 = vst.msk [vmem:[#allocation4 + $0x38] sm:$0xff] %vm21_vm5, %v17525_v6  ;;  %v60_v30 = vld [vmem:[%s17517_s0 + $0xb0] sm:$0xff]  ;;  %v61_v31 = vld [vmem:[%s17517_s0 + $0xb8] sm:$0xff]  ;;  %s8779_s11 = sshll.u32 %s13395_s10, 4  ;;  %vm8771_vm15 = vcmask 33792   ;;  %s8780_s11 = int_to_ptr.vmem [resolvable:$true] %s8779_s11 }
  0x15   :  { %30 = vst.msk [vmem:[#allocation4 + $0x40] sm:$0xff] %vm21_vm5, %v17525_v6  ;;  %31 = vst.msk [vmem:[#allocation4 + $0x48] sm:$0xff] %vm21_vm5, %v17525_v6  ;;  %v62_v32 = vld [vmem:[%s17517_s0 + $0xc0] sm:$0xff]  ;;  %v63_v33 = vld [vmem:[%s17517_s0 + $0xc8] sm:$0xff]  ;;  %p13369_p1 = scmp.lt.s32.totalorder %s8780_s11, %s8780_s11 }
  0x16   :  { %32 = vst.msk [vmem:[#allocation4 + $0x50] sm:$0xff] %vm21_vm5, %v17525_v6  ;;  %33 = vst.msk [vmem:[#allocation4 + $0x58] sm:$0xff] %vm21_vm5, %v17525_v6  ;;  %v64_v34 = vld [vmem:[%s17517_s0 + $0xd0] sm:$0xff]  ;;  %v65_v35 = vld [vmem:[%s17517_s0 + $0xd8] sm:$0xff] }
  0x17   :  { %10196 = vmatmul.mubr.msk.f32.gmra.mrb[6].mxu0 %vm99_vm4, %v41_v11  ;;  %34 = vst.msk [vmem:[#allocation4 + $0x60] sm:$0xff] %vm21_vm5, %v17525_v6  ;;  %35 = vst.msk [vmem:[#allocation6] sm:$0xff] %vm21_vm5, %v17525_v6  ;;  %v66_v36 = vld [vmem:[%s17517_s0 + $0xe0] sm:$0xff]  ;;  %v67_v37 = vld [vmem:[%s17517_s0 + $0xe8] sm:$0xff] }
  0x18   :  { %10198 = vmatprep.mubr.msk.f32.mxu0 %vm13389_vm1, %v17525_v6  ;;  %36 = vst.msk [vmem:[#allocation6 + $0x8] sm:$0xff] %vm21_vm5, %v17525_v6  ;;  %37 = vst.msk [vmem:[#allocation6 + $0x10] sm:$0xff] %vm21_vm5, %v17525_v6  ;;  %v68_v38 = vld [vmem:[%s17517_s0 + $0xf0] sm:$0xff]  ;;  %v69_v39 = vld [vmem:[%s17517_s0 + $0xf8] sm:$0xff] }
  0x19   :  { %v70_v40 = vld [vmem:[%s17517_s0 + $0x100] sm:$0xff]  ;;  %v71_v41 = vld [vmem:[%s17517_s0 + $0x108] sm:$0xff]  ;;  %v72_v42 = vld [vmem:[%s17517_s0 + $0x110] sm:$0xff] }
  0x1a   :  { %v73_v43 = vld [vmem:[%s17517_s0 + $0x118] sm:$0xff]  ;;  %v74_v44 = vld [vmem:[%s17517_s0 + $0x120] sm:$0xff]  ;;  %v75_v45 = vld [vmem:[%s17517_s0 + $0x128] sm:$0xff] }
  0x1b   :  { %10199 = vmatmul.mubr.msk.f32.gmra.mrb[8].mxu0 %vm99_vm4, %v42_v12  ;;  %v76_v46 = vld [vmem:[%s17517_s0 + $0x130] sm:$0xff]  ;;  %v77_v47 = vld [vmem:[%s17517_s0 + $0x138] sm:$0xff]  ;;  %v78_v48 = vld [vmem:[%s17517_s0 + $0x140] sm:$0xff] }
  0x1c   :  { %10201 = vmatprep.mubr.msk.f32.mxu0 %vm13389_vm1, %v17525_v6  ;;  %v79_v49 = vld [vmem:[%s17517_s0 + $0x148] sm:$0xff]  ;;  %v80_v50 = vld [vmem:[%s17517_s0 + $0x150] sm:$0xff]  ;;  %v81_v51 = vld [vmem:[%s17517_s0 + $0x158] sm:$0xff] }
  0x1d   :  { %v82_v52 = vld [vmem:[%s17517_s0 + $0x160] sm:$0xff]  ;;  %v83_v53 = vld [vmem:[%s17517_s0 + $0x168] sm:$0xff]  ;;  %v84_v54 = vld [vmem:[%s17517_s0 + $0x170] sm:$0xff] }
  0x1e   :  { %v85_v55 = vld [vmem:[%s17517_s0 + $0x178] sm:$0xff]  ;;  %v86_v56 = vld [vmem:[%s17517_s0 + $0x180] sm:$0xff]  ;;  %v87_v57 = vld [vmem:[%s17517_s0 + $0x188] sm:$0xff] }
  0x1f   :  { %10202 = vmatmul.mubr.msk.f32.gmra.mrb[10].mxu0 %vm99_vm4, %v43_v13  ;;  %v88_v58 = vld [vmem:[%s17517_s0 + $0x190] sm:$0xff]  ;;  %v89_v59 = vld [vmem:[%s17517_s0 + $0x198] sm:$0xff]  ;;  %v90_v60 = vld [vmem:[%s17517_s0 + $0x1a0] sm:$0xff] }
  0x20   :  { %10204 = vmatprep.mubr.msk.f32.mxu0 %vm13389_vm1, %v17525_v6  ;;  %v91_v61 = vld [vmem:[%s17517_s0 + $0x1a8] sm:$0xff]  ;;  %v92_v0 = vld [vmem:[%s17517_s0 + $0x1b0] sm:$0xff]  ;;  %v93_v10 = vld [vmem:[%s17517_s0 + $0x1b8] sm:$0xff] }
  0x23   :  { %10205 = vmatmul.mubr.msk.f32.gmra.mrb[12].mxu0 %vm99_vm4, %v44_v14 }
  0x24   :  { %10207 = vmatprep.mubr.msk.f32.mxu0 %vm13389_vm1, %v17525_v6 }
  0x27   :  { %10208 = vmatmul.mubr.msk.f32.gmra.mrb[14].mxu0 %vm99_vm4, %v45_v15 }
  0x28   :  { %10210 = vmatprep.mubr.msk.f32.mxu0 %vm13389_vm1, %v17525_v6 }
  0x2b   :  { %10211 = vmatmul.mubr.msk.f32.gmra.mrb[16].mxu0 %vm99_vm4, %v46_v16 }
  0x2c   :  { %10213 = vmatprep.mubr.msk.f32.mxu0 %vm13389_vm1, %v17525_v6 }
  0x2f   :  { %10214 = vmatmul.mubr.msk.f32.gmra.mrb[18].mxu0 %vm99_vm4, %v47_v17 }
  0x30   :  { %10216 = vmatprep.mubr.msk.f32.mxu0 %vm13389_vm1, %v17525_v6 }
  0x33   :  { %10217 = vmatmul.mubr.msk.f32.gmra.mrb[20].mxu0 %vm99_vm4, %v48_v18 }
  0x34   :  { %10219 = vmatprep.mubr.msk.f32.mxu0 %vm13389_vm1, %v17525_v6 }
  0x37   :  { %10220 = vmatmul.mubr.msk.f32.gmra.mrb[22].mxu0 %vm99_vm4, %v49_v19  ;;  %v94_v19 = vld [vmem:[%s17517_s0 + $0x1c0] sm:$0xff] }
  0x38   :  { %10222 = vmatprep.mubr.msk.f32.mxu0 %vm13389_vm1, %v17525_v6 }
  0x3b   :  { %10223 = vmatmul.mubr.msk.f32.gmra.mrb[24].mxu0 %vm99_vm4, %v50_v20 }
  0x3c   :  { %10225 = vmatprep.mubr.msk.f32.mxu0 %vm13389_vm1, %v17525_v6 }
  0x3f   :  { %10226 = vmatmul.mubr.msk.f32.gmra.mrb[26].mxu0 %vm99_vm4, %v51_v21 }
  0x40   :  { %10228 = vmatprep.mubr.msk.f32.mxu0 %vm13389_vm1, %v17525_v6 }
  0x43   :  { %10229 = vmatmul.mubr.msk.f32.gmra.mrb[28].mxu0 %vm99_vm4, %v52_v22 }
  0x44   :  { %10231 = vmatprep.mubr.msk.f32.mxu0 %vm13389_vm1, %v17525_v6 }
  0x47   :  { %10232 = vmatmul.mubr.msk.f32.gmra.mrb[30].mxu0 %vm99_vm4, %v53_v23 }
  0x48   :  { %10234 = vmatprep.mubr.msk.f32.mxu0 %vm13389_vm1, %v17525_v6 }
  0x4b   :  { %10235 = vmatmul.mubr.msk.f32.gmra.mrb[32].mxu0 %vm99_vm4, %v54_v24 }
  0x4c   :  { %10237 = vmatprep.mubr.msk.f32.mxu0 %vm13389_vm1, %v17525_v6 }
  0x4f   :  { %10238 = vmatmul.mubr.msk.f32.gmra.mrb[34].mxu0 %vm99_vm4, %v55_v25 }
  0x50   :  { %10240 = vmatprep.mubr.msk.f32.mxu0 %vm13389_vm1, %v17525_v6 }
  0x53   :  { %10241 = vmatmul.mubr.msk.f32.gmra.mrb[36].mxu0 %vm99_vm4, %v56_v26 }
  0x54   :  { %10243 = vmatprep.mubr.msk.f32.mxu0 %vm13389_vm1, %v17525_v6 }
  0x57   :  { %10244 = vmatmul.mubr.msk.f32.gmra.mrb[38].mxu0 %vm99_vm4, %v57_v27 }
  0x58   :  { %10246 = vmatprep.mubr.msk.f32.mxu0 %vm13389_vm1, %v17525_v6 }
  0x5b   :  { %10247 = vmatmul.mubr.msk.f32.gmra.mrb[40].mxu0 %vm99_vm4, %v58_v28 }
  0x5c   :  { %10249 = vmatprep.mubr.msk.f32.mxu0 %vm13389_vm1, %v17525_v6 }
  0x5f   :  { %10250 = vmatmul.mubr.msk.f32.gmra.mrb[42].mxu0 %vm99_vm4, %v59_v29 }
  0x60   :  { %10252 = vmatprep.mubr.msk.f32.mxu0 %vm13389_vm1, %v17525_v6 }
  0x63   :  { %10253 = vmatmul.mubr.msk.f32.gmra.mrb[44].mxu0 %vm99_vm4, %v60_v30 }
  0x64   :  { %10255 = vmatprep.mubr.msk.f32.mxu0 %vm13389_vm1, %v17525_v6 }
  0x67   :  { %10256 = vmatmul.mubr.msk.f32.gmra.mrb[46].mxu0 %vm99_vm4, %v61_v31 }
  0x68   :  { %10258 = vmatprep.mubr.msk.f32.mxu0 %vm13389_vm1, %v17525_v6 }
  0x6b   :  { %10259 = vmatmul.mubr.msk.f32.gmra.mrb[48].mxu0 %vm99_vm4, %v62_v32 }
  0x6c   :  { %10261 = vmatprep.mubr.msk.f32.mxu0 %vm13389_vm1, %v17525_v6 }
  0x6f   :  { %10262 = vmatmul.mubr.msk.f32.gmra.mrb[50].mxu0 %vm99_vm4, %v63_v33 }
  0x70   :  { %10264 = vmatprep.mubr.msk.f32.mxu0 %vm13389_vm1, %v17525_v6 }
  0x73   :  { %10265 = vmatmul.mubr.msk.f32.gmra.mrb[52].mxu0 %vm99_vm4, %v64_v34 }
  0x74   :  { %10267 = vmatprep.mubr.msk.f32.mxu0 %vm13389_vm1, %v17525_v6 }
  0x77   :  { %10268 = vmatmul.mubr.msk.f32.gmra.mrb[54].mxu0 %vm99_vm4, %v65_v35 }
  0x78   :  { %10270 = vmatprep.mubr.msk.f32.mxu0 %vm13389_vm1, %v17525_v6 }
  0x7b   :  { %10271 = vmatmul.mubr.msk.f32.gmra.mrb[56].mxu0 %vm99_vm4, %v66_v36 }
  0x7c   :  { %10273 = vmatprep.mubr.msk.f32.mxu0 %vm13389_vm1, %v17525_v6 }
  0x7f   :  { %10274 = vmatmul.mubr.msk.f32.gmra.mrb[58].mxu0 %vm99_vm4, %v67_v37 }
  0x80   :  { %10276 = vmatprep.mubr.msk.f32.mxu0 %vm13389_vm1, %v17525_v6 }
  0x83   :  { %10277 = vmatmul.mubr.msk.f32.gmra.mrb[60].mxu0 %vm99_vm4, %v68_v38 }
  0x84   :  { %10279 = vmatprep.mubr.msk.f32.mxu0 %vm13389_vm1, %v17525_v6 }
  0x87   :  { %10280 = vmatmul.mubr.msk.f32.gmra.mrb[62].mxu0 %vm99_vm4, %v69_v39 }
  0x88   :  { %10282 = vmatprep.mubr.msk.f32.mxu0 %vm13389_vm1, %v17525_v6 }
  0x8b   :  { %10283 = vmatmul.mubr.msk.f32.gmra.mrb[64].mxu0 %vm99_vm4, %v70_v40 }
  0x8c   :  { %10285 = vmatprep.mubr.msk.f32.mxu0 %vm13389_vm1, %v17525_v6 }
  0x8f   :  { %10286 = vmatmul.mubr.msk.f32.gmra.mrb[66].mxu0 %vm99_vm4, %v71_v41 }
  0x90   :  { %10288 = vmatprep.mubr.msk.f32.mxu0 %vm13389_vm1, %v17525_v6 }
  0x93   :  { %10289 = vmatmul.mubr.msk.f32.gmra.mrb[68].mxu0 %vm99_vm4, %v72_v42 }
  0x94   :  { %10291 = vmatprep.mubr.msk.f32.mxu0 %vm13389_vm1, %v17525_v6 }
  0x97   :  { %10292 = vmatmul.mubr.msk.f32.gmra.mrb[70].mxu0 %vm99_vm4, %v73_v43 }
  0x98   :  { %10294 = vmatprep.mubr.msk.f32.mxu0 %vm13389_vm1, %v17525_v6 }
  0x9b   :  { %10295 = vmatmul.mubr.msk.f32.gmra.mrb[72].mxu0 %vm99_vm4, %v74_v44 }
  0x9c   :  { %10297 = vmatprep.mubr.msk.f32.mxu0 %vm13389_vm1, %v17525_v6 }
  0x9f   :  { %10298 = vmatmul.mubr.msk.f32.gmra.mrb[74].mxu0 %vm99_vm4, %v75_v45 }
  0xa0   :  { %10300 = vmatprep.mubr.msk.f32.mxu0 %vm13389_vm1, %v17525_v6 }
  0xa3   :  { %10301 = vmatmul.mubr.msk.f32.gmra.mrb[76].mxu0 %vm99_vm4, %v76_v46 }
  0xa4   :  { %10303 = vmatprep.mubr.msk.f32.mxu0 %vm13389_vm1, %v17525_v6 }
  0xa7   :  { %10304 = vmatmul.mubr.msk.f32.gmra.mrb[78].mxu0 %vm99_vm4, %v77_v47 }
  0xa8   :  { %10306 = vmatprep.mubr.msk.f32.mxu0 %vm13389_vm1, %v17525_v6 }
  0xab   :  { %10307 = vmatmul.mubr.msk.f32.gmra.mrb[80].mxu0 %vm99_vm4, %v78_v48 }
  0xac   :  { %10309 = vmatprep.mubr.msk.f32.mxu0 %vm13389_vm1, %v17525_v6 }
  0xaf   :  { %10310 = vmatmul.mubr.msk.f32.gmra.mrb[82].mxu0 %vm99_vm4, %v79_v49 }
  0xb0   :  { %10312 = vmatprep.mubr.msk.f32.mxu0 %vm13389_vm1, %v17525_v6 }
  0xb3   :  { %10313 = vmatmul.mubr.msk.f32.gmra.mrb[84].mxu0 %vm99_vm4, %v80_v50 }
  0xb4   :  { %10315 = vmatprep.mubr.msk.f32.mxu0 %vm13389_vm1, %v17525_v6 }
  0xb7   :  { %10316 = vmatmul.mubr.msk.f32.gmra.mrb[86].mxu0 %vm99_vm4, %v81_v51 }
  0xb8   :  { %10318 = vmatprep.mubr.msk.f32.mxu0 %vm13389_vm1, %v17525_v6 }
  0xbb   :  { %10319 = vmatmul.mubr.msk.f32.gmra.mrb[88].mxu0 %vm99_vm4, %v82_v52 }
  0xbc   :  { %10321 = vmatprep.mubr.msk.f32.mxu0 %vm13389_vm1, %v17525_v6 }
  0xbf   :  { %10322 = vmatmul.mubr.msk.f32.gmra.mrb[90].mxu0 %vm99_vm4, %v83_v53 }
  0xc0   :  { %10324 = vmatprep.mubr.msk.f32.mxu0 %vm13389_vm1, %v17525_v6 }
  0xc3   :  { %10325 = vmatmul.mubr.msk.f32.gmra.mrb[92].mxu0 %vm99_vm4, %v84_v54 }
  0xc4   :  { %10327 = vmatprep.mubr.msk.f32.mxu0 %vm13389_vm1, %v17525_v6 }
  0xc7   :  { %10328 = vmatmul.mubr.msk.f32.gmra.mrb[94].mxu0 %vm99_vm4, %v85_v55 }
  0xc8   :  { %10330 = vmatprep.mubr.msk.f32.mxu0 %vm13389_vm1, %v17525_v6 }
  0xcb   :  { %10331 = vmatmul.mubr.msk.f32.gmra.mrb[96].mxu0 %vm99_vm4, %v86_v56 }
  0xcc   :  { %10333 = vmatprep.mubr.msk.f32.mxu0 %vm13389_vm1, %v17525_v6 }
  0xcf   :  { %10334 = vmatmul.mubr.msk.f32.gmra.mrb[98].mxu0 %vm99_vm4, %v87_v57 }
  0xd0   :  { %10336 = vmatprep.mubr.msk.f32.mxu0 %vm13389_vm1, %v17525_v6 }
  0xd3   :  { %10337 = vmatmul.mubr.msk.f32.gmra.mrb[100].mxu0 %vm99_vm4, %v88_v58 }
  0xd4   :  { %10339 = vmatprep.mubr.msk.f32.mxu0 %vm13389_vm1, %v17525_v6 }
  0xd7   :  { %10340 = vmatmul.mubr.msk.f32.gmra.mrb[102].mxu0 %vm99_vm4, %v89_v59 }
  0xd8   :  { %10342 = vmatprep.mubr.msk.f32.mxu0 %vm13389_vm1, %v17525_v6 }
  0xdb   :  { %10343 = vmatmul.mubr.msk.f32.gmra.mrb[104].mxu0 %vm99_vm4, %v90_v60 }
  0xdc   :  { %10345 = vmatprep.mubr.msk.f32.mxu0 %vm13389_vm1, %v17525_v6 }
  0xde   :  { %v13800_v62 = vpop.f32.mrb[0].mxu0 }
  0xdf   :  { %v10188_v63 = vpop.f32.mrb[1].mxu0  ;;  %10346 = vmatmul.mubr.msk.f32.gmra.mrb[106].mxu0 %vm99_vm4, %v91_v61  ;;  %v746_v1 = vmul.f32 %v13800_v62, %v13800_v62  ;;  %v627_v4 = vsel %vm21_vm5, %v13800_v62, 0.0 }
  0xe0   :  { %10348 = vmatprep.mubr.msk.f32.mxu0 %vm13389_vm1, %v17525_v6 }
  0xe1   :  { %v803_v11 = vsel %vm21_vm5, %v746_v1, 0.0 }
  0xe2   :  { %v13810_v2 = vpop.f32.mrb[2].mxu0 }
  0xe3   :  { %v628_v5 = vsel %vm21_vm5, %v13810_v2, 0.0  ;;  %v747_v7 = vmul.f32 %v13810_v2, %v13810_v2  ;;  %v10191_v8 = vpop.f32.mrb[3].mxu0  ;;  %10349 = vmatmul.mubr.msk.f32.gmra.mrb[108].mxu0 %vm99_vm4, %v92_v0 }
  0xe4   :  { %v629_v9 = vadd.f32 %v628_v5, %v627_v4  ;;  %10351 = vmatprep.mubr.msk.f32.mxu0 %vm13389_vm1, %v17525_v6 }
  0xe5   :  { %v804_v12 = vsel %vm21_vm5, %v747_v7, 0.0 }
  0xe6   :  { %v805_v13 = vadd.f32 %v804_v12, %v803_v11  ;;  %v13826_v14 = vpop.f32.mrb[4].mxu0 }
  0xe7   :  { %v630_v15 = vsel %vm21_vm5, %v13826_v14, 0.0  ;;  %v748_v16 = vmul.f32 %v13826_v14, %v13826_v14  ;;  %v10194_v17 = vpop.f32.mrb[5].mxu0  ;;  %10352 = vmatmul.mubr.msk.f32.gmra.mrb[110].mxu0 %vm99_vm4, %v93_v10 }
  0xe8   :  { %v631_v18 = vadd.f32 %v630_v15, %v629_v9  ;;  %10354 = vmatprep.mubr.msk.f32.mxu0 %vm13389_vm1, %v17525_v6 }
  0xe9   :  { %v806_v20 = vsel %vm21_vm5, %v748_v16, 0.0 }
  0xea   :  { %v807_v21 = vadd.f32 %v806_v20, %v805_v13  ;;  %v13839_v22 = vpop.f32.mrb[6].mxu0 }
  0xeb   :  { %v632_v23 = vsel %vm21_vm5, %v13839_v22, 0.0  ;;  %v749_v24 = vmul.f32 %v13839_v22, %v13839_v22  ;;  %v10197_v25 = vpop.f32.mrb[7].mxu0  ;;  %10355 = vmatmul.mubr.msk.f32.gmra.mrb[112].mxu0 %vm99_vm4, %v94_v19 }
  0xec   :  { %v633_v26 = vadd.f32 %v632_v23, %v631_v18  ;;  %10365 = vmatprep.mubr.msk.f32.mxu0 %vm13389_vm1, %v17525_v6 }
  0xed   :  { %v808_v27 = vsel %vm21_vm5, %v749_v24, 0.0 }
  0xee   :  { %v809_v28 = vadd.f32 %v808_v27, %v807_v21  ;;  %v13849_v29 = vpop.f32.mrb[8].mxu0 }
  0xef   :  { %v634_v30 = vsel %vm21_vm5, %v13849_v29, 0.0  ;;  %v750_v31 = vmul.f32 %v13849_v29, %v13849_v29  ;;  %v10200_v32 = vpop.f32.mrb[9].mxu0 }
  0xf0   :  { %v635_v33 = vadd.f32 %v634_v30, %v633_v26 }
  0xf1   :  { %v810_v34 = vsel %vm21_vm5, %v750_v31, 0.0 }
  0xf2   :  { %v811_v35 = vadd.f32 %v810_v34, %v809_v28  ;;  %v13856_v36 = vpop.f32.mrb[10].mxu0 }
  0xf3   :  { %v636_v37 = vsel %vm21_vm5, %v13856_v36, 0.0  ;;  %v751_v38 = vmul.f32 %v13856_v36, %v13856_v36  ;;  %v10203_v39 = vpop.f32.mrb[11].mxu0 }
  0xf4   :  { %v637_v40 = vadd.f32 %v636_v37, %v635_v33 }
  0xf5   :  { %v812_v41 = vsel %vm21_vm5, %v751_v38, 0.0 }
  0xf6   :  { %v813_v42 = vadd.f32 %v812_v41, %v811_v35  ;;  %v13863_v43 = vpop.f32.mrb[12].mxu0 }
  0xf7   :  { %v638_v44 = vsel %vm21_vm5, %v13863_v43, 0.0  ;;  %v752_v45 = vmul.f32 %v13863_v43, %v13863_v43  ;;  %v10206_v46 = vpop.f32.mrb[13].mxu0 }
  0xf8   :  { %v639_v47 = vadd.f32 %v638_v44, %v637_v40 }
  0xf9   :  { %v814_v48 = vsel %vm21_vm5, %v752_v45, 0.0 }
  0xfa   :  { %v815_v49 = vadd.f32 %v814_v48, %v813_v42  ;;  %v13870_v50 = vpop.f32.mrb[14].mxu0 }
  0xfb   :  { %v640_v51 = vsel %vm21_vm5, %v13870_v50, 0.0  ;;  %v753_v52 = vmul.f32 %v13870_v50, %v13870_v50  ;;  %v10209_v53 = vpop.f32.mrb[15].mxu0 }
  0xfc   :  { %v641_v54 = vadd.f32 %v640_v51, %v639_v47 }
  0xfd   :  { %v816_v55 = vsel %vm21_vm5, %v753_v52, 0.0 }
  0xfe   :  { %v817_v56 = vadd.f32 %v816_v55, %v815_v49  ;;  %v13877_v57 = vpop.f32.mrb[16].mxu0 }
  0xff   :  { %v642_v58 = vsel %vm21_vm5, %v13877_v57, 0.0  ;;  %v754_v59 = vmul.f32 %v13877_v57, %v13877_v57  ;;  %v10212_v60 = vpop.f32.mrb[17].mxu0 }
 0x100   :  { %v643_v61 = vadd.f32 %v642_v58, %v641_v54 }
 0x101   :  { %v818_v63 = vsel %vm21_vm5, %v754_v59, 0.0 }
 0x102   :  { %v819_v0 = vadd.f32 %v818_v63, %v817_v56  ;;  %v13884_v1 = vpop.f32.mrb[18].mxu0 }
 0x103   :  { %v644_v4 = vsel %vm21_vm5, %v13884_v1, 0.0  ;;  %v755_v5 = vmul.f32 %v13884_v1, %v13884_v1  ;;  %v10215_v7 = vpop.f32.mrb[19].mxu0 }
 0x104   :  { %v645_v8 = vadd.f32 %v644_v4, %v643_v61 }
 0x105   :  { %v820_v9 = vsel %vm21_vm5, %v755_v5, 0.0 }
 0x106   :  { %v821_v10 = vadd.f32 %v820_v9, %v819_v0  ;;  %v13891_v11 = vpop.f32.mrb[20].mxu0 }
 0x107   :  { %v646_v12 = vsel %vm21_vm5, %v13891_v11, 0.0  ;;  %v756_v13 = vmul.f32 %v13891_v11, %v13891_v11  ;;  %v10218_v15 = vpop.f32.mrb[21].mxu0 }
 0x108   :  { %v647_v16 = vadd.f32 %v646_v12, %v645_v8 }
 0x109   :  { %v822_v17 = vsel %vm21_vm5, %v756_v13, 0.0 }
 0x10a   :  { %v823_v18 = vadd.f32 %v822_v17, %v821_v10  ;;  %v13898_v19 = vpop.f32.mrb[22].mxu0 }
 0x10b   :  { %v648_v20 = vsel %vm21_vm5, %v13898_v19, 0.0  ;;  %v757_v21 = vmul.f32 %v13898_v19, %v13898_v19  ;;  %v10221_v23 = vpop.f32.mrb[23].mxu0 }
 0x10c   :  { %v649_v24 = vadd.f32 %v648_v20, %v647_v16 }
 0x10d   :  { %v824_v25 = vsel %vm21_vm5, %v757_v21, 0.0 }
 0x10e   :  { %v825_v26 = vadd.f32 %v824_v25, %v823_v18  ;;  %v13905_v27 = vpop.f32.mrb[24].mxu0 }
 0x10f   :  { %v650_v28 = vsel %vm21_vm5, %v13905_v27, 0.0  ;;  %v758_v30 = vmul.f32 %v13905_v27, %v13905_v27  ;;  %v10224_v31 = vpop.f32.mrb[25].mxu0 }
 0x110   :  { %v651_v32 = vadd.f32 %v650_v28, %v649_v24 }
 0x111   :  { %v826_v33 = vsel %vm21_vm5, %v758_v30, 0.0 }
 0x112   :  { %v827_v34 = vadd.f32 %v826_v33, %v825_v26  ;;  %v13912_v35 = vpop.f32.mrb[26].mxu0 }
 0x113   :  { %v652_v37 = vsel %vm21_vm5, %v13912_v35, 0.0  ;;  %v759_v38 = vmul.f32 %v13912_v35, %v13912_v35  ;;  %v10227_v39 = vpop.f32.mrb[27].mxu0 }
 0x114   :  { %v653_v40 = vadd.f32 %v652_v37, %v651_v32 }
 0x115   :  { %v828_v41 = vsel %vm21_vm5, %v759_v38, 0.0 }
 0x116   :  { %v829_v42 = vadd.f32 %v828_v41, %v827_v34  ;;  %v13919_v44 = vpop.f32.mrb[28].mxu0 }
 0x117   :  { %v654_v45 = vsel %vm21_vm5, %v13919_v44, 0.0  ;;  %v760_v46 = vmul.f32 %v13919_v44, %v13919_v44  ;;  %v10230_v47 = vpop.f32.mrb[29].mxu0 }
 0x118   :  { %v655_v48 = vadd.f32 %v654_v45, %v653_v40 }
 0x119   :  { %v830_v49 = vsel %vm21_vm5, %v760_v46, 0.0 }
 0x11a   :  { %v831_v51 = vadd.f32 %v830_v49, %v829_v42  ;;  %v13926_v52 = vpop.f32.mrb[30].mxu0 }
 0x11b   :  { %v656_v53 = vsel %vm21_vm5, %v13926_v52, 0.0  ;;  %v761_v54 = vmul.f32 %v13926_v52, %v13926_v52  ;;  %v10233_v55 = vpop.f32.mrb[31].mxu0 }
 0x11c   :  { %v657_v56 = vadd.f32 %v656_v53, %v655_v48 }
 0x11d   :  { %v832_v58 = vsel %vm21_vm5, %v761_v54, 0.0 }
 0x11e   :  { %v833_v59 = vadd.f32 %v832_v58, %v831_v51  ;;  %v13933_v60 = vpop.f32.mrb[32].mxu0 }
 0x11f   :  { %v658_v61 = vsel %vm21_vm5, %v13933_v60, 0.0  ;;  %v762_v63 = vmul.f32 %v13933_v60, %v13933_v60  ;;  %v10236_v0 = vpop.f32.mrb[33].mxu0 }
 0x120   :  { %v659_v4 = vadd.f32 %v658_v61, %v657_v56 }
 0x121   :  { %v834_v5 = vsel %vm21_vm5, %v762_v63, 0.0 }
 0x122   :  { %v835_v7 = vadd.f32 %v834_v5, %v833_v59  ;;  %v13940_v8 = vpop.f32.mrb[34].mxu0 }
 0x123   :  { %v660_v9 = vsel %vm21_vm5, %v13940_v8, 0.0  ;;  %v763_v10 = vmul.f32 %v13940_v8, %v13940_v8  ;;  %v10239_v12 = vpop.f32.mrb[35].mxu0 }
 0x124   :  { %v661_v13 = vadd.f32 %v660_v9, %v659_v4 }
 0x125   :  { %v836_v15 = vsel %vm21_vm5, %v763_v10, 0.0 }
 0x126   :  { %v837_v16 = vadd.f32 %v836_v15, %v835_v7  ;;  %v13947_v17 = vpop.f32.mrb[36].mxu0 }
 0x127   :  { %v662_v18 = vsel %vm21_vm5, %v13947_v17, 0.0  ;;  %v764_v20 = vmul.f32 %v13947_v17, %v13947_v17  ;;  %v10242_v21 = vpop.f32.mrb[37].mxu0 }
 0x128   :  { %v663_v23 = vadd.f32 %v662_v18, %v661_v13 }
 0x129   :  { %v838_v24 = vsel %vm21_vm5, %v764_v20, 0.0 }
 0x12a   :  { %v839_v25 = vadd.f32 %v838_v24, %v837_v16  ;;  %v13954_v26 = vpop.f32.mrb[38].mxu0 }
 0x12b   :  { %v664_v28 = vsel %vm21_vm5, %v13954_v26, 0.0  ;;  %v765_v30 = vmul.f32 %v13954_v26, %v13954_v26  ;;  %v10245_v31 = vpop.f32.mrb[39].mxu0 }
 0x12c   :  { %v665_v32 = vadd.f32 %v664_v28, %v663_v23 }
 0x12d   :  { %v840_v33 = vsel %vm21_vm5, %v765_v30, 0.0 }
 0x12e   :  { %v841_v34 = vadd.f32 %v840_v33, %v839_v25  ;;  %v13961_v37 = vpop.f32.mrb[40].mxu0 }
 0x12f   :  { %v666_v38 = vsel %vm21_vm5, %v13961_v37, 0.0  ;;  %v766_v39 = vmul.f32 %v13961_v37, %v13961_v37  ;;  %v10248_v40 = vpop.f32.mrb[41].mxu0 }
 0x130   :  { %v667_v41 = vadd.f32 %v666_v38, %v665_v32 }
 0x131   :  { %v842_v42 = vsel %vm21_vm5, %v766_v39, 0.0 }
 0x132   :  { %v843_v45 = vadd.f32 %v842_v42, %v841_v34  ;;  %v13968_v46 = vpop.f32.mrb[42].mxu0 }
 0x133   :  { %v668_v47 = vsel %vm21_vm5, %v13968_v46, 0.0  ;;  %v767_v48 = vmul.f32 %v13968_v46, %v13968_v46  ;;  %v10251_v49 = vpop.f32.mrb[43].mxu0 }
 0x134   :  { %v669_v51 = vadd.f32 %v668_v47, %v667_v41 }
 0x135   :  { %v844_v53 = vsel %vm21_vm5, %v767_v48, 0.0 }
 0x136   :  { %v845_v54 = vadd.f32 %v844_v53, %v843_v45  ;;  %v13975_v55 = vpop.f32.mrb[44].mxu0 }
 0x137   :  { %v670_v56 = vsel %vm21_vm5, %v13975_v55, 0.0  ;;  %v768_v58 = vmul.f32 %v13975_v55, %v13975_v55  ;;  %v10254_v59 = vpop.f32.mrb[45].mxu0 }
 0x138   :  { %v671_v61 = vadd.f32 %v670_v56, %v669_v51 }
 0x139   :  { %v846_v63 = vsel %vm21_vm5, %v768_v58, 0.0 }
 0x13a   :  { %v847_v0 = vadd.f32 %v846_v63, %v845_v54  ;;  %v13982_v4 = vpop.f32.mrb[46].mxu0 }
 0x13b   :  { %v672_v5 = vsel %vm21_vm5, %v13982_v4, 0.0  ;;  %v769_v7 = vmul.f32 %v13982_v4, %v13982_v4  ;;  %v10257_v9 = vpop.f32.mrb[47].mxu0 }
 0x13c   :  { %v673_v10 = vadd.f32 %v672_v5, %v671_v61 }
 0x13d   :  { %v848_v12 = vsel %vm21_vm5, %v769_v7, 0.0 }
 0x13e   :  { %v849_v13 = vadd.f32 %v848_v12, %v847_v0  ;;  %v13989_v15 = vpop.f32.mrb[48].mxu0 }
 0x13f   :  { %v674_v16 = vsel %vm21_vm5, %v13989_v15, 0.0  ;;  %v770_v18 = vmul.f32 %v13989_v15, %v13989_v15  ;;  %v10260_v20 = vpop.f32.mrb[49].mxu0 }
 0x140   :  { %v675_v21 = vadd.f32 %v674_v16, %v673_v10 }
 0x141   :  { %v850_v23 = vsel %vm21_vm5, %v770_v18, 0.0 }
 0x142   :  { %v851_v24 = vadd.f32 %v850_v23, %v849_v13  ;;  %v13996_v25 = vpop.f32.mrb[50].mxu0 }
 0x143   :  { %v676_v28 = vsel %vm21_vm5, %v13996_v25, 0.0  ;;  %v771_v30 = vmul.f32 %v13996_v25, %v13996_v25  ;;  %v10263_v31 = vpop.f32.mrb[51].mxu0 }
 0x144   :  { %v677_v32 = vadd.f32 %v676_v28, %v675_v21 }
 0x145   :  { %v852_v33 = vsel %vm21_vm5, %v771_v30, 0.0 }
 0x146   :  { %v853_v34 = vadd.f32 %v852_v33, %v851_v24  ;;  %v14003_v38 = vpop.f32.mrb[52].mxu0 }
 0x147   :  { %v678_v39 = vsel %vm21_vm5, %v14003_v38, 0.0  ;;  %v772_v40 = vmul.f32 %v14003_v38, %v14003_v38  ;;  %v10266_v41 = vpop.f32.mrb[53].mxu0 }
 0x148   :  { %v679_v42 = vadd.f32 %v678_v39, %v677_v32 }
 0x149   :  { %v854_v45 = vsel %vm21_vm5, %v772_v40, 0.0 }
 0x14a   :  { %v855_v47 = vadd.f32 %v854_v45, %v853_v34  ;;  %v14010_v48 = vpop.f32.mrb[54].mxu0 }
 0x14b   :  { %v680_v49 = vsel %vm21_vm5, %v14010_v48, 0.0  ;;  %v773_v51 = vmul.f32 %v14010_v48, %v14010_v48  ;;  %v10269_v53 = vpop.f32.mrb[55].mxu0 }
 0x14c   :  { %v681_v54 = vadd.f32 %v680_v49, %v679_v42 }
 0x14d   :  { %v856_v56 = vsel %vm21_vm5, %v773_v51, 0.0 }
 0x14e   :  { %v857_v58 = vadd.f32 %v856_v56, %v855_v47  ;;  %v14017_v59 = vpop.f32.mrb[56].mxu0 }
 0x14f   :  { %v682_v61 = vsel %vm21_vm5, %v14017_v59, 0.0  ;;  %v774_v63 = vmul.f32 %v14017_v59, %v14017_v59  ;;  %v10272_v0 = vpop.f32.mrb[57].mxu0 }
 0x150   :  { %v683_v5 = vadd.f32 %v682_v61, %v681_v54 }
 0x151   :  { %v858_v7 = vsel %vm21_vm5, %v774_v63, 0.0 }
 0x152   :  { %v859_v9 = vadd.f32 %v858_v7, %v857_v58  ;;  %v14024_v10 = vpop.f32.mrb[58].mxu0 }
 0x153   :  { %v684_v12 = vsel %vm21_vm5, %v14024_v10, 0.0  ;;  %v775_v13 = vmul.f32 %v14024_v10, %v14024_v10  ;;  %v10275_v16 = vpop.f32.mrb[59].mxu0 }
 0x154   :  { %v685_v18 = vadd.f32 %v684_v12, %v683_v5 }
 0x155   :  { %v860_v20 = vsel %vm21_vm5, %v775_v13, 0.0 }
 0x156   :  { %v861_v21 = vadd.f32 %v860_v20, %v859_v9  ;;  %v14031_v23 = vpop.f32.mrb[60].mxu0 }
 0x157   :  { %v686_v24 = vsel %vm21_vm5, %v14031_v23, 0.0  ;;  %v776_v28 = vmul.f32 %v14031_v23, %v14031_v23  ;;  %v10278_v30 = vpop.f32.mrb[61].mxu0 }
 0x158   :  { %v687_v31 = vadd.f32 %v686_v24, %v685_v18 }
 0x159   :  { %v862_v32 = vsel %vm21_vm5, %v776_v28, 0.0 }
 0x15a   :  { %v863_v33 = vadd.f32 %v862_v32, %v861_v21  ;;  %v14038_v34 = vpop.f32.mrb[62].mxu0 }
 0x15b   :  { %v688_v39 = vsel %vm21_vm5, %v14038_v34, 0.0  ;;  %v777_v40 = vmul.f32 %v14038_v34, %v14038_v34  ;;  %v10281_v41 = vpop.f32.mrb[63].mxu0 }
 0x15c   :  { %v689_v42 = vadd.f32 %v688_v39, %v687_v31 }
 0x15d   :  { %v864_v45 = vsel %vm21_vm5, %v777_v40, 0.0 }
 0x15e   :  { %v865_v47 = vadd.f32 %v864_v45, %v863_v33  ;;  %v14045_v49 = vpop.f32.mrb[64].mxu0 }
 0x15f   :  { %v690_v51 = vsel %vm21_vm5, %v14045_v49, 0.0  ;;  %v778_v53 = vmul.f32 %v14045_v49, %v14045_v49  ;;  %v10284_v54 = vpop.f32.mrb[65].mxu0 }
 0x160   :  { %v691_v56 = vadd.f32 %v690_v51, %v689_v42 }
 0x161   :  { %v866_v58 = vsel %vm21_vm5, %v778_v53, 0.0 }
 0x162   :  { %v867_v61 = vadd.f32 %v866_v58, %v865_v47  ;;  %v14052_v63 = vpop.f32.mrb[66].mxu0 }
 0x163   :  { %v692_v0 = vsel %vm21_vm5, %v14052_v63, 0.0  ;;  %v779_v5 = vmul.f32 %v14052_v63, %v14052_v63  ;;  %v10287_v7 = vpop.f32.mrb[67].mxu0 }
 0x164   :  { %v693_v9 = vadd.f32 %v692_v0, %v691_v56 }
 0x165   :  { %v868_v12 = vsel %vm21_vm5, %v779_v5, 0.0 }
 0x166   :  { %v869_v13 = vadd.f32 %v868_v12, %v867_v61  ;;  %v14059_v16 = vpop.f32.mrb[68].mxu0 }
 0x167   :  { %17546 = vst [vmem:[#allocation10_spill] sm:$0xff] %v14059_v16  ;;  %v10290_v18 = vpop.f32.mrb[69].mxu0  ;;  %v694_v20 = vsel %vm21_vm5, %v14059_v16, 0.0  ;;  %v780_v21 = vmul.f32 %v14059_v16, %v14059_v16 }
 0x168   :  { %v695_v24 = vadd.f32 %v694_v20, %v693_v9 }
 0x169   :  { %v870_v28 = vsel %vm21_vm5, %v780_v21, 0.0 }
 0x16a   :  { %v14066_v30 = vpop.f32.mrb[70].mxu0  ;;  %v871_v31 = vadd.f32 %v870_v28, %v869_v13 }
 0x16b   :  { %17547 = vst [vmem:[#allocation11_spill] sm:$0xff] %v14066_v30  ;;  %v10293_v32 = vpop.f32.mrb[71].mxu0  ;;  %v696_v33 = vsel %vm21_vm5, %v14066_v30, 0.0  ;;  %v781_v39 = vmul.f32 %v14066_v30, %v14066_v30 }
 0x16c   :  { %v697_v40 = vadd.f32 %v696_v33, %v695_v24 }
 0x16d   :  { %v872_v41 = vsel %vm21_vm5, %v781_v39, 0.0 }
 0x16e   :  { %v14073_v42 = vpop.f32.mrb[72].mxu0  ;;  %v873_v45 = vadd.f32 %v872_v41, %v871_v31 }
 0x16f   :  { %17548 = vst [vmem:[#allocation12_spill] sm:$0xff] %v14073_v42  ;;  %v10296_v47 = vpop.f32.mrb[73].mxu0  ;;  %v698_v51 = vsel %vm21_vm5, %v14073_v42, 0.0  ;;  %v782_v53 = vmul.f32 %v14073_v42, %v14073_v42 }
 0x170   :  { %v699_v54 = vadd.f32 %v698_v51, %v697_v40 }
 0x171   :  { %v874_v56 = vsel %vm21_vm5, %v782_v53, 0.0 }
 0x172   :  { %v14080_v58 = vpop.f32.mrb[74].mxu0  ;;  %v875_v61 = vadd.f32 %v874_v56, %v873_v45 }
 0x173   :  { %17549 = vst [vmem:[#allocation13_spill] sm:$0xff] %v14080_v58  ;;  %v10299_v0 = vpop.f32.mrb[75].mxu0  ;;  %v700_v5 = vsel %vm21_vm5, %v14080_v58, 0.0  ;;  %v783_v7 = vmul.f32 %v14080_v58, %v14080_v58 }
 0x174   :  { %v701_v9 = vadd.f32 %v700_v5, %v699_v54 }
 0x175   :  { %v876_v12 = vsel %vm21_vm5, %v783_v7, 0.0 }
 0x176   :  { %v14087_v13 = vpop.f32.mrb[76].mxu0  ;;  %v877_v18 = vadd.f32 %v876_v12, %v875_v61 }
 0x177   :  { %17550 = vst [vmem:[#allocation14_spill] sm:$0xff] %v14087_v13  ;;  %v10302_v20 = vpop.f32.mrb[77].mxu0  ;;  %v702_v21 = vsel %vm21_vm5, %v14087_v13, 0.0  ;;  %v784_v24 = vmul.f32 %v14087_v13, %v14087_v13 }
 0x178   :  { %v703_v28 = vadd.f32 %v702_v21, %v701_v9 }
 0x179   :  { %v878_v31 = vsel %vm21_vm5, %v784_v24, 0.0 }
 0x17a   :  { %v14094_v32 = vpop.f32.mrb[78].mxu0  ;;  %v879_v33 = vadd.f32 %v878_v31, %v877_v18 }
 0x17b   :  { %17551 = vst [vmem:[#allocation15_spill] sm:$0xff] %v14094_v32  ;;  %v10305_v39 = vpop.f32.mrb[79].mxu0  ;;  %v704_v40 = vsel %vm21_vm5, %v14094_v32, 0.0  ;;  %v785_v41 = vmul.f32 %v14094_v32, %v14094_v32 }
 0x17c   :  { %v705_v45 = vadd.f32 %v704_v40, %v703_v28 }
 0x17d   :  { %v880_v47 = vsel %vm21_vm5, %v785_v41, 0.0 }
 0x17e   :  { %v14101_v51 = vpop.f32.mrb[80].mxu0  ;;  %v881_v53 = vadd.f32 %v880_v47, %v879_v33  ;;  %v2313_v47 = vld [vmem:[%s17519_s2 + $0x40] sm:$0xff] }
 0x17f   :  { %17552 = vst [vmem:[#allocation16_spill] sm:$0xff] %v14101_v51  ;;  %v10308_v54 = vpop.f32.mrb[81].mxu0  ;;  %v706_v56 = vsel %vm21_vm5, %v14101_v51, 0.0  ;;  %v786_v61 = vmul.f32 %v14101_v51, %v14101_v51 }
 0x180   :  { %v707_v0 = vadd.f32 %v706_v56, %v705_v45  ;;  %v1278_v54 = vld [vmem:[%s17519_s2 + $0x20] sm:$0xff] }
 0x181   :  { %v882_v5 = vsel %vm21_vm5, %v786_v61, 0.0 }
 0x182   :  { %v14108_v7 = vpop.f32.mrb[82].mxu0  ;;  %v883_v9 = vadd.f32 %v882_v5, %v881_v53  ;;  %v2314_v53 = vld [vmem:[%s17519_s2 + $0x48] sm:$0xff] }
 0x183   :  { %17553 = vst [vmem:[#allocation17_spill] sm:$0xff] %v14108_v7  ;;  %v10311_v12 = vpop.f32.mrb[83].mxu0  ;;  %v708_v18 = vsel %vm21_vm5, %v14108_v7, 0.0  ;;  %v787_v20 = vmul.f32 %v14108_v7, %v14108_v7  ;;  %v1279_v5 = vld [vmem:[%s17519_s2 + $0x28] sm:$0xff] }
 0x184   :  { %v709_v21 = vadd.f32 %v708_v18, %v707_v0  ;;  %v12271_v0 = vpack.c.bf16 %v2314_v53, %v2313_v47 }
 0x185   :  { %v884_v24 = vsel %vm21_vm5, %v787_v20, 0.0  ;;  %v12259_v20 = vpack.c.bf16 %v1279_v5, %v1278_v54 }
 0x186   :  { %v14115_v28 = vpop.f32.mrb[84].mxu0  ;;  %v885_v31 = vadd.f32 %v884_v24, %v883_v9  ;;  %v2316_v24 = vld [vmem:[%s17519_s2 + $0x58] sm:$0xff]  ;;  %12272 = vmatpush3.bf16.msra.mxu1 %v12271_v0 }
 0x187   :  { %17554 = vst [vmem:[#allocation18_spill] sm:$0xff] %v14115_v28  ;;  %v10314_v33 = vpop.f32.mrb[85].mxu0  ;;  %v710_v39 = vsel %vm21_vm5, %v14115_v28, 0.0  ;;  %v788_v40 = vmul.f32 %v14115_v28, %v14115_v28  ;;  %12260 = vmatpush3.bf16.msra.mxu0 %v12259_v20  ;;  %12273 = vmatprep.subr.bf16.mxu1 %v17523_v3 }
 0x188   :  { %v711_v41 = vadd.f32 %v710_v39, %v709_v21  ;;  %v2315_v21 = vld [vmem:[%s17519_s2 + $0x50] sm:$0xff]  ;;  %12261 = vmatprep.subr.bf16.mxu0 %v17523_v3 }
 0x189   :  { %v886_v45 = vsel %vm21_vm5, %v788_v40, 0.0  ;;  %v12274_v39 = vpack.c.bf16 %v2316_v24, %v2315_v21  ;;  %v1281_v40 = vld [vmem:[%s17519_s2 + $0x38] sm:$0xff] }
 0x18a   :  { %v14131_v56 = vpop.f32.mrb[86].mxu0  ;;  %v887_v61 = vadd.f32 %v886_v45, %v885_v31  ;;  %v1280_v31 = vld [vmem:[%s17519_s2 + $0x30] sm:$0xff] }
 0x18b   :  { %17555 = vst [vmem:[#allocation19_spill] sm:$0xff] %v14131_v56  ;;  %v10317_v9 = vpop.f32.mrb[87].mxu0  ;;  %v712_v12 = vsel %vm21_vm5, %v14131_v56, 0.0  ;;  %v789_v18 = vmul.f32 %v14131_v56, %v14131_v56  ;;  %v12262_v47 = vpack.c.bf16 %v1281_v40, %v1280_v31  ;;  %12275 = vmatpush3.bf16.msra.mxu1 %v12274_v39 }
 0x18c   :  { %v713_v33 = vadd.f32 %v712_v12, %v711_v41  ;;  %12276 = vmatprep.subr.bf16.mxu1 %v17523_v3 }
 0x18d   :  { %v888_v45 = vsel %vm21_vm5, %v789_v18, 0.0  ;;  %12263 = vmatpush3.bf16.msra.mxu0 %v12262_v47 }
 0x18e   :  { %v14154_v53 = vpop.f32.mrb[88].mxu0  ;;  %v889_v54 = vadd.f32 %v888_v45, %v887_v61  ;;  %12264 = vmatprep.subr.bf16.mxu0 %v17523_v3 }
 0x18f   :  { %17556 = vst [vmem:[#allocation20_spill] sm:$0xff] %v14154_v53  ;;  %v10320_v5 = vpop.f32.mrb[89].mxu0  ;;  %v714_v41 = vsel %vm21_vm5, %v14154_v53, 0.0  ;;  %v790_v0 = vmul.f32 %v14154_v53, %v14154_v53 }
 0x190   :  { %v715_v9 = vadd.f32 %v714_v41, %v713_v33 }
 0x191   :  { %v890_v12 = vsel %vm21_vm5, %v790_v0, 0.0 }
 0x192   :  { %v14163_v18 = vpop.f32.mrb[90].mxu0  ;;  %v891_v20 = vadd.f32 %v890_v12, %v889_v54 }
 0x193   :  { %v716_v61 = vsel %vm21_vm5, %v14163_v18, 0.0  ;;  %v791_v21 = vmul.f32 %v14163_v18, %v14163_v18  ;;  %v10323_v24 = vpop.f32.mrb[91].mxu0 }
 0x194   :  { %v717_v31 = vadd.f32 %v716_v61, %v715_v9 }
 0x195   :  { %v892_v33 = vsel %vm21_vm5, %v791_v21, 0.0 }
 0x196   :  { %v893_v39 = vadd.f32 %v892_v33, %v891_v20  ;;  %v14171_v40 = vpop.f32.mrb[92].mxu0 }
 0x197   :  { %v718_v45 = vsel %vm21_vm5, %v14171_v40, 0.0  ;;  %v792_v47 = vmul.f32 %v14171_v40, %v14171_v40  ;;  %v10326_v54 = vpop.f32.mrb[93].mxu0 }
 0x198   :  { %v719_v5 = vadd.f32 %v718_v45, %v717_v31 }
 0x199   :  { %v894_v41 = vsel %vm21_vm5, %v792_v47, 0.0 }
 0x19a   :  { %v14178_v0 = vpop.f32.mrb[94].mxu0  ;;  %v895_v12 = vadd.f32 %v894_v41, %v893_v39 }
 0x19b   :  { %v793_v9 = vmul.f32 %v14178_v0, %v14178_v0  ;;  %v10329_v61 = vpop.f32.mrb[95].mxu0  ;;  %v720_v20 = vsel %vm21_vm5, %v14178_v0, 0.0 }
 0x19c   :  { %v721_v21 = vadd.f32 %v720_v20, %v719_v5 }
 0x19d   :  { %v896_v24 = vsel %vm21_vm5, %v793_v9, 0.0 }
 0x19e   :  { %v14185_v33 = vpop.f32.mrb[96].mxu0  ;;  %v897_v3 = vadd.f32 %v896_v24, %v895_v12 }
 0x19f   :  { %v722_v31 = vsel %vm21_vm5, %v14185_v33, 0.0  ;;  %v794_v45 = vmul.f32 %v14185_v33, %v14185_v33  ;;  %v10332_v39 = vpop.f32.mrb[97].mxu0 }
 0x1a0   :  { %v723_v47 = vadd.f32 %v722_v31, %v721_v21 }
 0x1a1   :  { %v898_v54 = vsel %vm21_vm5, %v794_v45, 0.0 }
 0x1a2   :  { %v899_v41 = vadd.f32 %v898_v54, %v897_v3  ;;  %v14192_v61 = vpop.f32.mrb[98].mxu0 }
 0x1a3   :  { %v724_v5 = vsel %vm21_vm5, %v14192_v61, 0.0  ;;  %v795_v9 = vmul.f32 %v14192_v61, %v14192_v61  ;;  %v10335_v12 = vpop.f32.mrb[99].mxu0 }
 0x1a4   :  { %v725_v20 = vadd.f32 %v724_v5, %v723_v47 }
 0x1a5   :  { %v900_v24 = vsel %vm21_vm5, %v795_v9, 0.0 }
 0x1a6   :  { %v901_v6 = vadd.f32 %v900_v24, %v899_v41  ;;  %v14199_v53 = vpop.f32.mrb[100].mxu0 }
 0x1a7   :  { %v726_v21 = vsel %vm21_vm5, %v14199_v53, 0.0  ;;  %v796_v3 = vmul.f32 %v14199_v53, %v14199_v53  ;;  %v10338_v31 = vpop.f32.mrb[101].mxu0 }
 0x1a8   :  { %v727_v45 = vadd.f32 %v726_v21, %v725_v20 }
 0x1a9   :  { %v902_v39 = vsel %vm21_vm5, %v796_v3, 0.0 }
 0x1aa   :  { %v903_v54 = vadd.f32 %v902_v39, %v901_v6  ;;  %v14206_v56 = vpop.f32.mrb[102].mxu0 }
 0x1ab   :  { %17557 = vst [vmem:[#allocation21_spill] sm:$0xff] %v14206_v56  ;;  %v728_v47 = vsel %vm21_vm5, %v14206_v56, 0.0  ;;  %v797_v41 = vmul.f32 %v14206_v56, %v14206_v56  ;;  %v10341_v5 = vpop.f32.mrb[103].mxu0 }
 0x1ac   :  { %v729_v9 = vadd.f32 %v728_v47, %v727_v45 }
 0x1ad   :  { %v904_v12 = vsel %vm21_vm5, %v797_v41, 0.0 }
 0x1ae   :  { %v905_v24 = vadd.f32 %v904_v12, %v903_v54  ;;  %v14213_v28 = vpop.f32.mrb[104].mxu0 }
 0x1af   :  { %17558 = vst [vmem:[#allocation22_spill] sm:$0xff] %v14213_v28  ;;  %v730_v20 = vsel %vm21_vm5, %v14213_v28, 0.0  ;;  %v798_v6 = vmul.f32 %v14213_v28, %v14213_v28  ;;  %v10344_v21 = vpop.f32.mrb[105].mxu0 }
 0x1b0   :  { %v731_v3 = vadd.f32 %v730_v20, %v729_v9 }
 0x1b1   :  { %v906_v31 = vsel %vm21_vm5, %v798_v6, 0.0 }
 0x1b2   :  { %v907_v39 = vadd.f32 %v906_v31, %v905_v24  ;;  %v14220_v7 = vpop.f32.mrb[106].mxu0 }
 0x1b3   :  { %17559 = vst [vmem:[#allocation23_spill] sm:$0xff] %v14220_v7  ;;  %v732_v45 = vsel %vm21_vm5, %v14220_v7, 0.0  ;;  %v799_v54 = vmul.f32 %v14220_v7, %v14220_v7  ;;  %v10347_v47 = vpop.f32.mrb[107].mxu0 }
 0x1b4   :  { %v733_v41 = vadd.f32 %v732_v45, %v731_v3 }
 0x1b5   :  { %v908_v5 = vsel %vm21_vm5, %v799_v54, 0.0 }
 0x1b6   :  { %v909_v12 = vadd.f32 %v908_v5, %v907_v39  ;;  %v14227_v51 = vpop.f32.mrb[108].mxu0 }
 0x1b7   :  { %17560 = vst [vmem:[#allocation24_spill] sm:$0xff] %v14227_v51  ;;  %v734_v9 = vsel %vm21_vm5, %v14227_v51, 0.0  ;;  %v800_v24 = vmul.f32 %v14227_v51, %v14227_v51  ;;  %v10350_v20 = vpop.f32.mrb[109].mxu0 }
 0x1b8   :  { %v735_v6 = vadd.f32 %v734_v9, %v733_v41 }
 0x1b9   :  { %v910_v21 = vsel %vm21_vm5, %v800_v24, 0.0 }
 0x1ba   :  { %v911_v31 = vadd.f32 %v910_v21, %v909_v12  ;;  %v14234_v32 = vpop.f32.mrb[110].mxu0 }
 0x1bb   :  { %17561 = vst [vmem:[#allocation25_spill] sm:$0xff] %v14234_v32  ;;  %v736_v3 = vsel %vm21_vm5, %v14234_v32, 0.0  ;;  %v801_v39 = vmul.f32 %v14234_v32, %v14234_v32  ;;  %v10353_v45 = vpop.f32.mrb[111].mxu0 }
 0x1bc   :  { %v737_v54 = vadd.f32 %v736_v3, %v735_v6 }
 0x1bd   :  { %v912_v47 = vsel %vm21_vm5, %v801_v39, 0.0 }
 0x1be   :  { %v913_v5 = vadd.f32 %v912_v47, %v911_v31  ;;  %v621_v13 = vpop.f32.mrb[112].mxu0 }
 0x1bf   :  { %v738_v20 = vsel %vm21_vm5, %v621_v13, 0.0  ;;  %v802_v41 = vmul.f32 %v621_v13, %v621_v13  ;;  %v10356_v9 = vpop.f32.mrb[113].mxu0 }
 0x1c0   :  { %v739_v24 = vadd.f32 %v738_v20, %v737_v54 }
 0x1c1   :  { %v914_v12 = vsel %vm21_vm5, %v802_v41, 0.0  ;;  %v932_v41 = vlaneseq }
 0x1c2   :  { %v740_v21 = vrot.slane %v739_v24, 4  ;;  %v915_v58 = vadd.f32 %v914_v12, %v913_v5 }
 0x1c3   :  { %v933_v5 = vshrl.u32 %v932_v41, 7  ;;  %v17563_v41 = vld [vmem:[#allocation21_spill] sm:$0xff] }
 0x1c4   :  { %v741_v42 = vadd.f32 %v740_v21, %v739_v24  ;;  %v916_v30 = vrot.slane %v915_v58, 4 }
 0x1c6   :  { %v742_v16 = vrot.slane %v741_v42, 2  ;;  %v917_v51 = vadd.f32 %v916_v30, %v915_v58  ;;  %v625_v30 = vld [vmem:[%s17520_s3] sm:$0x1] }
 0x1c8   :  { %v743_v32 = vadd.f32 %v742_v16, %v741_v42  ;;  %v918_v45 = vrot.slane %v917_v51, 2  ;;  %v14246_v16 = vsub.s32 0, %v933_v5  ;;  %v17564_v5 = vld [vmem:[#allocation22_spill] sm:$0xff] }
 0x1ca   :  { %v744_v6 = vrot.slane %v743_v32, 1  ;;  %v919_v3 = vadd.f32 %v918_v45, %v917_v51  ;;  %17562 = vst [vmem:[#allocation26_spill] sm:$0xff] %v14246_v16  ;;  %v14256_v51 = vld [vmem:[%s17519_s2 + $0x68] sm:$0xff] }
 0x1cc   :  { %v745_v39 = vadd.f32 %v744_v6, %v743_v32  ;;  %v920_v31 = vrot.slane %v919_v3, 1  ;;  %v14251_v32 = vld [vmem:[%s17519_s2 + $0x60] sm:$0xff] }
 0x1cd   :  { %v12277_v12 = vpack.c.bf16 %v14256_v51, %v14251_v32  ;;  %v17571_v32 = vmov 0.0|0.0   ;;  %v17572_v51 = vld [vmem:[#allocation12_spill] sm:$0xff] }
 0x1ce   :  { %v921_v47 = vadd.f32 %v920_v31, %v919_v3  ;;  %v922_v7 = vmul.f32 0.0022222223, %v745_v39 }
 0x1d0   :  { %v923_v28 = vmul.f32 0.0022222223, %v921_v47  ;;  %v924_v56 = vmul.f32 %v922_v7, %v922_v7 }
 0x1d2   :  { %v925_v9 = vsub.f32 %v923_v28, %v924_v56  ;;  %v626_v28 = vld [vmem:[%s17520_s3 + $0x1] sm:$0x1] }
 0x1d4   :  { %v926_v54 = vmax.f32 %v925_v9, 0.0 }
 0x1d6   :  { %v927_v20 = vadd.f32 1e-05, %v926_v54 }
 0x1d8   :  { %13356 = vrsqrt.f32 %v927_v20 }
 0x1e2   :  { %v13357_v42 = vpop.eup %13356 }
 0x1e3   :  { %v929_v58 = vmul.f32 %v13357_v42, %v625_v30  ;;  %v17565_v30 = vld [vmem:[#allocation23_spill] sm:$0xff]  ;;  %v17566_v42 = vld [vmem:[#allocation24_spill] sm:$0xff] }
 0x1e5   :  { %v930_v56 = vmul.f32 %v929_v58, %v922_v7  ;;  %v14262_v24 = vrot.slane %v929_v58, %v14246_v16  ;;  %v17567_v58 = vld [vmem:[#allocation25_spill] sm:$0xff] }
 0x1e7   :  { %v931_v21 = vsub.f32 %v626_v28, %v930_v56  ;;  %v992_v45 = vmul.f32 %v14262_v24, %v621_v13  ;;  %v936_v6 = vmul.f32 %v14262_v24, %v13800_v62  ;;  %v937_v3 = vmul.f32 %v14262_v24, %v13810_v2 }
 0x1e8   :  { %v938_v39 = vmul.f32 %v14262_v24, %v13826_v14  ;;  %v939_v7 = vmul.f32 %v14262_v24, %v13839_v22  ;;  %v940_v31 = vmul.f32 %v14262_v24, %v13849_v29  ;;  %v941_v47 = vmul.f32 %v14262_v24, %v13856_v36 }
 0x1e9   :  { %v14280_v13 = vrot.slane %v931_v21, %v14246_v16  ;;  %v942_v62 = vmul.f32 %v14262_v24, %v13863_v43  ;;  %v943_v2 = vmul.f32 %v14262_v24, %v13870_v50  ;;  %v944_v14 = vmul.f32 %v14262_v24, %v13877_v57 }
 0x1ea   :  { %v945_v22 = vmul.f32 %v14262_v24, %v13884_v1  ;;  %v946_v29 = vmul.f32 %v14262_v24, %v13891_v11  ;;  %v947_v36 = vmul.f32 %v14262_v24, %v13898_v19  ;;  %v948_v9 = vmul.f32 %v14262_v24, %v13905_v27 }
 0x1eb   :  { %v1053_v43 = vadd.f32 %v14280_v13, %v992_v45  ;;  %v949_v50 = vmul.f32 %v14262_v24, %v13912_v35  ;;  %v950_v57 = vmul.f32 %v14262_v24, %v13919_v44  ;;  %v951_v1 = vmul.f32 %v14262_v24, %v13926_v52 }
 0x1ec   :  { %v952_v11 = vmul.f32 %v14262_v24, %v13933_v60  ;;  %v953_v19 = vmul.f32 %v14262_v24, %v13940_v8  ;;  %v954_v27 = vmul.f32 %v14262_v24, %v13947_v17  ;;  %v955_v54 = vmul.f32 %v14262_v24, %v13954_v26 }
 0x1ed   :  { %v1110_v20 = vmax.f32 %v1053_v43, 0.0  ;;  %v956_v35 = vmul.f32 %v14262_v24, %v13961_v37  ;;  %v957_v44 = vmul.f32 %v14262_v24, %v13968_v46  ;;  %v958_v52 = vmul.f32 %v14262_v24, %v13975_v55 }
 0x1ee   :  { %v959_v60 = vmul.f32 %v14262_v24, %v13982_v4  ;;  %v960_v8 = vmul.f32 %v14262_v24, %v13989_v15  ;;  %v961_v17 = vmul.f32 %v14262_v24, %v13996_v25  ;;  %v962_v26 = vmul.f32 %v14262_v24, %v14003_v38 }
 0x1ef   :  { %1167 = vst.msk [vmem:[#allocation2 + $0x1c0] sm:$0xff] %vm21_vm5, %v1110_v20  ;;  %v963_v37 = vmul.f32 %v14262_v24, %v14010_v48  ;;  %v964_v46 = vmul.f32 %v14262_v24, %v14017_v59  ;;  %v965_v55 = vmul.f32 %v14262_v24, %v14024_v10  ;;  %v966_v4 = vmul.f32 %v14262_v24, %v14031_v23 }
 0x1f0   :  { %v967_v15 = vmul.f32 %v14262_v24, %v14038_v34  ;;  %v968_v25 = vmul.f32 %v14262_v24, %v14045_v49  ;;  %v969_v38 = vmul.f32 %v14262_v24, %v14052_v63  ;;  %v981_v48 = vmul.f32 %v14262_v24, %v14163_v18 }
 0x1f1   :  { %v982_v59 = vmul.f32 %v14262_v24, %v14171_v40  ;;  %v983_v10 = vmul.f32 %v14262_v24, %v14178_v0  ;;  %v984_v23 = vmul.f32 %v14262_v24, %v14185_v33  ;;  %v985_v34 = vmul.f32 %v14262_v24, %v14192_v61 }
 0x1f2   :  { %v986_v49 = vmul.f32 %v14262_v24, %v14199_v53  ;;  %v987_v63 = vmul.f32 %v14262_v24, %v17563_v41  ;;  %v988_v18 = vmul.f32 %v14262_v24, %v17564_v5  ;;  %v989_v40 = vmul.f32 %v14262_v24, %v17565_v30 }
 0x1f3   :  { %v990_v0 = vmul.f32 %v14262_v24, %v17566_v42  ;;  %v991_v33 = vmul.f32 %v14262_v24, %v17567_v58  ;;  %v997_v61 = vadd.f32 %v14280_v13, %v936_v6  ;;  %v998_v28 = vadd.f32 %v14280_v13, %v937_v3 }
 0x1f4   :  { %v999_v53 = vadd.f32 %v14280_v13, %v938_v39  ;;  %v1000_v56 = vadd.f32 %v14280_v13, %v939_v7  ;;  %v1001_v21 = vadd.f32 %v14280_v13, %v940_v31  ;;  %v14368_v45 = vadd.f32 %v14280_v13, %v941_v47 }
 0x1f5   :  { %v14371_v43 = vadd.f32 %v14280_v13, %v942_v62  ;;  %v14374_v20 = vadd.f32 %v14280_v13, %v943_v2  ;;  %v14377_v41 = vadd.f32 %v14280_v13, %v944_v14  ;;  %v14380_v6 = vadd.f32 %v14280_v13, %v945_v22 }
 0x1f6   :  { %v14383_v3 = vadd.f32 %v14280_v13, %v946_v29  ;;  %v14386_v39 = vadd.f32 %v14280_v13, %v947_v36  ;;  %v14389_v7 = vadd.f32 %v14280_v13, %v948_v9  ;;  %v14392_v31 = vadd.f32 %v14280_v13, %v949_v50 }
 0x1f7   :  { %v14395_v47 = vadd.f32 %v14280_v13, %v950_v57  ;;  %v14398_v62 = vadd.f32 %v14280_v13, %v951_v1  ;;  %v14401_v2 = vadd.f32 %v14280_v13, %v952_v11  ;;  %v14404_v14 = vadd.f32 %v14280_v13, %v953_v19 }
 0x1f8   :  { %v14407_v22 = vadd.f32 %v14280_v13, %v954_v27  ;;  %v14410_v29 = vadd.f32 %v14280_v13, %v955_v54  ;;  %v14413_v36 = vadd.f32 %v14280_v13, %v956_v35  ;;  %v14416_v9 = vadd.f32 %v14280_v13, %v957_v44 }
 0x1f9   :  { %v14419_v50 = vadd.f32 %v14280_v13, %v958_v52  ;;  %v14422_v57 = vadd.f32 %v14280_v13, %v959_v60  ;;  %v14425_v1 = vadd.f32 %v14280_v13, %v960_v8  ;;  %v14428_v11 = vadd.f32 %v14280_v13, %v961_v17 }
 0x1fa   :  { %v14431_v19 = vadd.f32 %v14280_v13, %v962_v26  ;;  %v14434_v27 = vadd.f32 %v14280_v13, %v963_v37  ;;  %v14437_v54 = vadd.f32 %v14280_v13, %v964_v46  ;;  %v14440_v35 = vadd.f32 %v14280_v13, %v965_v55 }
 0x1fb   :  { %v14443_v44 = vadd.f32 %v14280_v13, %v966_v4  ;;  %v14446_v52 = vadd.f32 %v14280_v13, %v967_v15  ;;  %v14449_v60 = vadd.f32 %v14280_v13, %v968_v25  ;;  %v14452_v8 = vadd.f32 %v14280_v13, %v969_v38 }
 0x1fc   :  { %v14455_v17 = vadd.f32 %v14280_v13, %v981_v48  ;;  %v14458_v26 = vadd.f32 %v14280_v13, %v982_v59  ;;  %v14461_v37 = vadd.f32 %v14280_v13, %v983_v10  ;;  %v14464_v46 = vadd.f32 %v14280_v13, %v984_v23 }
 0x1fd   :  { %v14467_v55 = vadd.f32 %v14280_v13, %v985_v34  ;;  %v14470_v4 = vadd.f32 %v14280_v13, %v986_v49  ;;  %v14473_v15 = vadd.f32 %v14280_v13, %v987_v63  ;;  %v14476_v25 = vadd.f32 %v14280_v13, %v988_v18 }
 0x1fe   :  { %v14479_v38 = vadd.f32 %v14280_v13, %v989_v40  ;;  %v14482_v48 = vadd.f32 %v14280_v13, %v990_v0  ;;  %v14485_v59 = vadd.f32 %v14280_v13, %v991_v33  ;;  %v1054_v10 = vmax.f32 %v997_v61, 0.0 }
 0x1ff   :  { %v1055_v23 = vmax.f32 %v998_v28, 0.0  ;;  %v1056_v34 = vmax.f32 %v999_v53, 0.0  ;;  %v1057_v49 = vmax.f32 %v1000_v56, 0.0  ;;  %v1058_v5 = vmax.f32 %v1001_v21, 0.0 }
 0x200   :  { %v1059_v63 = vmax.f32 %v14368_v45, 0.0  ;;  %v1060_v30 = vmax.f32 %v14371_v43, 0.0  ;;  %v1061_v18 = vmax.f32 %v14374_v20, 0.0  ;;  %v1062_v40 = vmax.f32 %v14377_v41, 0.0  ;;  %1111 = vst.msk [vmem:[#allocation2] sm:$0xff] %vm21_vm5, %v1054_v10 }
 0x201   :  { %v1063_v42 = vmax.f32 %v14380_v6, 0.0  ;;  %v1064_v0 = vmax.f32 %v14383_v3, 0.0  ;;  %v1065_v58 = vmax.f32 %v14386_v39, 0.0  ;;  %v1066_v33 = vmax.f32 %v14389_v7, 0.0  ;;  %1112 = vst.msk [vmem:[#allocation2 + $0x8] sm:$0xff] %vm21_vm5, %v1055_v23  ;;  %1113 = vst.msk [vmem:[#allocation2 + $0x10] sm:$0xff] %vm21_vm5, %v1056_v34 }
 0x202   :  { %1114 = vst.msk [vmem:[#allocation2 + $0x18] sm:$0xff] %vm21_vm5, %v1057_v49  ;;  %1115 = vst.msk [vmem:[#allocation2 + $0x20] sm:$0xff] %vm21_vm5, %v1058_v5  ;;  %v1067_v61 = vmax.f32 %v14392_v31, 0.0  ;;  %v1068_v28 = vmax.f32 %v14395_v47, 0.0  ;;  %v1069_v53 = vmax.f32 %v14398_v62, 0.0  ;;  %v1070_v56 = vmax.f32 %v14401_v2, 0.0 }
 0x203   :  { %1116 = vst.msk [vmem:[#allocation2 + $0x28] sm:$0xff] %vm21_vm5, %v1059_v63  ;;  %1117 = vst.msk [vmem:[#allocation2 + $0x30] sm:$0xff] %vm21_vm5, %v1060_v30  ;;  %v1071_v21 = vmax.f32 %v14404_v14, 0.0  ;;  %v1072_v45 = vmax.f32 %v14407_v22, 0.0  ;;  %v1073_v43 = vmax.f32 %v14410_v29, 0.0  ;;  %v1074_v20 = vmax.f32 %v14413_v36, 0.0 }
 0x204   :  { %1118 = vst.msk [vmem:[#allocation2 + $0x38] sm:$0xff] %vm21_vm5, %v1061_v18  ;;  %1119 = vst.msk [vmem:[#allocation2 + $0x40] sm:$0xff] %vm21_vm5, %v1062_v40  ;;  %v1075_v41 = vmax.f32 %v14416_v9, 0.0  ;;  %v1076_v6 = vmax.f32 %v14419_v50, 0.0  ;;  %v1077_v3 = vmax.f32 %v14422_v57, 0.0  ;;  %v1078_v39 = vmax.f32 %v14425_v1, 0.0 }
 0x205   :  { %1120 = vst.msk [vmem:[#allocation2 + $0x48] sm:$0xff] %vm21_vm5, %v1063_v42  ;;  %1121 = vst.msk [vmem:[#allocation2 + $0x50] sm:$0xff] %vm21_vm5, %v1064_v0  ;;  %v1079_v7 = vmax.f32 %v14428_v11, 0.0  ;;  %v1080_v31 = vmax.f32 %v14431_v19, 0.0  ;;  %v1081_v47 = vmax.f32 %v14434_v27, 0.0  ;;  %v1082_v62 = vmax.f32 %v14437_v54, 0.0 }
 0x206   :  { %1122 = vst.msk [vmem:[#allocation2 + $0x58] sm:$0xff] %vm21_vm5, %v1065_v58  ;;  %1123 = vst.msk [vmem:[#allocation2 + $0x60] sm:$0xff] %vm21_vm5, %v1066_v33  ;;  %v1083_v2 = vmax.f32 %v14440_v35, 0.0  ;;  %v1084_v14 = vmax.f32 %v14443_v44, 0.0  ;;  %v1085_v22 = vmax.f32 %v14446_v52, 0.0  ;;  %v1086_v29 = vmax.f32 %v14449_v60, 0.0 }
 0x207   :  { %1124 = vst.msk [vmem:[#allocation2 + $0x68] sm:$0xff] %vm21_vm5, %v1067_v61  ;;  %1125 = vst.msk [vmem:[#allocation2 + $0x70] sm:$0xff] %vm21_vm5, %v1068_v28  ;;  %v1087_v36 = vmax.f32 %v14452_v8, 0.0  ;;  %v1099_v9 = vmax.f32 %v14455_v17, 0.0  ;;  %v1100_v50 = vmax.f32 %v14458_v26, 0.0  ;;  %v1101_v57 = vmax.f32 %v14461_v37, 0.0 }
 0x208   :  { %1126 = vst.msk [vmem:[#allocation2 + $0x78] sm:$0xff] %vm21_vm5, %v1069_v53  ;;  %1127 = vst.msk [vmem:[#allocation2 + $0x80] sm:$0xff] %vm21_vm5, %v1070_v56  ;;  %v2914_v1 = vld [vmem:[%s17519_s2 + $0x70] sm:$0xff]  ;;  %v2915_v11 = vld [vmem:[%s17519_s2 + $0x78] sm:$0xff]  ;;  %v1102_v19 = vmax.f32 %v14464_v46, 0.0  ;;  %v1103_v27 = vmax.f32 %v14467_v55, 0.0 }
 0x209   :  { %1128 = vst.msk [vmem:[#allocation2 + $0x88] sm:$0xff] %vm21_vm5, %v1071_v21  ;;  %1129 = vst.msk [vmem:[#allocation2 + $0x90] sm:$0xff] %vm21_vm5, %v1072_v45  ;;  %v1104_v54 = vmax.f32 %v14470_v4, 0.0  ;;  %v1105_v35 = vmax.f32 %v14473_v15, 0.0  ;;  %v1225_v44 = vld [vmem:[#allocation2 + $0x1] sm:$0xff]  ;;  %v1106_v60 = vmax.f32 %v14476_v25, 0.0  ;;  %v12280_v46 = vpack.c.bf16 %v2915_v11, %v2914_v1 }
 0x20a   :  { %1130 = vst.msk [vmem:[#allocation2 + $0x98] sm:$0xff] %vm21_vm5, %v1073_v43  ;;  %1131 = vst.msk [vmem:[#allocation2 + $0xa0] sm:$0xff] %vm21_vm5, %v1074_v20  ;;  %v2260_v52 = vld [vmem:[#allocation2 + $0x2] sm:$0xff]  ;;  %v1107_v8 = vmax.f32 %v14479_v38, 0.0  ;;  %v1108_v17 = vmax.f32 %v14482_v48, 0.0  ;;  %v1109_v26 = vmax.f32 %v14485_v59, 0.0  ;;  %10366 = vmatmul.mubr.msk.f32.vlgmr.msra.gmra.mrb[114].mxu0 %vm21_vm5, %v1225_v44 }
 0x20b   :  { %1132 = vst.msk [vmem:[#allocation2 + $0xa8] sm:$0xff] %vm21_vm5, %v1075_v41  ;;  %1133 = vst.msk [vmem:[#allocation2 + $0xb0] sm:$0xff] %vm21_vm5, %v1076_v6  ;;  %10700 = vmatmul.mubr.msk.f32.vlgmr.msra.gmra.mrb[0].mxu1 %vm21_vm5, %v2260_v52  ;;  %v17568_v37 = vmov 0.0   ;;  %v17569_v55 = vld [vmem:[#allocation10_spill] sm:$0xff]  ;;  %v17570_v15 = vld [vmem:[#allocation11_spill] sm:$0xff] }
 0x20c   :  { %1134 = vst.msk [vmem:[#allocation2 + $0xb8] sm:$0xff] %vm21_vm5, %v1077_v3  ;;  %1135 = vst.msk [vmem:[#allocation2 + $0xc0] sm:$0xff] %vm21_vm5, %v1078_v39  ;;  %12278 = vmatpush3.bf16.msra.mxu1 %v12277_v12  ;;  %10368 = vmatprep.mubr.msk.f32.mxu0 %vm13389_vm1, %v17568_v37  ;;  %v970_v4 = vmul.f32 %v14262_v24, %v17569_v55  ;;  %v971_v25 = vmul.f32 %v14262_v24, %v17570_v15  ;;  %v17573_v38 = vld [vmem:[#allocation13_spill] sm:$0xff]  ;;  %v17574_v59 = vld [vmem:[#allocation14_spill] sm:$0xff] }
 0x20d   :  { %1136 = vst.msk [vmem:[#allocation2 + $0xc8] sm:$0xff] %vm21_vm5, %v1079_v7  ;;  %1137 = vst.msk [vmem:[#allocation2 + $0xd0] sm:$0xff] %vm21_vm5, %v1080_v31  ;;  %10702 = vmatprep.mubr.msk.f32.mxu1 %vm13389_vm1, %v17568_v37  ;;  %12279 = vmatprep.subr.bf16.mxu1 %v17571_v32  ;;  %v972_v12 = vmul.f32 %v14262_v24, %v17572_v51  ;;  %v973_v48 = vmul.f32 %v14262_v24, %v17573_v38  ;;  %v1226_v23 = vld [vmem:[#allocation2 + $0x9] sm:$0xff]  ;;  %v17575_v63 = vld [vmem:[#allocation15_spill] sm:$0xff] }
 0x20e   :  { %1138 = vst.msk [vmem:[#allocation2 + $0xd8] sm:$0xff] %vm21_vm5, %v1081_v47  ;;  %1139 = vst.msk [vmem:[#allocation2 + $0xe0] sm:$0xff] %vm21_vm5, %v1082_v62  ;;  %v974_v10 = vmul.f32 %v14262_v24, %v17574_v59  ;;  %v2261_v34 = vld [vmem:[#allocation2 + $0xa] sm:$0xff]  ;;  %v1031_v49 = vadd.f32 %v14280_v13, %v970_v4  ;;  %v1032_v5 = vadd.f32 %v14280_v13, %v971_v25  ;;  %v17576_v18 = vld [vmem:[#allocation16_spill] sm:$0xff]  ;;  %10369 = vmatmul.mubr.msk.f32.gmra.mrb[116].mxu0 %vm21_vm5, %v1226_v23 }
 0x20f   :  { %1140 = vst.msk [vmem:[#allocation2 + $0xe8] sm:$0xff] %vm21_vm5, %v1083_v2  ;;  %1141 = vst.msk [vmem:[#allocation2 + $0xf0] sm:$0xff] %vm21_vm5, %v1084_v14  ;;  %v975_v30 = vmul.f32 %v14262_v24, %v17575_v63  ;;  %v976_v40 = vmul.f32 %v14262_v24, %v17576_v18  ;;  %10703 = vmatmul.mubr.msk.f32.gmra.mrb[2].mxu1 %vm21_vm5, %v2261_v34  ;;  %v1033_v42 = vadd.f32 %v14280_v13, %v972_v12  ;;  %v17577_v43 = vld [vmem:[#allocation17_spill] sm:$0xff]  ;;  %v1227_v41 = vld [vmem:[#allocation2 + $0x11] sm:$0xff] }
 0x210   :  { %1142 = vst.msk [vmem:[#allocation2 + $0xf8] sm:$0xff] %vm21_vm5, %v1085_v22  ;;  %1143 = vst.msk [vmem:[#allocation2 + $0x100] sm:$0xff] %vm21_vm5, %v1086_v29  ;;  %v1034_v0 = vadd.f32 %v14280_v13, %v973_v48  ;;  %v1035_v58 = vadd.f32 %v14280_v13, %v974_v10  ;;  %10371 = vmatprep.mubr.msk.f32.mxu0 %vm13389_vm1, %v17568_v37  ;;  %10705 = vmatprep.mubr.msk.f32.mxu1 %vm13389_vm1, %v17568_v37  ;;  %v1088_v33 = vmax.f32 %v1031_v49, 0.0  ;;  %v2262_v6 = vld [vmem:[#allocation2 + $0x12] sm:$0xff]  ;;  %v17578_v7 = vld [vmem:[#allocation18_spill] sm:$0xff] }
 0x211   :  { %1144 = vst.msk [vmem:[#allocation2 + $0x108] sm:$0xff] %vm21_vm5, %v1087_v36  ;;  %1156 = vst.msk [vmem:[#allocation2 + $0x168] sm:$0xff] %vm21_vm5, %v1099_v9  ;;  %v1089_v61 = vmax.f32 %v1032_v5, 0.0  ;;  %v1036_v28 = vadd.f32 %v14280_v13, %v975_v30  ;;  %v1037_v53 = vadd.f32 %v14280_v13, %v976_v40  ;;  %12281 = vmatpush3.bf16.msra.mxu1 %v12280_v46  ;;  %v1090_v56 = vmax.f32 %v1033_v42, 0.0  ;;  %v17579_v47 = vld [vmem:[#allocation19_spill] sm:$0xff]  ;;  %v17580_v14 = vld [vmem:[#allocation20_spill] sm:$0xff] }
 0x212   :  { %1157 = vst.msk [vmem:[#allocation2 + $0x170] sm:$0xff] %vm21_vm5, %v1100_v50  ;;  %1158 = vst.msk [vmem:[#allocation2 + $0x178] sm:$0xff] %vm21_vm5, %v1101_v57  ;;  %v1091_v21 = vmax.f32 %v1034_v0, 0.0  ;;  %v1092_v45 = vmax.f32 %v1035_v58, 0.0  ;;  %v977_v20 = vmul.f32 %v14262_v24, %v17577_v43  ;;  %v978_v31 = vmul.f32 %v14262_v24, %v17578_v7  ;;  %12282 = vmatprep.subr.bf16.mxu1 %v17571_v32  ;;  %v1228_v57 = vld [vmem:[#allocation2 + $0x19] sm:$0xff]  ;;  %v1231_v44 = vld [vmem:[#allocation2 + $0x31] sm:$0xff] }
 0x213   :  { %1159 = vst.msk [vmem:[#allocation2 + $0x180] sm:$0xff] %vm21_vm5, %v1102_v19  ;;  %1160 = vst.msk [vmem:[#allocation2 + $0x188] sm:$0xff] %vm21_vm5, %v1103_v27  ;;  %v1093_v3 = vmax.f32 %v1036_v28, 0.0  ;;  %v1094_v39 = vmax.f32 %v1037_v53, 0.0  ;;  %v979_v62 = vmul.f32 %v14262_v24, %v17579_v47  ;;  %10372 = vmatmul.mubr.msk.f32.gmra.mrb[118].mxu0 %vm21_vm5, %v1227_v41  ;;  %10706 = vmatmul.mubr.msk.f32.gmra.mrb[4].mxu1 %vm21_vm5, %v2262_v6  ;;  %v2263_v1 = vld [vmem:[#allocation2 + $0x1a] sm:$0xff]  ;;  %v2264_v27 = vld [vmem:[#allocation2 + $0x22] sm:$0xff] }
 0x214   :  { %1161 = vst.msk [vmem:[#allocation2 + $0x190] sm:$0xff] %vm21_vm5, %v1104_v54  ;;  %1162 = vst.msk [vmem:[#allocation2 + $0x198] sm:$0xff] %vm21_vm5, %v1105_v35  ;;  %v1038_v2 = vadd.f32 %v14280_v13, %v977_v20  ;;  %v980_v22 = vmul.f32 %v14262_v24, %v17580_v14  ;;  %10374 = vmatprep.mubr.msk.f32.mxu0 %vm13389_vm1, %v17568_v37  ;;  %10708 = vmatprep.mubr.msk.f32.mxu1 %vm13389_vm1, %v17568_v37  ;;  %v1230_v54 = vld [vmem:[#allocation2 + $0x29] sm:$0xff]  ;;  %v2266_v52 = vld [vmem:[#allocation2 + $0x32] sm:$0xff] }
 0x215   :  { %1163 = vst.msk [vmem:[#allocation2 + $0x1a0] sm:$0xff] %vm21_vm5, %v1106_v60  ;;  %1164 = vst.msk [vmem:[#allocation2 + $0x1a8] sm:$0xff] %vm21_vm5, %v1107_v8  ;;  %v1039_v29 = vadd.f32 %v14280_v13, %v978_v31  ;;  %v1040_v36 = vadd.f32 %v14280_v13, %v979_v62  ;;  %v2265_v35 = vld [vmem:[#allocation2 + $0x2a] sm:$0xff]  ;;  %v1232_v60 = vld [vmem:[#allocation2 + $0x39] sm:$0xff] }
 0x216   :  { %1165 = vst.msk [vmem:[#allocation2 + $0x1b0] sm:$0xff] %vm21_vm5, %v1108_v17  ;;  %1166 = vst.msk [vmem:[#allocation2 + $0x1b8] sm:$0xff] %vm21_vm5, %v1109_v26  ;;  %v1095_v9 = vmax.f32 %v1038_v2, 0.0  ;;  %v1041_v50 = vadd.f32 %v14280_v13, %v980_v22  ;;  %v1229_v13 = vld [vmem:[#allocation2 + $0x21] sm:$0xff]  ;;  %v1234_v46 = vld [vmem:[#allocation2 + $0x49] sm:$0xff] }
 0x217   :  { %1145 = vst.msk [vmem:[#allocation2 + $0x110] sm:$0xff] %vm21_vm5, %v1088_v33  ;;  %1146 = vst.msk [vmem:[#allocation2 + $0x118] sm:$0xff] %vm21_vm5, %v1089_v61  ;;  %v1096_v24 = vmax.f32 %v1039_v29, 0.0  ;;  %v1097_v11 = vmax.f32 %v1040_v36, 0.0  ;;  %10375 = vmatmul.mubr.msk.f32.gmra.mrb[120].mxu0 %vm21_vm5, %v1228_v57  ;;  %10709 = vmatmul.mubr.msk.f32.gmra.mrb[6].mxu1 %vm21_vm5, %v2263_v1  ;;  %v2267_v8 = vld [vmem:[#allocation2 + $0x3a] sm:$0xff]  ;;  %v2268_v26 = vld [vmem:[#allocation2 + $0x42] sm:$0xff] }
 0x218   :  { %1147 = vst.msk [vmem:[#allocation2 + $0x120] sm:$0xff] %vm21_vm5, %v1090_v56  ;;  %1148 = vst.msk [vmem:[#allocation2 + $0x128] sm:$0xff] %vm21_vm5, %v1091_v21  ;;  %v1098_v19 = vmax.f32 %v1041_v50, 0.0  ;;  %10377 = vmatprep.mubr.msk.f32.mxu0 %vm13389_vm1, %v17568_v37  ;;  %10711 = vmatprep.mubr.msk.f32.mxu1 %vm13389_vm1, %v17568_v37  ;;  %v1233_v17 = vld [vmem:[#allocation2 + $0x41] sm:$0xff]  ;;  %v2269_v55 = vld [vmem:[#allocation2 + $0x4a] sm:$0xff] }
 0x219   :  { %1149 = vst.msk [vmem:[#allocation2 + $0x130] sm:$0xff] %vm21_vm5, %v1092_v45  ;;  %1150 = vst.msk [vmem:[#allocation2 + $0x138] sm:$0xff] %vm21_vm5, %v1093_v3  ;;  %v1235_v4 = vld [vmem:[#allocation2 + $0x51] sm:$0xff]  ;;  %v1236_v25 = vld [vmem:[#allocation2 + $0x59] sm:$0xff] }
 0x21a   :  { %1151 = vst.msk [vmem:[#allocation2 + $0x140] sm:$0xff] %vm21_vm5, %v1094_v39  ;;  %1152 = vst.msk [vmem:[#allocation2 + $0x148] sm:$0xff] %vm21_vm5, %v1095_v9  ;;  %v2270_v15 = vld [vmem:[#allocation2 + $0x52] sm:$0xff]  ;;  %v2271_v51 = vld [vmem:[#allocation2 + $0x5a] sm:$0xff] }
 0x21b   :  { %1153 = vst.msk [vmem:[#allocation2 + $0x150] sm:$0xff] %vm21_vm5, %v1096_v24  ;;  %1154 = vst.msk [vmem:[#allocation2 + $0x158] sm:$0xff] %vm21_vm5, %v1097_v11  ;;  %10378 = vmatmul.mubr.msk.f32.gmra.mrb[122].mxu0 %vm21_vm5, %v1229_v13  ;;  %10712 = vmatmul.mubr.msk.f32.gmra.mrb[8].mxu1 %vm21_vm5, %v2264_v27  ;;  %v1237_v12 = vld [vmem:[#allocation2 + $0x61] sm:$0xff]  ;;  %v1238_v48 = vld [vmem:[#allocation2 + $0x69] sm:$0xff] }
 0x21c   :  { %1155 = vst.msk [vmem:[#allocation2 + $0x160] sm:$0xff] %vm21_vm5, %v1098_v19  ;;  %10380 = vmatprep.mubr.msk.f32.mxu0 %vm13389_vm1, %v17568_v37  ;;  %10714 = vmatprep.mubr.msk.f32.mxu1 %vm13389_vm1, %v17568_v37  ;;  %v2272_v38 = vld [vmem:[#allocation2 + $0x62] sm:$0xff]  ;;  %v2273_v59 = vld [vmem:[#allocation2 + $0x6a] sm:$0xff]  ;;  %v2274_v23 = vld [vmem:[#allocation2 + $0x72] sm:$0xff] }
 0x21d   :  { %v1239_v10 = vld [vmem:[#allocation2 + $0x71] sm:$0xff]  ;;  %v1240_v34 = vld [vmem:[#allocation2 + $0x79] sm:$0xff]  ;;  %v1241_v5 = vld [vmem:[#allocation2 + $0x81] sm:$0xff] }
 0x21e   :  { %v2275_v49 = vld [vmem:[#allocation2 + $0x7a] sm:$0xff]  ;;  %v2276_v63 = vld [vmem:[#allocation2 + $0x82] sm:$0xff]  ;;  %v2277_v18 = vld [vmem:[#allocation2 + $0x8a] sm:$0xff] }
 0x21f   :  { %10381 = vmatmul.mubr.msk.f32.gmra.mrb[124].mxu0 %vm21_vm5, %v1230_v54  ;;  %10715 = vmatmul.mubr.msk.f32.gmra.mrb[10].mxu1 %vm21_vm5, %v2265_v35  ;;  %v1242_v30 = vld [vmem:[#allocation2 + $0x89] sm:$0xff]  ;;  %v1243_v40 = vld [vmem:[#allocation2 + $0x91] sm:$0xff]  ;;  %v1244_v0 = vld [vmem:[#allocation2 + $0x99] sm:$0xff] }
 0x220   :  { %10383 = vmatprep.mubr.msk.f32.mxu0 %vm13389_vm1, %v17568_v37  ;;  %10717 = vmatprep.mubr.msk.f32.mxu1 %vm13389_vm1, %v17568_v37  ;;  %v2278_v42 = vld [vmem:[#allocation2 + $0x92] sm:$0xff]  ;;  %v2279_v58 = vld [vmem:[#allocation2 + $0x9a] sm:$0xff]  ;;  %v1222_v61 = vld [vmem:[%s17519_s2 + $0x8] sm:$0xff] }
 0x221   :  { %v1221_v33 = vld [vmem:[%s17519_s2] sm:$0xff]  ;;  %v1223_v21 = vld [vmem:[%s17519_s2 + $0x10] sm:$0xff]  ;;  %v1224_v45 = vld [vmem:[%s17519_s2 + $0x18] sm:$0xff] }
 0x222   :  { %v12265_v28 = vpack.c.bf16 %v1222_v61, %v1221_v33  ;;  %v1245_v53 = vld [vmem:[#allocation2 + $0xa1] sm:$0xff]  ;;  %v12268_v43 = vpack.c.bf16 %v1224_v45, %v1223_v21  ;;  %v1246_v20 = vld [vmem:[#allocation2 + $0xa9] sm:$0xff]  ;;  %v1247_v6 = vld [vmem:[#allocation2 + $0xb1] sm:$0xff] }
 0x223   :  { %10384 = vmatmul.mubr.msk.f32.gmra.mrb[126].mxu0 %vm21_vm5, %v1231_v44  ;;  %10718 = vmatmul.mubr.msk.f32.gmra.mrb[12].mxu1 %vm21_vm5, %v2266_v52  ;;  %v2280_v56 = vld [vmem:[#allocation2 + $0xa2] sm:$0xff]  ;;  %v2281_v41 = vld [vmem:[#allocation2 + $0xaa] sm:$0xff]  ;;  %v2282_v3 = vld [vmem:[#allocation2 + $0xb2] sm:$0xff] }
 0x224   :  { %10386 = vmatprep.mubr.msk.f32.mxu0 %vm13389_vm1, %v17568_v37  ;;  %10720 = vmatprep.mubr.msk.f32.mxu1 %vm13389_vm1, %v17568_v37  ;;  %v1248_v39 = vld [vmem:[#allocation2 + $0xb9] sm:$0xff]  ;;  %v1249_v31 = vld [vmem:[#allocation2 + $0xc1] sm:$0xff]  ;;  %v1250_v62 = vld [vmem:[#allocation2 + $0xc9] sm:$0xff] }
 0x225   :  { %12266 = vmatpush3.bf16.msra.mxu0 %v12265_v28  ;;  %v2283_v7 = vld [vmem:[#allocation2 + $0xba] sm:$0xff]  ;;  %v2284_v47 = vld [vmem:[#allocation2 + $0xc2] sm:$0xff]  ;;  %v2285_v2 = vld [vmem:[#allocation2 + $0xca] sm:$0xff] }
 0x226   :  { %12267 = vmatprep.subr.bf16.mxu0 %v17571_v32  ;;  %v1251_v14 = vld [vmem:[#allocation2 + $0xd1] sm:$0xff]  ;;  %v1252_v29 = vld [vmem:[#allocation2 + $0xd9] sm:$0xff]  ;;  %v1253_v9 = vld [vmem:[#allocation2 + $0xe1] sm:$0xff] }
 0x227   :  { %10387 = vmatmul.mubr.msk.f32.gmra.mrb[128].mxu0 %vm21_vm5, %v1232_v60  ;;  %10721 = vmatmul.mubr.msk.f32.gmra.mrb[14].mxu1 %vm21_vm5, %v2267_v8  ;;  %v2286_v22 = vld [vmem:[#allocation2 + $0xd2] sm:$0xff]  ;;  %v2287_v36 = vld [vmem:[#allocation2 + $0xda] sm:$0xff]  ;;  %v2288_v50 = vld [vmem:[#allocation2 + $0xe2] sm:$0xff] }
 0x228   :  { %10389 = vmatprep.mubr.msk.f32.mxu0 %vm13389_vm1, %v17568_v37  ;;  %10723 = vmatprep.mubr.msk.f32.mxu1 %vm13389_vm1, %v17568_v37  ;;  %v1254_v57 = vld [vmem:[#allocation2 + $0xe9] sm:$0xff]  ;;  %v1255_v24 = vld [vmem:[#allocation2 + $0xf1] sm:$0xff]  ;;  %v1256_v19 = vld [vmem:[#allocation2 + $0xf9] sm:$0xff] }
 0x229   :  { %12269 = vmatpush3.bf16.msra.mxu0 %v12268_v43  ;;  %v2289_v1 = vld [vmem:[#allocation2 + $0xea] sm:$0xff]  ;;  %v2290_v11 = vld [vmem:[#allocation2 + $0xf2] sm:$0xff]  ;;  %v2291_v13 = vld [vmem:[#allocation2 + $0xfa] sm:$0xff] }
 0x22a   :  { %12306 = vmatprep.subr.bf16.mxu0 %v17571_v32  ;;  %v1257_v27 = vld [vmem:[#allocation2 + $0x101] sm:$0xff]  ;;  %v1258_v35 = vld [vmem:[#allocation2 + $0x109] sm:$0xff]  ;;  %v1259_v52 = vld [vmem:[#allocation2 + $0x111] sm:$0xff] }
 0x22b   :  { %10390 = vmatmul.mubr.msk.f32.gmra.mrb[130].mxu0 %vm21_vm5, %v1233_v17  ;;  %10724 = vmatmul.mubr.msk.f32.gmra.mrb[16].mxu1 %vm21_vm5, %v2268_v26  ;;  %v2292_v54 = vld [vmem:[#allocation2 + $0x102] sm:$0xff]  ;;  %v2293_v44 = vld [vmem:[#allocation2 + $0x10a] sm:$0xff]  ;;  %v2294_v60 = vld [vmem:[#allocation2 + $0x112] sm:$0xff] }
 0x22c   :  { %10392 = vmatprep.mubr.msk.f32.mxu0 %vm13389_vm1, %v17568_v37  ;;  %10726 = vmatprep.mubr.msk.f32.mxu1 %vm13389_vm1, %v17568_v37  ;;  %v1260_v8 = vld [vmem:[#allocation2 + $0x119] sm:$0xff]  ;;  %v1261_v26 = vld [vmem:[#allocation2 + $0x121] sm:$0xff]  ;;  %v1275_v21 = vld [vmem:[#allocation2 + $0x191] sm:$0xff] }
 0x22d   :  { %v2295_v17 = vld [vmem:[#allocation2 + $0x11a] sm:$0xff]  ;;  %v2308_v28 = vld [vmem:[#allocation2 + $0x182] sm:$0xff]  ;;  %v2310_v45 = vld [vmem:[#allocation2 + $0x192] sm:$0xff] }
 0x22e   :  { %v2307_v33 = vld [vmem:[#allocation2 + $0x17a] sm:$0xff] }
 0x22f   :  { %10393 = vmatmul.mubr.msk.f32.gmra.mrb[132].mxu0 %vm21_vm5, %v1234_v46  ;;  %10727 = vmatmul.mubr.msk.f32.gmra.mrb[18].mxu1 %vm21_vm5, %v2269_v55  ;;  %v2296_v46 = vld [vmem:[#allocation2 + $0x122] sm:$0xff]  ;;  %v1276_v43 = vld [vmem:[#allocation2 + $0x199] sm:$0xff] }
 0x230   :  { %10395 = vmatprep.mubr.msk.f32.mxu0 %vm13389_vm1, %v17568_v37  ;;  %10729 = vmatprep.mubr.msk.f32.mxu1 %vm13389_vm1, %v17568_v37  ;;  %v1262_v55 = vld [vmem:[#allocation2 + $0x129] sm:$0xff]  ;;  %v1273_v61 = vld [vmem:[#allocation2 + $0x181] sm:$0xff] }
 0x233   :  { %10396 = vmatmul.mubr.msk.f32.gmra.mrb[134].mxu0 %vm21_vm5, %v1235_v4  ;;  %10730 = vmatmul.mubr.msk.f32.gmra.mrb[20].mxu1 %vm21_vm5, %v2270_v15  ;;  %v2297_v4 = vld [vmem:[#allocation2 + $0x12a] sm:$0xff] }
 0x234   :  { %10398 = vmatprep.mubr.msk.f32.mxu0 %vm13389_vm1, %v17568_v37  ;;  %10732 = vmatprep.mubr.msk.f32.mxu1 %vm13389_vm1, %v17568_v37  ;;  %v1263_v15 = vld [vmem:[#allocation2 + $0x131] sm:$0xff] }
 0x237   :  { %10399 = vmatmul.mubr.msk.f32.gmra.mrb[136].mxu0 %vm21_vm5, %v1236_v25  ;;  %10733 = vmatmul.mubr.msk.f32.gmra.mrb[22].mxu1 %vm21_vm5, %v2271_v51  ;;  %v2298_v25 = vld [vmem:[#allocation2 + $0x132] sm:$0xff] }
 0x238   :  { %10401 = vmatprep.mubr.msk.f32.mxu0 %vm13389_vm1, %v17568_v37  ;;  %10735 = vmatprep.mubr.msk.f32.mxu1 %vm13389_vm1, %v17568_v37  ;;  %v1264_v51 = vld [vmem:[#allocation2 + $0x139] sm:$0xff] }
 0x23b   :  { %10402 = vmatmul.mubr.msk.f32.gmra.mrb[138].mxu0 %vm21_vm5, %v1237_v12  ;;  %10736 = vmatmul.mubr.msk.f32.gmra.mrb[24].mxu1 %vm21_vm5, %v2272_v38  ;;  %v2299_v12 = vld [vmem:[#allocation2 + $0x13a] sm:$0xff] }
 0x23c   :  { %10404 = vmatprep.mubr.msk.f32.mxu0 %vm13389_vm1, %v17568_v37  ;;  %10738 = vmatprep.mubr.msk.f32.mxu1 %vm13389_vm1, %v17568_v37  ;;  %v1265_v38 = vld [vmem:[#allocation2 + $0x141] sm:$0xff] }
 0x23f   :  { %10405 = vmatmul.mubr.msk.f32.gmra.mrb[140].mxu0 %vm21_vm5, %v1238_v48  ;;  %10739 = vmatmul.mubr.msk.f32.gmra.mrb[26].mxu1 %vm21_vm5, %v2273_v59  ;;  %v2300_v48 = vld [vmem:[#allocation2 + $0x142] sm:$0xff] }
 0x240   :  { %10407 = vmatprep.mubr.msk.f32.mxu0 %vm13389_vm1, %v17568_v37  ;;  %10741 = vmatprep.mubr.msk.f32.mxu1 %vm13389_vm1, %v17568_v37  ;;  %v1266_v59 = vld [vmem:[#allocation2 + $0x149] sm:$0xff] }
 0x243   :  { %10408 = vmatmul.mubr.msk.f32.gmra.mrb[142].mxu0 %vm21_vm5, %v1239_v10  ;;  %10742 = vmatmul.mubr.msk.f32.gmra.mrb[28].mxu1 %vm21_vm5, %v2274_v23  ;;  %v2301_v10 = vld [vmem:[#allocation2 + $0x14a] sm:$0xff] }
 0x244   :  { %10410 = vmatprep.mubr.msk.f32.mxu0 %vm13389_vm1, %v17568_v37  ;;  %10744 = vmatprep.mubr.msk.f32.mxu1 %vm13389_vm1, %v17568_v37  ;;  %v1267_v23 = vld [vmem:[#allocation2 + $0x151] sm:$0xff] }
 0x247   :  { %10411 = vmatmul.mubr.msk.f32.gmra.mrb[144].mxu0 %vm21_vm5, %v1240_v34  ;;  %10745 = vmatmul.mubr.msk.f32.gmra.mrb[30].mxu1 %vm21_vm5, %v2275_v49  ;;  %v2302_v34 = vld [vmem:[#allocation2 + $0x152] sm:$0xff] }
 0x248   :  { %10413 = vmatprep.mubr.msk.f32.mxu0 %vm13389_vm1, %v17568_v37  ;;  %10747 = vmatprep.mubr.msk.f32.mxu1 %vm13389_vm1, %v17568_v37  ;;  %v1268_v49 = vld [vmem:[#allocation2 + $0x159] sm:$0xff] }
 0x24b   :  { %10414 = vmatmul.mubr.msk.f32.gmra.mrb[146].mxu0 %vm21_vm5, %v1241_v5  ;;  %10748 = vmatmul.mubr.msk.f32.gmra.mrb[32].mxu1 %vm21_vm5, %v2276_v63  ;;  %v2303_v5 = vld [vmem:[#allocation2 + $0x15a] sm:$0xff] }
 0x24c   :  { %10416 = vmatprep.mubr.msk.f32.mxu0 %vm13389_vm1, %v17568_v37  ;;  %10750 = vmatprep.mubr.msk.f32.mxu1 %vm13389_vm1, %v17568_v37  ;;  %v1269_v63 = vld [vmem:[#allocation2 + $0x161] sm:$0xff] }
 0x24f   :  { %10417 = vmatmul.mubr.msk.f32.gmra.mrb[148].mxu0 %vm21_vm5, %v1242_v30  ;;  %10751 = vmatmul.mubr.msk.f32.gmra.mrb[34].mxu1 %vm21_vm5, %v2277_v18  ;;  %v2304_v30 = vld [vmem:[#allocation2 + $0x162] sm:$0xff] }
 0x250   :  { %10419 = vmatprep.mubr.msk.f32.mxu0 %vm13389_vm1, %v17568_v37  ;;  %10753 = vmatprep.mubr.msk.f32.mxu1 %vm13389_vm1, %v17568_v37  ;;  %v1270_v18 = vld [vmem:[#allocation2 + $0x169] sm:$0xff] }
 0x253   :  { %10420 = vmatmul.mubr.msk.f32.gmra.mrb[150].mxu0 %vm21_vm5, %v1243_v40  ;;  %10754 = vmatmul.mubr.msk.f32.gmra.mrb[36].mxu1 %vm21_vm5, %v2278_v42  ;;  %v2305_v40 = vld [vmem:[#allocation2 + $0x16a] sm:$0xff] }
 0x254   :  { %10422 = vmatprep.mubr.msk.f32.mxu0 %vm13389_vm1, %v17568_v37  ;;  %10756 = vmatprep.mubr.msk.f32.mxu1 %vm13389_vm1, %v17568_v37  ;;  %v1271_v42 = vld [vmem:[#allocation2 + $0x171] sm:$0xff] }
 0x257   :  { %10423 = vmatmul.mubr.msk.f32.gmra.mrb[152].mxu0 %vm21_vm5, %v1244_v0  ;;  %10757 = vmatmul.mubr.msk.f32.gmra.mrb[38].mxu1 %vm21_vm5, %v2279_v58  ;;  %v2306_v0 = vld [vmem:[#allocation2 + $0x172] sm:$0xff] }
 0x258   :  { %10425 = vmatprep.mubr.msk.f32.mxu0 %vm13389_vm1, %v17568_v37  ;;  %10759 = vmatprep.mubr.msk.f32.mxu1 %vm13389_vm1, %v17568_v37  ;;  %v1272_v58 = vld [vmem:[#allocation2 + $0x179] sm:$0xff] }
 0x25b   :  { %10426 = vmatmul.mubr.msk.f32.gmra.mrb[154].mxu0 %vm21_vm5, %v1245_v53  ;;  %10760 = vmatmul.mubr.msk.f32.gmra.mrb[40].mxu1 %vm21_vm5, %v2280_v56  ;;  %v1274_v53 = vld [vmem:[#allocation2 + $0x189] sm:$0xff] }
 0x25c   :  { %10428 = vmatprep.mubr.msk.f32.mxu0 %vm13389_vm1, %v17568_v37  ;;  %10762 = vmatprep.mubr.msk.f32.mxu1 %vm13389_vm1, %v17568_v37  ;;  %v2309_v56 = vld [vmem:[#allocation2 + $0x18a] sm:$0xff] }
 0x25f   :  { %10429 = vmatmul.mubr.msk.f32.gmra.mrb[156].mxu0 %vm21_vm5, %v1246_v20  ;;  %10763 = vmatmul.mubr.msk.f32.gmra.mrb[42].mxu1 %vm21_vm5, %v2281_v41  ;;  %v2311_v20 = vld [vmem:[#allocation2 + $0x19a] sm:$0xff] }
 0x260   :  { %10431 = vmatprep.mubr.msk.f32.mxu0 %vm13389_vm1, %v17568_v37  ;;  %10765 = vmatprep.mubr.msk.f32.mxu1 %vm13389_vm1, %v17568_v37  ;;  %v3511_v41 = vld [vmem:[%s17519_s2 + $0x80] sm:$0xff] }
 0x263   :  { %10432 = vmatmul.mubr.msk.f32.gmra.mrb[158].mxu0 %vm21_vm5, %v1247_v6  ;;  %10766 = vmatmul.mubr.msk.f32.gmra.mrb[44].mxu1 %vm21_vm5, %v2282_v3  ;;  %v3512_v6 = vld [vmem:[%s17519_s2 + $0x88] sm:$0xff] }
 0x264   :  { %10434 = vmatprep.mubr.msk.f32.mxu0 %vm13389_vm1, %v17568_v37  ;;  %10768 = vmatprep.mubr.msk.f32.mxu1 %vm13389_vm1, %v17568_v37  ;;  %v1277_v3 = vld [vmem:[#allocation2 + $0x1a1] sm:$0xff] }
 0x267   :  { %10435 = vmatmul.mubr.msk.f32.gmra.mrb[160].mxu0 %vm21_vm5, %v1248_v39  ;;  %10769 = vmatmul.mubr.msk.f32.gmra.mrb[46].mxu1 %vm21_vm5, %v2283_v7  ;;  %v2312_v39 = vld [vmem:[#allocation2 + $0x1a2] sm:$0xff]  ;;  %v12283_v7 = vpack.c.bf16 %v3512_v6, %v3511_v41 }
 0x268   :  { %10437 = vmatprep.mubr.msk.f32.mxu0 %vm13389_vm1, %v17568_v37  ;;  %10771 = vmatprep.mubr.msk.f32.mxu1 %vm13389_vm1, %v17568_v37  ;;  %v2882_v41 = vld [vmem:[#allocation2 + $0xc7] sm:$0xff] }
 0x269   :  { %v15203_v6 = vld [vmem:[#allocation2 + $0xc0] sm:$0xff] }
 0x26b   :  { %10438 = vmatmul.mubr.msk.f32.gmra.mrb[162].mxu0 %vm21_vm5, %v1249_v31  ;;  %10772 = vmatmul.mubr.msk.f32.gmra.mrb[48].mxu1 %vm21_vm5, %v2284_v47  ;;  %v1168_v31 = vld [vmem:[#allocation2] sm:$0xff]  ;;  %v2859_v47 = vld [vmem:[#allocation2 + $0xf] sm:$0xff] }
 0x26c   :  { %10440 = vmatprep.mubr.msk.f32.mxu0 %vm13389_vm1, %v17568_v37  ;;  %10774 = vmatprep.mubr.msk.f32.mxu1 %vm13389_vm1, %v17568_v37 }
 0x26f   :  { %10441 = vmatmul.mubr.msk.f32.gmra.mrb[164].mxu0 %vm21_vm5, %v1250_v62  ;;  %10775 = vmatmul.mubr.msk.f32.gmra.mrb[50].mxu1 %vm21_vm5, %v2285_v2  ;;  %v3513_v62 = vld [vmem:[%s17519_s2 + $0x90] sm:$0xff]  ;;  %v3514_v2 = vld [vmem:[%s17519_s2 + $0x98] sm:$0xff] }
 0x270   :  { %10443 = vmatprep.mubr.msk.f32.mxu0 %vm13389_vm1, %v17568_v37  ;;  %10777 = vmatprep.mubr.msk.f32.mxu1 %vm13389_vm1, %v17568_v37 }
 0x273   :  { %10444 = vmatmul.mubr.msk.f32.gmra.mrb[166].mxu0 %vm21_vm5, %v1251_v14  ;;  %10778 = vmatmul.mubr.msk.f32.gmra.mrb[52].mxu1 %vm21_vm5, %v2286_v22  ;;  %v12286_v14 = vpack.c.bf16 %v3514_v2, %v3513_v62  ;;  %v1169_v22 = vld [vmem:[#allocation2 + $0x8] sm:$0xff]  ;;  %v15230_v62 = vld [vmem:[#allocation2 + $0xd8] sm:$0xff] }
 0x274   :  { %10446 = vmatprep.mubr.msk.f32.mxu0 %vm13389_vm1, %v17568_v37  ;;  %10780 = vmatprep.mubr.msk.f32.mxu1 %vm13389_vm1, %v17568_v37  ;;  %v2886_v2 = vld [vmem:[#allocation2 + $0xe7] sm:$0xff] }
 0x277   :  { %10447 = vmatmul.mubr.msk.f32.gmra.mrb[168].mxu0 %vm21_vm5, %v1252_v29  ;;  %10781 = vmatmul.mubr.msk.f32.gmra.mrb[54].mxu1 %vm21_vm5, %v2287_v36  ;;  %v2860_v29 = vld [vmem:[#allocation2 + $0x17] sm:$0xff] }
 0x278   :  { %10449 = vmatprep.mubr.msk.f32.mxu0 %vm13389_vm1, %v17568_v37  ;;  %10783 = vmatprep.mubr.msk.f32.mxu1 %vm13389_vm1, %v17568_v37  ;;  %v14984_v36 = vld [vmem:[#allocation2 + $0x10] sm:$0xff] }
 0x27b   :  { %10450 = vmatmul.mubr.msk.f32.gmra.mrb[170].mxu0 %vm21_vm5, %v1253_v9  ;;  %10784 = vmatmul.mubr.msk.f32.gmra.mrb[56].mxu1 %vm21_vm5, %v2288_v50  ;;  %v2861_v9 = vld [vmem:[#allocation2 + $0x1f] sm:$0xff] }
 0x27c   :  { %10452 = vmatprep.mubr.msk.f32.mxu0 %vm13389_vm1, %v17568_v37  ;;  %10786 = vmatprep.mubr.msk.f32.mxu1 %vm13389_vm1, %v17568_v37  ;;  %v14994_v50 = vld [vmem:[#allocation2 + $0x18] sm:$0xff] }
 0x27f   :  { %10453 = vmatmul.mubr.msk.f32.gmra.mrb[172].mxu0 %vm21_vm5, %v1254_v57  ;;  %10787 = vmatmul.mubr.msk.f32.gmra.mrb[58].mxu1 %vm21_vm5, %v2289_v1  ;;  %v2862_v57 = vld [vmem:[#allocation2 + $0x27] sm:$0xff] }
 0x280   :  { %10455 = vmatprep.mubr.msk.f32.mxu0 %vm13389_vm1, %v17568_v37  ;;  %10789 = vmatprep.mubr.msk.f32.mxu1 %vm13389_vm1, %v17568_v37  ;;  %v15003_v1 = vld [vmem:[#allocation2 + $0x20] sm:$0xff] }
 0x283   :  { %10456 = vmatmul.mubr.msk.f32.gmra.mrb[174].mxu0 %vm21_vm5, %v1255_v24  ;;  %10790 = vmatmul.mubr.msk.f32.gmra.mrb[60].mxu1 %vm21_vm5, %v2290_v11  ;;  %v2863_v24 = vld [vmem:[#allocation2 + $0x2f] sm:$0xff] }
 0x284   :  { %10458 = vmatprep.mubr.msk.f32.mxu0 %vm13389_vm1, %v17568_v37  ;;  %10792 = vmatprep.mubr.msk.f32.mxu1 %vm13389_vm1, %v17568_v37  ;;  %v15012_v11 = vld [vmem:[#allocation2 + $0x28] sm:$0xff] }
 0x287   :  { %10459 = vmatmul.mubr.msk.f32.gmra.mrb[176].mxu0 %vm21_vm5, %v1256_v19  ;;  %10793 = vmatmul.mubr.msk.f32.gmra.mrb[62].mxu1 %vm21_vm5, %v2291_v13  ;;  %v2864_v19 = vld [vmem:[#allocation2 + $0x37] sm:$0xff] }
 0x288   :  { %10461 = vmatprep.mubr.msk.f32.mxu0 %vm13389_vm1, %v17568_v37  ;;  %10795 = vmatprep.mubr.msk.f32.mxu1 %vm13389_vm1, %v17568_v37  ;;  %v15021_v13 = vld [vmem:[#allocation2 + $0x30] sm:$0xff] }
 0x28b   :  { %10462 = vmatmul.mubr.msk.f32.gmra.mrb[178].mxu0 %vm21_vm5, %v1257_v27  ;;  %10796 = vmatmul.mubr.msk.f32.gmra.mrb[64].mxu1 %vm21_vm5, %v2292_v54  ;;  %v2865_v27 = vld [vmem:[#allocation2 + $0x3f] sm:$0xff] }
 0x28c   :  { %10464 = vmatprep.mubr.msk.f32.mxu0 %vm13389_vm1, %v17568_v37  ;;  %10798 = vmatprep.mubr.msk.f32.mxu1 %vm13389_vm1, %v17568_v37  ;;  %v15030_v54 = vld [vmem:[#allocation2 + $0x38] sm:$0xff] }
 0x28f   :  { %10465 = vmatmul.mubr.msk.f32.gmra.mrb[180].mxu0 %vm21_vm5, %v1258_v35  ;;  %10799 = vmatmul.mubr.msk.f32.gmra.mrb[66].mxu1 %vm21_vm5, %v2293_v44  ;;  %v2866_v35 = vld [vmem:[#allocation2 + $0x47] sm:$0xff] }
 0x290   :  { %10467 = vmatprep.mubr.msk.f32.mxu0 %vm13389_vm1, %v17568_v37  ;;  %10801 = vmatprep.mubr.msk.f32.mxu1 %vm13389_vm1, %v17568_v37  ;;  %v15039_v44 = vld [vmem:[#allocation2 + $0x40] sm:$0xff] }
 0x293   :  { %10468 = vmatmul.mubr.msk.f32.gmra.mrb[182].mxu0 %vm21_vm5, %v1259_v52  ;;  %10802 = vmatmul.mubr.msk.f32.gmra.mrb[68].mxu1 %vm21_vm5, %v2294_v60  ;;  %v2867_v52 = vld [vmem:[#allocation2 + $0x4f] sm:$0xff] }
 0x294   :  { %10470 = vmatprep.mubr.msk.f32.mxu0 %vm13389_vm1, %v17568_v37  ;;  %10804 = vmatprep.mubr.msk.f32.mxu1 %vm13389_vm1, %v17568_v37  ;;  %v15048_v60 = vld [vmem:[#allocation2 + $0x48] sm:$0xff] }
 0x297   :  { %10471 = vmatmul.mubr.msk.f32.gmra.mrb[184].mxu0 %vm21_vm5, %v1260_v8  ;;  %10805 = vmatmul.mubr.msk.f32.gmra.mrb[70].mxu1 %vm21_vm5, %v2295_v17  ;;  %v2868_v8 = vld [vmem:[#allocation2 + $0x57] sm:$0xff] }
 0x298   :  { %10473 = vmatprep.mubr.msk.f32.mxu0 %vm13389_vm1, %v17568_v37  ;;  %10807 = vmatprep.mubr.msk.f32.mxu1 %vm13389_vm1, %v17568_v37  ;;  %v15057_v17 = vld [vmem:[#allocation2 + $0x50] sm:$0xff] }
 0x29b   :  { %10474 = vmatmul.mubr.msk.f32.gmra.mrb[186].mxu0 %vm21_vm5, %v1261_v26  ;;  %10808 = vmatmul.mubr.msk.f32.gmra.mrb[72].mxu1 %vm21_vm5, %v2296_v46  ;;  %v2869_v26 = vld [vmem:[#allocation2 + $0x5f] sm:$0xff] }
 0x29c   :  { %10476 = vmatprep.mubr.msk.f32.mxu0 %vm13389_vm1, %v17568_v37  ;;  %10810 = vmatprep.mubr.msk.f32.mxu1 %vm13389_vm1, %v17568_v37  ;;  %v15066_v46 = vld [vmem:[#allocation2 + $0x58] sm:$0xff] }
 0x29f   :  { %10477 = vmatmul.mubr.msk.f32.gmra.mrb[188].mxu0 %vm21_vm5, %v1262_v55  ;;  %10811 = vmatmul.mubr.msk.f32.gmra.mrb[74].mxu1 %vm21_vm5, %v2297_v4  ;;  %v2870_v55 = vld [vmem:[#allocation2 + $0x67] sm:$0xff] }
 0x2a0   :  { %10479 = vmatprep.mubr.msk.f32.mxu0 %vm13389_vm1, %v17568_v37  ;;  %10813 = vmatprep.mubr.msk.f32.mxu1 %vm13389_vm1, %v17568_v37  ;;  %v15075_v4 = vld [vmem:[#allocation2 + $0x60] sm:$0xff] }
 0x2a3   :  { %10480 = vmatmul.mubr.msk.f32.gmra.mrb[190].mxu0 %vm21_vm5, %v1263_v15  ;;  %10814 = vmatmul.mubr.msk.f32.gmra.mrb[76].mxu1 %vm21_vm5, %v2298_v25  ;;  %v2871_v15 = vld [vmem:[#allocation2 + $0x6f] sm:$0xff] }
 0x2a4   :  { %10482 = vmatprep.mubr.msk.f32.mxu0 %vm13389_vm1, %v17568_v37  ;;  %10816 = vmatprep.mubr.msk.f32.mxu1 %vm13389_vm1, %v17568_v37  ;;  %v15084_v25 = vld [vmem:[#allocation2 + $0x68] sm:$0xff] }
 0x2a7   :  { %10483 = vmatmul.mubr.msk.f32.gmra.mrb[192].mxu0 %vm21_vm5, %v1264_v51  ;;  %10817 = vmatmul.mubr.msk.f32.gmra.mrb[78].mxu1 %vm21_vm5, %v2299_v12  ;;  %v2872_v51 = vld [vmem:[#allocation2 + $0x77] sm:$0xff] }
 0x2a8   :  { %10485 = vmatprep.mubr.msk.f32.mxu0 %vm13389_vm1, %v17568_v37  ;;  %10819 = vmatprep.mubr.msk.f32.mxu1 %vm13389_vm1, %v17568_v37  ;;  %v15093_v12 = vld [vmem:[#allocation2 + $0x70] sm:$0xff] }
 0x2ab   :  { %10486 = vmatmul.mubr.msk.f32.gmra.mrb[194].mxu0 %vm21_vm5, %v1265_v38  ;;  %10820 = vmatmul.mubr.msk.f32.gmra.mrb[80].mxu1 %vm21_vm5, %v2300_v48  ;;  %v2873_v38 = vld [vmem:[#allocation2 + $0x7f] sm:$0xff] }
 0x2ac   :  { %10488 = vmatprep.mubr.msk.f32.mxu0 %vm13389_vm1, %v17568_v37  ;;  %10822 = vmatprep.mubr.msk.f32.mxu1 %vm13389_vm1, %v17568_v37  ;;  %v15102_v48 = vld [vmem:[#allocation2 + $0x78] sm:$0xff] }
 0x2af   :  { %10489 = vmatmul.mubr.msk.f32.gmra.mrb[196].mxu0 %vm21_vm5, %v1266_v59  ;;  %10823 = vmatmul.mubr.msk.f32.gmra.mrb[82].mxu1 %vm21_vm5, %v2301_v10  ;;  %v2874_v59 = vld [vmem:[#allocation2 + $0x87] sm:$0xff] }
 0x2b0   :  { %10491 = vmatprep.mubr.msk.f32.mxu0 %vm13389_vm1, %v17568_v37  ;;  %10825 = vmatprep.mubr.msk.f32.mxu1 %vm13389_vm1, %v17568_v37  ;;  %v15111_v10 = vld [vmem:[#allocation2 + $0x80] sm:$0xff] }
 0x2b3   :  { %10492 = vmatmul.mubr.msk.f32.gmra.mrb[198].mxu0 %vm21_vm5, %v1267_v23  ;;  %10826 = vmatmul.mubr.msk.f32.gmra.mrb[84].mxu1 %vm21_vm5, %v2302_v34  ;;  %v2875_v23 = vld [vmem:[#allocation2 + $0x8f] sm:$0xff] }
 0x2b4   :  { %10494 = vmatprep.mubr.msk.f32.mxu0 %vm13389_vm1, %v17568_v37  ;;  %10828 = vmatprep.mubr.msk.f32.mxu1 %vm13389_vm1, %v17568_v37  ;;  %v15120_v34 = vld [vmem:[#allocation2 + $0x88] sm:$0xff] }
 0x2b7   :  { %10495 = vmatmul.mubr.msk.f32.gmra.mrb[200].mxu0 %vm21_vm5, %v1268_v49  ;;  %10829 = vmatmul.mubr.msk.f32.gmra.mrb[86].mxu1 %vm21_vm5, %v2303_v5  ;;  %v2876_v49 = vld [vmem:[#allocation2 + $0x97] sm:$0xff] }
 0x2b8   :  { %10497 = vmatprep.mubr.msk.f32.mxu0 %vm13389_vm1, %v17568_v37  ;;  %10831 = vmatprep.mubr.msk.f32.mxu1 %vm13389_vm1, %v17568_v37  ;;  %v15129_v5 = vld [vmem:[#allocation2 + $0x90] sm:$0xff] }
 0x2bb   :  { %10498 = vmatmul.mubr.msk.f32.gmra.mrb[202].mxu0 %vm21_vm5, %v1269_v63  ;;  %10832 = vmatmul.mubr.msk.f32.gmra.mrb[88].mxu1 %vm21_vm5, %v2304_v30  ;;  %v2877_v63 = vld [vmem:[#allocation2 + $0x9f] sm:$0xff] }
 0x2bc   :  { %10500 = vmatprep.mubr.msk.f32.mxu0 %vm13389_vm1, %v17568_v37  ;;  %10834 = vmatprep.mubr.msk.f32.mxu1 %vm13389_vm1, %v17568_v37  ;;  %v15138_v30 = vld [vmem:[#allocation2 + $0x98] sm:$0xff] }
 0x2bf   :  { %10501 = vmatmul.mubr.msk.f32.gmra.mrb[204].mxu0 %vm21_vm5, %v1270_v18  ;;  %10835 = vmatmul.mubr.msk.f32.gmra.mrb[90].mxu1 %vm21_vm5, %v2305_v40  ;;  %v2878_v18 = vld [vmem:[#allocation2 + $0xa7] sm:$0xff] }
 0x2c0   :  { %10503 = vmatprep.mubr.msk.f32.mxu0 %vm13389_vm1, %v17568_v37  ;;  %10837 = vmatprep.mubr.msk.f32.mxu1 %vm13389_vm1, %v17568_v37  ;;  %v5907_v40 = vld [vmem:[%s17519_s2 + $0x100] sm:$0xff] }
 0x2c3   :  { %10504 = vmatmul.mubr.msk.f32.gmra.mrb[206].mxu0 %vm21_vm5, %v1271_v42  ;;  %10838 = vmatmul.mubr.msk.f32.gmra.mrb[92].mxu1 %vm21_vm5, %v2306_v0  ;;  %v5908_v42 = vld [vmem:[%s17519_s2 + $0x108] sm:$0xff] }
 0x2c4   :  { %10506 = vmatprep.mubr.msk.f32.mxu0 %vm13389_vm1, %v17568_v37  ;;  %10840 = vmatprep.mubr.msk.f32.mxu1 %vm13389_vm1, %v17568_v37  ;;  %v15153_v0 = vpack.c.bf16 %v5908_v42, %v5907_v40  ;;  %v2897_v40 = vld [vmem:[#allocation2 + $0x13f] sm:$0xff] }
 0x2c5   :  { %v15338_v42 = vld [vmem:[#allocation2 + $0x138] sm:$0xff] }
 0x2c7   :  { %10507 = vmatmul.mubr.msk.f32.gmra.mrb[208].mxu0 %vm21_vm5, %v1272_v58  ;;  %10841 = vmatmul.mubr.msk.f32.gmra.mrb[94].mxu1 %vm21_vm5, %v2307_v33  ;;  %v15155_v58 = vld [vmem:[#allocation2 + $0xa0] sm:$0xff]  ;;  %v2879_v33 = vld [vmem:[#allocation2 + $0xaf] sm:$0xff] }
 0x2c8   :  { %10509 = vmatprep.mubr.msk.f32.mxu0 %vm13389_vm1, %v17568_v37  ;;  %10843 = vmatprep.mubr.msk.f32.mxu1 %vm13389_vm1, %v17568_v37 }
 0x2cb   :  { %10510 = vmatmul.mubr.msk.f32.gmra.mrb[210].mxu0 %vm21_vm5, %v1273_v61  ;;  %10844 = vmatmul.mubr.msk.f32.gmra.mrb[96].mxu1 %vm21_vm5, %v2308_v28  ;;  %v5909_v61 = vld [vmem:[%s17519_s2 + $0x110] sm:$0xff]  ;;  %v5910_v28 = vld [vmem:[%s17519_s2 + $0x118] sm:$0xff] }
 0x2cc   :  { %10512 = vmatprep.mubr.msk.f32.mxu0 %vm13389_vm1, %v17568_v37  ;;  %10846 = vmatprep.mubr.msk.f32.mxu1 %vm13389_vm1, %v17568_v37 }
 0x2cf   :  { %10513 = vmatmul.mubr.msk.f32.gmra.mrb[212].mxu0 %vm21_vm5, %v1274_v53  ;;  %10847 = vmatmul.mubr.msk.f32.gmra.mrb[98].mxu1 %vm21_vm5, %v2309_v56  ;;  %v15171_v53 = vpack.c.bf16 %v5910_v28, %v5909_v61  ;;  %v15174_v56 = vld [vmem:[#allocation2 + $0xa8] sm:$0xff]  ;;  %v15347_v61 = vld [vmem:[#allocation2 + $0x140] sm:$0xff] }
 0x2d0   :  { %10515 = vmatprep.mubr.msk.f32.mxu0 %vm13389_vm1, %v17568_v37  ;;  %10849 = vmatprep.mubr.msk.f32.mxu1 %vm13389_vm1, %v17568_v37  ;;  %v2899_v28 = vld [vmem:[#allocation2 + $0x14f] sm:$0xff] }
 0x2d3   :  { %10516 = vmatmul.mubr.msk.f32.gmra.mrb[214].mxu0 %vm21_vm5, %v1275_v21  ;;  %10850 = vmatmul.mubr.msk.f32.gmra.mrb[100].mxu1 %vm21_vm5, %v2310_v45  ;;  %v2880_v21 = vld [vmem:[#allocation2 + $0xb7] sm:$0xff] }
 0x2d4   :  { %10518 = vmatprep.mubr.msk.f32.mxu0 %vm13389_vm1, %v17568_v37  ;;  %10852 = vmatprep.mubr.msk.f32.mxu1 %vm13389_vm1, %v17568_v37  ;;  %v15185_v45 = vld [vmem:[#allocation2 + $0xb0] sm:$0xff] }
 0x2d7   :  { %10519 = vmatmul.mubr.msk.f32.gmra.mrb[216].mxu0 %vm21_vm5, %v1276_v43  ;;  %10853 = vmatmul.mubr.msk.f32.gmra.mrb[102].mxu1 %vm21_vm5, %v2311_v20  ;;  %v2881_v43 = vld [vmem:[#allocation2 + $0xbf] sm:$0xff] }
 0x2d8   :  { %10521 = vmatprep.mubr.msk.f32.mxu0 %vm13389_vm1, %v17568_v37  ;;  %10855 = vmatprep.mubr.msk.f32.mxu1 %vm13389_vm1, %v17568_v37  ;;  %v15194_v20 = vld [vmem:[#allocation2 + $0xb8] sm:$0xff] }
 0x2db   :  { %10522 = vmatmul.mubr.msk.f32.gmra.mrb[218].mxu0 %vm21_vm5, %v1277_v3  ;;  %10856 = vmatmul.mubr.msk.f32.gmra.mrb[104].mxu1 %vm21_vm5, %v2312_v39  ;;  %v2883_v3 = vld [vmem:[#allocation2 + $0xcf] sm:$0xff] }
 0x2dc   :  { %10532 = vmatprep.mubr.msk.f32.mxu0 %vm13389_vm1, %v17568_v37  ;;  %10866 = vmatprep.mubr.msk.f32.mxu1 %vm13389_vm1, %v17568_v37  ;;  %v15212_v39 = vld [vmem:[#allocation2 + $0xc8] sm:$0xff] }
 0x2df   :  { %10533 = vmatmul.mubr.msk.f32.vlgmr.msra.gmra.mrb[114].mxu0 %vm21_vm5, %v1168_v31  ;;  %10867 = vmatmul.mubr.msk.f32.vlgmr.msra.gmra.mrb[0].mxu1 %vm21_vm5, %v2859_v47  ;;  %v15221_v31 = vld [vmem:[#allocation2 + $0xd0] sm:$0xff]  ;;  %v2885_v47 = vld [vmem:[#allocation2 + $0xdf] sm:$0xff] }
 0x2e0   :  { %12284 = vmatpush3.bf16.msra.mxu1 %v12283_v7  ;;  %10535 = vmatprep.mubr.msk.f32.mxu0 %vm13389_vm1, %v17568_v37  ;;  %v2884_v7 = vld [vmem:[#allocation2 + $0xd7] sm:$0xff] }
 0x2e1   :  { %10869 = vmatprep.mubr.msk.f32.mxu1 %vm13389_vm1, %v17568_v37  ;;  %12285 = vmatprep.subr.bf16.mxu1 %v17571_v32 }
 0x2e2   :  { %12308 = vmatpush3.bf16.msra.mxu0 %v15153_v0 }
 0x2e3   :  { %10536 = vmatmul.mubr.msk.f32.gmra.mrb[116].mxu0 %vm21_vm5, %v1169_v22  ;;  %10870 = vmatmul.mubr.msk.f32.gmra.mrb[2].mxu1 %vm21_vm5, %v2860_v29  ;;  %v2887_v22 = vld [vmem:[#allocation2 + $0xef] sm:$0xff] }
 0x2e4   :  { %10538 = vmatprep.mubr.msk.f32.mxu0 %vm13389_vm1, %v17568_v37  ;;  %10872 = vmatprep.mubr.msk.f32.mxu1 %vm13389_vm1, %v17568_v37  ;;  %v15248_v29 = vld [vmem:[#allocation2 + $0xe8] sm:$0xff] }
 0x2e5   :  { %12287 = vmatpush3.bf16.msra.mxu1 %v12286_v14  ;;  %12309 = vmatprep.subr.bf16.mxu0 %v17571_v32  ;;  %v15239_v14 = vld [vmem:[#allocation2 + $0xe0] sm:$0xff] }
 0x2e6   :  { %12288 = vmatprep.subr.bf16.mxu1 %v17571_v32  ;;  %12311 = vmatpush3.bf16.msra.mxu0 %v15171_v53 }
 0x2e7   :  { %10539 = vmatmul.mubr.msk.f32.gmra.mrb[118].mxu0 %vm21_vm5, %v14984_v36  ;;  %10873 = vmatmul.mubr.msk.f32.gmra.mrb[4].mxu1 %vm21_vm5, %v2861_v9  ;;  %v2888_v9 = vld [vmem:[#allocation2 + $0xf7] sm:$0xff] }
 0x2e8   :  { %10541 = vmatprep.mubr.msk.f32.mxu0 %vm13389_vm1, %v17568_v37  ;;  %10875 = vmatprep.mubr.msk.f32.mxu1 %vm13389_vm1, %v17568_v37 }
 0x2e9   :  { %12312 = vmatprep.subr.bf16.mxu0 %v17571_v32 }
 0x2eb   :  { %10542 = vmatmul.mubr.msk.f32.gmra.mrb[120].mxu0 %vm21_vm5, %v14994_v50  ;;  %10876 = vmatmul.mubr.msk.f32.gmra.mrb[6].mxu1 %vm21_vm5, %v2862_v57  ;;  %v15257_v57 = vld [vmem:[#allocation2 + $0xf0] sm:$0xff] }
 0x2ec   :  { %10544 = vmatprep.mubr.msk.f32.mxu0 %vm13389_vm1, %v17568_v37  ;;  %10878 = vmatprep.mubr.msk.f32.mxu1 %vm13389_vm1, %v17568_v37 }
 0x2ef   :  { %10545 = vmatmul.mubr.msk.f32.gmra.mrb[122].mxu0 %vm21_vm5, %v15003_v1  ;;  %10879 = vmatmul.mubr.msk.f32.gmra.mrb[8].mxu1 %vm21_vm5, %v2863_v24  ;;  %v2889_v24 = vld [vmem:[#allocation2 + $0xff] sm:$0xff] }
 0x2f0   :  { %10547 = vmatprep.mubr.msk.f32.mxu0 %vm13389_vm1, %v17568_v37  ;;  %10881 = vmatprep.mubr.msk.f32.mxu1 %vm13389_vm1, %v17568_v37 }
 0x2f3   :  { %10548 = vmatmul.mubr.msk.f32.gmra.mrb[124].mxu0 %vm21_vm5, %v15012_v11  ;;  %10882 = vmatmul.mubr.msk.f32.gmra.mrb[10].mxu1 %vm21_vm5, %v2864_v19  ;;  %v15266_v19 = vld [vmem:[#allocation2 + $0xf8] sm:$0xff] }
 0x2f4   :  { %10550 = vmatprep.mubr.msk.f32.mxu0 %vm13389_vm1, %v17568_v37  ;;  %10884 = vmatprep.mubr.msk.f32.mxu1 %vm13389_vm1, %v17568_v37 }
 0x2f7   :  { %10551 = vmatmul.mubr.msk.f32.gmra.mrb[126].mxu0 %vm21_vm5, %v15021_v13  ;;  %10885 = vmatmul.mubr.msk.f32.gmra.mrb[12].mxu1 %vm21_vm5, %v2865_v27  ;;  %v2890_v27 = vld [vmem:[#allocation2 + $0x107] sm:$0xff] }
 0x2f8   :  { %10553 = vmatprep.mubr.msk.f32.mxu0 %vm13389_vm1, %v17568_v37  ;;  %10887 = vmatprep.mubr.msk.f32.mxu1 %vm13389_vm1, %v17568_v37 }
 0x2fb   :  { %10554 = vmatmul.mubr.msk.f32.gmra.mrb[128].mxu0 %vm21_vm5, %v15030_v54  ;;  %10888 = vmatmul.mubr.msk.f32.gmra.mrb[14].mxu1 %vm21_vm5, %v2866_v35  ;;  %v15275_v35 = vld [vmem:[#allocation2 + $0x100] sm:$0xff] }
 0x2fc   :  { %10556 = vmatprep.mubr.msk.f32.mxu0 %vm13389_vm1, %v17568_v37  ;;  %10890 = vmatprep.mubr.msk.f32.mxu1 %vm13389_vm1, %v17568_v37 }
 0x2ff   :  { %10557 = vmatmul.mubr.msk.f32.gmra.mrb[130].mxu0 %vm21_vm5, %v15039_v44  ;;  %10891 = vmatmul.mubr.msk.f32.gmra.mrb[16].mxu1 %vm21_vm5, %v2867_v52  ;;  %v2891_v52 = vld [vmem:[#allocation2 + $0x10f] sm:$0xff] }
 0x300   :  { %10559 = vmatprep.mubr.msk.f32.mxu0 %vm13389_vm1, %v17568_v37  ;;  %10893 = vmatprep.mubr.msk.f32.mxu1 %vm13389_vm1, %v17568_v37 }
 0x303   :  { %10560 = vmatmul.mubr.msk.f32.gmra.mrb[132].mxu0 %vm21_vm5, %v15048_v60  ;;  %10894 = vmatmul.mubr.msk.f32.gmra.mrb[18].mxu1 %vm21_vm5, %v2868_v8  ;;  %v15284_v8 = vld [vmem:[#allocation2 + $0x108] sm:$0xff] }
 0x304   :  { %10562 = vmatprep.mubr.msk.f32.mxu0 %vm13389_vm1, %v17568_v37  ;;  %10896 = vmatprep.mubr.msk.f32.mxu1 %vm13389_vm1, %v17568_v37 }
 0x307   :  { %10563 = vmatmul.mubr.msk.f32.gmra.mrb[134].mxu0 %vm21_vm5, %v15057_v17  ;;  %10897 = vmatmul.mubr.msk.f32.gmra.mrb[20].mxu1 %vm21_vm5, %v2869_v26  ;;  %v2892_v26 = vld [vmem:[#allocation2 + $0x117] sm:$0xff] }
 0x308   :  { %10565 = vmatprep.mubr.msk.f32.mxu0 %vm13389_vm1, %v17568_v37  ;;  %10899 = vmatprep.mubr.msk.f32.mxu1 %vm13389_vm1, %v17568_v37 }
 0x30b   :  { %10566 = vmatmul.mubr.msk.f32.gmra.mrb[136].mxu0 %vm21_vm5, %v15066_v46  ;;  %10900 = vmatmul.mubr.msk.f32.gmra.mrb[22].mxu1 %vm21_vm5, %v2870_v55  ;;  %v15293_v55 = vld [vmem:[#allocation2 + $0x110] sm:$0xff] }
 0x30c   :  { %10568 = vmatprep.mubr.msk.f32.mxu0 %vm13389_vm1, %v17568_v37  ;;  %10902 = vmatprep.mubr.msk.f32.mxu1 %vm13389_vm1, %v17568_v37 }
 0x30f   :  { %10569 = vmatmul.mubr.msk.f32.gmra.mrb[138].mxu0 %vm21_vm5, %v15075_v4  ;;  %10903 = vmatmul.mubr.msk.f32.gmra.mrb[24].mxu1 %vm21_vm5, %v2871_v15  ;;  %v2893_v15 = vld [vmem:[#allocation2 + $0x11f] sm:$0xff] }
 0x310   :  { %10571 = vmatprep.mubr.msk.f32.mxu0 %vm13389_vm1, %v17568_v37  ;;  %10905 = vmatprep.mubr.msk.f32.mxu1 %vm13389_vm1, %v17568_v37 }
 0x313   :  { %10572 = vmatmul.mubr.msk.f32.gmra.mrb[140].mxu0 %vm21_vm5, %v15084_v25  ;;  %10906 = vmatmul.mubr.msk.f32.gmra.mrb[26].mxu1 %vm21_vm5, %v2872_v51  ;;  %v15302_v51 = vld [vmem:[#allocation2 + $0x118] sm:$0xff] }
 0x314   :  { %10574 = vmatprep.mubr.msk.f32.mxu0 %vm13389_vm1, %v17568_v37  ;;  %10908 = vmatprep.mubr.msk.f32.mxu1 %vm13389_vm1, %v17568_v37 }
 0x317   :  { %10575 = vmatmul.mubr.msk.f32.gmra.mrb[142].mxu0 %vm21_vm5, %v15093_v12  ;;  %10909 = vmatmul.mubr.msk.f32.gmra.mrb[28].mxu1 %vm21_vm5, %v2873_v38  ;;  %v2894_v38 = vld [vmem:[#allocation2 + $0x127] sm:$0xff] }
 0x318   :  { %10577 = vmatprep.mubr.msk.f32.mxu0 %vm13389_vm1, %v17568_v37  ;;  %10911 = vmatprep.mubr.msk.f32.mxu1 %vm13389_vm1, %v17568_v37 }
 0x31b   :  { %10578 = vmatmul.mubr.msk.f32.gmra.mrb[144].mxu0 %vm21_vm5, %v15102_v48  ;;  %10912 = vmatmul.mubr.msk.f32.gmra.mrb[30].mxu1 %vm21_vm5, %v2874_v59  ;;  %v15311_v59 = vld [vmem:[#allocation2 + $0x120] sm:$0xff] }
 0x31c   :  { %10580 = vmatprep.mubr.msk.f32.mxu0 %vm13389_vm1, %v17568_v37  ;;  %10914 = vmatprep.mubr.msk.f32.mxu1 %vm13389_vm1, %v17568_v37 }
 0x31f   :  { %10581 = vmatmul.mubr.msk.f32.gmra.mrb[146].mxu0 %vm21_vm5, %v15111_v10  ;;  %10915 = vmatmul.mubr.msk.f32.gmra.mrb[32].mxu1 %vm21_vm5, %v2875_v23  ;;  %v2895_v23 = vld [vmem:[#allocation2 + $0x12f] sm:$0xff] }
 0x320   :  { %10583 = vmatprep.mubr.msk.f32.mxu0 %vm13389_vm1, %v17568_v37  ;;  %10917 = vmatprep.mubr.msk.f32.mxu1 %vm13389_vm1, %v17568_v37 }
 0x323   :  { %10584 = vmatmul.mubr.msk.f32.gmra.mrb[148].mxu0 %vm21_vm5, %v15120_v34  ;;  %10918 = vmatmul.mubr.msk.f32.gmra.mrb[34].mxu1 %vm21_vm5, %v2876_v49  ;;  %v15320_v49 = vld [vmem:[#allocation2 + $0x128] sm:$0xff] }
 0x324   :  { %10586 = vmatprep.mubr.msk.f32.mxu0 %vm13389_vm1, %v17568_v37  ;;  %10920 = vmatprep.mubr.msk.f32.mxu1 %vm13389_vm1, %v17568_v37 }
 0x327   :  { %10587 = vmatmul.mubr.msk.f32.gmra.mrb[150].mxu0 %vm21_vm5, %v15129_v5  ;;  %10921 = vmatmul.mubr.msk.f32.gmra.mrb[36].mxu1 %vm21_vm5, %v2877_v63  ;;  %v2896_v63 = vld [vmem:[#allocation2 + $0x137] sm:$0xff] }
 0x328   :  { %10589 = vmatprep.mubr.msk.f32.mxu0 %vm13389_vm1, %v17568_v37  ;;  %10923 = vmatprep.mubr.msk.f32.mxu1 %vm13389_vm1, %v17568_v37 }
 0x32b   :  { %10590 = vmatmul.mubr.msk.f32.gmra.mrb[152].mxu0 %vm21_vm5, %v15138_v30  ;;  %10924 = vmatmul.mubr.msk.f32.gmra.mrb[38].mxu1 %vm21_vm5, %v2878_v18  ;;  %v15329_v18 = vld [vmem:[#allocation2 + $0x130] sm:$0xff] }
 0x32c   :  { %10592 = vmatprep.mubr.msk.f32.mxu0 %vm13389_vm1, %v17568_v37  ;;  %10926 = vmatprep.mubr.msk.f32.mxu1 %vm13389_vm1, %v17568_v37 }
 0x32f   :  { %10593 = vmatmul.mubr.msk.f32.gmra.mrb[154].mxu0 %vm21_vm5, %v15155_v58  ;;  %10927 = vmatmul.mubr.msk.f32.gmra.mrb[40].mxu1 %vm21_vm5, %v2879_v33  ;;  %v2898_v33 = vld [vmem:[#allocation2 + $0x147] sm:$0xff] }
 0x330   :  { %10595 = vmatprep.mubr.msk.f32.mxu0 %vm13389_vm1, %v17568_v37  ;;  %10929 = vmatprep.mubr.msk.f32.mxu1 %vm13389_vm1, %v17568_v37 }
 0x333   :  { %10596 = vmatmul.mubr.msk.f32.gmra.mrb[156].mxu0 %vm21_vm5, %v15174_v56  ;;  %10930 = vmatmul.mubr.msk.f32.gmra.mrb[42].mxu1 %vm21_vm5, %v2880_v21  ;;  %v15356_v21 = vld [vmem:[#allocation2 + $0x148] sm:$0xff] }
 0x334   :  { %10598 = vmatprep.mubr.msk.f32.mxu0 %vm13389_vm1, %v17568_v37  ;;  %10932 = vmatprep.mubr.msk.f32.mxu1 %vm13389_vm1, %v17568_v37 }
 0x337   :  { %10599 = vmatmul.mubr.msk.f32.gmra.mrb[158].mxu0 %vm21_vm5, %v15185_v45  ;;  %10933 = vmatmul.mubr.msk.f32.gmra.mrb[44].mxu1 %vm21_vm5, %v2881_v43  ;;  %v2900_v43 = vld [vmem:[#allocation2 + $0x157] sm:$0xff] }
 0x338   :  { %10601 = vmatprep.mubr.msk.f32.mxu0 %vm13389_vm1, %v17568_v37  ;;  %10935 = vmatprep.mubr.msk.f32.mxu1 %vm13389_vm1, %v17568_v37 }
 0x33b   :  { %10602 = vmatmul.mubr.msk.f32.gmra.mrb[160].mxu0 %vm21_vm5, %v15194_v20  ;;  %10936 = vmatmul.mubr.msk.f32.gmra.mrb[46].mxu1 %vm21_vm5, %v2882_v41  ;;  %v15365_v41 = vld [vmem:[#allocation2 + $0x150] sm:$0xff] }
 0x33c   :  { %10604 = vmatprep.mubr.msk.f32.mxu0 %vm13389_vm1, %v17568_v37  ;;  %10938 = vmatprep.mubr.msk.f32.mxu1 %vm13389_vm1, %v17568_v37 }
 0x33f   :  { %10605 = vmatmul.mubr.msk.f32.gmra.mrb[162].mxu0 %vm21_vm5, %v15203_v6  ;;  %10939 = vmatmul.mubr.msk.f32.gmra.mrb[48].mxu1 %vm21_vm5, %v2883_v3  ;;  %v2901_v3 = vld [vmem:[#allocation2 + $0x15f] sm:$0xff] }
 0x340   :  { %10607 = vmatprep.mubr.msk.f32.mxu0 %vm13389_vm1, %v17568_v37  ;;  %10941 = vmatprep.mubr.msk.f32.mxu1 %vm13389_vm1, %v17568_v37 }
 0x343   :  { %10608 = vmatmul.mubr.msk.f32.gmra.mrb[164].mxu0 %vm21_vm5, %v15212_v39  ;;  %10942 = vmatmul.mubr.msk.f32.gmra.mrb[50].mxu1 %vm21_vm5, %v2884_v7  ;;  %v15374_v7 = vld [vmem:[#allocation2 + $0x158] sm:$0xff] }
 0x344   :  { %10610 = vmatprep.mubr.msk.f32.mxu0 %vm13389_vm1, %v17568_v37  ;;  %10944 = vmatprep.mubr.msk.f32.mxu1 %vm13389_vm1, %v17568_v37 }
 0x347   :  { %10611 = vmatmul.mubr.msk.f32.gmra.mrb[166].mxu0 %vm21_vm5, %v15221_v31  ;;  %10945 = vmatmul.mubr.msk.f32.gmra.mrb[52].mxu1 %vm21_vm5, %v2885_v47  ;;  %v2902_v47 = vld [vmem:[#allocation2 + $0x167] sm:$0xff] }
 0x348   :  { %10613 = vmatprep.mubr.msk.f32.mxu0 %vm13389_vm1, %v17568_v37  ;;  %10947 = vmatprep.mubr.msk.f32.mxu1 %vm13389_vm1, %v17568_v37 }
 0x34b   :  { %10614 = vmatmul.mubr.msk.f32.gmra.mrb[168].mxu0 %vm21_vm5, %v15230_v62  ;;  %10948 = vmatmul.mubr.msk.f32.gmra.mrb[54].mxu1 %vm21_vm5, %v2886_v2  ;;  %v15383_v2 = vld [vmem:[#allocation2 + $0x160] sm:$0xff] }
 0x34c   :  { %10616 = vmatprep.mubr.msk.f32.mxu0 %vm13389_vm1, %v17568_v37  ;;  %10950 = vmatprep.mubr.msk.f32.mxu1 %vm13389_vm1, %v17568_v37 }
 0x34f   :  { %10617 = vmatmul.mubr.msk.f32.gmra.mrb[170].mxu0 %vm21_vm5, %v15239_v14  ;;  %10951 = vmatmul.mubr.msk.f32.gmra.mrb[56].mxu1 %vm21_vm5, %v2887_v22  ;;  %v2903_v22 = vld [vmem:[#allocation2 + $0x16f] sm:$0xff] }
 0x350   :  { %10619 = vmatprep.mubr.msk.f32.mxu0 %vm13389_vm1, %v17568_v37  ;;  %10953 = vmatprep.mubr.msk.f32.mxu1 %vm13389_vm1, %v17568_v37 }
 0x353   :  { %10620 = vmatmul.mubr.msk.f32.gmra.mrb[172].mxu0 %vm21_vm5, %v15248_v29  ;;  %10954 = vmatmul.mubr.msk.f32.gmra.mrb[58].mxu1 %vm21_vm5, %v2888_v9  ;;  %v15392_v9 = vld [vmem:[#allocation2 + $0x168] sm:$0xff] }
 0x354   :  { %10622 = vmatprep.mubr.msk.f32.mxu0 %vm13389_vm1, %v17568_v37  ;;  %10956 = vmatprep.mubr.msk.f32.mxu1 %vm13389_vm1, %v17568_v37 }
 0x357   :  { %10623 = vmatmul.mubr.msk.f32.gmra.mrb[174].mxu0 %vm21_vm5, %v15257_v57  ;;  %10957 = vmatmul.mubr.msk.f32.gmra.mrb[60].mxu1 %vm21_vm5, %v2889_v24  ;;  %v2904_v24 = vld [vmem:[#allocation2 + $0x177] sm:$0xff] }
 0x358   :  { %10625 = vmatprep.mubr.msk.f32.mxu0 %vm13389_vm1, %v17568_v37  ;;  %10959 = vmatprep.mubr.msk.f32.mxu1 %vm13389_vm1, %v17568_v37 }
 0x35b   :  { %10626 = vmatmul.mubr.msk.f32.gmra.mrb[176].mxu0 %vm21_vm5, %v15266_v19  ;;  %10960 = vmatmul.mubr.msk.f32.gmra.mrb[62].mxu1 %vm21_vm5, %v2890_v27  ;;  %v15401_v27 = vld [vmem:[#allocation2 + $0x170] sm:$0xff] }
 0x35c   :  { %10628 = vmatprep.mubr.msk.f32.mxu0 %vm13389_vm1, %v17568_v37  ;;  %10962 = vmatprep.mubr.msk.f32.mxu1 %vm13389_vm1, %v17568_v37 }
 0x35f   :  { %10629 = vmatmul.mubr.msk.f32.gmra.mrb[178].mxu0 %vm21_vm5, %v15275_v35  ;;  %10963 = vmatmul.mubr.msk.f32.gmra.mrb[64].mxu1 %vm21_vm5, %v2891_v52  ;;  %v2905_v52 = vld [vmem:[#allocation2 + $0x17f] sm:$0xff] }
 0x360   :  { %10631 = vmatprep.mubr.msk.f32.mxu0 %vm13389_vm1, %v17568_v37  ;;  %10965 = vmatprep.mubr.msk.f32.mxu1 %vm13389_vm1, %v17568_v37 }
 0x363   :  { %10632 = vmatmul.mubr.msk.f32.gmra.mrb[180].mxu0 %vm21_vm5, %v15284_v8  ;;  %10966 = vmatmul.mubr.msk.f32.gmra.mrb[66].mxu1 %vm21_vm5, %v2892_v26  ;;  %v15410_v26 = vld [vmem:[#allocation2 + $0x178] sm:$0xff] }
 0x364   :  { %10634 = vmatprep.mubr.msk.f32.mxu0 %vm13389_vm1, %v17568_v37  ;;  %10968 = vmatprep.mubr.msk.f32.mxu1 %vm13389_vm1, %v17568_v37 }
 0x367   :  { %10635 = vmatmul.mubr.msk.f32.gmra.mrb[182].mxu0 %vm21_vm5, %v15293_v55  ;;  %10969 = vmatmul.mubr.msk.f32.gmra.mrb[68].mxu1 %vm21_vm5, %v2893_v15  ;;  %v2906_v15 = vld [vmem:[#allocation2 + $0x187] sm:$0xff] }
 0x368   :  { %10637 = vmatprep.mubr.msk.f32.mxu0 %vm13389_vm1, %v17568_v37  ;;  %10971 = vmatprep.mubr.msk.f32.mxu1 %vm13389_vm1, %v17568_v37 }
 0x36b   :  { %10638 = vmatmul.mubr.msk.f32.gmra.mrb[184].mxu0 %vm21_vm5, %v15302_v51  ;;  %10972 = vmatmul.mubr.msk.f32.gmra.mrb[70].mxu1 %vm21_vm5, %v2894_v38  ;;  %v15419_v38 = vld [vmem:[#allocation2 + $0x180] sm:$0xff] }
 0x36c   :  { %10640 = vmatprep.mubr.msk.f32.mxu0 %vm13389_vm1, %v17568_v37  ;;  %10974 = vmatprep.mubr.msk.f32.mxu1 %vm13389_vm1, %v17568_v37 }
 0x36f   :  { %10641 = vmatmul.mubr.msk.f32.gmra.mrb[186].mxu0 %vm21_vm5, %v15311_v59  ;;  %10975 = vmatmul.mubr.msk.f32.gmra.mrb[72].mxu1 %vm21_vm5, %v2895_v23  ;;  %v2907_v23 = vld [vmem:[#allocation2 + $0x18f] sm:$0xff] }
 0x370   :  { %10643 = vmatprep.mubr.msk.f32.mxu0 %vm13389_vm1, %v17568_v37  ;;  %10977 = vmatprep.mubr.msk.f32.mxu1 %vm13389_vm1, %v17568_v37 }
 0x373   :  { %10644 = vmatmul.mubr.msk.f32.gmra.mrb[188].mxu0 %vm21_vm5, %v15320_v49  ;;  %10978 = vmatmul.mubr.msk.f32.gmra.mrb[74].mxu1 %vm21_vm5, %v2896_v63  ;;  %v15428_v63 = vld [vmem:[#allocation2 + $0x188] sm:$0xff] }
 0x374   :  { %10646 = vmatprep.mubr.msk.f32.mxu0 %vm13389_vm1, %v17568_v37  ;;  %10980 = vmatprep.mubr.msk.f32.mxu1 %vm13389_vm1, %v17568_v37 }
 0x377   :  { %10647 = vmatmul.mubr.msk.f32.gmra.mrb[190].mxu0 %vm21_vm5, %v15329_v18  ;;  %10981 = vmatmul.mubr.msk.f32.gmra.mrb[76].mxu1 %vm21_vm5, %v2897_v40  ;;  %v2908_v40 = vld [vmem:[#allocation2 + $0x197] sm:$0xff] }
 0x378   :  { %10649 = vmatprep.mubr.msk.f32.mxu0 %vm13389_vm1, %v17568_v37  ;;  %10983 = vmatprep.mubr.msk.f32.mxu1 %vm13389_vm1, %v17568_v37 }
 0x37b   :  { %10650 = vmatmul.mubr.msk.f32.gmra.mrb[192].mxu0 %vm21_vm5, %v15338_v42  ;;  %10984 = vmatmul.mubr.msk.f32.gmra.mrb[78].mxu1 %vm21_vm5, %v2898_v33  ;;  %v15437_v33 = vld [vmem:[#allocation2 + $0x190] sm:$0xff] }
 0x37c   :  { %10652 = vmatprep.mubr.msk.f32.mxu0 %vm13389_vm1, %v17568_v37  ;;  %10986 = vmatprep.mubr.msk.f32.mxu1 %vm13389_vm1, %v17568_v37 }
 0x37f   :  { %10653 = vmatmul.mubr.msk.f32.gmra.mrb[194].mxu0 %vm21_vm5, %v15347_v61  ;;  %10987 = vmatmul.mubr.msk.f32.gmra.mrb[80].mxu1 %vm21_vm5, %v2899_v28  ;;  %v2909_v28 = vld [vmem:[#allocation2 + $0x19f] sm:$0xff] }
 0x380   :  { %10655 = vmatprep.mubr.msk.f32.mxu0 %vm13389_vm1, %v17568_v37  ;;  %10989 = vmatprep.mubr.msk.f32.mxu1 %vm13389_vm1, %v17568_v37 }
 0x383   :  { %10656 = vmatmul.mubr.msk.f32.gmra.mrb[196].mxu0 %vm21_vm5, %v15356_v21  ;;  %10990 = vmatmul.mubr.msk.f32.gmra.mrb[82].mxu1 %vm21_vm5, %v2900_v43  ;;  %v15446_v43 = vld [vmem:[#allocation2 + $0x198] sm:$0xff] }
 0x384   :  { %10658 = vmatprep.mubr.msk.f32.mxu0 %vm13389_vm1, %v17568_v37  ;;  %10992 = vmatprep.mubr.msk.f32.mxu1 %vm13389_vm1, %v17568_v37 }
 0x387   :  { %10659 = vmatmul.mubr.msk.f32.gmra.mrb[198].mxu0 %vm21_vm5, %v15365_v41  ;;  %10993 = vmatmul.mubr.msk.f32.gmra.mrb[84].mxu1 %vm21_vm5, %v2901_v3  ;;  %v2910_v3 = vld [vmem:[#allocation2 + $0x1a7] sm:$0xff] }
 0x388   :  { %10661 = vmatprep.mubr.msk.f32.mxu0 %vm13389_vm1, %v17568_v37  ;;  %10995 = vmatprep.mubr.msk.f32.mxu1 %vm13389_vm1, %v17568_v37 }
 0x38b   :  { %10662 = vmatmul.mubr.msk.f32.gmra.mrb[200].mxu0 %vm21_vm5, %v15374_v7  ;;  %10996 = vmatmul.mubr.msk.f32.gmra.mrb[86].mxu1 %vm21_vm5, %v2902_v47  ;;  %v4110_v47 = vld [vmem:[%s17519_s2 + $0xa0] sm:$0xff] }
 0x38c   :  { %10664 = vmatprep.mubr.msk.f32.mxu0 %vm13389_vm1, %v17568_v37  ;;  %10998 = vmatprep.mubr.msk.f32.mxu1 %vm13389_vm1, %v17568_v37 }
 0x38f   :  { %10665 = vmatmul.mubr.msk.f32.gmra.mrb[202].mxu0 %vm21_vm5, %v15383_v2  ;;  %10999 = vmatmul.mubr.msk.f32.gmra.mrb[88].mxu1 %vm21_vm5, %v2903_v22  ;;  %v4111_v22 = vld [vmem:[%s17519_s2 + $0xa8] sm:$0xff] }
 0x390   :  { %10667 = vmatprep.mubr.msk.f32.mxu0 %vm13389_vm1, %v17568_v37  ;;  %11001 = vmatprep.mubr.msk.f32.mxu1 %vm13389_vm1, %v17568_v37 }
 0x393   :  { %10668 = vmatmul.mubr.msk.f32.gmra.mrb[204].mxu0 %vm21_vm5, %v15392_v9  ;;  %11002 = vmatmul.mubr.msk.f32.gmra.mrb[90].mxu1 %vm21_vm5, %v2904_v24  ;;  %v15461_v24 = vld [vmem:[#allocation2 + $0x1a0] sm:$0xff] }
 0x394   :  { %10670 = vmatprep.mubr.msk.f32.mxu0 %vm13389_vm1, %v17568_v37  ;;  %11004 = vmatprep.mubr.msk.f32.mxu1 %vm13389_vm1, %v17568_v37 }
 0x397   :  { %10671 = vmatmul.mubr.msk.f32.gmra.mrb[206].mxu0 %vm21_vm5, %v15401_v27  ;;  %11005 = vmatmul.mubr.msk.f32.gmra.mrb[92].mxu1 %vm21_vm5, %v2905_v52  ;;  %v2911_v52 = vld [vmem:[#allocation2 + $0x1af] sm:$0xff] }
 0x398   :  { %10673 = vmatprep.mubr.msk.f32.mxu0 %vm13389_vm1, %v17568_v37  ;;  %11007 = vmatprep.mubr.msk.f32.mxu1 %vm13389_vm1, %v17568_v37 }
 0x39b   :  { %10674 = vmatmul.mubr.msk.f32.gmra.mrb[208].mxu0 %vm21_vm5, %v15410_v26  ;;  %11008 = vmatmul.mubr.msk.f32.gmra.mrb[94].mxu1 %vm21_vm5, %v2906_v15  ;;  %v12289_v15 = vpack.c.bf16 %v4111_v22, %v4110_v47 }
 0x39c   :  { %10676 = vmatprep.mubr.msk.f32.mxu0 %vm13389_vm1, %v17568_v37  ;;  %11010 = vmatprep.mubr.msk.f32.mxu1 %vm13389_vm1, %v17568_v37 }
 0x39f   :  { %10677 = vmatmul.mubr.msk.f32.gmra.mrb[210].mxu0 %vm21_vm5, %v15419_v38  ;;  %11011 = vmatmul.mubr.msk.f32.gmra.mrb[96].mxu1 %vm21_vm5, %v2907_v23 }
 0x3a0   :  { %10679 = vmatprep.mubr.msk.f32.mxu0 %vm13389_vm1, %v17568_v37  ;;  %11013 = vmatprep.mubr.msk.f32.mxu1 %vm13389_vm1, %v17568_v37 }
 0x3a3   :  { %10680 = vmatmul.mubr.msk.f32.gmra.mrb[212].mxu0 %vm21_vm5, %v15428_v63  ;;  %11014 = vmatmul.mubr.msk.f32.gmra.mrb[98].mxu1 %vm21_vm5, %v2908_v40  ;;  %v4112_v40 = vld [vmem:[%s17519_s2 + $0xb0] sm:$0xff] }
 0x3a4   :  { %10682 = vmatprep.mubr.msk.f32.mxu0 %vm13389_vm1, %v17568_v37  ;;  %11016 = vmatprep.mubr.msk.f32.mxu1 %vm13389_vm1, %v17568_v37 }
 0x3a7   :  { %10683 = vmatmul.mubr.msk.f32.gmra.mrb[214].mxu0 %vm21_vm5, %v15437_v33  ;;  %11017 = vmatmul.mubr.msk.f32.gmra.mrb[100].mxu1 %vm21_vm5, %v2909_v28  ;;  %v4113_v28 = vld [vmem:[%s17519_s2 + $0xb8] sm:$0xff] }
 0x3a8   :  { %10685 = vmatprep.mubr.msk.f32.mxu0 %vm13389_vm1, %v17568_v37  ;;  %11019 = vmatprep.mubr.msk.f32.mxu1 %vm13389_vm1, %v17568_v37  ;;  %v12292_v47 = vpack.c.bf16 %v4113_v28, %v4112_v40 }
 0x3ab   :  { %10686 = vmatmul.mubr.msk.f32.gmra.mrb[216].mxu0 %vm21_vm5, %v15446_v43  ;;  %11020 = vmatmul.mubr.msk.f32.gmra.mrb[102].mxu1 %vm21_vm5, %v2910_v3 }
 0x3ac   :  { %10688 = vmatprep.mubr.msk.f32.mxu0 %vm13389_vm1, %v17568_v37  ;;  %11022 = vmatprep.mubr.msk.f32.mxu1 %vm13389_vm1, %v17568_v37 }
 0x3af   :  { %10689 = vmatmul.mubr.msk.f32.gmra.mrb[218].mxu0 %vm21_vm5, %v15461_v24  ;;  %11023 = vmatmul.mubr.msk.f32.gmra.mrb[104].mxu1 %vm21_vm5, %v2911_v52 }
 0x3b0   :  { %11033 = vmatprep.mubr.msk.f32.mxu1 %vm13389_vm1, %v17568_v37  ;;  %11701 = vmatprep.mubr.msk.f32.mxu0 %vm13389_vm1, %v17568_v37 }
 0x3b2   :  { %v15470_v23 = vpop.f32.mrb[114].mxu0 }
 0x3b3   :  { %v10534_v3 = vpop.f32.mrb[115].mxu0  ;;  %11034 = vmatmul.mubr.msk.f32.vlgmr.msra.gmra.mrb[0].mxu1 %vm21_vm5, %v14984_v36  ;;  %11702 = vmatmul.mubr.msk.f32.vlgmr.msra.gmra.mrb[220].mxu0 %vm21_vm5, %v15003_v1 }
 0x3b4   :  { %12290 = vmatpush3.bf16.msra.mxu1 %v12289_v15  ;;  %11036 = vmatprep.mubr.msk.f32.mxu1 %vm13389_vm1, %v17568_v37 }
 0x3b5   :  { %11704 = vmatprep.mubr.msk.f32.mxu0 %vm13389_vm1, %v17568_v37  ;;  %12291 = vmatprep.subr.bf16.mxu1 %v17571_v32 }
 0x3b6   :  { %v15487_v22 = vpop.f32.mrb[116].mxu0 }
 0x3b7   :  { %v10537_v52 = vpop.f32.mrb[117].mxu0  ;;  %11037 = vmatmul.mubr.msk.f32.gmra.mrb[2].mxu1 %vm21_vm5, %v14994_v50  ;;  %11705 = vmatmul.mubr.msk.f32.gmra.mrb[222].mxu0 %vm21_vm5, %v15012_v11 }
 0x3b8   :  { %11039 = vmatprep.mubr.msk.f32.mxu1 %vm13389_vm1, %v17568_v37  ;;  %11707 = vmatprep.mubr.msk.f32.mxu0 %vm13389_vm1, %v17568_v37 }
 0x3b9   :  { %12293 = vmatpush3.bf16.msra.mxu1 %v12292_v47 }
 0x3ba   :  { %v2006_v36 = vpop.f32.mrb[118].mxu0  ;;  %12294 = vmatprep.subr.bf16.mxu1 %v17571_v32 }
 0x3bb   :  { %v10540_v15 = vpop.f32.mrb[119].mxu0  ;;  %11040 = vmatmul.mubr.msk.f32.gmra.mrb[4].mxu1 %vm21_vm5, %v15003_v1  ;;  %11708 = vmatmul.mubr.msk.f32.gmra.mrb[224].mxu0 %vm21_vm5, %v15021_v13 }
 0x3bc   :  { %11042 = vmatprep.mubr.msk.f32.mxu1 %vm13389_vm1, %v17568_v37  ;;  %11710 = vmatprep.mubr.msk.f32.mxu0 %vm13389_vm1, %v17568_v37 }
 0x3be   :  { %v15506_v50 = vpop.f32.mrb[120].mxu0 }
 0x3bf   :  { %v10543_v40 = vpop.f32.mrb[121].mxu0  ;;  %11043 = vmatmul.mubr.msk.f32.gmra.mrb[6].mxu1 %vm21_vm5, %v15012_v11  ;;  %11711 = vmatmul.mubr.msk.f32.gmra.mrb[226].mxu0 %vm21_vm5, %v15030_v54 }
 0x3c0   :  { %11045 = vmatprep.mubr.msk.f32.mxu1 %vm13389_vm1, %v17568_v37  ;;  %11713 = vmatprep.mubr.msk.f32.mxu0 %vm13389_vm1, %v17568_v37 }
 0x3c2   :  { %v15516_v1 = vpop.f32.mrb[122].mxu0 }
 0x3c3   :  { %v10546_v28 = vpop.f32.mrb[123].mxu0  ;;  %11046 = vmatmul.mubr.msk.f32.gmra.mrb[8].mxu1 %vm21_vm5, %v15021_v13  ;;  %11714 = vmatmul.mubr.msk.f32.gmra.mrb[228].mxu0 %vm21_vm5, %v15039_v44 }
 0x3c4   :  { %11048 = vmatprep.mubr.msk.f32.mxu1 %vm13389_vm1, %v17568_v37  ;;  %11716 = vmatprep.mubr.msk.f32.mxu0 %vm13389_vm1, %v17568_v37 }
 0x3c6   :  { %v15526_v11 = vpop.f32.mrb[124].mxu0 }
 0x3c7   :  { %v10549_v3 = vpop.f32.mrb[125].mxu0  ;;  %11049 = vmatmul.mubr.msk.f32.gmra.mrb[10].mxu1 %vm21_vm5, %v15030_v54  ;;  %11717 = vmatmul.mubr.msk.f32.gmra.mrb[230].mxu0 %vm21_vm5, %v15048_v60 }
 0x3c8   :  { %11051 = vmatprep.mubr.msk.f32.mxu1 %vm13389_vm1, %v17568_v37  ;;  %11719 = vmatprep.mubr.msk.f32.mxu0 %vm13389_vm1, %v17568_v37 }
 0x3ca   :  { %v2026_v13 = vpop.f32.mrb[126].mxu0 }
 0x3cb   :  { %v10552_v47 = vpop.f32.mrb[127].mxu0  ;;  %11052 = vmatmul.mubr.msk.f32.gmra.mrb[12].mxu1 %vm21_vm5, %v15039_v44  ;;  %11720 = vmatmul.mubr.msk.f32.gmra.mrb[232].mxu0 %vm21_vm5, %v15057_v17 }
 0x3cc   :  { %11054 = vmatprep.mubr.msk.f32.mxu1 %vm13389_vm1, %v17568_v37  ;;  %11722 = vmatprep.mubr.msk.f32.mxu0 %vm13389_vm1, %v17568_v37 }
 0x3ce   :  { %v15544_v54 = vpop.f32.mrb[128].mxu0 }
 0x3cf   :  { %v10555_v52 = vpop.f32.mrb[129].mxu0  ;;  %11055 = vmatmul.mubr.msk.f32.gmra.mrb[14].mxu1 %vm21_vm5, %v15048_v60  ;;  %11723 = vmatmul.mubr.msk.f32.gmra.mrb[234].mxu0 %vm21_vm5, %v15066_v46 }
 0x3d0   :  { %11057 = vmatprep.mubr.msk.f32.mxu1 %vm13389_vm1, %v17568_v37  ;;  %11725 = vmatprep.mubr.msk.f32.mxu0 %vm13389_vm1, %v17568_v37 }
 0x3d2   :  { %v15554_v44 = vpop.f32.mrb[130].mxu0 }
 0x3d3   :  { %v10558_v36 = vpop.f32.mrb[131].mxu0  ;;  %11058 = vmatmul.mubr.msk.f32.gmra.mrb[16].mxu1 %vm21_vm5, %v15057_v17  ;;  %11726 = vmatmul.mubr.msk.f32.gmra.mrb[236].mxu0 %vm21_vm5, %v15075_v4 }
 0x3d4   :  { %11060 = vmatprep.mubr.msk.f32.mxu1 %vm13389_vm1, %v17568_v37  ;;  %11728 = vmatprep.mubr.msk.f32.mxu0 %vm13389_vm1, %v17568_v37 }
 0x3d6   :  { %v15564_v60 = vpop.f32.mrb[132].mxu0 }
 0x3d7   :  { %v10561_v15 = vpop.f32.mrb[133].mxu0  ;;  %11061 = vmatmul.mubr.msk.f32.gmra.mrb[18].mxu1 %vm21_vm5, %v15066_v46  ;;  %11729 = vmatmul.mubr.msk.f32.gmra.mrb[238].mxu0 %vm21_vm5, %v15084_v25 }
 0x3d8   :  { %11063 = vmatprep.mubr.msk.f32.mxu1 %vm13389_vm1, %v17568_v37  ;;  %11731 = vmatprep.mubr.msk.f32.mxu0 %vm13389_vm1, %v17568_v37 }
 0x3da   :  { %v2046_v17 = vpop.f32.mrb[134].mxu0 }
 0x3db   :  { %v10564_v40 = vpop.f32.mrb[135].mxu0  ;;  %11064 = vmatmul.mubr.msk.f32.gmra.mrb[20].mxu1 %vm21_vm5, %v15075_v4  ;;  %11732 = vmatmul.mubr.msk.f32.gmra.mrb[240].mxu0 %vm21_vm5, %v15093_v12 }
 0x3dc   :  { %11066 = vmatprep.mubr.msk.f32.mxu1 %vm13389_vm1, %v17568_v37  ;;  %11734 = vmatprep.mubr.msk.f32.mxu0 %vm13389_vm1, %v17568_v37 }
 0x3de   :  { %v15582_v46 = vpop.f32.mrb[136].mxu0 }
 0x3df   :  { %v10567_v28 = vpop.f32.mrb[137].mxu0  ;;  %11067 = vmatmul.mubr.msk.f32.gmra.mrb[22].mxu1 %vm21_vm5, %v15084_v25  ;;  %11735 = vmatmul.mubr.msk.f32.gmra.mrb[242].mxu0 %vm21_vm5, %v15102_v48 }
 0x3e0   :  { %11069 = vmatprep.mubr.msk.f32.mxu1 %vm13389_vm1, %v17568_v37  ;;  %11737 = vmatprep.mubr.msk.f32.mxu0 %vm13389_vm1, %v17568_v37 }
 0x3e2   :  { %v15592_v4 = vpop.f32.mrb[138].mxu0 }
 0x3e3   :  { %v10570_v3 = vpop.f32.mrb[139].mxu0  ;;  %11070 = vmatmul.mubr.msk.f32.gmra.mrb[24].mxu1 %vm21_vm5, %v15093_v12  ;;  %11738 = vmatmul.mubr.msk.f32.gmra.mrb[244].mxu0 %vm21_vm5, %v15111_v10 }
 0x3e4   :  { %11072 = vmatprep.mubr.msk.f32.mxu1 %vm13389_vm1, %v17568_v37  ;;  %11740 = vmatprep.mubr.msk.f32.mxu0 %vm13389_vm1, %v17568_v37 }
 0x3e6   :  { %v2061_v25 = vpop.f32.mrb[140].mxu0 }
 0x3e7   :  { %v10573_v13 = vpop.f32.mrb[141].mxu0  ;;  %11073 = vmatmul.mubr.msk.f32.gmra.mrb[26].mxu1 %vm21_vm5, %v15102_v48  ;;  %11741 = vmatmul.mubr.msk.f32.gmra.mrb[246].mxu0 %vm21_vm5, %v15120_v34 }
 0x3e8   :  { %11075 = vmatprep.mubr.msk.f32.mxu1 %vm13389_vm1, %v17568_v37  ;;  %11743 = vmatprep.mubr.msk.f32.mxu0 %vm13389_vm1, %v17568_v37 }
 0x3ea   :  { %v2066_v12 = vpop.f32.mrb[142].mxu0 }
 0x3eb   :  { %v10576_v47 = vpop.f32.mrb[143].mxu0  ;;  %11076 = vmatmul.mubr.msk.f32.gmra.mrb[28].mxu1 %vm21_vm5, %v15111_v10  ;;  %11744 = vmatmul.mubr.msk.f32.gmra.mrb[248].mxu0 %vm21_vm5, %v15129_v5 }
 0x3ec   :  { %11078 = vmatprep.mubr.msk.f32.mxu1 %vm13389_vm1, %v17568_v37  ;;  %11746 = vmatprep.mubr.msk.f32.mxu0 %vm13389_vm1, %v17568_v37 }
 0x3ee   :  { %v15618_v48 = vpop.f32.mrb[144].mxu0 }
 0x3ef   :  { %v10579_v52 = vpop.f32.mrb[145].mxu0  ;;  %11079 = vmatmul.mubr.msk.f32.gmra.mrb[30].mxu1 %vm21_vm5, %v15120_v34  ;;  %11747 = vmatmul.mubr.msk.f32.gmra.mrb[250].mxu0 %vm21_vm5, %v15138_v30 }
 0x3f0   :  { %11081 = vmatprep.mubr.msk.f32.mxu1 %vm13389_vm1, %v17568_v37  ;;  %11749 = vmatprep.mubr.msk.f32.mxu0 %vm13389_vm1, %v17568_v37 }
 0x3f2   :  { %v15628_v10 = vpop.f32.mrb[146].mxu0 }
 0x3f3   :  { %v10582_v36 = vpop.f32.mrb[147].mxu0  ;;  %11082 = vmatmul.mubr.msk.f32.gmra.mrb[32].mxu1 %vm21_vm5, %v15129_v5  ;;  %11750 = vmatmul.mubr.msk.f32.gmra.mrb[252].mxu0 %vm21_vm5, %v15155_v58 }
 0x3f4   :  { %11084 = vmatprep.mubr.msk.f32.mxu1 %vm13389_vm1, %v17568_v37  ;;  %11752 = vmatprep.mubr.msk.f32.mxu0 %vm13389_vm1, %v17568_v37 }
 0x3f6   :  { %v2081_v34 = vpop.f32.mrb[148].mxu0 }
 0x3f7   :  { %v10585_v15 = vpop.f32.mrb[149].mxu0  ;;  %11085 = vmatmul.mubr.msk.f32.gmra.mrb[34].mxu1 %vm21_vm5, %v15138_v30  ;;  %11753 = vmatmul.mubr.msk.f32.gmra.mrb[254].mxu0 %vm21_vm5, %v15174_v56 }
 0x3f8   :  { %11087 = vmatprep.mubr.msk.f32.mxu1 %vm13389_vm1, %v17568_v37  ;;  %11755 = vmatprep.mubr.msk.f32.mxu0 %vm13389_vm1, %v17568_v37 }
 0x3fa   :  { %v15646_v5 = vpop.f32.mrb[150].mxu0 }
 0x3fb   :  { %v10588_v17 = vpop.f32.mrb[151].mxu0  ;;  %11088 = vmatmul.mubr.msk.f32.gmra.mrb[36].mxu1 %vm21_vm5, %v15155_v58  ;;  %11756 = vmatmul.mubr.msk.f32.gmra.mrb[0].mxu0 %vm21_vm5, %v15185_v45 }
 0x3fc   :  { %11090 = vmatprep.mubr.msk.f32.mxu1 %vm13389_vm1, %v17568_v37  ;;  %11758 = vmatprep.mubr.msk.f32.mxu0 %vm13389_vm1, %v17568_v37 }
 0x3fe   :  { %v15656_v30 = vpop.f32.mrb[152].mxu0 }
 0x3ff   :  { %v10591_v40 = vpop.f32.mrb[153].mxu0  ;;  %11091 = vmatmul.mubr.msk.f32.gmra.mrb[38].mxu1 %vm21_vm5, %v15174_v56  ;;  %11759 = vmatmul.mubr.msk.f32.gmra.mrb[2].mxu0 %vm21_vm5, %v15194_v20 }
 0x400   :  { %11093 = vmatprep.mubr.msk.f32.mxu1 %vm13389_vm1, %v17568_v37  ;;  %11761 = vmatprep.mubr.msk.f32.mxu0 %vm13389_vm1, %v17568_v37 }
 0x402   :  { %v15666_v58 = vpop.f32.mrb[154].mxu0 }
 0x403   :  { %v10594_v28 = vpop.f32.mrb[155].mxu0  ;;  %11094 = vmatmul.mubr.msk.f32.gmra.mrb[40].mxu1 %vm21_vm5, %v15185_v45  ;;  %11762 = vmatmul.mubr.msk.f32.gmra.mrb[4].mxu0 %vm21_vm5, %v15203_v6 }
 0x404   :  { %11096 = vmatprep.mubr.msk.f32.mxu1 %vm13389_vm1, %v17568_v37  ;;  %11764 = vmatprep.mubr.msk.f32.mxu0 %vm13389_vm1, %v17568_v37 }
 0x406   :  { %v2101_v56 = vpop.f32.mrb[156].mxu0 }
 0x407   :  { %v10597_v3 = vpop.f32.mrb[157].mxu0  ;;  %11097 = vmatmul.mubr.msk.f32.gmra.mrb[42].mxu1 %vm21_vm5, %v15194_v20  ;;  %11765 = vmatmul.mubr.msk.f32.gmra.mrb[6].mxu0 %vm21_vm5, %v15212_v39 }
 0x408   :  { %11099 = vmatprep.mubr.msk.f32.mxu1 %vm13389_vm1, %v17568_v37  ;;  %11767 = vmatprep.mubr.msk.f32.mxu0 %vm13389_vm1, %v17568_v37 }
 0x40a   :  { %v15684_v45 = vpop.f32.mrb[158].mxu0 }
 0x40b   :  { %v10600_v25 = vpop.f32.mrb[159].mxu0  ;;  %11100 = vmatmul.mubr.msk.f32.gmra.mrb[44].mxu1 %vm21_vm5, %v15203_v6  ;;  %11768 = vmatmul.mubr.msk.f32.gmra.mrb[8].mxu0 %vm21_vm5, %v15221_v31 }
 0x40c   :  { %11102 = vmatprep.mubr.msk.f32.mxu1 %vm13389_vm1, %v17568_v37  ;;  %11770 = vmatprep.mubr.msk.f32.mxu0 %vm13389_vm1, %v17568_v37 }
 0x40e   :  { %v15694_v20 = vpop.f32.mrb[160].mxu0 }
 0x40f   :  { %v10603_v13 = vpop.f32.mrb[161].mxu0  ;;  %11103 = vmatmul.mubr.msk.f32.gmra.mrb[46].mxu1 %vm21_vm5, %v15212_v39  ;;  %11771 = vmatmul.mubr.msk.f32.gmra.mrb[10].mxu0 %vm21_vm5, %v15230_v62 }
 0x410   :  { %11105 = vmatprep.mubr.msk.f32.mxu1 %vm13389_vm1, %v17568_v37  ;;  %11773 = vmatprep.mubr.msk.f32.mxu0 %vm13389_vm1, %v17568_v37 }
 0x412   :  { %v15704_v6 = vpop.f32.mrb[162].mxu0 }
 0x413   :  { %v10606_v12 = vpop.f32.mrb[163].mxu0  ;;  %11106 = vmatmul.mubr.msk.f32.gmra.mrb[48].mxu1 %vm21_vm5, %v15221_v31  ;;  %11774 = vmatmul.mubr.msk.f32.gmra.mrb[12].mxu0 %vm21_vm5, %v15239_v14 }
 0x414   :  { %11108 = vmatprep.mubr.msk.f32.mxu1 %vm13389_vm1, %v17568_v37  ;;  %11776 = vmatprep.mubr.msk.f32.mxu0 %vm13389_vm1, %v17568_v37 }
 0x416   :  { %v2121_v39 = vpop.f32.mrb[164].mxu0 }
 0x417   :  { %v10609_v47 = vpop.f32.mrb[165].mxu0  ;;  %11109 = vmatmul.mubr.msk.f32.gmra.mrb[50].mxu1 %vm21_vm5, %v15230_v62  ;;  %11777 = vmatmul.mubr.msk.f32.gmra.mrb[14].mxu0 %vm21_vm5, %v15248_v29 }
 0x418   :  { %11111 = vmatprep.mubr.msk.f32.mxu1 %vm13389_vm1, %v17568_v37  ;;  %11779 = vmatprep.mubr.msk.f32.mxu0 %vm13389_vm1, %v17568_v37 }
 0x41a   :  { %v2126_v31 = vpop.f32.mrb[166].mxu0 }
 0x41b   :  { %v10612_v52 = vpop.f32.mrb[167].mxu0  ;;  %11112 = vmatmul.mubr.msk.f32.gmra.mrb[52].mxu1 %vm21_vm5, %v15239_v14  ;;  %11780 = vmatmul.mubr.msk.f32.gmra.mrb[16].mxu0 %vm21_vm5, %v15257_v57 }
 0x41c   :  { %11114 = vmatprep.mubr.msk.f32.mxu1 %vm13389_vm1, %v17568_v37  ;;  %11782 = vmatprep.mubr.msk.f32.mxu0 %vm13389_vm1, %v17568_v37 }
 0x41e   :  { %v2131_v62 = vpop.f32.mrb[168].mxu0 }
 0x41f   :  { %v10615_v36 = vpop.f32.mrb[169].mxu0  ;;  %11115 = vmatmul.mubr.msk.f32.gmra.mrb[54].mxu1 %vm21_vm5, %v15248_v29  ;;  %11783 = vmatmul.mubr.msk.f32.gmra.mrb[18].mxu0 %vm21_vm5, %v15266_v19 }
 0x420   :  { %11117 = vmatprep.mubr.msk.f32.mxu1 %vm13389_vm1, %v17568_v37  ;;  %11785 = vmatprep.mubr.msk.f32.mxu0 %vm13389_vm1, %v17568_v37 }
 0x422   :  { %v15738_v14 = vpop.f32.mrb[170].mxu0 }
 0x423   :  { %v10618_v34 = vpop.f32.mrb[171].mxu0  ;;  %11118 = vmatmul.mubr.msk.f32.gmra.mrb[56].mxu1 %vm21_vm5, %v15257_v57  ;;  %11786 = vmatmul.mubr.msk.f32.gmra.mrb[20].mxu0 %vm21_vm5, %v15275_v35 }
 0x424   :  { %11120 = vmatprep.mubr.msk.f32.mxu1 %vm13389_vm1, %v17568_v37  ;;  %11788 = vmatprep.mubr.msk.f32.mxu0 %vm13389_vm1, %v17568_v37 }
 0x426   :  { %v15748_v29 = vpop.f32.mrb[172].mxu0 }
 0x427   :  { %v10621_v15 = vpop.f32.mrb[173].mxu0  ;;  %11121 = vmatmul.mubr.msk.f32.gmra.mrb[58].mxu1 %vm21_vm5, %v15266_v19  ;;  %11789 = vmatmul.mubr.msk.f32.gmra.mrb[22].mxu0 %vm21_vm5, %v15284_v8 }
 0x428   :  { %11123 = vmatprep.mubr.msk.f32.mxu1 %vm13389_vm1, %v17568_v37  ;;  %11791 = vmatprep.mubr.msk.f32.mxu0 %vm13389_vm1, %v17568_v37 }
 0x42a   :  { %v2146_v57 = vpop.f32.mrb[174].mxu0 }
 0x42b   :  { %v10624_v17 = vpop.f32.mrb[175].mxu0  ;;  %11124 = vmatmul.mubr.msk.f32.gmra.mrb[60].mxu1 %vm21_vm5, %v15275_v35  ;;  %11792 = vmatmul.mubr.msk.f32.gmra.mrb[24].mxu0 %vm21_vm5, %v15293_v55 }
 0x42c   :  { %11126 = vmatprep.mubr.msk.f32.mxu1 %vm13389_vm1, %v17568_v37  ;;  %11794 = vmatprep.mubr.msk.f32.mxu0 %vm13389_vm1, %v17568_v37 }
 0x42e   :  { %v15766_v19 = vpop.f32.mrb[176].mxu0 }
 0x42f   :  { %v10627_v40 = vpop.f32.mrb[177].mxu0  ;;  %11127 = vmatmul.mubr.msk.f32.gmra.mrb[62].mxu1 %vm21_vm5, %v15284_v8  ;;  %11795 = vmatmul.mubr.msk.f32.gmra.mrb[26].mxu0 %vm21_vm5, %v15302_v51 }
 0x430   :  { %11129 = vmatprep.mubr.msk.f32.mxu1 %vm13389_vm1, %v17568_v37  ;;  %11797 = vmatprep.mubr.msk.f32.mxu0 %vm13389_vm1, %v17568_v37 }
 0x432   :  { %v15776_v35 = vpop.f32.mrb[178].mxu0 }
 0x433   :  { %v10630_v28 = vpop.f32.mrb[179].mxu0  ;;  %11130 = vmatmul.mubr.msk.f32.gmra.mrb[64].mxu1 %vm21_vm5, %v15293_v55  ;;  %11798 = vmatmul.mubr.msk.f32.gmra.mrb[28].mxu0 %vm21_vm5, %v15311_v59 }
 0x434   :  { %11132 = vmatprep.mubr.msk.f32.mxu1 %vm13389_vm1, %v17568_v37  ;;  %11800 = vmatprep.mubr.msk.f32.mxu0 %vm13389_vm1, %v17568_v37  ;;  %v5903_v28 = vld [vmem:[#allocation2 + $0x1a8] sm:$0xff] }
 0x436   :  { %v15786_v8 = vpop.f32.mrb[180].mxu0 }
 0x437   :  { %v10633_v56 = vpop.f32.mrb[181].mxu0  ;;  %11133 = vmatmul.mubr.msk.f32.gmra.mrb[66].mxu1 %vm21_vm5, %v15302_v51  ;;  %11801 = vmatmul.mubr.msk.f32.gmra.mrb[30].mxu0 %vm21_vm5, %v15320_v49 }
 0x438   :  { %11135 = vmatprep.mubr.msk.f32.mxu1 %vm13389_vm1, %v17568_v37  ;;  %11803 = vmatprep.mubr.msk.f32.mxu0 %vm13389_vm1, %v17568_v37 }
 0x43a   :  { %v2166_v55 = vpop.f32.mrb[182].mxu0 }
 0x43b   :  { %v10636_v3 = vpop.f32.mrb[183].mxu0  ;;  %11136 = vmatmul.mubr.msk.f32.gmra.mrb[68].mxu1 %vm21_vm5, %v15311_v59  ;;  %11804 = vmatmul.mubr.msk.f32.gmra.mrb[32].mxu0 %vm21_vm5, %v15329_v18  ;;  %v5904_v55 = vld [vmem:[#allocation2 + $0x1b0] sm:$0xff] }
 0x43c   :  { %11138 = vmatprep.mubr.msk.f32.mxu1 %vm13389_vm1, %v17568_v37  ;;  %11806 = vmatprep.mubr.msk.f32.mxu0 %vm13389_vm1, %v17568_v37 }
 0x43e   :  { %v15804_v51 = vpop.f32.mrb[184].mxu0 }
 0x43f   :  { %v10639_v25 = vpop.f32.mrb[185].mxu0  ;;  %11139 = vmatmul.mubr.msk.f32.gmra.mrb[70].mxu1 %vm21_vm5, %v15320_v49  ;;  %11807 = vmatmul.mubr.msk.f32.gmra.mrb[34].mxu0 %vm21_vm5, %v15338_v42 }
 0x440   :  { %11141 = vmatprep.mubr.msk.f32.mxu1 %vm13389_vm1, %v17568_v37  ;;  %11809 = vmatprep.mubr.msk.f32.mxu0 %vm13389_vm1, %v17568_v37  ;;  %v5905_v25 = vld [vmem:[#allocation2 + $0x1b8] sm:$0xff] }
 0x442   :  { %v15814_v59 = vpop.f32.mrb[186].mxu0 }
 0x443   :  { %v10642_v13 = vpop.f32.mrb[187].mxu0  ;;  %11142 = vmatmul.mubr.msk.f32.gmra.mrb[72].mxu1 %vm21_vm5, %v15329_v18  ;;  %11810 = vmatmul.mubr.msk.f32.gmra.mrb[36].mxu0 %vm21_vm5, %v15347_v61 }
 0x444   :  { %11144 = vmatprep.mubr.msk.f32.mxu1 %vm13389_vm1, %v17568_v37  ;;  %11812 = vmatprep.mubr.msk.f32.mxu0 %vm13389_vm1, %v17568_v37 }
 0x446   :  { %v15824_v49 = vpop.f32.mrb[188].mxu0 }
 0x447   :  { %v10645_v12 = vpop.f32.mrb[189].mxu0  ;;  %11145 = vmatmul.mubr.msk.f32.gmra.mrb[74].mxu1 %vm21_vm5, %v15338_v42  ;;  %11813 = vmatmul.mubr.msk.f32.gmra.mrb[38].mxu0 %vm21_vm5, %v15356_v21 }
 0x448   :  { %11147 = vmatprep.mubr.msk.f32.mxu1 %vm13389_vm1, %v17568_v37  ;;  %11815 = vmatprep.mubr.msk.f32.mxu0 %vm13389_vm1, %v17568_v37  ;;  %v4710_v12 = vld [vmem:[%s17519_s2 + $0xc8] sm:$0xff] }
 0x44a   :  { %v2186_v18 = vpop.f32.mrb[190].mxu0 }
 0x44b   :  { %v10648_v39 = vpop.f32.mrb[191].mxu0  ;;  %11148 = vmatmul.mubr.msk.f32.gmra.mrb[76].mxu1 %vm21_vm5, %v15347_v61  ;;  %11816 = vmatmul.mubr.msk.f32.gmra.mrb[40].mxu0 %vm21_vm5, %v15365_v41 }
 0x44c   :  { %11150 = vmatprep.mubr.msk.f32.mxu1 %vm13389_vm1, %v17568_v37  ;;  %11818 = vmatprep.mubr.msk.f32.mxu0 %vm13389_vm1, %v17568_v37 }
 0x44e   :  { %v15842_v42 = vpop.f32.mrb[192].mxu0 }
 0x44f   :  { %17581 = vst [vmem:[#allocation21_spill] sm:$0xff] %v15842_v42  ;;  %v10651_v47 = vpop.f32.mrb[193].mxu0  ;;  %11151 = vmatmul.mubr.msk.f32.gmra.mrb[78].mxu1 %vm21_vm5, %v15356_v21  ;;  %11819 = vmatmul.mubr.msk.f32.gmra.mrb[42].mxu0 %vm21_vm5, %v15374_v7 }
 0x450   :  { %11153 = vmatprep.mubr.msk.f32.mxu1 %vm13389_vm1, %v17568_v37  ;;  %11821 = vmatprep.mubr.msk.f32.mxu0 %vm13389_vm1, %v17568_v37 }
 0x452   :  { %v15852_v61 = vpop.f32.mrb[194].mxu0 }
 0x453   :  { %17582 = vst [vmem:[#allocation22_spill] sm:$0xff] %v15852_v61  ;;  %v10654_v31 = vpop.f32.mrb[195].mxu0  ;;  %11154 = vmatmul.mubr.msk.f32.gmra.mrb[80].mxu1 %vm21_vm5, %v15365_v41  ;;  %11822 = vmatmul.mubr.msk.f32.gmra.mrb[44].mxu0 %vm21_vm5, %v15383_v2 }
 0x454   :  { %11156 = vmatprep.mubr.msk.f32.mxu1 %vm13389_vm1, %v17568_v37  ;;  %11824 = vmatprep.mubr.msk.f32.mxu0 %vm13389_vm1, %v17568_v37  ;;  %v4711_v31 = vld [vmem:[%s17519_s2 + $0xd0] sm:$0xff] }
 0x456   :  { %v2201_v21 = vpop.f32.mrb[196].mxu0 }
 0x457   :  { %v10657_v52 = vpop.f32.mrb[197].mxu0  ;;  %11157 = vmatmul.mubr.msk.f32.gmra.mrb[82].mxu1 %vm21_vm5, %v15374_v7  ;;  %11825 = vmatmul.mubr.msk.f32.gmra.mrb[46].mxu0 %vm21_vm5, %v15392_v9  ;;  %v4712_v21 = vld [vmem:[%s17519_s2 + $0xd8] sm:$0xff] }
 0x458   :  { %11159 = vmatprep.mubr.msk.f32.mxu1 %vm13389_vm1, %v17568_v37  ;;  %11827 = vmatprep.mubr.msk.f32.mxu0 %vm13389_vm1, %v17568_v37 }
 0x45a   :  { %v2206_v41 = vpop.f32.mrb[198].mxu0 }
 0x45b   :  { %v10660_v62 = vpop.f32.mrb[199].mxu0  ;;  %11160 = vmatmul.mubr.msk.f32.gmra.mrb[84].mxu1 %vm21_vm5, %v15383_v2  ;;  %11828 = vmatmul.mubr.msk.f32.gmra.mrb[48].mxu0 %vm21_vm5, %v15401_v27  ;;  %v4057_v41 = vld [vmem:[#allocation2 + $0x11] sm:$0xff] }
 0x45c   :  { %11162 = vmatprep.mubr.msk.f32.mxu1 %vm13389_vm1, %v17568_v37  ;;  %11830 = vmatprep.mubr.msk.f32.mxu0 %vm13389_vm1, %v17568_v37 }
 0x45e   :  { %v15878_v7 = vpop.f32.mrb[200].mxu0 }
 0x45f   :  { %17583 = vst [vmem:[#allocation23_spill] sm:$0xff] %v15878_v7  ;;  %v10663_v36 = vpop.f32.mrb[201].mxu0  ;;  %11163 = vmatmul.mubr.msk.f32.gmra.mrb[86].mxu1 %vm21_vm5, %v15392_v9  ;;  %11831 = vmatmul.mubr.msk.f32.gmra.mrb[50].mxu0 %vm21_vm5, %v15410_v26 }
 0x460   :  { %11165 = vmatprep.mubr.msk.f32.mxu1 %vm13389_vm1, %v17568_v37  ;;  %11833 = vmatprep.mubr.msk.f32.mxu0 %vm13389_vm1, %v17568_v37  ;;  %v12298_v36 = vpack.c.bf16 %v4712_v21, %v4711_v31 }
 0x462   :  { %v15888_v2 = vpop.f32.mrb[202].mxu0 }
 0x463   :  { %17584 = vst [vmem:[#allocation24_spill] sm:$0xff] %v15888_v2  ;;  %v10666_v34 = vpop.f32.mrb[203].mxu0  ;;  %11166 = vmatmul.mubr.msk.f32.gmra.mrb[88].mxu1 %vm21_vm5, %v15401_v27  ;;  %11834 = vmatmul.mubr.msk.f32.gmra.mrb[52].mxu0 %vm21_vm5, %v15419_v38 }
 0x464   :  { %11168 = vmatprep.mubr.msk.f32.mxu1 %vm13389_vm1, %v17568_v37  ;;  %11836 = vmatprep.mubr.msk.f32.mxu0 %vm13389_vm1, %v17568_v37 }
 0x466   :  { %v2221_v9 = vpop.f32.mrb[204].mxu0 }
 0x467   :  { %v10669_v15 = vpop.f32.mrb[205].mxu0  ;;  %11169 = vmatmul.mubr.msk.f32.gmra.mrb[90].mxu1 %vm21_vm5, %v15410_v26  ;;  %11837 = vmatmul.mubr.msk.f32.gmra.mrb[54].mxu0 %vm21_vm5, %v15428_v63  ;;  %v4058_v9 = vld [vmem:[#allocation2 + $0x19] sm:$0xff] }
 0x468   :  { %11171 = vmatprep.mubr.msk.f32.mxu1 %vm13389_vm1, %v17568_v37  ;;  %11839 = vmatprep.mubr.msk.f32.mxu0 %vm13389_vm1, %v17568_v37 }
 0x46a   :  { %v15906_v27 = vpop.f32.mrb[206].mxu0 }
 0x46b   :  { %17585 = vst [vmem:[#allocation25_spill] sm:$0xff] %v15906_v27  ;;  %v10672_v57 = vpop.f32.mrb[207].mxu0  ;;  %11172 = vmatmul.mubr.msk.f32.gmra.mrb[92].mxu1 %vm21_vm5, %v15419_v38  ;;  %11840 = vmatmul.mubr.msk.f32.gmra.mrb[56].mxu0 %vm21_vm5, %v15437_v33 }
 0x46c   :  { %11174 = vmatprep.mubr.msk.f32.mxu1 %vm13389_vm1, %v17568_v37  ;;  %11842 = vmatprep.mubr.msk.f32.mxu0 %vm13389_vm1, %v17568_v37 }
 0x46e   :  { %v15916_v26 = vpop.f32.mrb[208].mxu0 }
 0x46f   :  { %17586 = vst [vmem:[#allocation10_spill] sm:$0xff] %v15916_v26  ;;  %v10675_v17 = vpop.f32.mrb[209].mxu0  ;;  %11175 = vmatmul.mubr.msk.f32.gmra.mrb[94].mxu1 %vm21_vm5, %v15428_v63  ;;  %11843 = vmatmul.mubr.msk.f32.gmra.mrb[58].mxu0 %vm21_vm5, %v15446_v43 }
 0x470   :  { %11177 = vmatprep.mubr.msk.f32.mxu1 %vm13389_vm1, %v17568_v37  ;;  %11845 = vmatprep.mubr.msk.f32.mxu0 %vm13389_vm1, %v17568_v37  ;;  %v4059_v17 = vld [vmem:[#allocation2 + $0x21] sm:$0xff] }
 0x472   :  { %v15926_v38 = vpop.f32.mrb[210].mxu0 }
 0x473   :  { %17587 = vst [vmem:[#allocation11_spill] sm:$0xff] %v15926_v38  ;;  %v10678_v40 = vpop.f32.mrb[211].mxu0  ;;  %11178 = vmatmul.mubr.msk.f32.gmra.mrb[96].mxu1 %vm21_vm5, %v15437_v33  ;;  %11846 = vmatmul.mubr.msk.f32.gmra.mrb[60].mxu0 %vm21_vm5, %v15461_v24 }
 0x474   :  { %11180 = vmatprep.mubr.msk.f32.mxu1 %vm13389_vm1, %v17568_v37  ;;  %11848 = vmatprep.mubr.msk.f32.mxu0 %vm13389_vm1, %v17568_v37 }
 0x476   :  { %v2241_v63 = vpop.f32.mrb[212].mxu0 }
 0x477   :  { %v10681_v56 = vpop.f32.mrb[213].mxu0  ;;  %11181 = vmatmul.mubr.msk.f32.gmra.mrb[98].mxu1 %vm21_vm5, %v15446_v43  ;;  %11849 = vmatmul.mubr.msk.f32.gmra.mrb[62].mxu0 %vm21_vm5, %v5903_v28 }
 0x478   :  { %11183 = vmatprep.mubr.msk.f32.mxu1 %vm13389_vm1, %v17568_v37  ;;  %11851 = vmatprep.mubr.msk.f32.mxu0 %vm13389_vm1, %v17568_v37 }
 0x47a   :  { %v15943_v33 = vpop.f32.mrb[214].mxu0 }
 0x47b   :  { %17588 = vst [vmem:[#allocation12_spill] sm:$0xff] %v15943_v33  ;;  %v10684_v3 = vpop.f32.mrb[215].mxu0  ;;  %11184 = vmatmul.mubr.msk.f32.gmra.mrb[100].mxu1 %vm21_vm5, %v15461_v24  ;;  %11852 = vmatmul.mubr.msk.f32.gmra.mrb[64].mxu0 %vm21_vm5, %v5904_v55  ;;  %v4709_v24 = vld [vmem:[%s17519_s2 + $0xc0] sm:$0xff] }
 0x47c   :  { %11186 = vmatprep.mubr.msk.f32.mxu1 %vm13389_vm1, %v17568_v37  ;;  %11854 = vmatprep.mubr.msk.f32.mxu0 %vm13389_vm1, %v17568_v37  ;;  %v12295_v47 = vpack.c.bf16 %v4710_v12, %v4709_v24  ;;  %v4061_v3 = vld [vmem:[#allocation2 + $0x31] sm:$0xff]  ;;  %v4062_v24 = vld [vmem:[#allocation2 + $0x39] sm:$0xff] }
 0x47e   :  { %v15952_v43 = vpop.f32.mrb[216].mxu0 }
 0x47f   :  { %17589 = vst [vmem:[#allocation13_spill] sm:$0xff] %v15952_v43  ;;  %v10687_v13 = vpop.f32.mrb[217].mxu0  ;;  %11187 = vmatmul.mubr.msk.f32.gmra.mrb[102].mxu1 %vm21_vm5, %v5903_v28  ;;  %11855 = vmatmul.mubr.msk.f32.gmra.mrb[66].mxu0 %vm21_vm5, %v5905_v25  ;;  %v4060_v28 = vld [vmem:[#allocation2 + $0x29] sm:$0xff] }
 0x480   :  { %11189 = vmatprep.mubr.msk.f32.mxu1 %vm13389_vm1, %v17568_v37  ;;  %11868 = vmatprep.mubr.msk.f32.mxu0 %vm13389_vm1, %v17568_v37 }
 0x482   :  { %v15966_v18 = vpop.f32.mrb[218].mxu0 }
 0x483   :  { %17590 = vst [vmem:[#allocation14_spill] sm:$0xff] %v15966_v18  ;;  %v10690_v39 = vpop.f32.mrb[219].mxu0  ;;  %11190 = vmatmul.mubr.msk.f32.gmra.mrb[104].mxu1 %vm21_vm5, %v5904_v55 }
 0x484   :  { %11200 = vmatprep.mubr.msk.f32.mxu1 %vm13389_vm1, %v17568_v37 }
 0x486   :  { %v15977_v52 = vpop.f32.mrb[220].mxu0 }
 0x487   :  { %11201 = vmatmul.mubr.msk.f32.vlgmr.msra.gmra.mrb[0].mxu1 %vm21_vm5, %v4057_v41  ;;  %v11703_v62 = vpop.f32.mrb[221].mxu0  ;;  %v4064_v41 = vld [vmem:[#allocation2 + $0x49] sm:$0xff] }
 0x488   :  { %12296 = vmatpush3.bf16.msra.mxu1 %v12295_v47  ;;  %11203 = vmatprep.mubr.msk.f32.mxu1 %vm13389_vm1, %v17568_v37  ;;  %v4063_v47 = vld [vmem:[#allocation2 + $0x41] sm:$0xff] }
 0x489   :  { %12297 = vmatprep.subr.bf16.mxu1 %v17571_v32 }
 0x48a   :  { %v15983_v34 = vpop.f32.mrb[222].mxu0 }
 0x48b   :  { %11204 = vmatmul.mubr.msk.f32.gmra.mrb[2].mxu1 %vm21_vm5, %v4058_v9  ;;  %v11706_v15 = vpop.f32.mrb[223].mxu0  ;;  %v4065_v9 = vld [vmem:[#allocation2 + $0x51] sm:$0xff] }
 0x48c   :  { %11206 = vmatprep.mubr.msk.f32.mxu1 %vm13389_vm1, %v17568_v37  ;;  %12299 = vmatpush3.bf16.msra.mxu1 %v12298_v36 }
 0x48d   :  { %12300 = vmatprep.subr.bf16.mxu1 %v17571_v32 }
 0x48e   :  { %v6146_v57 = vpop.f32.mrb[224].mxu0 }
 0x48f   :  { %11207 = vmatmul.mubr.msk.f32.gmra.mrb[4].mxu1 %vm21_vm5, %v4059_v17  ;;  %v11709_v40 = vpop.f32.mrb[225].mxu0  ;;  %v4066_v17 = vld [vmem:[#allocation2 + $0x59] sm:$0xff] }
 0x490   :  { %11209 = vmatprep.mubr.msk.f32.mxu1 %vm13389_vm1, %v17568_v37 }
 0x492   :  { %v15992_v63 = vpop.f32.mrb[226].mxu0 }
 0x493   :  { %11210 = vmatmul.mubr.msk.f32.gmra.mrb[6].mxu1 %vm21_vm5, %v4060_v28  ;;  %v11712_v56 = vpop.f32.mrb[227].mxu0 }
 0x494   :  { %11212 = vmatprep.mubr.msk.f32.mxu1 %vm13389_vm1, %v17568_v37  ;;  %v4067_v56 = vld [vmem:[#allocation2 + $0x61] sm:$0xff] }
 0x496   :  { %v15997_v55 = vpop.f32.mrb[228].mxu0 }
 0x497   :  { %11213 = vmatmul.mubr.msk.f32.gmra.mrb[8].mxu1 %vm21_vm5, %v4061_v3  ;;  %v11715_v25 = vpop.f32.mrb[229].mxu0 }
 0x498   :  { %11215 = vmatprep.mubr.msk.f32.mxu1 %vm13389_vm1, %v17568_v37 }
 0x49a   :  { %v16002_v13 = vpop.f32.mrb[230].mxu0 }
 0x49b   :  { %11216 = vmatmul.mubr.msk.f32.gmra.mrb[10].mxu1 %vm21_vm5, %v4062_v24  ;;  %v11718_v12 = vpop.f32.mrb[231].mxu0  ;;  %v4068_v24 = vld [vmem:[#allocation2 + $0x69] sm:$0xff] }
 0x49c   :  { %11218 = vmatprep.mubr.msk.f32.mxu1 %vm13389_vm1, %v17568_v37 }
 0x49e   :  { %v6166_v39 = vpop.f32.mrb[232].mxu0 }
 0x49f   :  { %11219 = vmatmul.mubr.msk.f32.gmra.mrb[12].mxu1 %vm21_vm5, %v4063_v47  ;;  %v11721_v31 = vpop.f32.mrb[233].mxu0  ;;  %v4069_v47 = vld [vmem:[#allocation2 + $0x71] sm:$0xff] }
 0x4a0   :  { %11221 = vmatprep.mubr.msk.f32.mxu1 %vm13389_vm1, %v17568_v37 }
 0x4a2   :  { %v16010_v21 = vpop.f32.mrb[234].mxu0 }
 0x4a3   :  { %11222 = vmatmul.mubr.msk.f32.gmra.mrb[14].mxu1 %vm21_vm5, %v4064_v41  ;;  %v11724_v62 = vpop.f32.mrb[235].mxu0 }
 0x4a4   :  { %11224 = vmatprep.mubr.msk.f32.mxu1 %vm13389_vm1, %v17568_v37  ;;  %v4070_v62 = vld [vmem:[#allocation2 + $0x79] sm:$0xff] }
 0x4a6   :  { %v16015_v36 = vpop.f32.mrb[236].mxu0 }
 0x4a7   :  { %11225 = vmatmul.mubr.msk.f32.gmra.mrb[16].mxu1 %vm21_vm5, %v4065_v9  ;;  %v11727_v15 = vpop.f32.mrb[237].mxu0 }
 0x4a8   :  { %11227 = vmatprep.mubr.msk.f32.mxu1 %vm13389_vm1, %v17568_v37 }
 0x4aa   :  { %v16020_v57 = vpop.f32.mrb[238].mxu0 }
 0x4ab   :  { %11228 = vmatmul.mubr.msk.f32.gmra.mrb[18].mxu1 %vm21_vm5, %v4066_v17  ;;  %v11730_v40 = vpop.f32.mrb[239].mxu0  ;;  %v4071_v17 = vld [vmem:[#allocation2 + $0x81] sm:$0xff] }
 0x4ac   :  { %11230 = vmatprep.mubr.msk.f32.mxu1 %vm13389_vm1, %v17568_v37 }
 0x4ae   :  { %v6186_v28 = vpop.f32.mrb[240].mxu0 }
 0x4af   :  { %11231 = vmatmul.mubr.msk.f32.gmra.mrb[20].mxu1 %vm21_vm5, %v4067_v56  ;;  %v11733_v3 = vpop.f32.mrb[241].mxu0  ;;  %v4072_v56 = vld [vmem:[#allocation2 + $0x89] sm:$0xff] }
 0x4b0   :  { %11233 = vmatprep.mubr.msk.f32.mxu1 %vm13389_vm1, %v17568_v37 }
 0x4b2   :  { %v16028_v25 = vpop.f32.mrb[242].mxu0 }
 0x4b3   :  { %11234 = vmatmul.mubr.msk.f32.gmra.mrb[22].mxu1 %vm21_vm5, %v4068_v24  ;;  %v11736_v12 = vpop.f32.mrb[243].mxu0 }
 0x4b4   :  { %11236 = vmatprep.mubr.msk.f32.mxu1 %vm13389_vm1, %v17568_v37  ;;  %v4073_v12 = vld [vmem:[#allocation2 + $0x91] sm:$0xff] }
 0x4b6   :  { %v16033_v39 = vpop.f32.mrb[244].mxu0 }
 0x4b7   :  { %11237 = vmatmul.mubr.msk.f32.gmra.mrb[24].mxu1 %vm21_vm5, %v4069_v47  ;;  %v11739_v31 = vpop.f32.mrb[245].mxu0 }
 0x4b8   :  { %11239 = vmatprep.mubr.msk.f32.mxu1 %vm13389_vm1, %v17568_v37 }
 0x4ba   :  { %v6201_v41 = vpop.f32.mrb[246].mxu0 }
 0x4bb   :  { %11240 = vmatmul.mubr.msk.f32.gmra.mrb[26].mxu1 %vm21_vm5, %v4070_v62  ;;  %v11742_v9 = vpop.f32.mrb[247].mxu0  ;;  %v4074_v41 = vld [vmem:[#allocation2 + $0x99] sm:$0xff] }
 0x4bc   :  { %11242 = vmatprep.mubr.msk.f32.mxu1 %vm13389_vm1, %v17568_v37 }
 0x4be   :  { %v6206_v15 = vpop.f32.mrb[248].mxu0 }
 0x4bf   :  { %11243 = vmatmul.mubr.msk.f32.gmra.mrb[28].mxu1 %vm21_vm5, %v4071_v17  ;;  %v11745_v40 = vpop.f32.mrb[249].mxu0  ;;  %v4075_v15 = vld [vmem:[#allocation2 + $0xa1] sm:$0xff] }
 0x4c0   :  { %11245 = vmatprep.mubr.msk.f32.mxu1 %vm13389_vm1, %v17568_v37 }
 0x4c2   :  { %v16044_v28 = vpop.f32.mrb[250].mxu0 }
 0x4c3   :  { %11246 = vmatmul.mubr.msk.f32.gmra.mrb[30].mxu1 %vm21_vm5, %v4072_v56  ;;  %v11748_v3 = vpop.f32.mrb[251].mxu0  ;;  %v4076_v56 = vld [vmem:[#allocation2 + $0xa9] sm:$0xff] }
 0x4c4   :  { %11248 = vmatprep.mubr.msk.f32.mxu1 %vm13389_vm1, %v17568_v37 }
 0x4c6   :  { %v16049_v24 = vpop.f32.mrb[252].mxu0 }
 0x4c7   :  { %11249 = vmatmul.mubr.msk.f32.gmra.mrb[32].mxu1 %vm21_vm5, %v4073_v12  ;;  %v11751_v47 = vpop.f32.mrb[253].mxu0 }
 0x4c8   :  { %11251 = vmatprep.mubr.msk.f32.mxu1 %vm13389_vm1, %v17568_v37  ;;  %v4077_v47 = vld [vmem:[#allocation2 + $0xb1] sm:$0xff] }
 0x4ca   :  { %v6221_v31 = vpop.f32.mrb[254].mxu0 }
 0x4cb   :  { %11252 = vmatmul.mubr.msk.f32.gmra.mrb[34].mxu1 %vm21_vm5, %v4074_v41  ;;  %v11754_v62 = vpop.f32.mrb[255].mxu0 }
 0x4cc   :  { %11254 = vmatprep.mubr.msk.f32.mxu1 %vm13389_vm1, %v17568_v37  ;;  %v4078_v62 = vld [vmem:[#allocation2 + $0xb9] sm:$0xff] }
 0x4ce   :  { %v16057_v9 = vpop.f32.mrb[0].mxu0 }
 0x4cf   :  { %11255 = vmatmul.mubr.msk.f32.gmra.mrb[36].mxu1 %vm21_vm5, %v4075_v15  ;;  %v11757_v17 = vpop.f32.mrb[1].mxu0 }
 0x4d0   :  { %11257 = vmatprep.mubr.msk.f32.mxu1 %vm13389_vm1, %v17568_v37 }
 0x4d2   :  { %v16062_v40 = vpop.f32.mrb[2].mxu0 }
 0x4d3   :  { %11258 = vmatmul.mubr.msk.f32.gmra.mrb[38].mxu1 %vm21_vm5, %v4076_v56  ;;  %v11760_v3 = vpop.f32.mrb[3].mxu0  ;;  %v4079_v56 = vld [vmem:[#allocation2 + $0xc1] sm:$0xff] }
 0x4d4   :  { %11260 = vmatprep.mubr.msk.f32.mxu1 %vm13389_vm1, %v17568_v37 }
 0x4d6   :  { %v16067_v12 = vpop.f32.mrb[4].mxu0 }
 0x4d7   :  { %11261 = vmatmul.mubr.msk.f32.gmra.mrb[40].mxu1 %vm21_vm5, %v4077_v47  ;;  %v11763_v31 = vpop.f32.mrb[5].mxu0 }
 0x4d8   :  { %11263 = vmatprep.mubr.msk.f32.mxu1 %vm13389_vm1, %v17568_v37  ;;  %v4080_v31 = vld [vmem:[#allocation2 + $0xc9] sm:$0xff] }
 0x4da   :  { %v6241_v41 = vpop.f32.mrb[6].mxu0 }
 0x4db   :  { %11264 = vmatmul.mubr.msk.f32.gmra.mrb[42].mxu1 %vm21_vm5, %v4078_v62  ;;  %v11766_v15 = vpop.f32.mrb[7].mxu0 }
 0x4dc   :  { %11266 = vmatprep.mubr.msk.f32.mxu1 %vm13389_vm1, %v17568_v37  ;;  %v4081_v15 = vld [vmem:[#allocation2 + $0xd1] sm:$0xff] }
 0x4de   :  { %v16075_v17 = vpop.f32.mrb[8].mxu0 }
 0x4df   :  { %11267 = vmatmul.mubr.msk.f32.gmra.mrb[44].mxu1 %vm21_vm5, %v4079_v56  ;;  %v11769_v3 = vpop.f32.mrb[9].mxu0 }
 0x4e0   :  { %11269 = vmatprep.mubr.msk.f32.mxu1 %vm13389_vm1, %v17568_v37  ;;  %v4082_v3 = vld [vmem:[#allocation2 + $0xd9] sm:$0xff] }
 0x4e2   :  { %v16080_v47 = vpop.f32.mrb[10].mxu0 }
 0x4e3   :  { %11270 = vmatmul.mubr.msk.f32.gmra.mrb[46].mxu1 %vm21_vm5, %v4080_v31  ;;  %v11772_v41 = vpop.f32.mrb[11].mxu0 }
 0x4e4   :  { %11272 = vmatprep.mubr.msk.f32.mxu1 %vm13389_vm1, %v17568_v37  ;;  %v4083_v41 = vld [vmem:[#allocation2 + $0xe1] sm:$0xff] }
 0x4e6   :  { %v16085_v62 = vpop.f32.mrb[12].mxu0 }
 0x4e7   :  { %11273 = vmatmul.mubr.msk.f32.gmra.mrb[48].mxu1 %vm21_vm5, %v4081_v15  ;;  %v11775_v16 = vpop.f32.mrb[13].mxu0  ;;  %v4084_v15 = vld [vmem:[#allocation2 + $0xe9] sm:$0xff] }
 0x4e8   :  { %11275 = vmatprep.mubr.msk.f32.mxu1 %vm13389_vm1, %v17568_v37 }
 0x4ea   :  { %v6261_v56 = vpop.f32.mrb[14].mxu0 }
 0x4eb   :  { %11276 = vmatmul.mubr.msk.f32.gmra.mrb[50].mxu1 %vm21_vm5, %v4082_v3  ;;  %v11778_v18 = vpop.f32.mrb[15].mxu0  ;;  %v4085_v3 = vld [vmem:[#allocation2 + $0xf1] sm:$0xff] }
 0x4ec   :  { %11278 = vmatprep.mubr.msk.f32.mxu1 %vm13389_vm1, %v17568_v37 }
 0x4ee   :  { %v6266_v31 = vpop.f32.mrb[16].mxu0 }
 0x4ef   :  { %11279 = vmatmul.mubr.msk.f32.gmra.mrb[52].mxu1 %vm21_vm5, %v4083_v41  ;;  %v11781_v43 = vpop.f32.mrb[17].mxu0  ;;  %v4086_v41 = vld [vmem:[#allocation2 + $0xf9] sm:$0xff] }
 0x4f0   :  { %11281 = vmatprep.mubr.msk.f32.mxu1 %vm13389_vm1, %v17568_v37 }
 0x4f2   :  { %v6271_v16 = vpop.f32.mrb[18].mxu0 }
 0x4f3   :  { %11282 = vmatmul.mubr.msk.f32.gmra.mrb[54].mxu1 %vm21_vm5, %v4084_v15  ;;  %v11784_v56 = vpop.f32.mrb[19].mxu0 }
 0x4f4   :  { %11284 = vmatprep.mubr.msk.f32.mxu1 %vm13389_vm1, %v17568_v37  ;;  %v4087_v56 = vld [vmem:[#allocation2 + $0x101] sm:$0xff] }
 0x4f6   :  { %v16099_v18 = vpop.f32.mrb[20].mxu0 }
 0x4f7   :  { %11285 = vmatmul.mubr.msk.f32.gmra.mrb[56].mxu1 %vm21_vm5, %v4085_v3  ;;  %v11787_v31 = vpop.f32.mrb[21].mxu0 }
 0x4f8   :  { %11287 = vmatprep.mubr.msk.f32.mxu1 %vm13389_vm1, %v17568_v37  ;;  %v4088_v31 = vld [vmem:[#allocation2 + $0x109] sm:$0xff] }
 0x4fa   :  { %v16104_v43 = vpop.f32.mrb[22].mxu0 }
 0x4fb   :  { %11288 = vmatmul.mubr.msk.f32.gmra.mrb[58].mxu1 %vm21_vm5, %v4086_v41  ;;  %v11790_v16 = vpop.f32.mrb[23].mxu0 }
 0x4fc   :  { %11290 = vmatprep.mubr.msk.f32.mxu1 %vm13389_vm1, %v17568_v37  ;;  %v4089_v16 = vld [vmem:[#allocation2 + $0x111] sm:$0xff] }
 0x4fe   :  { %v6286_v15 = vpop.f32.mrb[24].mxu0 }
 0x4ff   :  { %11291 = vmatmul.mubr.msk.f32.gmra.mrb[60].mxu1 %vm21_vm5, %v4087_v56  ;;  %v11793_v33 = vpop.f32.mrb[25].mxu0  ;;  %v4090_v56 = vld [vmem:[#allocation2 + $0x119] sm:$0xff] }
 0x500   :  { %11293 = vmatprep.mubr.msk.f32.mxu1 %vm13389_vm1, %v17568_v37 }
 0x502   :  { %v16112_v3 = vpop.f32.mrb[26].mxu0 }
 0x503   :  { %11294 = vmatmul.mubr.msk.f32.gmra.mrb[62].mxu1 %vm21_vm5, %v4088_v31  ;;  %v11796_v38 = vpop.f32.mrb[27].mxu0  ;;  %v4091_v31 = vld [vmem:[#allocation2 + $0x121] sm:$0xff] }
 0x504   :  { %11296 = vmatprep.mubr.msk.f32.mxu1 %vm13389_vm1, %v17568_v37 }
 0x506   :  { %v16117_v41 = vpop.f32.mrb[28].mxu0 }
 0x507   :  { %11297 = vmatmul.mubr.msk.f32.gmra.mrb[64].mxu1 %vm21_vm5, %v4089_v16  ;;  %v11799_v15 = vpop.f32.mrb[29].mxu0 }
 0x508   :  { %11299 = vmatprep.mubr.msk.f32.mxu1 %vm13389_vm1, %v17568_v37  ;;  %v4092_v15 = vld [vmem:[#allocation2 + $0x129] sm:$0xff] }
 0x50a   :  { %v16122_v33 = vpop.f32.mrb[30].mxu0 }
 0x50b   :  { %11300 = vmatmul.mubr.msk.f32.gmra.mrb[66].mxu1 %vm21_vm5, %v4090_v56  ;;  %v11802_v26 = vpop.f32.mrb[31].mxu0  ;;  %v4093_v56 = vld [vmem:[#allocation2 + $0x131] sm:$0xff] }
 0x50c   :  { %11302 = vmatprep.mubr.msk.f32.mxu1 %vm13389_vm1, %v17568_v37 }
 0x50e   :  { %v6306_v38 = vpop.f32.mrb[32].mxu0 }
 0x50f   :  { %11303 = vmatmul.mubr.msk.f32.gmra.mrb[68].mxu1 %vm21_vm5, %v4091_v31  ;;  %v11805_v27 = vpop.f32.mrb[33].mxu0  ;;  %v4094_v31 = vld [vmem:[#allocation2 + $0x139] sm:$0xff] }
 0x510   :  { %11305 = vmatprep.mubr.msk.f32.mxu1 %vm13389_vm1, %v17568_v37 }
 0x512   :  { %v16130_v16 = vpop.f32.mrb[34].mxu0 }
 0x513   :  { %11306 = vmatmul.mubr.msk.f32.gmra.mrb[70].mxu1 %vm21_vm5, %v4092_v15  ;;  %v11808_v2 = vpop.f32.mrb[35].mxu0  ;;  %v4095_v15 = vld [vmem:[#allocation2 + $0x141] sm:$0xff] }
 0x514   :  { %11308 = vmatprep.mubr.msk.f32.mxu1 %vm13389_vm1, %v17568_v37 }
 0x516   :  { %v16135_v26 = vpop.f32.mrb[36].mxu0 }
 0x517   :  { %11309 = vmatmul.mubr.msk.f32.gmra.mrb[72].mxu1 %vm21_vm5, %v4093_v56  ;;  %v11811_v38 = vpop.f32.mrb[37].mxu0 }
 0x518   :  { %11311 = vmatprep.mubr.msk.f32.mxu1 %vm13389_vm1, %v17568_v37  ;;  %v4096_v38 = vld [vmem:[#allocation2 + $0x149] sm:$0xff] }
 0x51a   :  { %v16140_v27 = vpop.f32.mrb[38].mxu0 }
 0x51b   :  { %17591 = vst [vmem:[#allocation15_spill] sm:$0xff] %v16140_v27  ;;  %11312 = vmatmul.mubr.msk.f32.gmra.mrb[74].mxu1 %vm21_vm5, %v4094_v31  ;;  %v11814_v7 = vpop.f32.mrb[39].mxu0  ;;  %v4097_v31 = vld [vmem:[#allocation2 + $0x151] sm:$0xff] }
 0x51c   :  { %11314 = vmatprep.mubr.msk.f32.mxu1 %vm13389_vm1, %v17568_v37 }
 0x51e   :  { %v6326_v2 = vpop.f32.mrb[40].mxu0 }
 0x51f   :  { %11315 = vmatmul.mubr.msk.f32.gmra.mrb[76].mxu1 %vm21_vm5, %v4095_v15  ;;  %v11817_v61 = vpop.f32.mrb[41].mxu0  ;;  %v4098_v15 = vld [vmem:[#allocation2 + $0x159] sm:$0xff] }
 0x520   :  { %11317 = vmatprep.mubr.msk.f32.mxu1 %vm13389_vm1, %v17568_v37 }
 0x522   :  { %v16148_v56 = vpop.f32.mrb[42].mxu0 }
 0x523   :  { %17592 = vst [vmem:[#allocation16_spill] sm:$0xff] %v16148_v56  ;;  %11318 = vmatmul.mubr.msk.f32.gmra.mrb[78].mxu1 %vm21_vm5, %v4096_v38  ;;  %v11820_v42 = vpop.f32.mrb[43].mxu0  ;;  %v4099_v38 = vld [vmem:[#allocation2 + $0x161] sm:$0xff] }
 0x524   :  { %11320 = vmatprep.mubr.msk.f32.mxu1 %vm13389_vm1, %v17568_v37 }
 0x526   :  { %v16153_v7 = vpop.f32.mrb[44].mxu0 }
 0x527   :  { %17593 = vst [vmem:[#allocation17_spill] sm:$0xff] %v16153_v7  ;;  %11321 = vmatmul.mubr.msk.f32.gmra.mrb[80].mxu1 %vm21_vm5, %v4097_v31  ;;  %v11823_v2 = vpop.f32.mrb[45].mxu0 }
 0x528   :  { %11323 = vmatprep.mubr.msk.f32.mxu1 %vm13389_vm1, %v17568_v37  ;;  %v4100_v2 = vld [vmem:[#allocation2 + $0x169] sm:$0xff] }
 0x52a   :  { %v6341_v61 = vpop.f32.mrb[46].mxu0 }
 0x52b   :  { %11324 = vmatmul.mubr.msk.f32.gmra.mrb[82].mxu1 %vm21_vm5, %v4098_v15  ;;  %v11826_v56 = vpop.f32.mrb[47].mxu0  ;;  %v4101_v15 = vld [vmem:[#allocation2 + $0x171] sm:$0xff] }
 0x52c   :  { %11326 = vmatprep.mubr.msk.f32.mxu1 %vm13389_vm1, %v17568_v37 }
 0x52e   :  { %v6346_v42 = vpop.f32.mrb[48].mxu0 }
 0x52f   :  { %11327 = vmatmul.mubr.msk.f32.gmra.mrb[84].mxu1 %vm21_vm5, %v4099_v38  ;;  %v11829_v7 = vpop.f32.mrb[49].mxu0  ;;  %v4102_v38 = vld [vmem:[#allocation2 + $0x179] sm:$0xff] }
 0x530   :  { %11329 = vmatprep.mubr.msk.f32.mxu1 %vm13389_vm1, %v17568_v37 }
 0x532   :  { %v16164_v31 = vpop.f32.mrb[50].mxu0 }
 0x533   :  { %17594 = vst [vmem:[#allocation18_spill] sm:$0xff] %v16164_v31  ;;  %11330 = vmatmul.mubr.msk.f32.gmra.mrb[86].mxu1 %vm21_vm5, %v4100_v2  ;;  %v11832_v61 = vpop.f32.mrb[51].mxu0 }
 0x534   :  { %11332 = vmatprep.mubr.msk.f32.mxu1 %vm13389_vm1, %v17568_v37  ;;  %v4103_v61 = vld [vmem:[#allocation2 + $0x181] sm:$0xff] }
 0x536   :  { %v16169_v56 = vpop.f32.mrb[52].mxu0 }
 0x537   :  { %17595 = vst [vmem:[#allocation19_spill] sm:$0xff] %v16169_v56  ;;  %11333 = vmatmul.mubr.msk.f32.gmra.mrb[88].mxu1 %vm21_vm5, %v4101_v15  ;;  %v11835_v42 = vpop.f32.mrb[53].mxu0 }
 0x538   :  { %11335 = vmatprep.mubr.msk.f32.mxu1 %vm13389_vm1, %v17568_v37  ;;  %v4104_v42 = vld [vmem:[#allocation2 + $0x189] sm:$0xff] }
 0x53a   :  { %v6361_v7 = vpop.f32.mrb[54].mxu0 }
 0x53b   :  { %11336 = vmatmul.mubr.msk.f32.gmra.mrb[90].mxu1 %vm21_vm5, %v4102_v38  ;;  %v11838_v31 = vpop.f32.mrb[55].mxu0  ;;  %v4105_v38 = vld [vmem:[#allocation2 + $0x191] sm:$0xff] }
 0x53c   :  { %11338 = vmatprep.mubr.msk.f32.mxu1 %vm13389_vm1, %v17568_v37 }
 0x53e   :  { %v16177_v2 = vpop.f32.mrb[56].mxu0 }
 0x53f   :  { %17596 = vst [vmem:[#allocation20_spill] sm:$0xff] %v16177_v2  ;;  %11339 = vmatmul.mubr.msk.f32.gmra.mrb[92].mxu1 %vm21_vm5, %v4103_v61  ;;  %v11841_v56 = vpop.f32.mrb[57].mxu0  ;;  %v4106_v61 = vld [vmem:[#allocation2 + $0x199] sm:$0xff] }
 0x540   :  { %11341 = vmatprep.mubr.msk.f32.mxu1 %vm13389_vm1, %v17568_v37 }
 0x542   :  { %v16182_v15 = vpop.f32.mrb[58].mxu0 }
 0x543   :  { %17597 = vst [vmem:[#allocation27_spill] sm:$0xff] %v16182_v15  ;;  %11342 = vmatmul.mubr.msk.f32.gmra.mrb[94].mxu1 %vm21_vm5, %v4104_v42  ;;  %v11844_v7 = vpop.f32.mrb[59].mxu0 }
 0x544   :  { %11344 = vmatprep.mubr.msk.f32.mxu1 %vm13389_vm1, %v17568_v37  ;;  %v4107_v7 = vld [vmem:[#allocation2 + $0x1a1] sm:$0xff] }
 0x546   :  { %v16187_v31 = vpop.f32.mrb[60].mxu0 }
 0x547   :  { %17598 = vst [vmem:[#allocation28_spill] sm:$0xff] %v16187_v31  ;;  %11345 = vmatmul.mubr.msk.f32.gmra.mrb[96].mxu1 %vm21_vm5, %v4105_v38  ;;  %v11847_v2 = vpop.f32.mrb[61].mxu0  ;;  %v4108_v38 = vld [vmem:[#allocation2 + $0x1a9] sm:$0xff] }
 0x548   :  { %11347 = vmatprep.mubr.msk.f32.mxu1 %vm13389_vm1, %v17568_v37 }
 0x54a   :  { %v6381_v56 = vpop.f32.mrb[62].mxu0 }
 0x54b   :  { %11348 = vmatmul.mubr.msk.f32.gmra.mrb[98].mxu1 %vm21_vm5, %v4106_v61  ;;  %v11850_v15 = vpop.f32.mrb[63].mxu0  ;;  %v4109_v61 = vld [vmem:[#allocation2 + $0x1b1] sm:$0xff] }
 0x54c   :  { %11350 = vmatprep.mubr.msk.f32.mxu1 %vm13389_vm1, %v17568_v37  ;;  %v5308_v15 = vld [vmem:[%s17519_s2 + $0xe0] sm:$0xff] }
 0x54e   :  { %v16195_v42 = vpop.f32.mrb[64].mxu0 }
 0x54f   :  { %17599 = vst [vmem:[#allocation29_spill] sm:$0xff] %v16195_v42  ;;  %11351 = vmatmul.mubr.msk.f32.gmra.mrb[100].mxu1 %vm21_vm5, %v4107_v7  ;;  %v11853_v31 = vpop.f32.mrb[65].mxu0  ;;  %v4657_v42 = vld [vmem:[#allocation2 + $0x26] sm:$0xff] }
 0x550   :  { %11353 = vmatprep.mubr.msk.f32.mxu1 %vm13389_vm1, %v17568_v37  ;;  %v5309_v31 = vld [vmem:[%s17519_s2 + $0xe8] sm:$0xff] }
 0x551   :  { %v12301_v7 = vpack.c.bf16 %v5309_v31, %v5308_v15  ;;  %v4658_v15 = vld [vmem:[#allocation2 + $0x2e] sm:$0xff]  ;;  %v4660_v31 = vld [vmem:[#allocation2 + $0x3e] sm:$0xff] }
 0x552   :  { %v16200_v2 = vpop.f32.mrb[66].mxu0 }
 0x553   :  { %17600 = vst [vmem:[#allocation30_spill] sm:$0xff] %v16200_v2  ;;  %11354 = vmatmul.mubr.msk.f32.gmra.mrb[102].mxu1 %vm21_vm5, %v4108_v38  ;;  %v11856_v56 = vpop.f32.mrb[67].mxu0  ;;  %v5310_v38 = vld [vmem:[%s17519_s2 + $0xf0] sm:$0xff]  ;;  %v4656_v2 = vld [vmem:[#allocation2 + $0x1e] sm:$0xff] }
 0x554   :  { %11356 = vmatprep.mubr.msk.f32.mxu1 %vm13389_vm1, %v17568_v37  ;;  %v5311_v56 = vld [vmem:[%s17519_s2 + $0xf8] sm:$0xff] }
 0x557   :  { %11357 = vmatmul.mubr.msk.f32.gmra.mrb[104].mxu1 %vm21_vm5, %v4109_v61  ;;  %v12304_v61 = vpack.c.bf16 %v5311_v56, %v5310_v38  ;;  %v4663_v38 = vld [vmem:[#allocation2 + $0x56] sm:$0xff]  ;;  %v4664_v56 = vld [vmem:[#allocation2 + $0x5e] sm:$0xff] }
 0x558   :  { %11367 = vmatprep.mubr.msk.f32.mxu1 %vm13389_vm1, %v17568_v37 }
 0x55b   :  { %11368 = vmatmul.mubr.msk.f32.vlgmr.msra.gmra.mrb[0].mxu1 %vm21_vm5, %v4656_v2  ;;  %v4659_v2 = vld [vmem:[#allocation2 + $0x36] sm:$0xff] }
 0x55c   :  { %12302 = vmatpush3.bf16.msra.mxu1 %v12301_v7  ;;  %11370 = vmatprep.mubr.msk.f32.mxu1 %vm13389_vm1, %v17568_v37  ;;  %v4662_v7 = vld [vmem:[#allocation2 + $0x4e] sm:$0xff] }
 0x55d   :  { %12303 = vmatprep.subr.bf16.mxu1 %v17571_v32 }
 0x55f   :  { %11371 = vmatmul.mubr.msk.f32.gmra.mrb[2].mxu1 %vm21_vm5, %v4657_v42  ;;  %v4661_v42 = vld [vmem:[#allocation2 + $0x46] sm:$0xff] }
 0x560   :  { %11373 = vmatprep.mubr.msk.f32.mxu1 %vm13389_vm1, %v17568_v37  ;;  %12305 = vmatpush3.bf16.msra.mxu1 %v12304_v61  ;;  %v4665_v61 = vld [vmem:[#allocation2 + $0x66] sm:$0xff] }
 0x561   :  { %12410 = vmatprep.subr.bf16.mxu1 %v17571_v32 }
 0x563   :  { %11374 = vmatmul.mubr.msk.f32.gmra.mrb[4].mxu1 %vm21_vm5, %v4658_v15  ;;  %v4666_v15 = vld [vmem:[#allocation2 + $0x6e] sm:$0xff] }
 0x564   :  { %11376 = vmatprep.mubr.msk.f32.mxu1 %vm13389_vm1, %v17568_v37 }
 0x567   :  { %11377 = vmatmul.mubr.msk.f32.gmra.mrb[6].mxu1 %vm21_vm5, %v4659_v2  ;;  %v4667_v2 = vld [vmem:[#allocation2 + $0x76] sm:$0xff] }
 0x568   :  { %11379 = vmatprep.mubr.msk.f32.mxu1 %vm13389_vm1, %v17568_v37 }
 0x56b   :  { %11380 = vmatmul.mubr.msk.f32.gmra.mrb[8].mxu1 %vm21_vm5, %v4660_v31  ;;  %v4668_v31 = vld [vmem:[#allocation2 + $0x7e] sm:$0xff] }
 0x56c   :  { %11382 = vmatprep.mubr.msk.f32.mxu1 %vm13389_vm1, %v17568_v37 }
 0x56f   :  { %11383 = vmatmul.mubr.msk.f32.gmra.mrb[10].mxu1 %vm21_vm5, %v4661_v42  ;;  %v4669_v42 = vld [vmem:[#allocation2 + $0x86] sm:$0xff] }
 0x570   :  { %11385 = vmatprep.mubr.msk.f32.mxu1 %vm13389_vm1, %v17568_v37 }
 0x573   :  { %11386 = vmatmul.mubr.msk.f32.gmra.mrb[12].mxu1 %vm21_vm5, %v4662_v7  ;;  %v4670_v7 = vld [vmem:[#allocation2 + $0x8e] sm:$0xff] }
 0x574   :  { %11388 = vmatprep.mubr.msk.f32.mxu1 %vm13389_vm1, %v17568_v37 }
 0x577   :  { %11389 = vmatmul.mubr.msk.f32.gmra.mrb[14].mxu1 %vm21_vm5, %v4663_v38  ;;  %v4671_v38 = vld [vmem:[#allocation2 + $0x96] sm:$0xff] }
 0x578   :  { %11391 = vmatprep.mubr.msk.f32.mxu1 %vm13389_vm1, %v17568_v37 }
 0x57b   :  { %11392 = vmatmul.mubr.msk.f32.gmra.mrb[16].mxu1 %vm21_vm5, %v4664_v56  ;;  %v4672_v56 = vld [vmem:[#allocation2 + $0x9e] sm:$0xff] }
 0x57c   :  { %11394 = vmatprep.mubr.msk.f32.mxu1 %vm13389_vm1, %v17568_v37 }
 0x57f   :  { %11395 = vmatmul.mubr.msk.f32.gmra.mrb[18].mxu1 %vm21_vm5, %v4665_v61  ;;  %v4673_v61 = vld [vmem:[#allocation2 + $0xa6] sm:$0xff] }
 0x580   :  { %11397 = vmatprep.mubr.msk.f32.mxu1 %vm13389_vm1, %v17568_v37 }
 0x583   :  { %11398 = vmatmul.mubr.msk.f32.gmra.mrb[20].mxu1 %vm21_vm5, %v4666_v15  ;;  %v4674_v15 = vld [vmem:[#allocation2 + $0xae] sm:$0xff] }
 0x584   :  { %11400 = vmatprep.mubr.msk.f32.mxu1 %vm13389_vm1, %v17568_v37 }
 0x587   :  { %11401 = vmatmul.mubr.msk.f32.gmra.mrb[22].mxu1 %vm21_vm5, %v4667_v2  ;;  %v4675_v2 = vld [vmem:[#allocation2 + $0xb6] sm:$0xff] }
 0x588   :  { %11403 = vmatprep.mubr.msk.f32.mxu1 %vm13389_vm1, %v17568_v37 }
 0x58b   :  { %11404 = vmatmul.mubr.msk.f32.gmra.mrb[24].mxu1 %vm21_vm5, %v4668_v31  ;;  %v4676_v31 = vld [vmem:[#allocation2 + $0xbe] sm:$0xff] }
 0x58c   :  { %11406 = vmatprep.mubr.msk.f32.mxu1 %vm13389_vm1, %v17568_v37 }
 0x58f   :  { %11407 = vmatmul.mubr.msk.f32.gmra.mrb[26].mxu1 %vm21_vm5, %v4669_v42  ;;  %v4677_v42 = vld [vmem:[#allocation2 + $0xc6] sm:$0xff] }
 0x590   :  { %11409 = vmatprep.mubr.msk.f32.mxu1 %vm13389_vm1, %v17568_v37 }
 0x593   :  { %11410 = vmatmul.mubr.msk.f32.gmra.mrb[28].mxu1 %vm21_vm5, %v4670_v7  ;;  %v4678_v7 = vld [vmem:[#allocation2 + $0xce] sm:$0xff] }
 0x594   :  { %11412 = vmatprep.mubr.msk.f32.mxu1 %vm13389_vm1, %v17568_v37 }
 0x597   :  { %11413 = vmatmul.mubr.msk.f32.gmra.mrb[30].mxu1 %vm21_vm5, %v4671_v38  ;;  %v4679_v38 = vld [vmem:[#allocation2 + $0xd6] sm:$0xff] }
 0x598   :  { %11415 = vmatprep.mubr.msk.f32.mxu1 %vm13389_vm1, %v17568_v37 }
 0x59b   :  { %11416 = vmatmul.mubr.msk.f32.gmra.mrb[32].mxu1 %vm21_vm5, %v4672_v56  ;;  %v4680_v56 = vld [vmem:[#allocation2 + $0xde] sm:$0xff] }
 0x59c   :  { %11418 = vmatprep.mubr.msk.f32.mxu1 %vm13389_vm1, %v17568_v37 }
 0x59f   :  { %11419 = vmatmul.mubr.msk.f32.gmra.mrb[34].mxu1 %vm21_vm5, %v4673_v61  ;;  %v4681_v61 = vld [vmem:[#allocation2 + $0xe6] sm:$0xff] }
 0x5a0   :  { %11421 = vmatprep.mubr.msk.f32.mxu1 %vm13389_vm1, %v17568_v37 }
 0x5a3   :  { %11422 = vmatmul.mubr.msk.f32.gmra.mrb[36].mxu1 %vm21_vm5, %v4674_v15  ;;  %v4682_v15 = vld [vmem:[#allocation2 + $0xee] sm:$0xff] }
 0x5a4   :  { %11424 = vmatprep.mubr.msk.f32.mxu1 %vm13389_vm1, %v17568_v37 }
 0x5a7   :  { %11425 = vmatmul.mubr.msk.f32.gmra.mrb[38].mxu1 %vm21_vm5, %v4675_v2  ;;  %v4683_v2 = vld [vmem:[#allocation2 + $0xf6] sm:$0xff] }
 0x5a8   :  { %11427 = vmatprep.mubr.msk.f32.mxu1 %vm13389_vm1, %v17568_v37 }
 0x5ab   :  { %11428 = vmatmul.mubr.msk.f32.gmra.mrb[40].mxu1 %vm21_vm5, %v4676_v31  ;;  %v4684_v31 = vld [vmem:[#allocation2 + $0xfe] sm:$0xff] }
 0x5ac   :  { %11430 = vmatprep.mubr.msk.f32.mxu1 %vm13389_vm1, %v17568_v37 }
 0x5af   :  { %11431 = vmatmul.mubr.msk.f32.gmra.mrb[42].mxu1 %vm21_vm5, %v4677_v42  ;;  %v4685_v42 = vld [vmem:[#allocation2 + $0x106] sm:$0xff] }
 0x5b0   :  { %11433 = vmatprep.mubr.msk.f32.mxu1 %vm13389_vm1, %v17568_v37 }
 0x5b3   :  { %11434 = vmatmul.mubr.msk.f32.gmra.mrb[44].mxu1 %vm21_vm5, %v4678_v7  ;;  %v4686_v7 = vld [vmem:[#allocation2 + $0x10e] sm:$0xff] }
 0x5b4   :  { %11436 = vmatprep.mubr.msk.f32.mxu1 %vm13389_vm1, %v17568_v37 }
 0x5b7   :  { %11437 = vmatmul.mubr.msk.f32.gmra.mrb[46].mxu1 %vm21_vm5, %v4679_v38  ;;  %v4687_v38 = vld [vmem:[#allocation2 + $0x116] sm:$0xff] }
 0x5b8   :  { %11439 = vmatprep.mubr.msk.f32.mxu1 %vm13389_vm1, %v17568_v37 }
 0x5bb   :  { %11440 = vmatmul.mubr.msk.f32.gmra.mrb[48].mxu1 %vm21_vm5, %v4680_v56  ;;  %v4688_v56 = vld [vmem:[#allocation2 + $0x11e] sm:$0xff] }
 0x5bc   :  { %11442 = vmatprep.mubr.msk.f32.mxu1 %vm13389_vm1, %v17568_v37 }
 0x5bf   :  { %11443 = vmatmul.mubr.msk.f32.gmra.mrb[50].mxu1 %vm21_vm5, %v4681_v61  ;;  %v4689_v61 = vld [vmem:[#allocation2 + $0x126] sm:$0xff] }
 0x5c0   :  { %11445 = vmatprep.mubr.msk.f32.mxu1 %vm13389_vm1, %v17568_v37 }
 0x5c3   :  { %11446 = vmatmul.mubr.msk.f32.gmra.mrb[52].mxu1 %vm21_vm5, %v4682_v15  ;;  %v4690_v15 = vld [vmem:[#allocation2 + $0x12e] sm:$0xff] }
 0x5c4   :  { %11448 = vmatprep.mubr.msk.f32.mxu1 %vm13389_vm1, %v17568_v37 }
 0x5c7   :  { %11449 = vmatmul.mubr.msk.f32.gmra.mrb[54].mxu1 %vm21_vm5, %v4683_v2  ;;  %v4691_v2 = vld [vmem:[#allocation2 + $0x136] sm:$0xff] }
 0x5c8   :  { %11451 = vmatprep.mubr.msk.f32.mxu1 %vm13389_vm1, %v17568_v37 }
 0x5cb   :  { %11452 = vmatmul.mubr.msk.f32.gmra.mrb[56].mxu1 %vm21_vm5, %v4684_v31  ;;  %v4692_v31 = vld [vmem:[#allocation2 + $0x13e] sm:$0xff] }
 0x5cc   :  { %11454 = vmatprep.mubr.msk.f32.mxu1 %vm13389_vm1, %v17568_v37 }
 0x5cf   :  { %11455 = vmatmul.mubr.msk.f32.gmra.mrb[58].mxu1 %vm21_vm5, %v4685_v42  ;;  %v4693_v42 = vld [vmem:[#allocation2 + $0x146] sm:$0xff] }
 0x5d0   :  { %11457 = vmatprep.mubr.msk.f32.mxu1 %vm13389_vm1, %v17568_v37 }
 0x5d3   :  { %11458 = vmatmul.mubr.msk.f32.gmra.mrb[60].mxu1 %vm21_vm5, %v4686_v7  ;;  %v4694_v7 = vld [vmem:[#allocation2 + $0x14e] sm:$0xff] }
 0x5d4   :  { %11460 = vmatprep.mubr.msk.f32.mxu1 %vm13389_vm1, %v17568_v37 }
 0x5d7   :  { %11461 = vmatmul.mubr.msk.f32.gmra.mrb[62].mxu1 %vm21_vm5, %v4687_v38  ;;  %v4695_v38 = vld [vmem:[#allocation2 + $0x156] sm:$0xff] }
 0x5d8   :  { %11463 = vmatprep.mubr.msk.f32.mxu1 %vm13389_vm1, %v17568_v37 }
 0x5db   :  { %11464 = vmatmul.mubr.msk.f32.gmra.mrb[64].mxu1 %vm21_vm5, %v4688_v56  ;;  %v4696_v56 = vld [vmem:[#allocation2 + $0x15e] sm:$0xff] }
 0x5dc   :  { %11466 = vmatprep.mubr.msk.f32.mxu1 %vm13389_vm1, %v17568_v37 }
 0x5df   :  { %11467 = vmatmul.mubr.msk.f32.gmra.mrb[66].mxu1 %vm21_vm5, %v4689_v61  ;;  %v4697_v61 = vld [vmem:[#allocation2 + $0x166] sm:$0xff] }
 0x5e0   :  { %11469 = vmatprep.mubr.msk.f32.mxu1 %vm13389_vm1, %v17568_v37 }
 0x5e3   :  { %11470 = vmatmul.mubr.msk.f32.gmra.mrb[68].mxu1 %vm21_vm5, %v4690_v15  ;;  %v4698_v15 = vld [vmem:[#allocation2 + $0x16e] sm:$0xff] }
 0x5e4   :  { %11472 = vmatprep.mubr.msk.f32.mxu1 %vm13389_vm1, %v17568_v37 }
 0x5e7   :  { %11473 = vmatmul.mubr.msk.f32.gmra.mrb[70].mxu1 %vm21_vm5, %v4691_v2  ;;  %v4699_v2 = vld [vmem:[#allocation2 + $0x176] sm:$0xff] }
 0x5e8   :  { %11475 = vmatprep.mubr.msk.f32.mxu1 %vm13389_vm1, %v17568_v37 }
 0x5eb   :  { %11476 = vmatmul.mubr.msk.f32.gmra.mrb[72].mxu1 %vm21_vm5, %v4692_v31  ;;  %v4700_v31 = vld [vmem:[#allocation2 + $0x17e] sm:$0xff] }
 0x5ec   :  { %11478 = vmatprep.mubr.msk.f32.mxu1 %vm13389_vm1, %v17568_v37 }
 0x5ef   :  { %11479 = vmatmul.mubr.msk.f32.gmra.mrb[74].mxu1 %vm21_vm5, %v4693_v42  ;;  %v4701_v42 = vld [vmem:[#allocation2 + $0x186] sm:$0xff] }
 0x5f0   :  { %11481 = vmatprep.mubr.msk.f32.mxu1 %vm13389_vm1, %v17568_v37 }
 0x5f3   :  { %11482 = vmatmul.mubr.msk.f32.gmra.mrb[76].mxu1 %vm21_vm5, %v4694_v7  ;;  %v4702_v7 = vld [vmem:[#allocation2 + $0x18e] sm:$0xff] }
 0x5f4   :  { %11484 = vmatprep.mubr.msk.f32.mxu1 %vm13389_vm1, %v17568_v37 }
 0x5f7   :  { %11485 = vmatmul.mubr.msk.f32.gmra.mrb[78].mxu1 %vm21_vm5, %v4695_v38  ;;  %v4703_v38 = vld [vmem:[#allocation2 + $0x196] sm:$0xff] }
 0x5f8   :  { %11487 = vmatprep.mubr.msk.f32.mxu1 %vm13389_vm1, %v17568_v37 }
 0x5fb   :  { %11488 = vmatmul.mubr.msk.f32.gmra.mrb[80].mxu1 %vm21_vm5, %v4696_v56  ;;  %v4704_v56 = vld [vmem:[#allocation2 + $0x19e] sm:$0xff] }
 0x5fc   :  { %11490 = vmatprep.mubr.msk.f32.mxu1 %vm13389_vm1, %v17568_v37 }
 0x5ff   :  { %11491 = vmatmul.mubr.msk.f32.gmra.mrb[82].mxu1 %vm21_vm5, %v4697_v61  ;;  %v4705_v61 = vld [vmem:[#allocation2 + $0x1a6] sm:$0xff] }
 0x600   :  { %11493 = vmatprep.mubr.msk.f32.mxu1 %vm13389_vm1, %v17568_v37 }
 0x603   :  { %11494 = vmatmul.mubr.msk.f32.gmra.mrb[84].mxu1 %vm21_vm5, %v4698_v15  ;;  %v4706_v15 = vld [vmem:[#allocation2 + $0x1ae] sm:$0xff] }
 0x604   :  { %11496 = vmatprep.mubr.msk.f32.mxu1 %vm13389_vm1, %v17568_v37 }
 0x607   :  { %11497 = vmatmul.mubr.msk.f32.gmra.mrb[86].mxu1 %vm21_vm5, %v4699_v2  ;;  %v4707_v2 = vld [vmem:[#allocation2 + $0x1b6] sm:$0xff] }
 0x608   :  { %11499 = vmatprep.mubr.msk.f32.mxu1 %vm13389_vm1, %v17568_v37 }
 0x60b   :  { %11500 = vmatmul.mubr.msk.f32.gmra.mrb[88].mxu1 %vm21_vm5, %v4700_v31  ;;  %v4708_v31 = vld [vmem:[#allocation2 + $0x1be] sm:$0xff] }
 0x60c   :  { %11502 = vmatprep.mubr.msk.f32.mxu1 %vm13389_vm1, %v17568_v37 }
 0x60f   :  { %11503 = vmatmul.mubr.msk.f32.gmra.mrb[90].mxu1 %vm21_vm5, %v4701_v42  ;;  %v5255_v42 = vld [vmem:[#allocation2 + $0x1f] sm:$0xff] }
 0x610   :  { %11505 = vmatprep.mubr.msk.f32.mxu1 %vm13389_vm1, %v17568_v37 }
 0x613   :  { %11506 = vmatmul.mubr.msk.f32.gmra.mrb[92].mxu1 %vm21_vm5, %v4702_v7  ;;  %v5256_v7 = vld [vmem:[#allocation2 + $0x27] sm:$0xff] }
 0x614   :  { %11508 = vmatprep.mubr.msk.f32.mxu1 %vm13389_vm1, %v17568_v37 }
 0x617   :  { %11509 = vmatmul.mubr.msk.f32.gmra.mrb[94].mxu1 %vm21_vm5, %v4703_v38  ;;  %v5257_v38 = vld [vmem:[#allocation2 + $0x2f] sm:$0xff] }
 0x618   :  { %11511 = vmatprep.mubr.msk.f32.mxu1 %vm13389_vm1, %v17568_v37 }
 0x61b   :  { %11512 = vmatmul.mubr.msk.f32.gmra.mrb[96].mxu1 %vm21_vm5, %v4704_v56  ;;  %v5259_v56 = vld [vmem:[#allocation2 + $0x3f] sm:$0xff] }
 0x61c   :  { %11514 = vmatprep.mubr.msk.f32.mxu1 %vm13389_vm1, %v17568_v37 }
 0x61f   :  { %11515 = vmatmul.mubr.msk.f32.gmra.mrb[98].mxu1 %vm21_vm5, %v4705_v61  ;;  %v5260_v61 = vld [vmem:[#allocation2 + $0x47] sm:$0xff] }
 0x620   :  { %11517 = vmatprep.mubr.msk.f32.mxu1 %vm13389_vm1, %v17568_v37 }
 0x623   :  { %11518 = vmatmul.mubr.msk.f32.gmra.mrb[100].mxu1 %vm21_vm5, %v4706_v15  ;;  %v5262_v15 = vld [vmem:[#allocation2 + $0x57] sm:$0xff] }
 0x624   :  { %11520 = vmatprep.mubr.msk.f32.mxu1 %vm13389_vm1, %v17568_v37 }
 0x627   :  { %11521 = vmatmul.mubr.msk.f32.gmra.mrb[102].mxu1 %vm21_vm5, %v4707_v2  ;;  %v5263_v2 = vld [vmem:[#allocation2 + $0x5f] sm:$0xff] }
 0x628   :  { %11523 = vmatprep.mubr.msk.f32.mxu1 %vm13389_vm1, %v17568_v37 }
 0x62b   :  { %11524 = vmatmul.mubr.msk.f32.gmra.mrb[104].mxu1 %vm21_vm5, %v4708_v31  ;;  %v5264_v31 = vld [vmem:[#allocation2 + $0x67] sm:$0xff] }
 0x62c   :  { %11534 = vmatprep.mubr.msk.f32.mxu1 %vm13389_vm1, %v17568_v37 }
 0x62f   :  { %11535 = vmatmul.mubr.msk.f32.vlgmr.msra.gmra.mrb[0].mxu1 %vm21_vm5, %v5255_v42  ;;  %v5265_v42 = vld [vmem:[#allocation2 + $0x6f] sm:$0xff] }
 0x630   :  { %12412 = vmatpush3.bf16.msra.mxu1 %v15153_v0  ;;  %11537 = vmatprep.mubr.msk.f32.mxu1 %vm13389_vm1, %v17568_v37  ;;  %v5258_v0 = vld [vmem:[#allocation2 + $0x37] sm:$0xff] }
 0x631   :  { %12411 = vmatprep.subr.bf16.mxu1 %v17571_v32 }
 0x633   :  { %11538 = vmatmul.mubr.msk.f32.gmra.mrb[2].mxu1 %vm21_vm5, %v5256_v7  ;;  %v5266_v7 = vld [vmem:[#allocation2 + $0x77] sm:$0xff] }
 0x634   :  { %11540 = vmatprep.mubr.msk.f32.mxu1 %vm13389_vm1, %v17568_v37  ;;  %12413 = vmatpush3.bf16.msra.mxu1 %v15171_v53  ;;  %v5261_v53 = vld [vmem:[#allocation2 + $0x4f] sm:$0xff] }
 0x637   :  { %11541 = vmatmul.mubr.msk.f32.gmra.mrb[4].mxu1 %vm21_vm5, %v5257_v38  ;;  %v5267_v38 = vld [vmem:[#allocation2 + $0x7f] sm:$0xff] }
 0x638   :  { %11543 = vmatprep.mubr.msk.f32.mxu1 %vm13389_vm1, %v17568_v37 }
 0x63b   :  { %11544 = vmatmul.mubr.msk.f32.gmra.mrb[6].mxu1 %vm21_vm5, %v5258_v0  ;;  %v5268_v0 = vld [vmem:[#allocation2 + $0x87] sm:$0xff] }
 0x63c   :  { %11546 = vmatprep.mubr.msk.f32.mxu1 %vm13389_vm1, %v17568_v37 }
 0x63f   :  { %11547 = vmatmul.mubr.msk.f32.gmra.mrb[8].mxu1 %vm21_vm5, %v5259_v56  ;;  %v5269_v56 = vld [vmem:[#allocation2 + $0x8f] sm:$0xff] }
 0x640   :  { %11549 = vmatprep.mubr.msk.f32.mxu1 %vm13389_vm1, %v17568_v37 }
 0x643   :  { %11550 = vmatmul.mubr.msk.f32.gmra.mrb[10].mxu1 %vm21_vm5, %v5260_v61  ;;  %v5270_v61 = vld [vmem:[#allocation2 + $0x97] sm:$0xff] }
 0x644   :  { %11552 = vmatprep.mubr.msk.f32.mxu1 %vm13389_vm1, %v17568_v37 }
 0x647   :  { %11553 = vmatmul.mubr.msk.f32.gmra.mrb[12].mxu1 %vm21_vm5, %v5261_v53  ;;  %v5271_v53 = vld [vmem:[#allocation2 + $0x9f] sm:$0xff] }
 0x648   :  { %11555 = vmatprep.mubr.msk.f32.mxu1 %vm13389_vm1, %v17568_v37 }
 0x64b   :  { %11556 = vmatmul.mubr.msk.f32.gmra.mrb[14].mxu1 %vm21_vm5, %v5262_v15  ;;  %v5272_v15 = vld [vmem:[#allocation2 + $0xa7] sm:$0xff] }
 0x64c   :  { %11558 = vmatprep.mubr.msk.f32.mxu1 %vm13389_vm1, %v17568_v37 }
 0x64f   :  { %11559 = vmatmul.mubr.msk.f32.gmra.mrb[16].mxu1 %vm21_vm5, %v5263_v2  ;;  %v5273_v2 = vld [vmem:[#allocation2 + $0xaf] sm:$0xff] }
 0x650   :  { %11561 = vmatprep.mubr.msk.f32.mxu1 %vm13389_vm1, %v17568_v37 }
 0x653   :  { %11562 = vmatmul.mubr.msk.f32.gmra.mrb[18].mxu1 %vm21_vm5, %v5264_v31  ;;  %v5274_v31 = vld [vmem:[#allocation2 + $0xb7] sm:$0xff] }
 0x654   :  { %11564 = vmatprep.mubr.msk.f32.mxu1 %vm13389_vm1, %v17568_v37 }
 0x657   :  { %11565 = vmatmul.mubr.msk.f32.gmra.mrb[20].mxu1 %vm21_vm5, %v5265_v42  ;;  %v5275_v42 = vld [vmem:[#allocation2 + $0xbf] sm:$0xff] }
 0x658   :  { %11567 = vmatprep.mubr.msk.f32.mxu1 %vm13389_vm1, %v17568_v37 }
 0x65b   :  { %11568 = vmatmul.mubr.msk.f32.gmra.mrb[22].mxu1 %vm21_vm5, %v5266_v7  ;;  %v5276_v7 = vld [vmem:[#allocation2 + $0xc7] sm:$0xff] }
 0x65c   :  { %11570 = vmatprep.mubr.msk.f32.mxu1 %vm13389_vm1, %v17568_v37 }
 0x65f   :  { %11571 = vmatmul.mubr.msk.f32.gmra.mrb[24].mxu1 %vm21_vm5, %v5267_v38  ;;  %v5277_v38 = vld [vmem:[#allocation2 + $0xcf] sm:$0xff] }
 0x660   :  { %11573 = vmatprep.mubr.msk.f32.mxu1 %vm13389_vm1, %v17568_v37 }
 0x663   :  { %11574 = vmatmul.mubr.msk.f32.gmra.mrb[26].mxu1 %vm21_vm5, %v5268_v0  ;;  %v5278_v0 = vld [vmem:[#allocation2 + $0xd7] sm:$0xff] }
 0x664   :  { %11576 = vmatprep.mubr.msk.f32.mxu1 %vm13389_vm1, %v17568_v37 }
 0x667   :  { %11577 = vmatmul.mubr.msk.f32.gmra.mrb[28].mxu1 %vm21_vm5, %v5269_v56  ;;  %v5279_v56 = vld [vmem:[#allocation2 + $0xdf] sm:$0xff] }
 0x668   :  { %11579 = vmatprep.mubr.msk.f32.mxu1 %vm13389_vm1, %v17568_v37 }
 0x66b   :  { %11580 = vmatmul.mubr.msk.f32.gmra.mrb[30].mxu1 %vm21_vm5, %v5270_v61  ;;  %v5280_v61 = vld [vmem:[#allocation2 + $0xe7] sm:$0xff] }
 0x66c   :  { %11582 = vmatprep.mubr.msk.f32.mxu1 %vm13389_vm1, %v17568_v37 }
 0x66f   :  { %11583 = vmatmul.mubr.msk.f32.gmra.mrb[32].mxu1 %vm21_vm5, %v5271_v53  ;;  %v5281_v53 = vld [vmem:[#allocation2 + $0xef] sm:$0xff] }
 0x670   :  { %11585 = vmatprep.mubr.msk.f32.mxu1 %vm13389_vm1, %v17568_v37 }
 0x673   :  { %11586 = vmatmul.mubr.msk.f32.gmra.mrb[34].mxu1 %vm21_vm5, %v5272_v15  ;;  %v5282_v15 = vld [vmem:[#allocation2 + $0xf7] sm:$0xff] }
 0x674   :  { %11588 = vmatprep.mubr.msk.f32.mxu1 %vm13389_vm1, %v17568_v37 }
 0x677   :  { %11589 = vmatmul.mubr.msk.f32.gmra.mrb[36].mxu1 %vm21_vm5, %v5273_v2  ;;  %v5283_v2 = vld [vmem:[#allocation2 + $0xff] sm:$0xff] }
 0x678   :  { %11591 = vmatprep.mubr.msk.f32.mxu1 %vm13389_vm1, %v17568_v37 }
 0x67b   :  { %11592 = vmatmul.mubr.msk.f32.gmra.mrb[38].mxu1 %vm21_vm5, %v5274_v31  ;;  %v5284_v31 = vld [vmem:[#allocation2 + $0x107] sm:$0xff] }
 0x67c   :  { %11594 = vmatprep.mubr.msk.f32.mxu1 %vm13389_vm1, %v17568_v37 }
 0x67f   :  { %11595 = vmatmul.mubr.msk.f32.gmra.mrb[40].mxu1 %vm21_vm5, %v5275_v42  ;;  %v5285_v42 = vld [vmem:[#allocation2 + $0x10f] sm:$0xff] }
 0x680   :  { %11597 = vmatprep.mubr.msk.f32.mxu1 %vm13389_vm1, %v17568_v37 }
 0x683   :  { %11598 = vmatmul.mubr.msk.f32.gmra.mrb[42].mxu1 %vm21_vm5, %v5276_v7  ;;  %v5286_v7 = vld [vmem:[#allocation2 + $0x117] sm:$0xff] }
 0x684   :  { %11600 = vmatprep.mubr.msk.f32.mxu1 %vm13389_vm1, %v17568_v37 }
 0x687   :  { %11601 = vmatmul.mubr.msk.f32.gmra.mrb[44].mxu1 %vm21_vm5, %v5277_v38  ;;  %v5287_v38 = vld [vmem:[#allocation2 + $0x11f] sm:$0xff] }
 0x688   :  { %11603 = vmatprep.mubr.msk.f32.mxu1 %vm13389_vm1, %v17568_v37 }
 0x68b   :  { %11604 = vmatmul.mubr.msk.f32.gmra.mrb[46].mxu1 %vm21_vm5, %v5278_v0  ;;  %v5288_v0 = vld [vmem:[#allocation2 + $0x127] sm:$0xff] }
 0x68c   :  { %11606 = vmatprep.mubr.msk.f32.mxu1 %vm13389_vm1, %v17568_v37 }
 0x68f   :  { %11607 = vmatmul.mubr.msk.f32.gmra.mrb[48].mxu1 %vm21_vm5, %v5279_v56  ;;  %v5289_v56 = vld [vmem:[#allocation2 + $0x12f] sm:$0xff] }
 0x690   :  { %11609 = vmatprep.mubr.msk.f32.mxu1 %vm13389_vm1, %v17568_v37 }
 0x693   :  { %11610 = vmatmul.mubr.msk.f32.gmra.mrb[50].mxu1 %vm21_vm5, %v5280_v61  ;;  %v5290_v61 = vld [vmem:[#allocation2 + $0x137] sm:$0xff] }
 0x694   :  { %11612 = vmatprep.mubr.msk.f32.mxu1 %vm13389_vm1, %v17568_v37 }
 0x697   :  { %11613 = vmatmul.mubr.msk.f32.gmra.mrb[52].mxu1 %vm21_vm5, %v5281_v53  ;;  %v5291_v53 = vld [vmem:[#allocation2 + $0x13f] sm:$0xff] }
 0x698   :  { %11615 = vmatprep.mubr.msk.f32.mxu1 %vm13389_vm1, %v17568_v37 }
 0x69b   :  { %11616 = vmatmul.mubr.msk.f32.gmra.mrb[54].mxu1 %vm21_vm5, %v5282_v15  ;;  %v5292_v15 = vld [vmem:[#allocation2 + $0x147] sm:$0xff] }
 0x69c   :  { %11618 = vmatprep.mubr.msk.f32.mxu1 %vm13389_vm1, %v17568_v37 }
 0x69f   :  { %11619 = vmatmul.mubr.msk.f32.gmra.mrb[56].mxu1 %vm21_vm5, %v5283_v2  ;;  %v5293_v2 = vld [vmem:[#allocation2 + $0x14f] sm:$0xff] }
 0x6a0   :  { %11621 = vmatprep.mubr.msk.f32.mxu1 %vm13389_vm1, %v17568_v37 }
 0x6a3   :  { %11622 = vmatmul.mubr.msk.f32.gmra.mrb[58].mxu1 %vm21_vm5, %v5284_v31  ;;  %v5294_v31 = vld [vmem:[#allocation2 + $0x157] sm:$0xff] }
 0x6a4   :  { %11624 = vmatprep.mubr.msk.f32.mxu1 %vm13389_vm1, %v17568_v37 }
 0x6a7   :  { %11625 = vmatmul.mubr.msk.f32.gmra.mrb[60].mxu1 %vm21_vm5, %v5285_v42  ;;  %v5295_v42 = vld [vmem:[#allocation2 + $0x15f] sm:$0xff] }
 0x6a8   :  { %11627 = vmatprep.mubr.msk.f32.mxu1 %vm13389_vm1, %v17568_v37 }
 0x6ab   :  { %11628 = vmatmul.mubr.msk.f32.gmra.mrb[62].mxu1 %vm21_vm5, %v5286_v7  ;;  %v5296_v7 = vld [vmem:[#allocation2 + $0x167] sm:$0xff] }
 0x6ac   :  { %11630 = vmatprep.mubr.msk.f32.mxu1 %vm13389_vm1, %v17568_v37 }
 0x6af   :  { %11631 = vmatmul.mubr.msk.f32.gmra.mrb[64].mxu1 %vm21_vm5, %v5287_v38  ;;  %v5297_v38 = vld [vmem:[#allocation2 + $0x16f] sm:$0xff] }
 0x6b0   :  { %11633 = vmatprep.mubr.msk.f32.mxu1 %vm13389_vm1, %v17568_v37 }
 0x6b3   :  { %11634 = vmatmul.mubr.msk.f32.gmra.mrb[66].mxu1 %vm21_vm5, %v5288_v0  ;;  %v5298_v0 = vld [vmem:[#allocation2 + $0x177] sm:$0xff] }
 0x6b4   :  { %11636 = vmatprep.mubr.msk.f32.mxu1 %vm13389_vm1, %v17568_v37 }
 0x6b7   :  { %11637 = vmatmul.mubr.msk.f32.gmra.mrb[68].mxu1 %vm21_vm5, %v5289_v56  ;;  %v5299_v56 = vld [vmem:[#allocation2 + $0x17f] sm:$0xff] }
 0x6b8   :  { %11639 = vmatprep.mubr.msk.f32.mxu1 %vm13389_vm1, %v17568_v37 }
 0x6bb   :  { %11640 = vmatmul.mubr.msk.f32.gmra.mrb[70].mxu1 %vm21_vm5, %v5290_v61  ;;  %v5300_v61 = vld [vmem:[#allocation2 + $0x187] sm:$0xff] }
 0x6bc   :  { %11642 = vmatprep.mubr.msk.f32.mxu1 %vm13389_vm1, %v17568_v37 }
 0x6bf   :  { %11643 = vmatmul.mubr.msk.f32.gmra.mrb[72].mxu1 %vm21_vm5, %v5291_v53  ;;  %v6761_v53 = vld [vmem:[%s17519_s2 + $0x140] sm:$0xff] }
 0x6c0   :  { %11645 = vmatprep.mubr.msk.f32.mxu1 %vm13389_vm1, %v17568_v37 }
 0x6c3   :  { %11646 = vmatmul.mubr.msk.f32.gmra.mrb[74].mxu1 %vm21_vm5, %v5292_v15  ;;  %v6762_v15 = vld [vmem:[%s17519_s2 + $0x148] sm:$0xff] }
 0x6c4   :  { %11648 = vmatprep.mubr.msk.f32.mxu1 %vm13389_vm1, %v17568_v37 }
 0x6c7   :  { %11649 = vmatmul.mubr.msk.f32.gmra.mrb[76].mxu1 %vm21_vm5, %v5293_v2  ;;  %v5301_v2 = vld [vmem:[#allocation2 + $0x18f] sm:$0xff] }
 0x6c8   :  { %11651 = vmatprep.mubr.msk.f32.mxu1 %vm13389_vm1, %v17568_v37 }
 0x6cb   :  { %11652 = vmatmul.mubr.msk.f32.gmra.mrb[78].mxu1 %vm21_vm5, %v5294_v31  ;;  %v12313_v31 = vpack.c.bf16 %v6762_v15, %v6761_v53 }
 0x6cc   :  { %11654 = vmatprep.mubr.msk.f32.mxu1 %vm13389_vm1, %v17568_v37 }
 0x6cd   :  { %12314 = vmatpush3.bf16.msra.mxu0 %v12313_v31 }
 0x6ce   :  { %12315 = vmatprep.subr.bf16.mxu0 %v17571_v32 }
 0x6cf   :  { %11655 = vmatmul.mubr.msk.f32.gmra.mrb[80].mxu1 %vm21_vm5, %v5295_v42  ;;  %v5302_v42 = vld [vmem:[#allocation2 + $0x197] sm:$0xff] }
 0x6d0   :  { %11657 = vmatprep.mubr.msk.f32.mxu1 %vm13389_vm1, %v17568_v37 }
 0x6d3   :  { %11658 = vmatmul.mubr.msk.f32.gmra.mrb[82].mxu1 %vm21_vm5, %v5296_v7  ;;  %v5303_v7 = vld [vmem:[#allocation2 + $0x19f] sm:$0xff] }
 0x6d4   :  { %11660 = vmatprep.mubr.msk.f32.mxu1 %vm13389_vm1, %v17568_v37 }
 0x6d7   :  { %11661 = vmatmul.mubr.msk.f32.gmra.mrb[84].mxu1 %vm21_vm5, %v5297_v38  ;;  %v5304_v38 = vld [vmem:[#allocation2 + $0x1a7] sm:$0xff] }
 0x6d8   :  { %11663 = vmatprep.mubr.msk.f32.mxu1 %vm13389_vm1, %v17568_v37 }
 0x6db   :  { %11664 = vmatmul.mubr.msk.f32.gmra.mrb[86].mxu1 %vm21_vm5, %v5298_v0  ;;  %v5305_v0 = vld [vmem:[#allocation2 + $0x1af] sm:$0xff] }
 0x6dc   :  { %11666 = vmatprep.mubr.msk.f32.mxu1 %vm13389_vm1, %v17568_v37 }
 0x6df   :  { %11667 = vmatmul.mubr.msk.f32.gmra.mrb[88].mxu1 %vm21_vm5, %v5299_v56  ;;  %v5306_v56 = vld [vmem:[#allocation2 + $0x1b7] sm:$0xff] }
 0x6e0   :  { %11669 = vmatprep.mubr.msk.f32.mxu1 %vm13389_vm1, %v17568_v37 }
 0x6e3   :  { %11670 = vmatmul.mubr.msk.f32.gmra.mrb[90].mxu1 %vm21_vm5, %v5300_v61  ;;  %v5307_v61 = vld [vmem:[#allocation2 + $0x1bf] sm:$0xff] }
 0x6e4   :  { %11672 = vmatprep.mubr.msk.f32.mxu1 %vm13389_vm1, %v17568_v37 }
 0x6e7   :  { %11673 = vmatmul.mubr.msk.f32.gmra.mrb[92].mxu1 %vm21_vm5, %v5301_v2 }
 0x6e8   :  { %11675 = vmatprep.mubr.msk.f32.mxu1 %vm13389_vm1, %v17568_v37 }
 0x6eb   :  { %11676 = vmatmul.mubr.msk.f32.gmra.mrb[94].mxu1 %vm21_vm5, %v5302_v42 }
 0x6ec   :  { %11678 = vmatprep.mubr.msk.f32.mxu1 %vm13389_vm1, %v17568_v37 }
 0x6ef   :  { %11679 = vmatmul.mubr.msk.f32.gmra.mrb[96].mxu1 %vm21_vm5, %v5303_v7  ;;  %v5906_v7 = vld [vmem:[#allocation2 + $0x1c0] sm:$0xff] }
 0x6f0   :  { %11681 = vmatprep.mubr.msk.f32.mxu1 %vm13389_vm1, %v17568_v37 }
 0x6f3   :  { %11682 = vmatmul.mubr.msk.f32.gmra.mrb[98].mxu1 %vm21_vm5, %v5304_v38 }
 0x6f4   :  { %11684 = vmatprep.mubr.msk.f32.mxu1 %vm13389_vm1, %v17568_v37 }
 0x6f7   :  { %11685 = vmatmul.mubr.msk.f32.gmra.mrb[100].mxu1 %vm21_vm5, %v5305_v0 }
 0x6f8   :  { %11687 = vmatprep.mubr.msk.f32.mxu1 %vm13389_vm1, %v17568_v37 }
 0x6fb   :  { %11688 = vmatmul.mubr.msk.f32.gmra.mrb[102].mxu1 %vm21_vm5, %v5306_v56 }
 0x6fc   :  { %11690 = vmatprep.mubr.msk.f32.mxu1 %vm13389_vm1, %v17568_v37 }
 0x6ff   :  { %11691 = vmatmul.mubr.msk.f32.gmra.mrb[104].mxu1 %vm21_vm5, %v5307_v61 }
 0x700   :  { %11857 = vmatprep.mubr.msk.f32.mxu1 %vm13389_vm1, %v17568_v37 }
 0x702   :  { %v5537_v53 = vpop.f32.mrb[0].mxu1 }
 0x703   :  { %v12414_v15 = vadd.f32 %v5537_v53, %v15470_v23  ;;  %v11536_v2 = vpop.f32.mrb[1].mxu1 }
 0x705   :  { %v12415_v31 = vadd.f32 %v12414_v15, %v15977_v52 }
 0x706   :  { %v5542_v42 = vpop.f32.mrb[2].mxu1 }
 0x707   :  { %6453 = vst.msk [vmem:[#allocation3] sm:$0xff] %vm21_vm5, %v12415_v31  ;;  %v12416_v38 = vadd.f32 %v5542_v42, %v15487_v22  ;;  %v11539_v0 = vpop.f32.mrb[3].mxu1  ;;  %11858 = vmatmul.mubr.msk.f32.vlgmr.msra.gmra.mrb[104].mxu1 %vm21_vm5, %v5906_v7 }
 0x709   :  { %v12417_v56 = vadd.f32 %v12416_v38, %v15983_v34 }
 0x70a   :  { %v5547_v61 = vpop.f32.mrb[4].mxu1 }
 0x70b   :  { %6454 = vst.msk [vmem:[#allocation3 + $0x8] sm:$0xff] %vm21_vm5, %v12417_v56  ;;  %v11542_v37 = vpop.f32.mrb[5].mxu1 }
 0x70e   :  { %v5552_v27 = vpop.f32.mrb[6].mxu1 }
 0x70f   :  { %v12420_v23 = vadd.f32 %v5552_v27, %v15506_v50  ;;  %v11545_v53 = vpop.f32.mrb[7].mxu1 }
 0x711   :  { %v12421_v52 = vadd.f32 %v12420_v23, %v15992_v63 }
 0x712   :  { %v5557_v15 = vpop.f32.mrb[8].mxu1 }
 0x713   :  { %6456 = vst.msk [vmem:[#allocation3 + $0x18] sm:$0xff] %vm21_vm5, %v12421_v52  ;;  %v12422_v22 = vadd.f32 %v5557_v15, %v15516_v1  ;;  %v11548_v2 = vpop.f32.mrb[9].mxu1 }
 0x715   :  { %v12423_v31 = vadd.f32 %v12422_v22, %v15997_v55 }
 0x716   :  { %v5562_v42 = vpop.f32.mrb[10].mxu1 }
 0x717   :  { %6457 = vst.msk [vmem:[#allocation3 + $0x20] sm:$0xff] %vm21_vm5, %v12423_v31  ;;  %v12424_v34 = vadd.f32 %v5562_v42, %v15526_v11  ;;  %v11551_v37 = vpop.f32.mrb[11].mxu1 }
 0x719   :  { %v12425_v7 = vadd.f32 %v12424_v34, %v16002_v13 }
 0x71a   :  { %v5567_v50 = vpop.f32.mrb[12].mxu1 }
 0x71b   :  { %6458 = vst.msk [vmem:[#allocation3 + $0x28] sm:$0xff] %vm21_vm5, %v12425_v7  ;;  %v11554_v63 = vpop.f32.mrb[13].mxu1 }
 0x71e   :  { %v5572_v27 = vpop.f32.mrb[14].mxu1 }
 0x71f   :  { %v12428_v38 = vadd.f32 %v5572_v27, %v15544_v54  ;;  %v11557_v0 = vpop.f32.mrb[15].mxu1 }
 0x720   :  { %v6763_v0 = vld [vmem:[%s17519_s2 + $0x150] sm:$0xff] }
 0x721   :  { %v12429_v1 = vadd.f32 %v12428_v38, %v16010_v21 }
 0x722   :  { %v5577_v56 = vpop.f32.mrb[16].mxu1 }
 0x723   :  { %6460 = vst.msk [vmem:[#allocation3 + $0x38] sm:$0xff] %vm21_vm5, %v12429_v1  ;;  %v12430_v55 = vadd.f32 %v5577_v56, %v15554_v44  ;;  %v11560_v61 = vpop.f32.mrb[17].mxu1  ;;  %v6764_v1 = vld [vmem:[%s17519_s2 + $0x158] sm:$0xff] }
 0x724   :  { %v12316_v56 = vpack.c.bf16 %v6764_v1, %v6763_v0 }
 0x725   :  { %v12431_v11 = vadd.f32 %v12430_v55, %v16015_v36 }
 0x726   :  { %v5582_v23 = vpop.f32.mrb[18].mxu1  ;;  %12317 = vmatpush3.bf16.msra.mxu0 %v12316_v56 }
 0x727   :  { %6461 = vst.msk [vmem:[#allocation3 + $0x40] sm:$0xff] %vm21_vm5, %v12431_v11  ;;  %v12432_v13 = vadd.f32 %v5582_v23, %v15564_v60  ;;  %v11563_v53 = vpop.f32.mrb[19].mxu1  ;;  %12318 = vmatprep.subr.bf16.mxu0 %v17571_v32 }
 0x729   :  { %v12433_v52 = vadd.f32 %v12432_v13, %v16020_v57 }
 0x72a   :  { %v5587_v54 = vpop.f32.mrb[20].mxu1 }
 0x72b   :  { %6462 = vst.msk [vmem:[#allocation3 + $0x48] sm:$0xff] %vm21_vm5, %v12433_v52  ;;  %v11566_v21 = vpop.f32.mrb[21].mxu1 }
 0x72e   :  { %v5592_v15 = vpop.f32.mrb[22].mxu1 }
 0x72f   :  { %v12436_v22 = vadd.f32 %v5592_v15, %v15582_v46  ;;  %v11569_v2 = vpop.f32.mrb[23].mxu1 }
 0x731   :  { %v12437_v44 = vadd.f32 %v12436_v22, %v16028_v25 }
 0x732   :  { %v5597_v31 = vpop.f32.mrb[24].mxu1 }
 0x733   :  { %6464 = vst.msk [vmem:[#allocation3 + $0x58] sm:$0xff] %vm21_vm5, %v12437_v44  ;;  %v12438_v36 = vadd.f32 %v5597_v31, %v15592_v4  ;;  %v11572_v42 = vpop.f32.mrb[25].mxu1 }
 0x735   :  { %v12439_v60 = vadd.f32 %v12438_v36, %v16033_v39 }
 0x736   :  { %v5602_v34 = vpop.f32.mrb[26].mxu1 }
 0x737   :  { %6465 = vst.msk [vmem:[#allocation3 + $0x60] sm:$0xff] %vm21_vm5, %v12439_v60  ;;  %v11575_v57 = vpop.f32.mrb[27].mxu1 }
 0x73a   :  { %v5607_v37 = vpop.f32.mrb[28].mxu1 }
 0x73b   :  { %v11578_v7 = vpop.f32.mrb[29].mxu1 }
 0x73e   :  { %v5612_v50 = vpop.f32.mrb[30].mxu1 }
 0x73f   :  { %v12444_v46 = vadd.f32 %v5612_v50, %v15618_v48  ;;  %v11581_v63 = vpop.f32.mrb[31].mxu1 }
 0x741   :  { %v12445_v25 = vadd.f32 %v12444_v46, %v16044_v28 }
 0x742   :  { %v5617_v27 = vpop.f32.mrb[32].mxu1 }
 0x743   :  { %6468 = vst.msk [vmem:[#allocation3 + $0x78] sm:$0xff] %vm21_vm5, %v12445_v25  ;;  %v12446_v4 = vadd.f32 %v5617_v27, %v15628_v10  ;;  %v11584_v38 = vpop.f32.mrb[33].mxu1 }
 0x745   :  { %v12447_v39 = vadd.f32 %v12446_v4, %v16049_v24 }
 0x746   :  { %v5622_v48 = vpop.f32.mrb[34].mxu1 }
 0x747   :  { %6469 = vst.msk [vmem:[#allocation3 + $0x80] sm:$0xff] %vm21_vm5, %v12447_v39  ;;  %v11587_v28 = vpop.f32.mrb[35].mxu1 }
 0x74a   :  { %v5627_v10 = vpop.f32.mrb[36].mxu1 }
 0x74b   :  { %v12450_v55 = vadd.f32 %v5627_v10, %v15646_v5  ;;  %v11590_v24 = vpop.f32.mrb[37].mxu1 }
 0x74d   :  { %v12451_v61 = vadd.f32 %v12450_v55, %v16057_v9 }
 0x74e   :  { %v5632_v11 = vpop.f32.mrb[38].mxu1 }
 0x74f   :  { %6471 = vst.msk [vmem:[#allocation3 + $0x90] sm:$0xff] %vm21_vm5, %v12451_v61  ;;  %v12452_v23 = vadd.f32 %v5632_v11, %v15656_v30  ;;  %v11593_v13 = vpop.f32.mrb[39].mxu1 }
 0x751   :  { %v12453_v53 = vadd.f32 %v12452_v23, %v16062_v40 }
 0x752   :  { %v5637_v52 = vpop.f32.mrb[40].mxu1 }
 0x753   :  { %6472 = vst.msk [vmem:[#allocation3 + $0x98] sm:$0xff] %vm21_vm5, %v12453_v53  ;;  %v12454_v54 = vadd.f32 %v5637_v52, %v15666_v58  ;;  %v11596_v21 = vpop.f32.mrb[41].mxu1 }
 0x755   :  { %v12455_v15 = vadd.f32 %v12454_v54, %v16067_v12  ;;  %v17601_v54 = vld [vmem:[#allocation15_spill] sm:$0xff] }
 0x756   :  { %v5642_v5 = vpop.f32.mrb[42].mxu1 }
 0x757   :  { %6473 = vst.msk [vmem:[#allocation3 + $0xa0] sm:$0xff] %vm21_vm5, %v12455_v15  ;;  %v11599_v9 = vpop.f32.mrb[43].mxu1  ;;  %v17602_v5 = vld [vmem:[#allocation21_spill] sm:$0xff] }
 0x75a   :  { %v5647_v22 = vpop.f32.mrb[44].mxu1 }
 0x75b   :  { %v12458_v2 = vadd.f32 %v5647_v22, %v15684_v45  ;;  %v11602_v44 = vpop.f32.mrb[45].mxu1 }
 0x75d   :  { %v12459_v30 = vadd.f32 %v12458_v2, %v16075_v17 }
 0x75e   :  { %v5652_v31 = vpop.f32.mrb[46].mxu1 }
 0x75f   :  { %6475 = vst.msk [vmem:[#allocation3 + $0xb0] sm:$0xff] %vm21_vm5, %v12459_v30  ;;  %v12460_v40 = vadd.f32 %v5652_v31, %v15694_v20  ;;  %v11605_v36 = vpop.f32.mrb[47].mxu1 }
 0x761   :  { %v12461_v58 = vadd.f32 %v12460_v40, %v16080_v47 }
 0x762   :  { %v5657_v42 = vpop.f32.mrb[48].mxu1 }
 0x763   :  { %6476 = vst.msk [vmem:[#allocation3 + $0xb8] sm:$0xff] %vm21_vm5, %v12461_v58  ;;  %v12462_v12 = vadd.f32 %v5657_v42, %v15704_v6  ;;  %v11608_v60 = vpop.f32.mrb[49].mxu1 }
 0x765   :  { %v12463_v34 = vadd.f32 %v12462_v12, %v16085_v62 }
 0x766   :  { %v5662_v45 = vpop.f32.mrb[50].mxu1 }
 0x767   :  { %6477 = vst.msk [vmem:[#allocation3 + $0xc0] sm:$0xff] %vm21_vm5, %v12463_v34  ;;  %v11611_v17 = vpop.f32.mrb[51].mxu1  ;;  %v17606_v34 = vld [vmem:[#allocation23_spill] sm:$0xff] }
 0x76a   :  { %v5667_v57 = vpop.f32.mrb[52].mxu1 }
 0x76b   :  { %v11614_v37 = vpop.f32.mrb[53].mxu1  ;;  %v17607_v57 = vld [vmem:[#allocation18_spill] sm:$0xff] }
 0x76e   :  { %v5672_v7 = vpop.f32.mrb[54].mxu1 }
 0x76f   :  { %v11617_v50 = vpop.f32.mrb[55].mxu1 }
 0x770   :  { %v17608_v50 = vld [vmem:[#allocation24_spill] sm:$0xff] }
 0x772   :  { %v5677_v20 = vpop.f32.mrb[56].mxu1 }
 0x773   :  { %v12470_v46 = vadd.f32 %v5677_v20, %v15738_v14  ;;  %v11620_v47 = vpop.f32.mrb[57].mxu1 }
 0x774   :  { %v17609_v47 = vld [vmem:[#allocation19_spill] sm:$0xff] }
 0x775   :  { %v12471_v63 = vadd.f32 %v12470_v46, %v16099_v18 }
 0x776   :  { %v5682_v25 = vpop.f32.mrb[58].mxu1 }
 0x777   :  { %6481 = vst.msk [vmem:[#allocation3 + $0xe0] sm:$0xff] %vm21_vm5, %v12471_v63  ;;  %v12472_v6 = vadd.f32 %v5682_v25, %v15748_v29  ;;  %v11623_v62 = vpop.f32.mrb[59].mxu1 }
 0x779   :  { %v12473_v27 = vadd.f32 %v12472_v6, %v16104_v43 }
 0x77a   :  { %v5687_v4 = vpop.f32.mrb[60].mxu1 }
 0x77b   :  { %6482 = vst.msk [vmem:[#allocation3 + $0xe8] sm:$0xff] %vm21_vm5, %v12473_v27  ;;  %v11626_v38 = vpop.f32.mrb[61].mxu1  ;;  %v17610_v27 = vld [vmem:[#allocation25_spill] sm:$0xff] }
 0x77e   :  { %v5692_v39 = vpop.f32.mrb[62].mxu1 }
 0x77f   :  { %v12476_v0 = vadd.f32 %v5692_v39, %v15766_v19  ;;  %v11629_v1 = vpop.f32.mrb[63].mxu1  ;;  %v17611_v39 = vld [vmem:[#allocation20_spill] sm:$0xff] }
 0x781   :  { %v12477_v14 = vadd.f32 %v12476_v0, %v16112_v3 }
 0x782   :  { %v5697_v48 = vpop.f32.mrb[64].mxu1 }
 0x783   :  { %6484 = vst.msk [vmem:[#allocation3 + $0xf8] sm:$0xff] %vm21_vm5, %v12477_v14  ;;  %v12478_v18 = vadd.f32 %v5697_v48, %v15776_v35  ;;  %v11632_v56 = vpop.f32.mrb[65].mxu1  ;;  %v17612_v14 = vld [vmem:[#allocation10_spill] sm:$0xff] }
 0x784   :  { %v17613_v56 = vld [vmem:[#allocation27_spill] sm:$0xff] }
 0x785   :  { %v12479_v29 = vadd.f32 %v12478_v18, %v16117_v41 }
 0x786   :  { %v5702_v28 = vpop.f32.mrb[66].mxu1 }
 0x787   :  { %6485 = vst.msk [vmem:[#allocation3 + $0x100] sm:$0xff] %vm21_vm5, %v12479_v29  ;;  %v12480_v43 = vadd.f32 %v5702_v28, %v15786_v8  ;;  %v11635_v10 = vpop.f32.mrb[67].mxu1 }
 0x789   :  { %v12481_v55 = vadd.f32 %v12480_v43, %v16122_v33  ;;  %v17614_v43 = vld [vmem:[#allocation11_spill] sm:$0xff] }
 0x78a   :  { %v5707_v19 = vpop.f32.mrb[68].mxu1 }
 0x78b   :  { %6486 = vst.msk [vmem:[#allocation3 + $0x108] sm:$0xff] %vm21_vm5, %v12481_v55  ;;  %v11638_v3 = vpop.f32.mrb[69].mxu1  ;;  %v6510_v19 = vld [vmem:[#allocation3 + $0x3c] ss:$2 sm:$0x7f] }
 0x78c   :  { %v17615_v3 = vld [vmem:[#allocation28_spill] sm:$0xff] }
 0x78e   :  { %v5712_v24 = vpop.f32.mrb[70].mxu1 }
 0x78f   :  { %v12484_v61 = vadd.f32 %v5712_v24, %v15804_v51  ;;  %v11641_v11 = vpop.f32.mrb[71].mxu1 }
 0x791   :  { %v12485_v35 = vadd.f32 %v12484_v61, %v16130_v16  ;;  %v6508_v61 = vld [vmem:[#allocation3 + $0x1e] ss:$2 sm:$0x7f] }
 0x792   :  { %v5717_v23 = vpop.f32.mrb[72].mxu1 }
 0x793   :  { %6488 = vst.msk [vmem:[#allocation3 + $0x118] sm:$0xff] %vm21_vm5, %v12485_v35  ;;  %v12486_v41 = vadd.f32 %v5717_v23, %v15814_v59  ;;  %v11644_v13 = vpop.f32.mrb[73].mxu1  ;;  %v17603_v59 = vld [vmem:[#allocation16_spill] sm:$0xff]  ;;  %v6537_v35 = vrot.slane %v6510_v19, 2 }
 0x794   :  { %v6512_v23 = vld [vmem:[#allocation3 + $0x5a] ss:$2 sm:$0x7f]  ;;  %v6534_v13 = vrot.slane %v6508_v61, 1 }
 0x795   :  { %v12487_v8 = vadd.f32 %v12486_v41, %v16135_v26  ;;  %v17604_v26 = vld [vmem:[#allocation22_spill] sm:$0xff] }
 0x796   :  { %v5722_v53 = vpop.f32.mrb[74].mxu1 }
 0x797   :  { %6489 = vst.msk [vmem:[#allocation3 + $0x120] sm:$0xff] %vm21_vm5, %v12487_v8  ;;  %v12488_v33 = vadd.f32 %v5722_v53, %v15824_v49  ;;  %v11647_v52 = vpop.f32.mrb[75].mxu1  ;;  %v17605_v49 = vld [vmem:[#allocation17_spill] sm:$0xff]  ;;  %v6540_v53 = vrot.slane %v6512_v23, 3 }
 0x798   :  { %v6514_v8 = vld [vmem:[#allocation3 + $0x78] ss:$2 sm:$0x7f] }
 0x799   :  { %v12489_v21 = vadd.f32 %v12488_v33, %v17601_v54  ;;  %v6506_v52 = vld [vmem:[#allocation3] ss:$2 sm:$0x7f]  ;;  %v16658_v54 = vsel %vm6571_vm6, %v6534_v13, %v6537_v35 }
 0x79a   :  { %v5727_v51 = vpop.f32.mrb[76].mxu1 }
 0x79b   :  { %6490 = vst.msk [vmem:[#allocation3 + $0x128] sm:$0xff] %vm21_vm5, %v12489_v21  ;;  %v11650_v16 = vpop.f32.mrb[77].mxu1  ;;  %v17616_v21 = vld [vmem:[#allocation12_spill] sm:$0xff] }
 0x79e   :  { %v5732_v15 = vpop.f32.mrb[78].mxu1 }
 0x79f   :  { %v12492_v9 = vadd.f32 %v5732_v15, %v17602_v5  ;;  %v11653_v22 = vpop.f32.mrb[79].mxu1  ;;  %v6543_v15 = vrot.slane %v6514_v8, 4  ;;  %v6516_v5 = vld [vmem:[#allocation3 + $0x96] ss:$2 sm:$0x7f] }
 0x7a0   :  { %v17617_v22 = vld [vmem:[#allocation29_spill] sm:$0xff] }
 0x7a1   :  { %v12493_v2 = vadd.f32 %v12492_v9, %v17603_v59  ;;  %v16662_v9 = vsel %vm6569_vm7, %v6506_v52, %v6534_v13  ;;  %v17620_v52 = vld [vmem:[#allocation14_spill] sm:$0xff] }
 0x7a2   :  { %v5737_v44 = vpop.f32.mrb[80].mxu1 }
 0x7a3   :  { %6492 = vst.msk [vmem:[#allocation3 + $0x138] sm:$0xff] %vm21_vm5, %v12493_v2  ;;  %v12494_v30 = vadd.f32 %v5737_v44, %v17604_v26  ;;  %v11656_v31 = vpop.f32.mrb[81].mxu1  ;;  %v6622_v2 = vmul.f32 %v16658_v54, %v16658_v54  ;;  %v16668_v44 = vsel %vm6573_vm8, %v6537_v35, %v6540_v53  ;;  %v6518_v26 = vld [vmem:[#allocation3 + $0xb4] ss:$2 sm:$0x7f] }
 0x7a4   :  { %v6546_v31 = vrot.slane %v6516_v5, 5 }
 0x7a5   :  { %v12495_v40 = vadd.f32 %v12494_v30, %v17605_v49  ;;  %v17618_v49 = vld [vmem:[#allocation13_spill] sm:$0xff] }
 0x7a6   :  { %v5742_v36 = vpop.f32.mrb[82].mxu1 }
 0x7a7   :  { %6493 = vst.msk [vmem:[#allocation3 + $0x140] sm:$0xff] %vm21_vm5, %v12495_v40  ;;  %v11659_v58 = vpop.f32.mrb[83].mxu1 }
 0x7a8   :  { %v6621_v58 = vmul.f32 %v16662_v9, %v16662_v9 }
 0x7aa   :  { %v5747_v42 = vpop.f32.mrb[84].mxu1 }
 0x7ab   :  { %v11662_v12 = vpop.f32.mrb[85].mxu1  ;;  %v16675_v42 = vsel %vm6575_vm9, %v6540_v53, %v6543_v15 }
 0x7ac   :  { %v6520_v12 = vld [vmem:[#allocation3 + $0xe1] ss:$2 sm:$0x7f] }
 0x7ae   :  { %v5752_v60 = vpop.f32.mrb[86].mxu1 }
 0x7af   :  { %v12500_v45 = vadd.f32 %v5752_v60, %v17606_v34  ;;  %v11665_v17 = vpop.f32.mrb[87].mxu1  ;;  %v6590_v60 = vsel %vm21_vm5, %v16658_v54, 0.0  ;;  %v6623_v34 = vmul.f32 %v16668_v44, %v16668_v44 }
 0x7b0   :  { %v17619_v17 = vld [vmem:[#allocation30_spill] sm:$0xff] }
 0x7b1   :  { %v12501_v37 = vadd.f32 %v12500_v45, %v17607_v57  ;;  %v6549_v45 = vrot.slane %v6518_v26, 6 }
 0x7b2   :  { %v5757_v7 = vpop.f32.mrb[88].mxu1 }
 0x7b3   :  { %6496 = vst.msk [vmem:[#allocation3 + $0x158] sm:$0xff] %vm21_vm5, %v12501_v37  ;;  %v12502_v20 = vadd.f32 %v5757_v7, %v17608_v50  ;;  %v11668_v46 = vpop.f32.mrb[89].mxu1  ;;  %v6589_v37 = vsel %vm21_vm5, %v16662_v9, 0.0  ;;  %v6635_v7 = vsel %vm21_vm5, %v6622_v2, 0.0 }
 0x7b4   :  { %v6524_v50 = vld [vmem:[#allocation3 + $0x11d] ss:$2 sm:$0x7f]  ;;  %v6624_v46 = vmul.f32 %v16675_v42, %v16675_v42 }
 0x7b5   :  { %v12503_v63 = vadd.f32 %v12502_v20, %v17609_v47  ;;  %v6592_v20 = vsel %vm21_vm5, %v16668_v44, 0.0  ;;  %v16690_v47 = vsel %vm271_vm0, %v6543_v15, %v6546_v31 }
 0x7b6   :  { %v5762_v25 = vpop.f32.mrb[90].mxu1 }
 0x7b7   :  { %6497 = vst.msk [vmem:[#allocation3 + $0x160] sm:$0xff] %vm21_vm5, %v12503_v63  ;;  %v11671_v6 = vpop.f32.mrb[91].mxu1  ;;  %v6552_v63 = vrot.slane %v6520_v12, 7  ;;  %v6591_v25 = vadd.f32 %v6590_v60, %v6589_v37 }
 0x7b8   :  { %v6526_v6 = vld [vmem:[#allocation3 + $0x13b] ss:$2 sm:$0x7f] }
 0x7ba   :  { %v5767_v62 = vpop.f32.mrb[92].mxu1 }
 0x7bb   :  { %v12506_v4 = vadd.f32 %v5767_v62, %v17610_v27  ;;  %v11674_v38 = vpop.f32.mrb[93].mxu1  ;;  %v6634_v62 = vsel %vm21_vm5, %v6621_v58, 0.0  ;;  %v6637_v27 = vsel %vm21_vm5, %v6623_v34, 0.0 }
 0x7bc   :  { %v6555_v38 = vrot.slane %v6524_v50, 1 }
 0x7bd   :  { %v12507_v0 = vadd.f32 %v12506_v4, %v17611_v39  ;;  %v16695_v4 = vsel %vm6578_vm10, %v6546_v31, %v6549_v45  ;;  %v6636_v39 = vadd.f32 %v6635_v7, %v6634_v62 }
 0x7be   :  { %v5772_v1 = vpop.f32.mrb[94].mxu1  ;;  %v6598_v23 = vsel %vm21_vm5, %v16695_v4, 0.0 }
 0x7bf   :  { %6499 = vst.msk [vmem:[#allocation3 + $0x170] sm:$0xff] %vm21_vm5, %v12507_v0  ;;  %v12508_v48 = vadd.f32 %v5772_v1, %v17612_v14  ;;  %v11677_v18 = vpop.f32.mrb[95].mxu1  ;;  %v6593_v0 = vadd.f32 %v6592_v20, %v6591_v25  ;;  %v6594_v1 = vsel %vm21_vm5, %v16675_v42, 0.0  ;;  %v6625_v14 = vmul.f32 %v16690_v47, %v16690_v47 }
 0x7c0   :  { %v6639_v18 = vsel %vm21_vm5, %v6624_v46, 0.0 }
 0x7c1   :  { %v12509_v29 = vadd.f32 %v12508_v48, %v17613_v56  ;;  %v6528_v48 = vld [vmem:[#allocation3 + $0x159] ss:$2 sm:$0x7f]  ;;  %v6596_v56 = vsel %vm21_vm5, %v16690_v47, 0.0  ;;  %v6641_v35 = vsel %vm21_vm5, %v6625_v14, 0.0 }
 0x7c2   :  { %v5777_v28 = vpop.f32.mrb[96].mxu1  ;;  %v6561_v61 = vrot.slane %v6528_v48, 3 }
 0x7c3   :  { %6500 = vst.msk [vmem:[#allocation3 + $0x178] sm:$0xff] %vm21_vm5, %v12509_v29  ;;  %v12510_v10 = vadd.f32 %v5777_v28, %v17614_v43  ;;  %v11680_v55 = vpop.f32.mrb[97].mxu1  ;;  %v16705_v29 = vsel %vm6580_vm11, %v6549_v45, %v6552_v63  ;;  %v6558_v28 = vrot.slane %v6526_v6, 2  ;;  %v6638_v43 = vadd.f32 %v6637_v27, %v6636_v39 }
 0x7c4   :  { %v6522_v55 = vld [vmem:[#allocation3 + $0xff] ss:$2 sm:$0x7f]  ;;  %v6600_v15 = vsel %vm21_vm5, %v16705_v29, 0.0 }
 0x7c5   :  { %v12511_v24 = vadd.f32 %v12510_v10, %v17615_v3  ;;  %v6626_v10 = vmul.f32 %v16695_v4, %v16695_v4  ;;  %v6595_v3 = vadd.f32 %v6594_v1, %v6593_v0  ;;  %v16718_v53 = vsel %vm6571_vm6, %v6555_v38, %v6558_v28 }
 0x7c6   :  { %v5782_v11 = vpop.f32.mrb[98].mxu1  ;;  %v16727_v2 = vsel %vm6573_vm8, %v6558_v28, %v6561_v61  ;;  %v6629_v31 = vmul.f32 %v16718_v53, %v16718_v53  ;;  %v6604_v12 = vsel %vm21_vm5, %v16718_v53, 0.0 }
 0x7c7   :  { %6501 = vst.msk [vmem:[#allocation3 + $0x180] sm:$0xff] %vm21_vm5, %v12511_v24  ;;  %v11683_v41 = vpop.f32.mrb[99].mxu1  ;;  %v16710_v24 = vsel %vm6569_vm7, %v6522_v55, %v6555_v38  ;;  %v6640_v11 = vadd.f32 %v6639_v18, %v6638_v43  ;;  %v6597_v8 = vadd.f32 %v6596_v56, %v6595_v3  ;;  %v6630_v60 = vmul.f32 %v16727_v2, %v16727_v2 }
 0x7c8   :  { %v6627_v41 = vmul.f32 %v16705_v29, %v16705_v29  ;;  %v6628_v5 = vmul.f32 %v16710_v24, %v16710_v24 }
 0x7c9   :  { %v6651_v20 = vsel %vm21_vm5, %v6630_v60, 0.0  ;;  %v17621_v60 = vld [vmem:[#allocation26_spill] sm:$0xff] }
 0x7ca   :  { %v5787_v33 = vpop.f32.mrb[100].mxu1  ;;  %v6645_v26 = vsel %vm21_vm5, %v6627_v41, 0.0  ;;  %v6647_v58 = vsel %vm21_vm5, %v6628_v5, 0.0 }
 0x7cb   :  { %v12514_v51 = vadd.f32 %v5787_v33, %v17616_v21  ;;  %v11686_v16 = vpop.f32.mrb[101].mxu1 }
 0x7cc   :  { %v6643_v16 = vsel %vm21_vm5, %v6626_v10, 0.0 }
 0x7cd   :  { %v12515_v59 = vadd.f32 %v12514_v51, %v17617_v22  ;;  %v6642_v22 = vadd.f32 %v6641_v35, %v6640_v11 }
 0x7ce   :  { %v5792_v30 = vpop.f32.mrb[102].mxu1  ;;  %v6530_v19 = vld [vmem:[#allocation3 + $0x177] ss:$2 sm:$0x7f] }
 0x7cf   :  { %6503 = vst.msk [vmem:[#allocation3 + $0x190] sm:$0xff] %vm21_vm5, %v12515_v59  ;;  %v12516_v40 = vadd.f32 %v5792_v30, %v17618_v49  ;;  %v11689_v36 = vpop.f32.mrb[103].mxu1  ;;  %v6564_v33 = vrot.slane %v6530_v19, 4  ;;  %v6599_v59 = vadd.f32 %v6598_v23, %v6597_v8  ;;  %v6602_v30 = vsel %vm21_vm5, %v16710_v24, 0.0 }
 0x7d0   :  { %v6644_v49 = vadd.f32 %v6643_v16, %v6642_v22 }
 0x7d1   :  { %v12517_v57 = vadd.f32 %v12516_v40, %v17619_v17  ;;  %v6601_v40 = vadd.f32 %v6600_v15, %v6599_v59  ;;  %v16736_v36 = vsel %vm6575_vm9, %v6561_v61, %v6564_v33  ;;  %v6649_v17 = vsel %vm21_vm5, %v6629_v31, 0.0  ;;  %v6587_v31 = vld [vmem:[%s17520_s3 + $0x2] sm:$0x1] }
 0x7d2   :  { %v6646_v34 = vadd.f32 %v6645_v26, %v6644_v49  ;;  %v6631_v37 = vmul.f32 %v16736_v36, %v16736_v36  ;;  %v6608_v46 = vsel %vm21_vm5, %v16736_v36, 0.0 }
 0x7d3   :  { %6504 = vst.msk [vmem:[#allocation3 + $0x198] sm:$0xff] %vm21_vm5, %v12517_v57  ;;  %v6603_v45 = vadd.f32 %v6602_v30, %v6601_v40  ;;  %v6606_v57 = vsel %vm21_vm5, %v16727_v2, 0.0 }
 0x7d4   :  { %v6648_v7 = vadd.f32 %v6647_v58, %v6646_v34  ;;  %v6653_v27 = vsel %vm21_vm5, %v6631_v37, 0.0  ;;  %v6588_v58 = vld [vmem:[%s17520_s3 + $0x3] sm:$0x1] }
 0x7d5   :  { %v6605_v50 = vadd.f32 %v6604_v12, %v6603_v45 }
 0x7d6   :  { %v6650_v25 = vadd.f32 %v6649_v17, %v6648_v7 }
 0x7d7   :  { %v6607_v6 = vadd.f32 %v6606_v57, %v6605_v50 }
 0x7d8   :  { %v6652_v38 = vadd.f32 %v6651_v20, %v6650_v25 }
 0x7d9   :  { %v6609_v39 = vadd.f32 %v6608_v46, %v6607_v6 }
 0x7da   :  { %v6396_v13 = vpop.f32.mrb[104].mxu1  ;;  %v6654_v18 = vadd.f32 %v6653_v27, %v6652_v38 }
 0x7db   :  { %v12518_v21 = vadd.f32 %v6396_v13, %v17620_v52  ;;  %v11859_v51 = vpop.f32.mrb[105].mxu1 }
 0x7dd   :  { %6505 = vst.msk [vmem:[#allocation3 + $0x1a0] sm:$0xff] %vm21_vm5, %v12518_v21 }
 0x7e4   :  { %v6532_v63 = vld [vmem:[#allocation3 + $0x195] ss:$2 sm:$0x7f] }
 0x7e5   :  { %v6567_v62 = vrot.slane %v6532_v63, 5 }
 0x7e7   :  { %v6586_v0 = vsel %vm271_vm0, %v6564_v33, %v6567_v62  ;;  %v6633_v48 = vmul.f32 %v6567_v62, %v6567_v62  ;;  %v6613_v28 = vsel %vm6612_vm12, %v6567_v62, 0.0 }
 0x7e8   :  { %v6610_v1 = vsel %vm21_vm5, %v6586_v0, 0.0  ;;  %v6632_v14 = vmul.f32 %v6586_v0, %v6586_v0 }
 0x7e9   :  { %v6611_v56 = vadd.f32 %v6610_v1, %v6609_v39  ;;  %v6657_v19 = vsel %vm6612_vm12, %v6633_v48, 0.0 }
 0x7ea   :  { %v6655_v43 = vsel %vm21_vm5, %v6632_v14, 0.0 }
 0x7eb   :  { %v6614_v10 = vadd.f32 %v6613_v28, %v6611_v56  ;;  %v6656_v55 = vadd.f32 %v6655_v43, %v6654_v18 }
 0x7ed   :  { %v6615_v3 = vrot.slane %v6614_v10, 4  ;;  %v6658_v61 = vadd.f32 %v6657_v19, %v6656_v55 }
 0x7ef   :  { %v6616_v11 = vadd.f32 %v6615_v3, %v6614_v10  ;;  %v6659_v35 = vrot.slane %v6658_v61, 4  ;;  %v6746_v3 = vld [vmem:[%s17519_s2 + $0x120] sm:$0xff] }
 0x7f1   :  { %v6617_v23 = vrot.slane %v6616_v11, 2  ;;  %v6660_v41 = vadd.f32 %v6659_v35, %v6658_v61  ;;  %v6747_v61 = vld [vmem:[%s17519_s2 + $0x128] sm:$0xff] }
 0x7f3   :  { %v6618_v13 = vadd.f32 %v6617_v23, %v6616_v11  ;;  %v6661_v8 = vrot.slane %v6660_v41, 2 }
 0x7f5   :  { %v6619_v33 = vrot.slane %v6618_v13, 1  ;;  %v6662_v52 = vadd.f32 %v6661_v8, %v6660_v41  ;;  %v6748_v8 = vld [vmem:[%s17519_s2 + $0x130] sm:$0xff] }
 0x7f7   :  { %v6620_v21 = vadd.f32 %v6619_v33, %v6618_v13  ;;  %v6663_v51 = vrot.slane %v6662_v52, 1  ;;  %v12319_v13 = vpack.c.bf16 %v6747_v61, %v6746_v3  ;;  %v6749_v33 = vld [vmem:[%s17519_s2 + $0x138] sm:$0xff] }
 0x7f9   :  { %v6664_v16 = vadd.f32 %v6663_v51, %v6662_v52  ;;  %v6665_v15 = vmul.f32 0.010204081, %v6620_v21  ;;  %v17622_v21 = vmov 0.0   ;;  %v12322_v51 = vpack.c.bf16 %v6749_v33, %v6748_v8 }
 0x7fb   :  { %v6666_v5 = vmul.f32 0.010204081, %v6664_v16  ;;  %v6667_v22 = vmul.f32 %v6665_v15, %v6665_v15 }
 0x7fd   :  { %v6668_v59 = vsub.f32 %v6666_v5, %v6667_v22 }
 0x7ff   :  { %v6669_v26 = vmax.f32 %v6668_v59, 0.0 }
 0x801   :  { %v6670_v30 = vadd.f32 1e-05, %v6669_v26 }
 0x803   :  { %13358 = vrsqrt.f32 %v6670_v30 }
 0x80d   :  { %v13359_v49 = vpop.eup %13358 }
 0x80e   :  { %v6672_v40 = vmul.f32 %v13359_v49, %v6587_v31 }
 0x810   :  { %v6673_v12 = vmul.f32 %v6672_v40, %v6665_v15  ;;  %v6678_v34 = vrot.slane %v6672_v40, %v17621_v60  ;;  %v7082_v40 = vld [vmem:[%s17519_s2 + $0x160] sm:$0xff] }
 0x812   :  { %v6674_v45 = vsub.f32 %v6588_v58, %v6673_v12  ;;  %v6690_v17 = vmul.f32 %v6678_v34, %v6586_v0  ;;  %v6691_v57 = vmul.f32 %v6678_v34, %v6567_v62  ;;  %v6679_v37 = vmul.f32 %v6678_v34, %v16662_v9  ;;  %v7083_v58 = vld [vmem:[%s17519_s2 + $0x168] sm:$0xff] }
 0x813   :  { %v6680_v7 = vmul.f32 %v6678_v34, %v16658_v54  ;;  %v6681_v50 = vmul.f32 %v6678_v34, %v16668_v44  ;;  %v6682_v20 = vmul.f32 %v6678_v34, %v16675_v42  ;;  %v6683_v63 = vmul.f32 %v6678_v34, %v16690_v47 }
 0x814   :  { %v6695_v46 = vrot.slane %v6674_v45, %v17621_v60  ;;  %v6684_v25 = vmul.f32 %v6678_v34, %v16695_v4  ;;  %v6685_v6 = vmul.f32 %v6678_v34, %v16705_v29  ;;  %v6686_v27 = vmul.f32 %v6678_v34, %v16710_v24  ;;  %v7084_v45 = vld [vmem:[%s17519_s2 + $0x170] sm:$0xff] }
 0x815   :  { %v6687_v62 = vmul.f32 %v6678_v34, %v16718_v53  ;;  %v6688_v9 = vmul.f32 %v6678_v34, %v16727_v2  ;;  %v6689_v54 = vmul.f32 %v6678_v34, %v16736_v36  ;;  %v12325_v34 = vpack.c.bf16 %v7083_v58, %v7082_v40  ;;  %v7620_v40 = vld [vmem:[%s17519_s2 + $0x1c8] sm:$0xff] }
 0x816   :  { %v6708_v38 = vadd.f32 %v6695_v46, %v6691_v57  ;;  %v6696_v44 = vadd.f32 %v6695_v46, %v6679_v37  ;;  %v6697_v39 = vadd.f32 %v6695_v46, %v6680_v7  ;;  %v6698_v42 = vadd.f32 %v6695_v46, %v6681_v50 }
 0x817   :  { %v6699_v0 = vadd.f32 %v6695_v46, %v6682_v20  ;;  %v6700_v1 = vadd.f32 %v6695_v46, %v6683_v63  ;;  %v6701_v14 = vadd.f32 %v6695_v46, %v6684_v25  ;;  %v6702_v47 = vadd.f32 %v6695_v46, %v6685_v6 }
 0x818   :  { %v6709_v48 = vmax.f32 %v6696_v44, 0.0  ;;  %v6710_v4 = vmax.f32 %v6697_v39, 0.0  ;;  %v6711_v18 = vmax.f32 %v6698_v42, 0.0  ;;  %v6703_v29 = vadd.f32 %v6695_v46, %v6686_v27  ;;  %v7263_v39 = vld [vmem:[%s17519_s2 + $0x190] sm:$0xff]  ;;  %v7264_v42 = vld [vmem:[%s17519_s2 + $0x198] sm:$0xff] }
 0x819   :  { %v6712_v56 = vmax.f32 %v6699_v0, 0.0  ;;  %v6713_v24 = vmax.f32 %v6700_v1, 0.0  ;;  %v6714_v28 = vmax.f32 %v6701_v14, 0.0  ;;  %v6715_v53 = vmax.f32 %v6702_v47, 0.0 }
 0x81a   :  { %6722 = vst.msk [vmem:[#allocation4] sm:$0xff] %vm21_vm5, %v6709_v48  ;;  %6723 = vst.msk [vmem:[#allocation4 + $0x8] sm:$0xff] %vm21_vm5, %v6710_v4  ;;  %v6716_v2 = vmax.f32 %v6703_v29, 0.0  ;;  %v6704_v36 = vadd.f32 %v6695_v46, %v6687_v62  ;;  %v6705_v43 = vadd.f32 %v6695_v46, %v6688_v9  ;;  %v6706_v10 = vadd.f32 %v6695_v46, %v6689_v54  ;;  %v7261_v9 = vld [vmem:[%s17519_s2 + $0x180] sm:$0xff]  ;;  %v7262_v54 = vld [vmem:[%s17519_s2 + $0x188] sm:$0xff] }
 0x81b   :  { %6724 = vst.msk [vmem:[#allocation4 + $0x10] sm:$0xff] %vm21_vm5, %v6711_v18  ;;  %6725 = vst.msk [vmem:[#allocation4 + $0x18] sm:$0xff] %vm21_vm5, %v6712_v56  ;;  %v6707_v55 = vadd.f32 %v6695_v46, %v6690_v17  ;;  %v6721_v19 = vmax.f32 %v6708_v38, 0.0  ;;  %v7085_v17 = vld [vmem:[%s17519_s2 + $0x178] sm:$0xff]  ;;  %v12331_v44 = vpack.c.bf16 %v7262_v54, %v7261_v9  ;;  %v12334_v1 = vpack.c.bf16 %v7264_v42, %v7263_v39 }
 0x81c   :  { %6726 = vst.msk [vmem:[#allocation4 + $0x20] sm:$0xff] %vm21_vm5, %v6713_v24  ;;  %6727 = vst.msk [vmem:[#allocation4 + $0x28] sm:$0xff] %vm21_vm5, %v6714_v28  ;;  %v6717_v11 = vmax.f32 %v6704_v36, 0.0  ;;  %v6718_v35 = vmax.f32 %v6705_v43, 0.0  ;;  %v6719_v23 = vmax.f32 %v6706_v10, 0.0  ;;  %v12328_v37 = vpack.c.bf16 %v7085_v17, %v7084_v45  ;;  %v7442_v10 = vld [vmem:[%s17519_s2 + $0x1b0] sm:$0xff] }
 0x81d   :  { %6728 = vst.msk [vmem:[#allocation4 + $0x30] sm:$0xff] %vm21_vm5, %v6715_v53  ;;  %6729 = vst.msk [vmem:[#allocation4 + $0x38] sm:$0xff] %vm21_vm5, %v6716_v2  ;;  %v6720_v41 = vmax.f32 %v6707_v55, 0.0  ;;  %v7440_v53 = vld [vmem:[%s17519_s2 + $0x1a0] sm:$0xff]  ;;  %v7441_v2 = vld [vmem:[%s17519_s2 + $0x1a8] sm:$0xff] }
 0x81e   :  { %6734 = vst.msk [vmem:[#allocation4 + $0x60] sm:$0x3] %vm6612_vm12, %v6721_v19  ;;  %v12337_v43 = vpack.c.bf16 %v7441_v2, %v7440_v53  ;;  %v7443_v55 = vld [vmem:[%s17519_s2 + $0x1b8] sm:$0xff]  ;;  %v7621_v45 = vld [vmem:[%s17519_s2 + $0x1d0] sm:$0xff] }
 0x81f   :  { %6730 = vst.msk [vmem:[#allocation4 + $0x40] sm:$0xff] %vm21_vm5, %v6717_v11  ;;  %6731 = vst.msk [vmem:[#allocation4 + $0x48] sm:$0xff] %vm21_vm5, %v6718_v35  ;;  %v12340_v3 = vpack.c.bf16 %v7443_v55, %v7442_v10  ;;  %v7622_v17 = vld [vmem:[%s17519_s2 + $0x1d8] sm:$0xff]  ;;  %v8158_v53 = vld [vmem:[%s17519_s2 + $0x230] sm:$0xff] }
 0x820   :  { %6732 = vst.msk [vmem:[#allocation4 + $0x50] sm:$0xff] %vm21_vm5, %v6719_v23  ;;  %6733 = vst.msk [vmem:[#allocation4 + $0x58] sm:$0xff] %vm21_vm5, %v6720_v41  ;;  %v7801_v39 = vld [vmem:[%s17519_s2 + $0x1f8] sm:$0xff]  ;;  %v8474_v55 = vld [vmem:[%s17519_s2 + $0x250] sm:$0xff] }
 0x821   :  { %v6750_v52 = vld [vmem:[#allocation4 + $0x1] sm:$0xff] }
 0x822   :  { %11869 = vmatmul.mubr.msk.f32.vlgmr.msra.gmra.mrb[68].mxu0 %vm21_vm5, %v6750_v52  ;;  %v16805_v16 = vld [vmem:[#allocation4 + $0x9] sm:$0xff]  ;;  %v16812_v15 = vld [vmem:[#allocation4 + $0x11] sm:$0xff]  ;;  %v6735_v57 = vld [vmem:[#allocation4] sm:$0xff] }
 0x823   :  { %12320 = vmatpush3.bf16.msra.mxu0 %v12319_v13  ;;  %11871 = vmatprep.mubr.msk.f32.mxu0 %vm13389_vm1, %v17622_v21  ;;  %v16818_v5 = vld [vmem:[#allocation4 + $0x19] sm:$0xff]  ;;  %v16824_v22 = vld [vmem:[#allocation4 + $0x21] sm:$0xff]  ;;  %v16889_v50 = vld [vmem:[#allocation4 + $0x10] sm:$0xff] }
 0x824   :  { %12321 = vmatprep.subr.bf16.mxu0 %v17571_v32  ;;  %v16830_v59 = vld [vmem:[#allocation4 + $0x29] sm:$0xff]  ;;  %v16836_v26 = vld [vmem:[#allocation4 + $0x31] sm:$0xff]  ;;  %v16901_v46 = vld [vmem:[#allocation4 + $0x20] sm:$0xff] }
 0x825   :  { %v16882_v7 = vld [vmem:[#allocation4 + $0x8] sm:$0xff]  ;;  %v16895_v20 = vld [vmem:[#allocation4 + $0x18] sm:$0xff]  ;;  %v16913_v25 = vld [vmem:[#allocation4 + $0x30] sm:$0xff] }
 0x826   :  { %11872 = vmatmul.mubr.msk.f32.gmra.mrb[70].mxu0 %vm21_vm5, %v16805_v16  ;;  %v16842_v30 = vld [vmem:[#allocation4 + $0x39] sm:$0xff]  ;;  %v16848_v31 = vld [vmem:[#allocation4 + $0x41] sm:$0xff]  ;;  %v7072_v14 = vld [vmem:[#allocation4 + $0xa] sm:$0xff] }
 0x827   :  { %11874 = vmatprep.mubr.msk.f32.mxu0 %vm13389_vm1, %v17622_v21  ;;  %12323 = vmatpush3.bf16.msra.mxu0 %v12322_v51  ;;  %v16854_v49 = vld [vmem:[#allocation4 + $0x49] sm:$0xff]  ;;  %v16866_v12 = vld [vmem:[#allocation4 + $0x51] sm:$0xff]  ;;  %v16925_v27 = vld [vmem:[#allocation4 + $0x40] sm:$0xff] }
 0x828   :  { %12324 = vmatprep.subr.bf16.mxu0 %v17571_v32  ;;  %v16907_v63 = vld [vmem:[#allocation4 + $0x28] sm:$0xff]  ;;  %v16919_v6 = vld [vmem:[#allocation4 + $0x38] sm:$0xff]  ;;  %v16943_v38 = vld [vmem:[#allocation4 + $0x50] sm:$0xff] }
 0x829   :  { %v16931_v62 = vld [vmem:[#allocation4 + $0x48] sm:$0xff]  ;;  %v7073_v47 = vld [vmem:[#allocation4 + $0x12] sm:$0xff]  ;;  %v7074_v48 = vld [vmem:[#allocation4 + $0x1a] sm:$0xff] }
 0x82a   :  { %11875 = vmatmul.mubr.msk.f32.gmra.mrb[72].mxu0 %vm21_vm5, %v16812_v15  ;;  %v7071_v0 = vld [vmem:[#allocation4 + $0x2] sm:$0xff]  ;;  %v7076_v18 = vld [vmem:[#allocation4 + $0x2a] sm:$0xff]  ;;  %v7077_v29 = vld [vmem:[#allocation4 + $0x32] sm:$0xff] }
 0x82b   :  { %11877 = vmatprep.mubr.msk.f32.mxu0 %vm13389_vm1, %v17622_v21  ;;  %v7075_v4 = vld [vmem:[#allocation4 + $0x22] sm:$0xff]  ;;  %v7078_v56 = vld [vmem:[#allocation4 + $0x3a] sm:$0xff]  ;;  %v7080_v28 = vld [vmem:[#allocation4 + $0x4a] sm:$0xff] }
 0x82c   :  { %v7079_v24 = vld [vmem:[#allocation4 + $0x42] sm:$0xff]  ;;  %v7081_v36 = vld [vmem:[#allocation4 + $0x52] sm:$0xff] }
 0x82d   :  { %v7250_v19 = vld [vmem:[#allocation4 + $0x7] sm:$0xff]  ;;  %v17006_v61 = vld [vmem:[#allocation4 + $0xf] sm:$0xff]  ;;  %v17013_v11 = vld [vmem:[#allocation4 + $0x17] sm:$0xff] }
 0x82e   :  { %11878 = vmatmul.mubr.msk.f32.gmra.mrb[74].mxu0 %vm21_vm5, %v16818_v5  ;;  %v17019_v35 = vld [vmem:[#allocation4 + $0x1f] sm:$0xff]  ;;  %v17025_v23 = vld [vmem:[#allocation4 + $0x27] sm:$0xff]  ;;  %v17031_v41 = vld [vmem:[#allocation4 + $0x2f] sm:$0xff] }
 0x82f   :  { %11880 = vmatprep.mubr.msk.f32.mxu0 %vm13389_vm1, %v17622_v21  ;;  %v17037_v13 = vld [vmem:[#allocation4 + $0x37] sm:$0xff]  ;;  %v17043_v8 = vld [vmem:[#allocation4 + $0x3f] sm:$0xff]  ;;  %v17049_v33 = vld [vmem:[#allocation4 + $0x47] sm:$0xff] }
 0x830   :  { %v17055_v52 = vld [vmem:[#allocation4 + $0x4f] sm:$0xff]  ;;  %v17067_v58 = vld [vmem:[#allocation4 + $0x57] sm:$0xff] }
 0x831   :  { %v7619_v51 = vld [vmem:[%s17519_s2 + $0x1c0] sm:$0xff]  ;;  %v17127_v9 = vld [vmem:[#allocation4 + $0x58] sm:$0xff]  ;;  %v8159_v2 = vld [vmem:[%s17519_s2 + $0x238] sm:$0xff] }
 0x832   :  { %11881 = vmatmul.mubr.msk.f32.gmra.mrb[76].mxu0 %vm21_vm5, %v16824_v22 }
 0x833   :  { %11883 = vmatprep.mubr.msk.f32.mxu0 %vm13389_vm1, %v17622_v21 }
 0x836   :  { %11884 = vmatmul.mubr.msk.f32.gmra.mrb[78].mxu0 %vm21_vm5, %v16830_v59 }
 0x837   :  { %11886 = vmatprep.mubr.msk.f32.mxu0 %vm13389_vm1, %v17622_v21 }
 0x83a   :  { %11887 = vmatmul.mubr.msk.f32.gmra.mrb[80].mxu0 %vm21_vm5, %v16836_v26 }
 0x83b   :  { %11889 = vmatprep.mubr.msk.f32.mxu0 %vm13389_vm1, %v17622_v21 }
 0x83e   :  { %11890 = vmatmul.mubr.msk.f32.gmra.mrb[82].mxu0 %vm21_vm5, %v16842_v30 }
 0x83f   :  { %11892 = vmatprep.mubr.msk.f32.mxu0 %vm13389_vm1, %v17622_v21 }
 0x842   :  { %11893 = vmatmul.mubr.msk.f32.gmra.mrb[84].mxu0 %vm21_vm5, %v16848_v31 }
 0x843   :  { %11895 = vmatprep.mubr.msk.f32.mxu0 %vm13389_vm1, %v17622_v21 }
 0x846   :  { %11896 = vmatmul.mubr.msk.f32.gmra.mrb[86].mxu0 %vm21_vm5, %v16854_v49 }
 0x847   :  { %11898 = vmatprep.mubr.msk.f32.mxu0 %vm13389_vm1, %v17622_v21 }
 0x84a   :  { %11899 = vmatmul.mubr.msk.f32.gmra.mrb[88].mxu0 %vm21_vm5, %v16866_v12 }
 0x84b   :  { %11909 = vmatprep.mubr.msk.f32.mxu0 %vm13389_vm1, %v17622_v21 }
 0x84e   :  { %11910 = vmatmul.mubr.msk.f32.vlgmr.msra.gmra.mrb[68].mxu0 %vm21_vm5, %v6735_v57  ;;  %v12346_v57 = vpack.c.bf16 %v7622_v17, %v7621_v45 }
 0x84f   :  { %12326 = vmatpush3.bf16.msra.mxu0 %v12325_v34  ;;  %11912 = vmatprep.mubr.msk.f32.mxu0 %vm13389_vm1, %v17622_v21  ;;  %v12343_v34 = vpack.c.bf16 %v7620_v40, %v7619_v51  ;;  %v8478_v51 = vld [vmem:[%s17519_s2 + $0x270] sm:$0xff]  ;;  %v8479_v40 = vld [vmem:[%s17519_s2 + $0x278] sm:$0xff] }
 0x850   :  { %12327 = vmatprep.subr.bf16.mxu0 %v17571_v32 }
 0x852   :  { %11913 = vmatmul.mubr.msk.f32.gmra.mrb[70].mxu0 %vm21_vm5, %v16882_v7 }
 0x853   :  { %11915 = vmatprep.mubr.msk.f32.mxu0 %vm13389_vm1, %v17622_v21  ;;  %12329 = vmatpush3.bf16.msra.mxu0 %v12328_v37  ;;  %v7798_v37 = vld [vmem:[%s17519_s2 + $0x1e0] sm:$0xff] }
 0x854   :  { %12330 = vmatprep.subr.bf16.mxu0 %v17571_v32 }
 0x856   :  { %11916 = vmatmul.mubr.msk.f32.gmra.mrb[72].mxu0 %vm21_vm5, %v16889_v50 }
 0x857   :  { %11918 = vmatprep.mubr.msk.f32.mxu0 %vm13389_vm1, %v17622_v21 }
 0x85a   :  { %11919 = vmatmul.mubr.msk.f32.gmra.mrb[74].mxu0 %vm21_vm5, %v16895_v20 }
 0x85b   :  { %11921 = vmatprep.mubr.msk.f32.mxu0 %vm13389_vm1, %v17622_v21 }
 0x85e   :  { %11922 = vmatmul.mubr.msk.f32.gmra.mrb[76].mxu0 %vm21_vm5, %v16901_v46 }
 0x85f   :  { %11924 = vmatprep.mubr.msk.f32.mxu0 %vm13389_vm1, %v17622_v21 }
 0x862   :  { %11925 = vmatmul.mubr.msk.f32.gmra.mrb[78].mxu0 %vm21_vm5, %v16907_v63 }
 0x863   :  { %11927 = vmatprep.mubr.msk.f32.mxu0 %vm13389_vm1, %v17622_v21 }
 0x866   :  { %11928 = vmatmul.mubr.msk.f32.gmra.mrb[80].mxu0 %vm21_vm5, %v16913_v25 }
 0x867   :  { %11930 = vmatprep.mubr.msk.f32.mxu0 %vm13389_vm1, %v17622_v21 }
 0x86a   :  { %11931 = vmatmul.mubr.msk.f32.gmra.mrb[82].mxu0 %vm21_vm5, %v16919_v6 }
 0x86b   :  { %11933 = vmatprep.mubr.msk.f32.mxu0 %vm13389_vm1, %v17622_v21 }
 0x86e   :  { %11934 = vmatmul.mubr.msk.f32.gmra.mrb[84].mxu0 %vm21_vm5, %v16925_v27 }
 0x86f   :  { %11936 = vmatprep.mubr.msk.f32.mxu0 %vm13389_vm1, %v17622_v21 }
 0x872   :  { %11937 = vmatmul.mubr.msk.f32.gmra.mrb[86].mxu0 %vm21_vm5, %v16931_v62 }
 0x873   :  { %11939 = vmatprep.mubr.msk.f32.mxu0 %vm13389_vm1, %v17622_v21 }
 0x876   :  { %11940 = vmatmul.mubr.msk.f32.gmra.mrb[88].mxu0 %vm21_vm5, %v16943_v38 }
 0x877   :  { %11950 = vmatprep.mubr.msk.f32.mxu0 %vm13389_vm1, %v17622_v21 }
 0x87a   :  { %11951 = vmatmul.mubr.msk.f32.vlgmr.msra.gmra.mrb[68].mxu0 %vm21_vm5, %v7071_v0  ;;  %v7790_v0 = vld [vmem:[#allocation4 + $0x26] sm:$0xff] }
 0x87b   :  { %12332 = vmatpush3.bf16.msra.mxu0 %v12331_v44  ;;  %11953 = vmatprep.mubr.msk.f32.mxu0 %vm13389_vm1, %v17622_v21  ;;  %v7800_v44 = vld [vmem:[%s17519_s2 + $0x1f0] sm:$0xff] }
 0x87c   :  { %12333 = vmatprep.subr.bf16.mxu0 %v17571_v32  ;;  %v12352_v42 = vpack.c.bf16 %v7801_v39, %v7800_v44  ;;  %v8499_v44 = vld [vmem:[%s17519_s2 + $0x318] sm:$0xff] }
 0x87e   :  { %11954 = vmatmul.mubr.msk.f32.gmra.mrb[70].mxu0 %vm21_vm5, %v7072_v14  ;;  %v7792_v14 = vld [vmem:[#allocation4 + $0x36] sm:$0xff] }
 0x87f   :  { %11956 = vmatprep.mubr.msk.f32.mxu0 %vm13389_vm1, %v17622_v21  ;;  %12335 = vmatpush3.bf16.msra.mxu0 %v12334_v1  ;;  %v7791_v1 = vld [vmem:[#allocation4 + $0x2e] sm:$0xff] }
 0x880   :  { %12336 = vmatprep.subr.bf16.mxu0 %v17571_v32 }
 0x882   :  { %11957 = vmatmul.mubr.msk.f32.gmra.mrb[72].mxu0 %vm21_vm5, %v7073_v47  ;;  %v7793_v47 = vld [vmem:[#allocation4 + $0x3e] sm:$0xff] }
 0x883   :  { %11959 = vmatprep.mubr.msk.f32.mxu0 %vm13389_vm1, %v17622_v21 }
 0x886   :  { %11960 = vmatmul.mubr.msk.f32.gmra.mrb[74].mxu0 %vm21_vm5, %v7074_v48  ;;  %v7794_v48 = vld [vmem:[#allocation4 + $0x46] sm:$0xff] }
 0x887   :  { %11962 = vmatprep.mubr.msk.f32.mxu0 %vm13389_vm1, %v17622_v21 }
 0x88a   :  { %11963 = vmatmul.mubr.msk.f32.gmra.mrb[76].mxu0 %vm21_vm5, %v7075_v4  ;;  %v7795_v4 = vld [vmem:[#allocation4 + $0x4e] sm:$0xff] }
 0x88b   :  { %11965 = vmatprep.mubr.msk.f32.mxu0 %vm13389_vm1, %v17622_v21 }
 0x88e   :  { %11966 = vmatmul.mubr.msk.f32.gmra.mrb[78].mxu0 %vm21_vm5, %v7076_v18  ;;  %v7796_v18 = vld [vmem:[#allocation4 + $0x56] sm:$0xff] }
 0x88f   :  { %11968 = vmatprep.mubr.msk.f32.mxu0 %vm13389_vm1, %v17622_v21 }
 0x892   :  { %11969 = vmatmul.mubr.msk.f32.gmra.mrb[80].mxu0 %vm21_vm5, %v7077_v29  ;;  %v8156_v29 = vld [vmem:[%s17519_s2 + $0x220] sm:$0xff] }
 0x893   :  { %11971 = vmatprep.mubr.msk.f32.mxu0 %vm13389_vm1, %v17622_v21 }
 0x896   :  { %11972 = vmatmul.mubr.msk.f32.gmra.mrb[82].mxu0 %vm21_vm5, %v7078_v56  ;;  %v8157_v56 = vld [vmem:[%s17519_s2 + $0x228] sm:$0xff] }
 0x897   :  { %11974 = vmatprep.mubr.msk.f32.mxu0 %vm13389_vm1, %v17622_v21 }
 0x89a   :  { %11975 = vmatmul.mubr.msk.f32.gmra.mrb[84].mxu0 %vm21_vm5, %v7079_v24  ;;  %v7797_v24 = vld [vmem:[#allocation4 + $0x5e] sm:$0xff] }
 0x89b   :  { %11977 = vmatprep.mubr.msk.f32.mxu0 %vm13389_vm1, %v17622_v21 }
 0x89e   :  { %11978 = vmatmul.mubr.msk.f32.gmra.mrb[86].mxu0 %vm21_vm5, %v7080_v28  ;;  %v12361_v28 = vpack.c.bf16 %v8157_v56, %v8156_v29 }
 0x89f   :  { %11980 = vmatprep.mubr.msk.f32.mxu0 %vm13389_vm1, %v17622_v21 }
 0x8a2   :  { %11981 = vmatmul.mubr.msk.f32.gmra.mrb[88].mxu0 %vm21_vm5, %v7081_v36  ;;  %v12364_v36 = vpack.c.bf16 %v8159_v2, %v8158_v53 }
 0x8a3   :  { %11991 = vmatprep.mubr.msk.f32.mxu0 %vm13389_vm1, %v17622_v21 }
 0x8a6   :  { %11992 = vmatmul.mubr.msk.f32.vlgmr.msra.gmra.mrb[68].mxu0 %vm21_vm5, %v7250_v19  ;;  %v8475_v19 = vld [vmem:[%s17519_s2 + $0x258] sm:$0xff] }
 0x8a7   :  { %12338 = vmatpush3.bf16.msra.mxu0 %v12337_v43  ;;  %11994 = vmatprep.mubr.msk.f32.mxu0 %vm13389_vm1, %v17622_v21  ;;  %v7976_v43 = vld [vmem:[#allocation4 + $0x5f] sm:$0xff] }
 0x8a8   :  { %12339 = vmatprep.subr.bf16.mxu0 %v17571_v32 }
 0x8aa   :  { %11995 = vmatmul.mubr.msk.f32.gmra.mrb[70].mxu0 %vm21_vm5, %v17006_v61 }
 0x8ab   :  { %11997 = vmatprep.mubr.msk.f32.mxu0 %vm13389_vm1, %v17622_v21  ;;  %12341 = vmatpush3.bf16.msra.mxu0 %v12340_v3  ;;  %v8492_v3 = vld [vmem:[%s17519_s2 + $0x2e0] sm:$0xff] }
 0x8ac   :  { %12342 = vmatprep.subr.bf16.mxu0 %v17571_v32 }
 0x8ae   :  { %11998 = vmatmul.mubr.msk.f32.gmra.mrb[72].mxu0 %vm21_vm5, %v17013_v11 }
 0x8af   :  { %12000 = vmatprep.mubr.msk.f32.mxu0 %vm13389_vm1, %v17622_v21 }
 0x8b2   :  { %12001 = vmatmul.mubr.msk.f32.gmra.mrb[74].mxu0 %vm21_vm5, %v17019_v35 }
 0x8b3   :  { %12003 = vmatprep.mubr.msk.f32.mxu0 %vm13389_vm1, %v17622_v21 }
 0x8b6   :  { %12004 = vmatmul.mubr.msk.f32.gmra.mrb[76].mxu0 %vm21_vm5, %v17025_v23 }
 0x8b7   :  { %12006 = vmatprep.mubr.msk.f32.mxu0 %vm13389_vm1, %v17622_v21 }
 0x8ba   :  { %12007 = vmatmul.mubr.msk.f32.gmra.mrb[78].mxu0 %vm21_vm5, %v17031_v41 }
 0x8bb   :  { %12009 = vmatprep.mubr.msk.f32.mxu0 %vm13389_vm1, %v17622_v21 }
 0x8be   :  { %12010 = vmatmul.mubr.msk.f32.gmra.mrb[80].mxu0 %vm21_vm5, %v17037_v13 }
 0x8bf   :  { %12012 = vmatprep.mubr.msk.f32.mxu0 %vm13389_vm1, %v17622_v21 }
 0x8c2   :  { %12013 = vmatmul.mubr.msk.f32.gmra.mrb[82].mxu0 %vm21_vm5, %v17043_v8 }
 0x8c3   :  { %12015 = vmatprep.mubr.msk.f32.mxu0 %vm13389_vm1, %v17622_v21 }
 0x8c6   :  { %12016 = vmatmul.mubr.msk.f32.gmra.mrb[84].mxu0 %vm21_vm5, %v17049_v33 }
 0x8c7   :  { %12018 = vmatprep.mubr.msk.f32.mxu0 %vm13389_vm1, %v17622_v21 }
 0x8ca   :  { %12019 = vmatmul.mubr.msk.f32.gmra.mrb[86].mxu0 %vm21_vm5, %v17055_v52 }
 0x8cb   :  { %12021 = vmatprep.mubr.msk.f32.mxu0 %vm13389_vm1, %v17622_v21 }
 0x8ce   :  { %12022 = vmatmul.mubr.msk.f32.gmra.mrb[88].mxu0 %vm21_vm5, %v17067_v58 }
 0x8cf   :  { %12032 = vmatprep.mubr.msk.f32.mxu0 %vm13389_vm1, %v17622_v21 }
 0x8d2   :  { %12033 = vmatmul.mubr.msk.f32.vlgmr.msra.gmra.mrb[68].mxu0 %vm21_vm5, %v16882_v7  ;;  %v7799_v7 = vld [vmem:[%s17519_s2 + $0x1e8] sm:$0xff] }
 0x8d3   :  { %12344 = vmatpush3.bf16.msra.mxu0 %v12343_v34  ;;  %12035 = vmatprep.mubr.msk.f32.mxu0 %vm13389_vm1, %v17622_v21  ;;  %v12349_v54 = vpack.c.bf16 %v7799_v7, %v7798_v37  ;;  %v8497_v34 = vld [vmem:[%s17519_s2 + $0x308] sm:$0xff]  ;;  %v8480_v7 = vld [vmem:[%s17519_s2 + $0x280] sm:$0xff] }
 0x8d4   :  { %12345 = vmatprep.subr.bf16.mxu0 %v17571_v32 }
 0x8d6   :  { %12036 = vmatmul.mubr.msk.f32.gmra.mrb[70].mxu0 %vm21_vm5, %v16889_v50 }
 0x8d7   :  { %12038 = vmatprep.mubr.msk.f32.mxu0 %vm13389_vm1, %v17622_v21  ;;  %12347 = vmatpush3.bf16.msra.mxu0 %v12346_v57  ;;  %v12380_v57 = vpack.c.bf16 %v8479_v40, %v8478_v51 }
 0x8d8   :  { %12348 = vmatprep.subr.bf16.mxu0 %v17571_v32 }
 0x8da   :  { %12039 = vmatmul.mubr.msk.f32.gmra.mrb[72].mxu0 %vm21_vm5, %v16895_v20 }
 0x8db   :  { %12041 = vmatprep.mubr.msk.f32.mxu0 %vm13389_vm1, %v17622_v21 }
 0x8de   :  { %12042 = vmatmul.mubr.msk.f32.gmra.mrb[74].mxu0 %vm21_vm5, %v16901_v46 }
 0x8df   :  { %12044 = vmatprep.mubr.msk.f32.mxu0 %vm13389_vm1, %v17622_v21 }
 0x8e2   :  { %12045 = vmatmul.mubr.msk.f32.gmra.mrb[76].mxu0 %vm21_vm5, %v16907_v63 }
 0x8e3   :  { %12047 = vmatprep.mubr.msk.f32.mxu0 %vm13389_vm1, %v17622_v21 }
 0x8e6   :  { %12048 = vmatmul.mubr.msk.f32.gmra.mrb[78].mxu0 %vm21_vm5, %v16913_v25 }
 0x8e7   :  { %12050 = vmatprep.mubr.msk.f32.mxu0 %vm13389_vm1, %v17622_v21 }
 0x8ea   :  { %12051 = vmatmul.mubr.msk.f32.gmra.mrb[80].mxu0 %vm21_vm5, %v16919_v6 }
 0x8eb   :  { %12053 = vmatprep.mubr.msk.f32.mxu0 %vm13389_vm1, %v17622_v21 }
 0x8ee   :  { %12054 = vmatmul.mubr.msk.f32.gmra.mrb[82].mxu0 %vm21_vm5, %v16925_v27 }
 0x8ef   :  { %12056 = vmatprep.mubr.msk.f32.mxu0 %vm13389_vm1, %v17622_v21 }
 0x8f2   :  { %12057 = vmatmul.mubr.msk.f32.gmra.mrb[84].mxu0 %vm21_vm5, %v16931_v62 }
 0x8f3   :  { %12059 = vmatprep.mubr.msk.f32.mxu0 %vm13389_vm1, %v17622_v21 }
 0x8f6   :  { %12060 = vmatmul.mubr.msk.f32.gmra.mrb[86].mxu0 %vm21_vm5, %v16943_v38 }
 0x8f7   :  { %12062 = vmatprep.mubr.msk.f32.mxu0 %vm13389_vm1, %v17622_v21 }
 0x8fa   :  { %12063 = vmatmul.mubr.msk.f32.gmra.mrb[88].mxu0 %vm21_vm5, %v17127_v9 }
 0x8fb   :  { %12073 = vmatprep.mubr.msk.f32.mxu0 %vm13389_vm1, %v17622_v21 }
 0x8fe   :  { %12074 = vmatmul.mubr.msk.f32.vlgmr.msra.gmra.mrb[68].mxu0 %vm21_vm5, %v16805_v16  ;;  %v7977_v16 = vld [vmem:[%s17519_s2 + $0x200] sm:$0xff] }
 0x8ff   :  { %12350 = vmatpush3.bf16.msra.mxu0 %v12349_v54  ;;  %12076 = vmatprep.mubr.msk.f32.mxu0 %vm13389_vm1, %v17622_v21  ;;  %v8498_v54 = vld [vmem:[%s17519_s2 + $0x310] sm:$0xff] }
 0x900   :  { %12351 = vmatprep.subr.bf16.mxu0 %v17571_v32 }
 0x902   :  { %12077 = vmatmul.mubr.msk.f32.gmra.mrb[70].mxu0 %vm21_vm5, %v16812_v15  ;;  %v7978_v15 = vld [vmem:[%s17519_s2 + $0x208] sm:$0xff] }
 0x903   :  { %12079 = vmatprep.mubr.msk.f32.mxu0 %vm13389_vm1, %v17622_v21  ;;  %12353 = vmatpush3.bf16.msra.mxu0 %v12352_v42 }
 0x904   :  { %12354 = vmatprep.subr.bf16.mxu0 %v17571_v32 }
 0x906   :  { %12080 = vmatmul.mubr.msk.f32.gmra.mrb[72].mxu0 %vm21_vm5, %v16818_v5  ;;  %v7618_v5 = vld [vmem:[#allocation4 + $0x59] sm:$0xff] }
 0x907   :  { %12082 = vmatprep.mubr.msk.f32.mxu0 %vm13389_vm1, %v17622_v21 }
 0x90a   :  { %12083 = vmatmul.mubr.msk.f32.gmra.mrb[74].mxu0 %vm21_vm5, %v16824_v22  ;;  %v12355_v22 = vpack.c.bf16 %v7978_v15, %v7977_v16  ;;  %v12386_v15 = vpack.c.bf16 %v8499_v44, %v8498_v54 }
 0x90b   :  { %12085 = vmatprep.mubr.msk.f32.mxu0 %vm13389_vm1, %v17622_v21 }
 0x90e   :  { %12086 = vmatmul.mubr.msk.f32.gmra.mrb[76].mxu0 %vm21_vm5, %v16830_v59  ;;  %v7979_v59 = vld [vmem:[%s17519_s2 + $0x210] sm:$0xff] }
 0x90f   :  { %12088 = vmatprep.mubr.msk.f32.mxu0 %vm13389_vm1, %v17622_v21 }
 0x912   :  { %12089 = vmatmul.mubr.msk.f32.gmra.mrb[78].mxu0 %vm21_vm5, %v16836_v26  ;;  %v7980_v26 = vld [vmem:[%s17519_s2 + $0x218] sm:$0xff] }
 0x913   :  { %12091 = vmatprep.mubr.msk.f32.mxu0 %vm13389_vm1, %v17622_v21 }
 0x916   :  { %12092 = vmatmul.mubr.msk.f32.gmra.mrb[80].mxu0 %vm21_vm5, %v16842_v30  ;;  %v7787_v30 = vld [vmem:[#allocation4 + $0xe] sm:$0xff] }
 0x917   :  { %12094 = vmatprep.mubr.msk.f32.mxu0 %vm13389_vm1, %v17622_v21 }
 0x91a   :  { %12095 = vmatmul.mubr.msk.f32.gmra.mrb[82].mxu0 %vm21_vm5, %v16848_v31  ;;  %v12358_v31 = vpack.c.bf16 %v7980_v26, %v7979_v59  ;;  %v8500_v59 = vld [vmem:[%s17519_s2 + $0x320] sm:$0xff]  ;;  %v8501_v26 = vld [vmem:[%s17519_s2 + $0x328] sm:$0xff] }
 0x91b   :  { %12097 = vmatprep.mubr.msk.f32.mxu0 %vm13389_vm1, %v17622_v21 }
 0x91e   :  { %12098 = vmatmul.mubr.msk.f32.gmra.mrb[84].mxu0 %vm21_vm5, %v16854_v49  ;;  %v7788_v49 = vld [vmem:[#allocation4 + $0x16] sm:$0xff] }
 0x91f   :  { %12100 = vmatprep.mubr.msk.f32.mxu0 %vm13389_vm1, %v17622_v21 }
 0x922   :  { %12101 = vmatmul.mubr.msk.f32.gmra.mrb[86].mxu0 %vm21_vm5, %v16866_v12  ;;  %v7789_v12 = vld [vmem:[#allocation4 + $0x1e] sm:$0xff] }
 0x923   :  { %12103 = vmatprep.mubr.msk.f32.mxu0 %vm13389_vm1, %v17622_v21 }
 0x926   :  { %12104 = vmatmul.mubr.msk.f32.gmra.mrb[88].mxu0 %vm21_vm5, %v7618_v5  ;;  %v8482_v5 = vld [vmem:[%s17519_s2 + $0x290] sm:$0xff] }
 0x927   :  { %12114 = vmatprep.mubr.msk.f32.mxu0 %vm13389_vm1, %v17622_v21 }
 0x92a   :  { %12115 = vmatmul.mubr.msk.f32.vlgmr.msra.gmra.mrb[68].mxu0 %vm21_vm5, %v7787_v30 }
 0x92b   :  { %12356 = vmatpush3.bf16.msra.mxu0 %v12355_v22  ;;  %12117 = vmatprep.mubr.msk.f32.mxu0 %vm13389_vm1, %v17622_v21  ;;  %v8483_v22 = vld [vmem:[%s17519_s2 + $0x298] sm:$0xff] }
 0x92c   :  { %12357 = vmatprep.subr.bf16.mxu0 %v17571_v32 }
 0x92e   :  { %12118 = vmatmul.mubr.msk.f32.gmra.mrb[70].mxu0 %vm21_vm5, %v7788_v49  ;;  %v12388_v49 = vpack.c.bf16 %v8483_v22, %v8482_v5 }
 0x92f   :  { %12120 = vmatprep.mubr.msk.f32.mxu0 %vm13389_vm1, %v17622_v21  ;;  %12359 = vmatpush3.bf16.msra.mxu0 %v12358_v31 }
 0x930   :  { %12360 = vmatprep.subr.bf16.mxu0 %v17571_v32 }
 0x932   :  { %12121 = vmatmul.mubr.msk.f32.gmra.mrb[72].mxu0 %vm21_vm5, %v7789_v12  ;;  %v12390_v12 = vpack.c.bf16 %v8501_v26, %v8500_v59 }
 0x933   :  { %12123 = vmatprep.mubr.msk.f32.mxu0 %vm13389_vm1, %v17622_v21 }
 0x936   :  { %12124 = vmatmul.mubr.msk.f32.gmra.mrb[74].mxu0 %vm21_vm5, %v7790_v0  ;;  %v8484_v0 = vld [vmem:[%s17519_s2 + $0x2a0] sm:$0xff] }
 0x937   :  { %12126 = vmatprep.mubr.msk.f32.mxu0 %vm13389_vm1, %v17622_v21 }
 0x93a   :  { %12127 = vmatmul.mubr.msk.f32.gmra.mrb[76].mxu0 %vm21_vm5, %v7791_v1  ;;  %v8485_v1 = vld [vmem:[%s17519_s2 + $0x2a8] sm:$0xff] }
 0x93b   :  { %12129 = vmatprep.mubr.msk.f32.mxu0 %vm13389_vm1, %v17622_v21 }
 0x93e   :  { %12130 = vmatmul.mubr.msk.f32.gmra.mrb[78].mxu0 %vm21_vm5, %v7792_v14 }
 0x93f   :  { %12132 = vmatprep.mubr.msk.f32.mxu0 %vm13389_vm1, %v17622_v21 }
 0x942   :  { %12133 = vmatmul.mubr.msk.f32.gmra.mrb[80].mxu0 %vm21_vm5, %v7793_v47 }
 0x943   :  { %12135 = vmatprep.mubr.msk.f32.mxu0 %vm13389_vm1, %v17622_v21 }
 0x946   :  { %12136 = vmatmul.mubr.msk.f32.gmra.mrb[82].mxu0 %vm21_vm5, %v7794_v48  ;;  %v12392_v48 = vpack.c.bf16 %v8485_v1, %v8484_v0 }
 0x947   :  { %12138 = vmatprep.mubr.msk.f32.mxu0 %vm13389_vm1, %v17622_v21 }
 0x94a   :  { %12139 = vmatmul.mubr.msk.f32.gmra.mrb[84].mxu0 %vm21_vm5, %v7795_v4 }
 0x94b   :  { %12141 = vmatprep.mubr.msk.f32.mxu0 %vm13389_vm1, %v17622_v21 }
 0x94e   :  { %12142 = vmatmul.mubr.msk.f32.gmra.mrb[86].mxu0 %vm21_vm5, %v7796_v18 }
 0x94f   :  { %12144 = vmatprep.mubr.msk.f32.mxu0 %vm13389_vm1, %v17622_v21 }
 0x952   :  { %12145 = vmatmul.mubr.msk.f32.gmra.mrb[88].mxu0 %vm21_vm5, %v7797_v24 }
 0x953   :  { %12155 = vmatprep.mubr.msk.f32.mxu0 %vm13389_vm1, %v17622_v21 }
 0x956   :  { %12156 = vmatmul.mubr.msk.f32.vlgmr.msra.gmra.mrb[68].mxu0 %vm21_vm5, %v17006_v61  ;;  %v8493_v61 = vld [vmem:[%s17519_s2 + $0x2e8] sm:$0xff] }
 0x957   :  { %12362 = vmatpush3.bf16.msra.mxu0 %v12361_v28  ;;  %12158 = vmatprep.mubr.msk.f32.mxu0 %vm13389_vm1, %v17622_v21 }
 0x958   :  { %12363 = vmatprep.subr.bf16.mxu0 %v17571_v32 }
 0x95a   :  { %12159 = vmatmul.mubr.msk.f32.gmra.mrb[70].mxu0 %vm21_vm5, %v17013_v11  ;;  %v12372_v11 = vpack.c.bf16 %v8475_v19, %v8474_v55 }
 0x95b   :  { %12161 = vmatprep.mubr.msk.f32.mxu0 %vm13389_vm1, %v17622_v21  ;;  %12365 = vmatpush3.bf16.msra.mxu0 %v12364_v36 }
 0x95e   :  { %12162 = vmatmul.mubr.msk.f32.gmra.mrb[72].mxu0 %vm21_vm5, %v17019_v35  ;;  %v12374_v35 = vpack.c.bf16 %v8493_v61, %v8492_v3 }
 0x95f   :  { %12164 = vmatprep.mubr.msk.f32.mxu0 %vm13389_vm1, %v17622_v21 }
 0x962   :  { %12165 = vmatmul.mubr.msk.f32.gmra.mrb[74].mxu0 %vm21_vm5, %v17025_v23  ;;  %v8476_v23 = vld [vmem:[%s17519_s2 + $0x260] sm:$0xff] }
 0x963   :  { %12167 = vmatprep.mubr.msk.f32.mxu0 %vm13389_vm1, %v17622_v21 }
 0x966   :  { %12168 = vmatmul.mubr.msk.f32.gmra.mrb[76].mxu0 %vm21_vm5, %v17031_v41  ;;  %v8477_v41 = vld [vmem:[%s17519_s2 + $0x268] sm:$0xff] }
 0x967   :  { %12170 = vmatprep.mubr.msk.f32.mxu0 %vm13389_vm1, %v17622_v21 }
 0x96a   :  { %12171 = vmatmul.mubr.msk.f32.gmra.mrb[78].mxu0 %vm21_vm5, %v17037_v13  ;;  %v8494_v13 = vld [vmem:[%s17519_s2 + $0x2f0] sm:$0xff] }
 0x96b   :  { %12173 = vmatprep.mubr.msk.f32.mxu0 %vm13389_vm1, %v17622_v21 }
 0x96e   :  { %12174 = vmatmul.mubr.msk.f32.gmra.mrb[80].mxu0 %vm21_vm5, %v17043_v8  ;;  %v8495_v8 = vld [vmem:[%s17519_s2 + $0x2f8] sm:$0xff] }
 0x96f   :  { %12176 = vmatprep.mubr.msk.f32.mxu0 %vm13389_vm1, %v17622_v21 }
 0x972   :  { %12177 = vmatmul.mubr.msk.f32.gmra.mrb[82].mxu0 %vm21_vm5, %v17049_v33  ;;  %v12376_v33 = vpack.c.bf16 %v8477_v41, %v8476_v23 }
 0x973   :  { %12179 = vmatprep.mubr.msk.f32.mxu0 %vm13389_vm1, %v17622_v21 }
 0x976   :  { %12180 = vmatmul.mubr.msk.f32.gmra.mrb[84].mxu0 %vm21_vm5, %v17055_v52  ;;  %v12378_v52 = vpack.c.bf16 %v8495_v8, %v8494_v13 }
 0x977   :  { %12182 = vmatprep.mubr.msk.f32.mxu0 %vm13389_vm1, %v17622_v21 }
 0x97a   :  { %12183 = vmatmul.mubr.msk.f32.gmra.mrb[86].mxu0 %vm21_vm5, %v17067_v58  ;;  %v8496_v58 = vld [vmem:[%s17519_s2 + $0x300] sm:$0xff] }
 0x97b   :  { %12185 = vmatprep.mubr.msk.f32.mxu0 %vm13389_vm1, %v17622_v21  ;;  %v12382_v37 = vpack.c.bf16 %v8497_v34, %v8496_v58 }
 0x97e   :  { %12186 = vmatmul.mubr.msk.f32.gmra.mrb[88].mxu0 %vm21_vm5, %v7976_v43 }
 0x97f   :  { %12196 = vmatprep.mubr.msk.f32.mxu0 %vm13389_vm1, %v17622_v21 }
 0x982   :  { %12197 = vmatmul.mubr.msk.f32.vlgmr.msra.gmra.mrb[68].mxu0 %vm21_vm5, %v16889_v50  ;;  %v8155_v50 = vld [vmem:[#allocation4 + $0x60] sm:$0xff] }
 0x983   :  { %12199 = vmatprep.mubr.msk.f32.mxu0 %vm13389_vm1, %v17622_v21 }
 0x986   :  { %12200 = vmatmul.mubr.msk.f32.gmra.mrb[70].mxu0 %vm21_vm5, %v16895_v20  ;;  %v8488_v20 = vld [vmem:[%s17519_s2 + $0x2c0] sm:$0xff] }
 0x987   :  { %12202 = vmatprep.mubr.msk.f32.mxu0 %vm13389_vm1, %v17622_v21 }
 0x98a   :  { %12203 = vmatmul.mubr.msk.f32.gmra.mrb[72].mxu0 %vm21_vm5, %v16901_v46  ;;  %v8489_v46 = vld [vmem:[%s17519_s2 + $0x2c8] sm:$0xff] }
 0x98b   :  { %12205 = vmatprep.mubr.msk.f32.mxu0 %vm13389_vm1, %v17622_v21 }
 0x98e   :  { %12206 = vmatmul.mubr.msk.f32.gmra.mrb[74].mxu0 %vm21_vm5, %v16907_v63  ;;  %v8472_v63 = vld [vmem:[%s17519_s2 + $0x240] sm:$0xff] }
 0x98f   :  { %12208 = vmatprep.mubr.msk.f32.mxu0 %vm13389_vm1, %v17622_v21 }
 0x992   :  { %12209 = vmatmul.mubr.msk.f32.gmra.mrb[76].mxu0 %vm21_vm5, %v16913_v25  ;;  %v12366_v25 = vpack.c.bf16 %v8489_v46, %v8488_v20 }
 0x993   :  { %12211 = vmatprep.mubr.msk.f32.mxu0 %vm13389_vm1, %v17622_v21 }
 0x994   :  { %12367 = vmatprep.subr.bf16.mxu0 %v12366_v25 }
 0x996   :  { %12212 = vmatmul.mubr.msk.f32.gmra.mrb[78].mxu0 %vm21_vm5, %v16919_v6  ;;  %v8473_v6 = vld [vmem:[%s17519_s2 + $0x248] sm:$0xff] }
 0x997   :  { %12214 = vmatprep.mubr.msk.f32.mxu0 %vm13389_vm1, %v17622_v21 }
 0x99a   :  { %12215 = vmatmul.mubr.msk.f32.gmra.mrb[80].mxu0 %vm21_vm5, %v16925_v27  ;;  %v8490_v27 = vld [vmem:[%s17519_s2 + $0x2d0] sm:$0xff] }
 0x99b   :  { %12217 = vmatprep.mubr.msk.f32.mxu0 %vm13389_vm1, %v17622_v21 }
 0x99e   :  { %12218 = vmatmul.mubr.msk.f32.gmra.mrb[82].mxu0 %vm21_vm5, %v16931_v62  ;;  %v8491_v62 = vld [vmem:[%s17519_s2 + $0x2d8] sm:$0xff] }
 0x99f   :  { %12220 = vmatprep.mubr.msk.f32.mxu0 %vm13389_vm1, %v17622_v21  ;;  %v12370_v10 = vpack.c.bf16 %v8491_v62, %v8490_v27 }
 0x9a2   :  { %12221 = vmatmul.mubr.msk.f32.gmra.mrb[84].mxu0 %vm21_vm5, %v16943_v38  ;;  %v12368_v38 = vpack.c.bf16 %v8473_v6, %v8472_v63 }
 0x9a3   :  { %12223 = vmatprep.mubr.msk.f32.mxu0 %vm13389_vm1, %v17622_v21 }
 0x9a4   :  { %12369 = vmatpush3.bf16.msra.mxu0 %v12368_v38 }
 0x9a5   :  { %12371 = vmatprep.subr.bf16.mxu0 %v12370_v10 }
 0x9a6   :  { %12224 = vmatmul.mubr.msk.f32.gmra.mrb[86].mxu0 %vm21_vm5, %v17127_v9  ;;  %v8481_v9 = vld [vmem:[%s17519_s2 + $0x288] sm:$0xff] }
 0x9a7   :  { %12226 = vmatprep.mubr.msk.f32.mxu0 %vm13389_vm1, %v17622_v21  ;;  %v12384_v16 = vpack.c.bf16 %v8481_v9, %v8480_v7 }
 0x9a8   :  { %12373 = vmatpush3.bf16.msra.mxu0 %v12372_v11 }
 0x9a9   :  { %12375 = vmatprep.subr.bf16.mxu0 %v12374_v35 }
 0x9aa   :  { %12227 = vmatmul.mubr.msk.f32.gmra.mrb[88].mxu0 %vm21_vm5, %v8155_v50 }
 0x9ac   :  { %12377 = vmatpush3.bf16.msra.mxu0 %v12376_v33 }
 0x9ad   :  { %12379 = vmatprep.subr.bf16.mxu0 %v12378_v52 }
 0x9b0   :  { %12381 = vmatpush3.bf16.msra.mxu0 %v12380_v57 }
 0x9b1   :  { %12383 = vmatprep.subr.bf16.mxu0 %v12382_v37 }
 0x9b4   :  { %12385 = vmatpush3.bf16.msra.mxu0 %v12384_v16 }
 0x9b5   :  { %12387 = vmatprep.subr.bf16.mxu0 %v12386_v15 }
 0x9b8   :  { %12389 = vmatpush3.bf16.msra.mxu0 %v12388_v49 }
 0x9b9   :  { %12391 = vmatprep.subr.bf16.mxu0 %v12390_v12 }
 0x9bc   :  { %12393 = vmatpush3.bf16.msra.mxu0 %v12392_v48 }
 0xa55   :  { %v8259_v45 = vpop.f32.mrb[68].mxu0 }
 0xa56   :  { %8324 = vst.msk [vmem:[#allocation5] sm:$0xff] %vm21_vm5, %v8259_v45  ;;  %v12198_v17 = vpop.f32.mrb[69].mxu0 }
 0xa59   :  { %v8264_v39 = vpop.f32.mrb[70].mxu0 }
 0xa5a   :  { %8325 = vst.msk [vmem:[#allocation5 + $0x8] sm:$0xff] %vm21_vm5, %v8264_v39  ;;  %v12201_v42 = vpop.f32.mrb[71].mxu0 }
 0xa5d   :  { %v8269_v30 = vpop.f32.mrb[72].mxu0  ;;  %v8335_v55 = vld [vmem:[#allocation5] ss:$2 sm:$0x7] }
 0xa5e   :  { %8326 = vst.msk [vmem:[#allocation5 + $0x10] sm:$0xff] %vm21_vm5, %v8269_v30  ;;  %v12204_v31 = vpop.f32.mrb[73].mxu0 }
 0xa61   :  { %v8274_v14 = vpop.f32.mrb[74].mxu0 }
 0xa62   :  { %8327 = vst.msk [vmem:[#allocation5 + $0x18] sm:$0xff] %vm21_vm5, %v8274_v14  ;;  %v12207_v47 = vpop.f32.mrb[75].mxu0 }
 0xa65   :  { %v8279_v4 = vpop.f32.mrb[76].mxu0  ;;  %v8337_v46 = vld [vmem:[#allocation5 + $0xe] ss:$2 sm:$0x7] }
 0xa66   :  { %8328 = vst.msk [vmem:[#allocation5 + $0x20] sm:$0xff] %vm21_vm5, %v8279_v4  ;;  %v12210_v18 = vpop.f32.mrb[77].mxu0  ;;  %v8347_v27 = vrot.slane %v8337_v46, 5  ;;  %v8366_v4 = vld [vmem:[%s17520_s3 + $0x4] sm:$0x1] }
 0xa68   :  { %v8361_v3 = vsel %vm271_vm0, %v8335_v55, %v8347_v27  ;;  %v8486_v55 = vld [vmem:[%s17519_s2 + $0x2b0] sm:$0xff] }
 0xa69   :  { %v8284_v29 = vpop.f32.mrb[78].mxu0 }
 0xa6a   :  { %v12213_v56 = vpop.f32.mrb[79].mxu0 }
 0xa6b   :  { %v8367_v56 = vld [vmem:[%s17520_s3 + $0x5] sm:$0x1] }
 0xa6d   :  { %v8289_v24 = vpop.f32.mrb[80].mxu0  ;;  %v8339_v63 = vld [vmem:[#allocation5 + $0x1c] ss:$2 sm:$0x7] }
 0xa6e   :  { %8330 = vst.msk [vmem:[#allocation5 + $0x30] sm:$0xff] %vm21_vm5, %v8289_v24  ;;  %v12216_v28 = vpop.f32.mrb[81].mxu0  ;;  %v8350_v38 = vrot.slane %v8339_v63, 2 }
 0xa70   :  { %v8362_v11 = vsel %vm6571_vm6, %v8361_v3, %v8350_v38 }
 0xa71   :  { %v8294_v53 = vpop.f32.mrb[82].mxu0  ;;  %v8379_v13 = vmul.f32 %v8362_v11, %v8362_v11  ;;  %v8368_v52 = vsel %vm21_vm5, %v8362_v11, 0.0 }
 0xa72   :  { %8331 = vst.msk [vmem:[#allocation5 + $0x38] sm:$0xff] %vm21_vm5, %v8294_v53  ;;  %v12219_v2 = vpop.f32.mrb[83].mxu0 }
 0xa73   :  { %v8382_v45 = vsel %vm21_vm5, %v8379_v13, 0.0 }
 0xa75   :  { %v8299_v36 = vpop.f32.mrb[84].mxu0  ;;  %v8341_v62 = vld [vmem:[#allocation5 + $0x31] ss:$2 sm:$0x7] }
 0xa76   :  { %8332 = vst.msk [vmem:[#allocation5 + $0x40] sm:$0xff] %vm21_vm5, %v8299_v36  ;;  %v12222_v43 = vpop.f32.mrb[85].mxu0  ;;  %v8353_v19 = vrot.slane %v8341_v62, 7  ;;  %v8502_v62 = vld [vmem:[%s17519_s2 + $0x330] sm:$0xff] }
 0xa78   :  { %v8363_v23 = vsel %vm6580_vm11, %v8350_v38, %v8353_v19  ;;  %v8503_v38 = vld [vmem:[%s17519_s2 + $0x338] sm:$0xff] }
 0xa79   :  { %v8304_v50 = vpop.f32.mrb[86].mxu0  ;;  %v8487_v19 = vld [vmem:[%s17519_s2 + $0x2b8] sm:$0xff] }
 0xa7a   :  { %8333 = vst.msk [vmem:[#allocation5 + $0x48] sm:$0xff] %vm21_vm5, %v8304_v50  ;;  %v12225_v20 = vpop.f32.mrb[87].mxu0  ;;  %v12396_v3 = vpack.c.bf16 %v8487_v19, %v8486_v55 }
 0xa7d   :  { %v8309_v25 = vpop.f32.mrb[88].mxu0  ;;  %v8343_v10 = vld [vmem:[#allocation5 + $0x3f] ss:$2 sm:$0x7] }
 0xa7e   :  { %8334 = vst.msk [vmem:[#allocation5 + $0x50] sm:$0xff] %vm21_vm5, %v8309_v25  ;;  %v12228_v6 = vpop.f32.mrb[89].mxu0  ;;  %v8356_v61 = vrot.slane %v8343_v10, 4  ;;  %v12394_v10 = vpack.c.bf16 %v8503_v38, %v8502_v62 }
 0xa80   :  { %v8364_v8 = vsel %vm6575_vm9, %v8363_v23, %v8356_v61  ;;  %12395 = vmatprep.subr.bf16.mxu0 %v12394_v10 }
 0xa81   :  { %12397 = vmatpush3.bf16.msra.mxu0 %v12396_v3 }
 0xa82   :  { %12398 = vmatprep.subr.bf16.mxu0 %v17571_v32 }
 0xa85   :  { %v8345_v35 = vld [vmem:[#allocation5 + $0x4d] ss:$2 sm:$0x7] }
 0xa86   :  { %v8359_v41 = vrot.slane %v8345_v35, 1 }
 0xa88   :  { %v8365_v33 = vsel %vm6569_vm7, %v8364_v8, %v8359_v41  ;;  %v8381_v58 = vmul.f32 %v8359_v41, %v8359_v41  ;;  %v8371_v17 = vsel %vm6612_vm12, %v8359_v41, 0.0 }
 0xa89   :  { %v8369_v51 = vsel %vm21_vm5, %v8365_v33, 0.0  ;;  %v8380_v40 = vmul.f32 %v8365_v33, %v8365_v33 }
 0xa8a   :  { %v8370_v34 = vadd.f32 %v8369_v51, %v8368_v52  ;;  %v8385_v9 = vsel %vm6612_vm12, %v8381_v58, 0.0 }
 0xa8b   :  { %v8383_v57 = vsel %vm21_vm5, %v8380_v40, 0.0 }
 0xa8c   :  { %v8372_v37 = vadd.f32 %v8371_v17, %v8370_v34  ;;  %v8384_v7 = vadd.f32 %v8383_v57, %v8382_v45  ;;  %v8504_v17 = vld [vmem:[%s17519_s2 + $0x340] sm:$0xff]  ;;  %v8505_v57 = vld [vmem:[%s17519_s2 + $0x348] sm:$0xff] }
 0xa8e   :  { %v8373_v54 = vrot.slane %v8372_v37, 4  ;;  %v8386_v44 = vadd.f32 %v8385_v9, %v8384_v7 }
 0xa90   :  { %v8374_v39 = vadd.f32 %v8373_v54, %v8372_v37  ;;  %v8387_v42 = vrot.slane %v8386_v44, 4 }
 0xa92   :  { %v8375_v16 = vrot.slane %v8374_v39, 2  ;;  %v8388_v15 = vadd.f32 %v8387_v42, %v8386_v44 }
 0xa94   :  { %v8376_v5 = vadd.f32 %v8375_v16, %v8374_v39  ;;  %v8389_v22 = vrot.slane %v8388_v15, 2 }
 0xa96   :  { %v8377_v59 = vrot.slane %v8376_v5, 1  ;;  %v8390_v26 = vadd.f32 %v8389_v22, %v8388_v15  ;;  %v12399_v22 = vpack.c.bf16 %v8505_v57, %v8504_v17  ;;  %v9422_v17 = vld [vmem:[%s17521_s4 + $0x20] ss:$0 sm:$0xff] }
 0xa98   :  { %v8378_v30 = vadd.f32 %v8377_v59, %v8376_v5  ;;  %v8391_v31 = vrot.slane %v8390_v26, 1 }
 0xa9a   :  { %v8392_v49 = vadd.f32 %v8391_v31, %v8390_v26  ;;  %v8393_v12 = vmul.f32 0.055555556, %v8378_v30  ;;  %v8506_v30 = vld [vmem:[%s17519_s2 + $0x350] sm:$0xff]  ;;  %v8507_v31 = vld [vmem:[%s17519_s2 + $0x358] sm:$0xff] }
 0xa9c   :  { %v8394_v0 = vmul.f32 0.055555556, %v8392_v49  ;;  %v8395_v1 = vmul.f32 %v8393_v12, %v8393_v12  ;;  %v12402_v49 = vpack.c.bf16 %v8507_v31, %v8506_v30 }
 0xa9e   :  { %v8396_v14 = vsub.f32 %v8394_v0, %v8395_v1  ;;  %v8689_v0 = vld [vmem:[%s17521_s4] sm:$0xff]  ;;  %v8690_v1 = vld [vmem:[%s17521_s4 + $0x8] sm:$0xff] }
 0xaa0   :  { %v8397_v47 = vmax.f32 %v8396_v14, 0.0  ;;  %v8691_v14 = vld [vmem:[%s17521_s4 + $0x10] sm:$0xff] }
 0xaa2   :  { %v8398_v48 = vadd.f32 1e-05, %v8397_v47  ;;  %v12405_v47 = vpack.c.bf16 %v8690_v1, %v8689_v0 }
 0xaa4   :  { %13360 = vrsqrt.f32 %v8398_v48  ;;  %v8692_v48 = vld [vmem:[%s17521_s4 + $0x18] sm:$0xff] }
 0xaae   :  { %v13361_v18 = vpop.eup %13360 }
 0xaaf   :  { %v8400_v29 = vmul.f32 %v13361_v18, %v8366_v4  ;;  %v12408_v4 = vpack.c.bf16 %v8692_v48, %v8691_v14 }
 0xab1   :  { %v8406_v24 = vrot.slane %v8400_v29, %v17621_v60  ;;  %v8401_v28 = vmul.f32 %v8400_v29, %v8393_v12 }
 0xab3   :  { %v8402_v53 = vsub.f32 %v8367_v56, %v8401_v28  ;;  %v8409_v2 = vmul.f32 %v8406_v24, %v8359_v41  ;;  %v8407_v36 = vmul.f32 %v8406_v24, %v8362_v11  ;;  %v8408_v43 = vmul.f32 %v8406_v24, %v8365_v33 }
 0xab5   :  { %v8413_v50 = vrot.slane %v8402_v53, %v17621_v60 }
 0xab7   :  { %v8414_v20 = vadd.f32 %v8413_v50, %v8407_v36  ;;  %v8415_v46 = vadd.f32 %v8413_v50, %v8408_v43  ;;  %v8416_v63 = vadd.f32 %v8413_v50, %v8409_v2 }
 0xab9   :  { %v8417_v25 = vmax.f32 %v8414_v20, 0.0  ;;  %v8418_v6 = vmax.f32 %v8415_v46, 0.0  ;;  %v8419_v27 = vmax.f32 %v8416_v63, 0.0 }
 0xabb   :  { %8420 = vst.msk [vmem:[#allocation6] sm:$0xff] %vm21_vm5, %v8417_v25  ;;  %8421 = vst.msk [vmem:[#allocation6 + $0x8] sm:$0xff] %vm21_vm5, %v8418_v6 }
 0xabc   :  { %8422 = vst.msk [vmem:[#allocation6 + $0x10] sm:$0x3] %vm6612_vm12, %v8419_v27 }
 0xac2   :  { %v8429_v61 = vld [vmem:[#allocation6 + $0x3] ss:$9 sm:$0x3]  ;;  %v8425_v23 = vld [vmem:[#allocation6 + $0x1] ss:$9 sm:$0x3] }
 0xac3   :  { %v8437_v11 = vld [vmem:[#allocation6 + $0x7] ss:$9 sm:$0x3]  ;;  %v8433_v41 = vld [vmem:[#allocation6 + $0x5] ss:$9 sm:$0x3] }
 0xac4   :  { %v13351_v35 = vpack.i.bf16 %v8429_v61, %v8437_v11  ;;  %v13341_v13 = vpack.i.bf16 %v8425_v23, %v8433_v41  ;;  %v8427_v8 = vld [vmem:[#allocation6 + $0x2] ss:$9 sm:$0x3]  ;;  %v8435_v33 = vld [vmem:[#allocation6 + $0x6] ss:$9 sm:$0x3] }
 0xac5   :  { %v13346_v52 = vpack.i.bf16 %v8427_v8, %v8435_v33  ;;  %v8423_v37 = vld [vmem:[#allocation6] ss:$9 sm:$0x3]  ;;  %v8431_v54 = vld [vmem:[#allocation6 + $0x4] ss:$9 sm:$0x3] }
 0xac6   :  { %13352 = vrot.lane.b32.xlu1 %v13351_v35, %s13392_s13  ;;  %13342 = vrot.lane.b32.xlu0 %v13341_v13, %s13393_s14  ;;  %v8439_v12 = vld [vmem:[#allocation6 + $0x8] ss:$9 sm:$0x3]  ;;  %v8651_v23 = vld [vmem:[%s17520_s3 + $0x6] sm:$0x1] }
 0xac7   :  { %v8652_v8 = vld [vmem:[%s17520_s3 + $0x7] sm:$0x1]  ;;  %s13364_s3 = scalar_lea.vmem %s8780_s11, 32 }
 0xac8   :  { %p13365_p0 = scmp.ne.s32.totalorder %s8780_s11, %s13364_s3  ;;  %p13370_p2 = scmp.lt.s32.totalorder %s13364_s3, %s13364_s3 }
 0xaca   :  { %13347 = vrot.lane.b32.xlu0 %v13346_v52, %s13394_s15  ;;  %p13371_p3 = por %p13370_p2, %p13369_p1 }
 0xacc   :  { %p13372_p4 = pnand %p13371_p3, %p13365_p0 }
 0xb38   :  { %v13343_v51 = vpop.permute.xlu0 %13342  ;;  %v13353_v34 = vpop.permute.xlu1 %13352 }
 0xb39   :  { %v13345_v40 = vunpack.i.h.bf16 %v13343_v51  ;;  %v13344_v58 = vunpack.i.l.bf16 %v13343_v51  ;;  %v13355_v44 = vunpack.i.h.bf16 %v13353_v34  ;;  %v13354_v39 = vunpack.i.l.bf16 %v13353_v34 }
 0xb3b   :  { %v8464_v42 = vsel %vm21_vm5, %v8423_v37, %v13345_v40  ;;  %v8469_v16 = vsel %vm21_vm5, %v8431_v54, %v13344_v58 }
 0xb3c   :  { %v13348_v45 = vpop.permute.xlu0 %13347 }
 0xb3d   :  { %v13350_v7 = vunpack.i.h.bf16 %v13348_v45  ;;  %v13349_v9 = vunpack.i.l.bf16 %v13348_v45 }
 0xb3f   :  { %v8466_v15 = vsel %vm8465_vm13, %v8464_v42, %v13350_v7  ;;  %v8470_v5 = vsel %vm8465_vm13, %v8469_v16, %v13349_v9 }
 0xb40   :  { %v8468_v59 = vsel %vm8467_vm14, %v8466_v15, %v13355_v44  ;;  %v8471_v26 = vsel %vm8467_vm14, %v8470_v5, %v13354_v39 }
 0xb41   :  { %8575 = vmatprep.mubr.f32.mxu0 %v8471_v26 }
 0xb42   :  { %8576 = vmatmul.mubr.f32.vlgmr.msra.gmra.mrb[90].mxu0 %v8468_v59 }
 0xb43   :  { %12400 = vmatpush3.bf16.msra.mxu0 %v12399_v22  ;;  %12237 = vmatprep.mubr.msk.f32.mxu0 %vm13389_vm1, %v17622_v21 }
 0xb44   :  { %12401 = vmatprep.subr.bf16.mxu0 %v17571_v32 }
 0xb47   :  { %12403 = vmatpush3.bf16.msra.mxu0 %v12402_v49 }
 0xb48   :  { %12404 = vmatprep.subr.bf16.mxu0 %v17571_v32 }
 0xb4a   :  { %12238 = vmatmul.mubr.msk.f32.vlgmr.msra.gmra.mrb[92].mxu0 %vm21_vm5, %v8439_v12 }
 0xb4b   :  { %12248 = vmatprep.mubr.msk.f32.mxu0 %vm13389_vm1, %v17622_v21  ;;  %12406 = vmatpush3.bf16.msra.mxu0 %v12405_v47 }
 0xb4c   :  { %12407 = vmatprep.subr.bf16.mxu0 %v17571_v32 }
 0xb4f   :  { %12409 = vmatpush3.bf16.msra.mxu0 %v12408_v4 }
 0xc15   :  { %v10165_v21 = vpop.f32.mrb[90].mxu0 }
 0xc16   :  { %v10166_v18 = vpop.f32.mrb[91].mxu0 }
 0xc17   :  { %v10167_v29 = vadd.f32 %v10166_v18, %v10165_v21 }
 0xc1d   :  { %v8647_v56 = vpop.f32.mrb[92].mxu0 }
 0xc1e   :  { %v8648_v24 = vadd.f32 %v10167_v29, %v8647_v56  ;;  %v12239_v28 = vpop.f32.mrb[93].mxu0 }
 0xc20   :  { %v8653_v53 = vsel %vm6612_vm12, %v8648_v24, 0.0  ;;  %v8660_v2 = vmul.f32 %v8648_v24, %v8648_v24 }
 0xc21   :  { %v8654_v36 = vrot.slane %v8653_v53, 4 }
 0xc22   :  { %v8661_v43 = vsel %vm6612_vm12, %v8660_v2, 0.0 }
 0xc23   :  { %v8655_v50 = vadd.f32 %v8654_v36, %v8653_v53  ;;  %v8662_v20 = vrot.slane %v8661_v43, 4 }
 0xc25   :  { %v8656_v46 = vrot.slane %v8655_v50, 2  ;;  %v8663_v63 = vadd.f32 %v8662_v20, %v8661_v43 }
 0xc27   :  { %v8657_v25 = vadd.f32 %v8656_v46, %v8655_v50  ;;  %v8664_v6 = vrot.slane %v8663_v63, 2 }
 0xc29   :  { %v8658_v32 = vrot.slane %v8657_v25, 1  ;;  %v8665_v27 = vadd.f32 %v8664_v6, %v8663_v63 }
 0xc2b   :  { %v8659_v62 = vadd.f32 %v8658_v32, %v8657_v25  ;;  %v8666_v38 = vrot.slane %v8665_v27, 1 }
 0xc2d   :  { %v8667_v10 = vadd.f32 %v8666_v38, %v8665_v27  ;;  %v8668_v55 = vmul.f32 0.5, %v8659_v62 }
 0xc2f   :  { %v8669_v19 = vmul.f32 0.5, %v8667_v10  ;;  %v8670_v3 = vmul.f32 %v8668_v55, %v8668_v55 }
 0xc31   :  { %v8671_v61 = vsub.f32 %v8669_v19, %v8670_v3 }
 0xc33   :  { %v8672_v11 = vmax.f32 %v8671_v61, 0.0 }
 0xc35   :  { %v8673_v35 = vadd.f32 1e-05, %v8672_v11 }
 0xc37   :  { %13362 = vrsqrt.f32 %v8673_v35 }
 0xc41   :  { %v13363_v41 = vpop.eup %13362 }
 0xc42   :  { %v8675_v13 = vmul.f32 %v13363_v41, %v8651_v23 }
 0xc44   :  { %v8676_v33 = vmul.f32 %v8675_v13, %v8668_v55  ;;  %v8681_v52 = vrot.slane %v8675_v13, %v17621_v60 }
 0xc46   :  { %v8677_v51 = vsub.f32 %v8652_v8, %v8676_v33  ;;  %v8682_v40 = vmul.f32 %v8681_v52, %v8648_v24 }
 0xc48   :  { %v8686_v58 = vrot.slane %v8677_v51, %v17621_v60 }
 0xc4a   :  { %v8687_v34 = vadd.f32 %v8686_v58, %v8682_v40 }
 0xc4c   :  { %v8688_v45 = vmax.f32 %v8687_v34, 0.0 }
 0xc4e   :  { %12249 = vmatmul.mubr.msk.f32.vlgmr.msra.gmra.mrb[94].mxu0 %vm21_vm5, %v8688_v45 }
 0xd21   :  { %v8767_v57 = vpop.f32.mrb[94].mxu0 }
 0xd22   :  { %v8768_v37 = vadd.f32 %v9422_v17, %v8767_v57  ;;  %v12250_v7 = vpop.f32.mrb[95].mxu0 }
 0xd24   :  { %8772 = vst.msk [vmem:[#allocation7] sm:$0x3] %vm8771_vm15, %v8768_v37 }
 0xd25   :  { %13375 = shalt.err (!%p13372_p4)
}
 0xd26   :  { %s13376_s14 = scalar_lea.hbm %s17522_s5, 32 }
 0xd27   :  { %p13377_p5 = scmp.ne.s32.totalorder %s17522_s5, %s13376_s14  ;;  %p13380_p6 = scmp.lt.u32.totalorder %s13376_s14, %s17522_s5 }
 0xd29   :  { %p13382_p7 = pnand %p13380_p6, %p13377_p5 }
 0xd2b   :  { %13385 = shalt.err (!%p13382_p7)
}
 0xd2c   :  { %8782 = dma.vmem_to_hbm [thread:$0]  %s8780_s11, 32, %s17522_s5, [#allocation8]  }
 0xd2d   :  { %13386 = dma.done.wait [#allocation8], 32  }
 0xd2e   :  { %13387 = vsyncadd [#allocation8], 4294967264 }
 0xd2f   :  { %8786 = vsyncpa [#allocation8], 1 }

</bundles_post_ra>
